<compile_context>
chip_gen: v6e
topology: v6e:2x2x1
jax: 0.10.0
libtpu: 0.0.40
codegen_flags: <defaults>
</compile_context>

<pallas_src>
import functools

import jax
import jax.numpy as jnp
import numpy as np
from jax.experimental import pallas as pl
from jax.experimental.pallas import tpu as pltpu

BN_EPS = 1e-5
LRELU_SLOPE = 0.2
LANE = 128


def _round_up(v, m):
    return (v + m - 1) // m * m


def _lrelu(x):
    return jnp.where(x >= 0.0, x, LRELU_SLOPE * x)


def _compiler_params():
    # Batch grid axis is fully parallel (every output block is written exactly once per
    # step) -> valid for megacore sharding on v7x; harmless on v5e/v6e.
    return pltpu.CompilerParams(
        dimension_semantics=("parallel",),
        vmem_limit_bytes=32 * 1024 * 1024,  # well within scoped VMEM on v5e/v6e/v7x
    )


# --------------------------------- kernels ---------------------------------- #

def _conv3x3_s1_kernel(x_ref, scale_ref, shift_ref, w_ref,
                       y_ref, part_ref, pad_scr, *, activate):
    """3x3 stride-1 conv (pad 1) via 9 shifted matmuls, with optional fused
    BN-apply + LeakyReLU on the *input* and single-pass sum/sumsq partials on the output.

    x_ref     : (1, H, W, Cin)   previous-stage pre-BN output (or raw input)
    scale_ref : (1, Cin)         folded BN scale of the previous stage (unused if !activate)
    shift_ref : (1, Cin)         folded BN shift of the previous stage (unused if !activate)
    w_ref     : (9, Cin, Cout)   bf16 weights, tap-major (kh*3+kw), VMEM-resident
    y_ref     : (1, H, W, Cout)  pre-BN conv output
    part_ref  : (1, 2, Cout)     per-block [sum, sum of squares] over the H*W rows
    pad_scr   : (H+2, W+2, Cin)  VMEM scratch holding the zero-padded activation
    """
    _, H, W, Cin = x_ref.shape
    Cout = y_ref.shape[-1]

    a = x_ref[0]                                              # (H, W, Cin), f32
    if activate:
        s = scale_ref[...].reshape(1, 1, Cin)
        b = shift_ref[...].reshape(1, 1, Cin)
        a = _lrelu(a * s + b)                                 # f32 epilogue math

    # zero-padded activation in VMEM (in-kernel "im2col"): border ring stays zero.
    pad_scr[...] = jnp.zeros_like(pad_scr)
    pad_scr[1:H + 1, 1:W + 1, :] = a

    acc = jnp.zeros((H * W, Cout), jnp.float32)
    for kh in range(3):
        for kw in range(3):
            tap = pad_scr[kh:kh + H, kw:kw + W, :].reshape(H * W, Cin)
            acc = acc + jnp.dot(tap.astype(jnp.bfloat16),      # bf16 MXU operands
                                w_ref[kh * 3 + kw],
                                preferred_element_type=jnp.float32)

    y_ref[0] = acc.reshape(H, W, Cout)
    part_ref[0, 0:1, :] = jnp.sum(acc, axis=0, keepdims=True)
    part_ref[0, 1:2, :] = jnp.sum(acc * acc, axis=0, keepdims=True)


def _conv3x3_s2_bypass_kernel(yph_ref, xs_ref, scale_ref, shift_ref,
                              w3_ref, wb_ref,
                              y3_ref, yb_ref, p3_ref, pb_ref, ph_scr):
    """Stride-2 3x3 conv (pad 1) on a polyphase-split input + fused 1x1 stride-2 bypass.

    yph_ref : (1, 2, 2, Ho, Wo, C)  stage-2 pre-BN output split into (h-phase, w-phase)
    xs_ref  : (1, Ho, Wo, Cin)      stride-2 subsampled raw input for the bypass conv
    ph_scr  : (2, 2, Ho+1, Wo+1, C) phases of lrelu(bn2(y2)) with a zero leading edge
    """
    _, _, _, Ho, Wo, C = yph_ref.shape
    Cin = xs_ref.shape[-1]
    Cout = y3_ref.shape[-1]

    s = scale_ref[...].reshape(1, 1, C)
    b = shift_ref[...].reshape(1, 1, C)

    ph_scr[...] = jnp.zeros_like(ph_scr)
    for p in range(2):
        for q in range(2):
            a = _lrelu(yph_ref[0, p, q] * s + b)              # (Ho, Wo, C), f32
            ph_scr[p, q, 1:Ho + 1, 1:Wo + 1, :] = a

    # main: out[i,j] = sum_{kh,kw} a2_pad[2i+kh, 2j+kw] @ W[kh,kw]
    acc = jnp.zeros((Ho * Wo, Cout), jnp.float32)
    for kh in range(3):
        for kw in range(3):
            r, t = kh - 1, kw - 1                             # offsets in unpadded a2
            p, q = r % 2, t % 2                               # which phase
            di, dj = (r - p) // 2, (t - q) // 2               # -1 or 0 (phase-space shift)
            tap = ph_scr[p, q, di + 1:di + 1 + Ho, dj + 1:dj + 1 + Wo, :]
            acc = acc + jnp.dot(tap.reshape(Ho * Wo, C).astype(jnp.bfloat16),
                                w3_ref[kh * 3 + kw],
                                preferred_element_type=jnp.float32)
    y3_ref[0] = acc.reshape(Ho, Wo, Cout)
    p3_ref[0, 0:1, :] = jnp.sum(acc, axis=0, keepdims=True)
    p3_ref[0, 1:2, :] = jnp.sum(acc * acc, axis=0, keepdims=True)

    # bypass: 1x1 stride-2 conv == plain matmul on the subsampled input.
    accb = jnp.dot(xs_ref[0].reshape(Ho * Wo, Cin).astype(jnp.bfloat16),
                   wb_ref[...], preferred_element_type=jnp.float32)
    yb_ref[0] = accb.reshape(Ho, Wo, Cout)
    pb_ref[0, 0:1, :] = jnp.sum(accb, axis=0, keepdims=True)
    pb_ref[0, 1:2, :] = jnp.sum(accb * accb, axis=0, keepdims=True)


def _merge_kernel(y3_ref, yb_ref, s3_ref, b3_ref, sb_ref, bb_ref, o_ref):
    """out = BN3(y3) + BNb(yb)   (scale/shift already folded from global batch stats)."""
    C = o_ref.shape[-1]
    main = y3_ref[0] * s3_ref[...].reshape(1, 1, C) + b3_ref[...].reshape(1, 1, C)
    byp = yb_ref[0] * sb_ref[...].reshape(1, 1, C) + bb_ref[...].reshape(1, 1, C)
    o_ref[0] = main + byp


# ------------------------------ pallas_call wrappers ------------------------ #

def _conv_stage(x, scale, shift, w, *, activate):
    N, H, W, Cin = x.shape
    Cout = w.shape[-1]
    flops = 2 * N * H * W * 9 * Cin * Cout
    bytes_accessed = int(4 * (x.size + N * H * W * Cout + 2 * N * Cout) + 2 * w.size)
    return pl.pallas_call(
        functools.partial(_conv3x3_s1_kernel, activate=activate),
        grid=(N,),
        in_specs=[
            pl.BlockSpec((1, H, W, Cin), lambda i: (i, 0, 0, 0)),
            pl.BlockSpec((1, Cin), lambda i: (0, 0)),
            pl.BlockSpec((1, Cin), lambda i: (0, 0)),
            pl.BlockSpec((9, Cin, Cout), lambda i: (0, 0, 0)),   # weights stay resident
        ],
        out_specs=[
            pl.BlockSpec((1, H, W, Cout), lambda i: (i, 0, 0, 0)),
            pl.BlockSpec((1, 2, Cout), lambda i: (i, 0, 0)),
        ],
        out_shape=[
            jax.ShapeDtypeStruct((N, H, W, Cout), jnp.float32),
            jax.ShapeDtypeStruct((N, 2, Cout), jnp.float32),
        ],
        scratch_shapes=[pltpu.VMEM((H + 2, W + 2, Cin), jnp.float32)],
        compiler_params=_compiler_params(),
        cost_estimate=pl.CostEstimate(flops=flops, transcendentals=0,
                                      bytes_accessed=bytes_accessed),
    )(x, scale, shift, w)


def _stride2_stage(y2_ph, xs, scale, shift, w3, wb):
    N = y2_ph.shape[0]
    Ho, Wo, C = y2_ph.shape[3], y2_ph.shape[4], y2_ph.shape[5]
    Cin = xs.shape[-1]
    Cout = w3.shape[-1]
    flops = 2 * N * Ho * Wo * (9 * C + Cin) * Cout
    bytes_accessed = int(4 * (y2_ph.size + xs.size + 2 * N * Ho * Wo * Cout + 4 * N * Cout)
                         + 2 * (w3.size + wb.size))
    return pl.pallas_call(
        _conv3x3_s2_bypass_kernel,
        grid=(N,),
        in_specs=[
            pl.BlockSpec((1, 2, 2, Ho, Wo, C), lambda i: (i, 0, 0, 0, 0, 0)),
            pl.BlockSpec((1, Ho, Wo, Cin), lambda i: (i, 0, 0, 0)),
            pl.BlockSpec((1, C), lambda i: (0, 0)),
            pl.BlockSpec((1, C), lambda i: (0, 0)),
            pl.BlockSpec((9, C, Cout), lambda i: (0, 0, 0)),
            pl.BlockSpec((Cin, Cout), lambda i: (0, 0)),
        ],
        out_specs=[
            pl.BlockSpec((1, Ho, Wo, Cout), lambda i: (i, 0, 0, 0)),
            pl.BlockSpec((1, Ho, Wo, Cout), lambda i: (i, 0, 0, 0)),
            pl.BlockSpec((1, 2, Cout), lambda i: (i, 0, 0)),
            pl.BlockSpec((1, 2, Cout), lambda i: (i, 0, 0)),
        ],
        out_shape=[
            jax.ShapeDtypeStruct((N, Ho, Wo, Cout), jnp.float32),
            jax.ShapeDtypeStruct((N, Ho, Wo, Cout), jnp.float32),
            jax.ShapeDtypeStruct((N, 2, Cout), jnp.float32),
            jax.ShapeDtypeStruct((N, 2, Cout), jnp.float32),
        ],
        scratch_shapes=[pltpu.VMEM((2, 2, Ho + 1, Wo + 1, C), jnp.float32)],
        compiler_params=_compiler_params(),
        cost_estimate=pl.CostEstimate(flops=flops, transcendentals=0,
                                      bytes_accessed=bytes_accessed),
    )(y2_ph, xs, scale, shift, w3, wb)


def _merge_stage(y3, yb, s3, b3, sb, bb):
    N, Ho, Wo, C = y3.shape
    return pl.pallas_call(
        _merge_kernel,
        grid=(N,),
        in_specs=[
            pl.BlockSpec((1, Ho, Wo, C), lambda i: (i, 0, 0, 0)),
            pl.BlockSpec((1, Ho, Wo, C), lambda i: (i, 0, 0, 0)),
            pl.BlockSpec((1, C), lambda i: (0, 0)),
            pl.BlockSpec((1, C), lambda i: (0, 0)),
            pl.BlockSpec((1, C), lambda i: (0, 0)),
            pl.BlockSpec((1, C), lambda i: (0, 0)),
        ],
        out_specs=pl.BlockSpec((1, Ho, Wo, C), lambda i: (i, 0, 0, 0)),
        out_shape=jax.ShapeDtypeStruct((N, Ho, Wo, C), jnp.float32),
        compiler_params=_compiler_params(),
    )(y3, yb, s3, b3, sb, bb)


# --------------------------------- JAX glue ---------------------------------- #

def _pad_last(a, target):
    pad = target - a.shape[-1]
    if pad == 0:
        return a
    return jnp.pad(a, [(0, 0)] * (a.ndim - 1) + [(0, pad)])


def _fold_bn(part, gamma_p, beta_p, count):
    """Reduce per-block [sum, sumsq] partials into per-channel BN scale/shift (f32)."""
    s = jnp.sum(part[:, 0, :], axis=0)
    ss = jnp.sum(part[:, 1, :], axis=0)
    mean = s / count
    var = jnp.maximum(ss / count - mean * mean, 0.0)      # biased variance (PyTorch train)
    scale = gamma_p * jax.lax.rsqrt(var + BN_EPS)
    shift = beta_p - mean * scale
    return scale.reshape(1, -1), shift.reshape(1, -1)


@jax.jit
def res_block_discriminator(x_nchw, params):
    # layout: NCHW (PyTorch) -> NHWC internally (channels on TPU lanes) -> NCHW output.
    x = jnp.transpose(x_nchw, (0, 2, 3, 1)).astype(jnp.float32)
    N, H, W, Cin = x.shape
    Cout = params["g1"].shape[-1]
    assert H % 2 == 0 and W % 2 == 0
    Ho, Wo = H // 2, W // 2
    Cinp = _round_up(Cin, LANE)
    Cp = _round_up(Cout, LANE)

    # lane-dense, tap-major, bf16 weights (zero padding on both channel axes).
    def prep3x3(w):
        ci = w.shape[2]
        cip = _round_up(ci, LANE)
        wp = jnp.zeros((3, 3, cip, Cp), jnp.float32).at[:, :, :ci, :Cout].set(w)
        return wp.reshape(9, cip, Cp).astype(jnp.bfloat16)

    w1 = prep3x3(params["w1"])
    w2 = prep3x3(params["w2"])
    w3 = prep3x3(params["w3"])
    wb = (jnp.zeros((Cinp, Cp), jnp.float32)
          .at[:Cin, :Cout].set(params["wb"][0, 0]).astype(jnp.bfloat16))

    gp = lambda g: _pad_last(g.astype(jnp.float32).reshape(-1), Cp)
    g1, b1 = gp(params["g1"]), gp(params["b1"])
    g2, b2 = gp(params["g2"]), gp(params["b2"])
    g3, b3 = gp(params["g3"]), gp(params["b3"])
    gb, bb = gp(params["gb"]), gp(params["bb"])

    x_p = _pad_last(x, Cinp)                      # channel-padded raw input
    xs = x_p[:, ::2, ::2, :]                      # stride-2 subsample for 1x1 bypass

    ones = jnp.ones((1, Cinp), jnp.float32)
    zeros = jnp.zeros((1, Cinp), jnp.float32)

    # stage 1: conv1 (+ per-block BN partials)
    y1, p1 = _conv_stage(x_p, ones, zeros, w1, activate=False)
    s1, sh1 = _fold_bn(p1, g1, b1, N * H * W)

    # stage 2: [BN1 + lrelu] fused into conv2
    y2, p2 = _conv_stage(y1, s1, sh1, w2, activate=True)
    s2, sh2 = _fold_bn(p2, g2, b2, N * H * W)

    # stage 3: [BN2 + lrelu] fused into stride-2 conv3 (+ fused 1x1 bypass conv).
    # polyphase split of y2 so the stride-2 kernel only needs contiguous slices.
    y2_ph = jnp.transpose(y2.reshape(N, Ho, 2, Wo, 2, Cp), (0, 2, 4, 1, 3, 5))
    y3, yb, p3, pb = _stride2_stage(y2_ph, xs, s2, sh2, w3, wb)
    s3, sh3 = _fold_bn(p3, g3, b3, N * Ho * Wo)
    sb, shb = _fold_bn(pb, gb, bb, N * Ho * Wo)

    # merge: BN3(main) + BNb(bypass)
    out = _merge_stage(y3, yb, s3, sh3, sb, shb)
    out = out[..., :Cout]
    return jnp.transpose(out, (0, 3, 1, 2))


# ----------------------------- parameter creation ---------------------------- #

def init_params(key, cin, cout):
    ks = jax.random.split(key, 12)

    def conv_w(k, kh, kw, ci, co):
        bound = 1.0 / np.sqrt(kh * kw * ci)
        return jax.random.uniform(k, (kh, kw, ci, co), jnp.float32, -bound, bound)

    def affine(kg, kb):
        g = 1.0 + 0.1 * jax.random.normal(kg, (cout,), jnp.float32)
        b = 0.1 * jax.random.normal(kb, (cout,), jnp.float32)
        return g, b

    w1 = conv_w(ks[0], 3, 3, cin, cout)
    w2 = conv_w(ks[1], 3, 3, cout, cout)
    w3 = conv_w(ks[2], 3, 3, cout, cout)
    wb = conv_w(ks[3], 1, 1, cin, cout)
    g1, b1 = affine(ks[4], ks[5])
    g2, b2 = affine(ks[6], ks[7])
    g3, b3 = affine(ks[8], ks[9])
    gb, bb = affine(ks[10], ks[11])
    return dict(w1=w1, w2=w2, w3=w3, wb=wb,
                g1=g1, b1=b1, g2=g2, b2=b2, g3=g3, b3=b3, gb=gb, bb=bb)


# -------------------------------- pure-JAX ref -------------------------------- #

def ref_forward(x_nchw, params):
    x = jnp.transpose(x_nchw, (0, 2, 3, 1)).astype(jnp.float32)

    def conv(a, w, stride, pad):
        return jax.lax.conv_general_dilated(
            a, w, (stride, stride), ((pad, pad), (pad, pad)),
            dimension_numbers=("NHWC", "HWIO", "NHWC"))

    def bn(y, g, b):
        m = jnp.mean(y, axis=(0, 1, 2), keepdims=True)
        v = jnp.mean(jnp.square(y - m), axis=(0, 1, 2), keepdims=True)
        return (y - m) * jax.lax.rsqrt(v + BN_EPS) * g.reshape(1, 1, 1, -1) \
            + b.reshape(1, 1, 1, -1)

    lr = lambda y: jnp.where(y >= 0, y, LRELU_SLOPE * y)

    a = lr(bn(conv(x, params["w1"], 1, 1), params["g1"], params["b1"]))
    a = lr(bn(conv(a, params["w2"], 1, 1), params["g2"], params["b2"]))
    main = bn(conv(a, params["w3"], 2, 1), params["g3"], params["b3"])
    byp = bn(conv(x, params["wb"], 2, 0), params["gb"], params["bb"])
    return jnp.transpose(main + byp, (0, 3, 1, 2))


# ------------------------------------ main ------------------------------------ #

if __name__ == "__main__":
    key = jax.random.PRNGKey(0)
    kx, kp = jax.random.split(key)

    N, Cin, Cout, H, W = 2, 4, 8, 16, 16
    x = jax.random.normal(kx, (N, Cin, H, W), jnp.float32)    # NCHW like PyTorch
    params = init_params(kp, Cin, Cout)

    out = jax.block_until_ready(res_block_discriminator(x, params))
    ref = jax.block_until_ready(ref_forward(x, params))

    assert out.shape == (N, Cout, H // 2, W // 2), out.shape
    err = float(jnp.max(jnp.abs(out - ref)))
    # bf16 MXU operands (f32 accumulation / f32 BN epilogue) vs pure-f32 reference.
    assert err < 5e-2, f"max abs diff vs reference: {err}"
    print("KERNEL_OK")
</pallas_src>

<mosaic_0001>
module attributes {stable_mosaic.version = 11 : i64} {
  func.func @_conv3x3_s1_kernel(%arg0: i32, %arg1: memref<1x16x16x128xf32, #tpu.memory_space<vmem>>, %arg2: memref<1x128xf32, #tpu.memory_space<vmem>>, %arg3: memref<1x128xf32, #tpu.memory_space<vmem>>, %arg4: memref<9x128x128xbf16, #tpu.memory_space<vmem>>, %arg5: memref<1x16x16x128xf32, #tpu.memory_space<vmem>>, %arg6: memref<1x2x128xf32, #tpu.memory_space<vmem>>, %arg7: memref<18x18x128xf32, #tpu.memory_space<vmem>>) attributes {dimension_semantics = [#tpu.dimension_semantics<parallel>], iteration_bounds = array<i64: 2>, scalar_prefetch = 0 : i64, scratch_operands = 1 : i64, tpu.core_type = #tpu.core_type<tc>, window_params = [{transform_indices = @transform_0, window_bounds = array<i64: 1, 16, 16, 128>}, {pipeline_mode = #tpu.pipeline_mode<synchronous>, transform_indices = @transform_1, window_bounds = array<i64: 1, 128>}, {pipeline_mode = #tpu.pipeline_mode<synchronous>, transform_indices = @transform_2, window_bounds = array<i64: 1, 128>}, {pipeline_mode = #tpu.pipeline_mode<synchronous>, transform_indices = @transform_3, window_bounds = array<i64: 9, 128, 128>}, {transform_indices = @transform_4, window_bounds = array<i64: 1, 16, 16, 128>}, {transform_indices = @transform_5, window_bounds = array<i64: 1, 2, 128>}]} {
    %c0 = arith.constant 0 : index
    %c0_0 = arith.constant 0 : index
    %c0_1 = arith.constant 0 : index
    %c0_2 = arith.constant 0 : index
    %0 = vector.load %arg1[%c0, %c0_0, %c0_1, %c0_2] : memref<1x16x16x128xf32, #tpu.memory_space<vmem>>, vector<1x16x16x128xf32>
    %1 = vector.shape_cast %0 : vector<1x16x16x128xf32> to vector<16x16x128xf32>
    %cst = arith.constant 0.000000e+00 : f32
    %2 = vector.broadcast %cst : f32 to vector<18x18x128xf32>
    %c0_3 = arith.constant 0 : index
    %c0_4 = arith.constant 0 : index
    %c0_5 = arith.constant 0 : index
    %3 = vector.load %arg7[%c0_3, %c0_4, %c0_5] : memref<18x18x128xf32, #tpu.memory_space<vmem>>, vector<18x18x128xf32>
    tpu.vector_store %arg7[%c0_3, %c0_4, %c0_5], %2 {strides = array<i32>} : memref<18x18x128xf32, #tpu.memory_space<vmem>>, vector<18x18x128xf32>,
    %c1 = arith.constant 1 : index
    %c1_6 = arith.constant 1 : index
    %c0_7 = arith.constant 0 : index
    %4 = vector.load %arg7[%c1, %c1_6, %c0_7] : memref<18x18x128xf32, #tpu.memory_space<vmem>>, vector<16x16x128xf32>
    tpu.vector_store %arg7[%c1, %c1_6, %c0_7], %1 {strides = array<i32>} : memref<18x18x128xf32, #tpu.memory_space<vmem>>, vector<16x16x128xf32>,
    %cst_8 = arith.constant 0.000000e+00 : f32
    %5 = vector.broadcast %cst_8 : f32 to vector<256x128xf32>
    %c0_9 = arith.constant 0 : index
    %c0_10 = arith.constant 0 : index
    %c0_11 = arith.constant 0 : index
    %6 = vector.load %arg7[%c0_9, %c0_10, %c0_11] : memref<18x18x128xf32, #tpu.memory_space<vmem>>, vector<16x16x128xf32>
    %7 = vector.shape_cast %6 : vector<16x16x128xf32> to vector<256x128xf32>
    %8 = arith.truncf %7 : vector<256x128xf32> to vector<256x128xbf16>
    %c0_12 = arith.constant 0 : index
    %c0_13 = arith.constant 0 : index
    %c0_14 = arith.constant 0 : index
    %9 = vector.load %arg4[%c0_12, %c0_13, %c0_14] : memref<9x128x128xbf16, #tpu.memory_space<vmem>>, vector<1x128x128xbf16>
    %10 = vector.shape_cast %9 : vector<1x128x128xbf16> to vector<128x128xbf16>
    %cst_15 = arith.constant dense<0.000000e+00> : vector<256x128xf32>
    %11 = tpu.matmul %8, %10, %cst_15 {dimension_numbers = #tpu.dot_dimension_numbers<[1], [0], [0], [1], [0, 0, 1, 1], [], []>} : vector<256x128xbf16>, vector<128x128xbf16>, vector<256x128xf32> -> vector<256x128xf32>
    %12 = arith.addf %5, %11 : vector<256x128xf32>
    %c0_16 = arith.constant 0 : index
    %c1_17 = arith.constant 1 : index
    %c0_18 = arith.constant 0 : index
    %13 = vector.load %arg7[%c0_16, %c1_17, %c0_18] : memref<18x18x128xf32, #tpu.memory_space<vmem>>, vector<16x16x128xf32>
    %14 = vector.shape_cast %13 : vector<16x16x128xf32> to vector<256x128xf32>
    %15 = arith.truncf %14 : vector<256x128xf32> to vector<256x128xbf16>
    %c1_19 = arith.constant 1 : index
    %c0_20 = arith.constant 0 : index
    %c0_21 = arith.constant 0 : index
    %16 = vector.load %arg4[%c1_19, %c0_20, %c0_21] : memref<9x128x128xbf16, #tpu.memory_space<vmem>>, vector<1x128x128xbf16>
    %17 = vector.shape_cast %16 : vector<1x128x128xbf16> to vector<128x128xbf16>
    %cst_22 = arith.constant dense<0.000000e+00> : vector<256x128xf32>
    %18 = tpu.matmul %15, %17, %cst_22 {dimension_numbers = #tpu.dot_dimension_numbers<[1], [0], [0], [1], [0, 0, 1, 1], [], []>} : vector<256x128xbf16>, vector<128x128xbf16>, vector<256x128xf32> -> vector<256x128xf32>
    %19 = arith.addf %12, %18 : vector<256x128xf32>
    %c0_23 = arith.constant 0 : index
    %c2 = arith.constant 2 : index
    %c0_24 = arith.constant 0 : index
    %20 = vector.load %arg7[%c0_23, %c2, %c0_24] : memref<18x18x128xf32, #tpu.memory_space<vmem>>, vector<16x16x128xf32>
    %21 = vector.shape_cast %20 : vector<16x16x128xf32> to vector<256x128xf32>
    %22 = arith.truncf %21 : vector<256x128xf32> to vector<256x128xbf16>
    %c2_25 = arith.constant 2 : index
    %c0_26 = arith.constant 0 : index
    %c0_27 = arith.constant 0 : index
    %23 = vector.load %arg4[%c2_25, %c0_26, %c0_27] : memref<9x128x128xbf16, #tpu.memory_space<vmem>>, vector<1x128x128xbf16>
    %24 = vector.shape_cast %23 : vector<1x128x128xbf16> to vector<128x128xbf16>
    %cst_28 = arith.constant dense<0.000000e+00> : vector<256x128xf32>
    %25 = tpu.matmul %22, %24, %cst_28 {dimension_numbers = #tpu.dot_dimension_numbers<[1], [0], [0], [1], [0, 0, 1, 1], [], []>} : vector<256x128xbf16>, vector<128x128xbf16>, vector<256x128xf32> -> vector<256x128xf32>
    %26 = arith.addf %19, %25 : vector<256x128xf32>
    %c1_29 = arith.constant 1 : index
    %c0_30 = arith.constant 0 : index
    %c0_31 = arith.constant 0 : index
    %27 = vector.load %arg7[%c1_29, %c0_30, %c0_31] : memref<18x18x128xf32, #tpu.memory_space<vmem>>, vector<16x16x128xf32>
    %28 = vector.shape_cast %27 : vector<16x16x128xf32> to vector<256x128xf32>
    %29 = arith.truncf %28 : vector<256x128xf32> to vector<256x128xbf16>
    %c3 = arith.constant 3 : index
    %c0_32 = arith.constant 0 : index
    %c0_33 = arith.constant 0 : index
    %30 = vector.load %arg4[%c3, %c0_32, %c0_33] : memref<9x128x128xbf16, #tpu.memory_space<vmem>>, vector<1x128x128xbf16>
    %31 = vector.shape_cast %30 : vector<1x128x128xbf16> to vector<128x128xbf16>
    %cst_34 = arith.constant dense<0.000000e+00> : vector<256x128xf32>
    %32 = tpu.matmul %29, %31, %cst_34 {dimension_numbers = #tpu.dot_dimension_numbers<[1], [0], [0], [1], [0, 0, 1, 1], [], []>} : vector<256x128xbf16>, vector<128x128xbf16>, vector<256x128xf32> -> vector<256x128xf32>
    %33 = arith.addf %26, %32 : vector<256x128xf32>
    %c1_35 = arith.constant 1 : index
    %c1_36 = arith.constant 1 : index
    %c0_37 = arith.constant 0 : index
    %34 = vector.load %arg7[%c1_35, %c1_36, %c0_37] : memref<18x18x128xf32, #tpu.memory_space<vmem>>, vector<16x16x128xf32>
    %35 = vector.shape_cast %34 : vector<16x16x128xf32> to vector<256x128xf32>
    %36 = arith.truncf %35 : vector<256x128xf32> to vector<256x128xbf16>
    %c4 = arith.constant 4 : index
    %c0_38 = arith.constant 0 : index
    %c0_39 = arith.constant 0 : index
    %37 = vector.load %arg4[%c4, %c0_38, %c0_39] : memref<9x128x128xbf16, #tpu.memory_space<vmem>>, vector<1x128x128xbf16>
    %38 = vector.shape_cast %37 : vector<1x128x128xbf16> to vector<128x128xbf16>
    %cst_40 = arith.constant dense<0.000000e+00> : vector<256x128xf32>
    %39 = tpu.matmul %36, %38, %cst_40 {dimension_numbers = #tpu.dot_dimension_numbers<[1], [0], [0], [1], [0, 0, 1, 1], [], []>} : vector<256x128xbf16>, vector<128x128xbf16>, vector<256x128xf32> -> vector<256x128xf32>
    %40 = arith.addf %33, %39 : vector<256x128xf32>
    %c1_41 = arith.constant 1 : index
    %c2_42 = arith.constant 2 : index
    %c0_43 = arith.constant 0 : index
    %41 = vector.load %arg7[%c1_41, %c2_42, %c0_43] : memref<18x18x128xf32, #tpu.memory_space<vmem>>, vector<16x16x128xf32>
    %42 = vector.shape_cast %41 : vector<16x16x128xf32> to vector<256x128xf32>
    %43 = arith.truncf %42 : vector<256x128xf32> to vector<256x128xbf16>
    %c5 = arith.constant 5 : index
    %c0_44 = arith.constant 0 : index
    %c0_45 = arith.constant 0 : index
    %44 = vector.load %arg4[%c5, %c0_44, %c0_45] : memref<9x128x128xbf16, #tpu.memory_space<vmem>>, vector<1x128x128xbf16>
    %45 = vector.shape_cast %44 : vector<1x128x128xbf16> to vector<128x128xbf16>
    %cst_46 = arith.constant dense<0.000000e+00> : vector<256x128xf32>
    %46 = tpu.matmul %43, %45, %cst_46 {dimension_numbers = #tpu.dot_dimension_numbers<[1], [0], [0], [1], [0, 0, 1, 1], [], []>} : vector<256x128xbf16>, vector<128x128xbf16>, vector<256x128xf32> -> vector<256x128xf32>
    %47 = arith.addf %40, %46 : vector<256x128xf32>
    %c2_47 = arith.constant 2 : index
    %c0_48 = arith.constant 0 : index
    %c0_49 = arith.constant 0 : index
    %48 = vector.load %arg7[%c2_47, %c0_48, %c0_49] : memref<18x18x128xf32, #tpu.memory_space<vmem>>, vector<16x16x128xf32>
    %49 = vector.shape_cast %48 : vector<16x16x128xf32> to vector<256x128xf32>
    %50 = arith.truncf %49 : vector<256x128xf32> to vector<256x128xbf16>
    %c6 = arith.constant 6 : index
    %c0_50 = arith.constant 0 : index
    %c0_51 = arith.constant 0 : index
    %51 = vector.load %arg4[%c6, %c0_50, %c0_51] : memref<9x128x128xbf16, #tpu.memory_space<vmem>>, vector<1x128x128xbf16>
    %52 = vector.shape_cast %51 : vector<1x128x128xbf16> to vector<128x128xbf16>
    %cst_52 = arith.constant dense<0.000000e+00> : vector<256x128xf32>
    %53 = tpu.matmul %50, %52, %cst_52 {dimension_numbers = #tpu.dot_dimension_numbers<[1], [0], [0], [1], [0, 0, 1, 1], [], []>} : vector<256x128xbf16>, vector<128x128xbf16>, vector<256x128xf32> -> vector<256x128xf32>
    %54 = arith.addf %47, %53 : vector<256x128xf32>
    %c2_53 = arith.constant 2 : index
    %c1_54 = arith.constant 1 : index
    %c0_55 = arith.constant 0 : index
    %55 = vector.load %arg7[%c2_53, %c1_54, %c0_55] : memref<18x18x128xf32, #tpu.memory_space<vmem>>, vector<16x16x128xf32>
    %56 = vector.shape_cast %55 : vector<16x16x128xf32> to vector<256x128xf32>
    %57 = arith.truncf %56 : vector<256x128xf32> to vector<256x128xbf16>
    %c7 = arith.constant 7 : index
    %c0_56 = arith.constant 0 : index
    %c0_57 = arith.constant 0 : index
    %58 = vector.load %arg4[%c7, %c0_56, %c0_57] : memref<9x128x128xbf16, #tpu.memory_space<vmem>>, vector<1x128x128xbf16>
    %59 = vector.shape_cast %58 : vector<1x128x128xbf16> to vector<128x128xbf16>
    %cst_58 = arith.constant dense<0.000000e+00> : vector<256x128xf32>
    %60 = tpu.matmul %57, %59, %cst_58 {dimension_numbers = #tpu.dot_dimension_numbers<[1], [0], [0], [1], [0, 0, 1, 1], [], []>} : vector<256x128xbf16>, vector<128x128xbf16>, vector<256x128xf32> -> vector<256x128xf32>
    %61 = arith.addf %54, %60 : vector<256x128xf32>
    %c2_59 = arith.constant 2 : index
    %c2_60 = arith.constant 2 : index
    %c0_61 = arith.constant 0 : index
    %62 = vector.load %arg7[%c2_59, %c2_60, %c0_61] : memref<18x18x128xf32, #tpu.memory_space<vmem>>, vector<16x16x128xf32>
    %63 = vector.shape_cast %62 : vector<16x16x128xf32> to vector<256x128xf32>
    %64 = arith.truncf %63 : vector<256x128xf32> to vector<256x128xbf16>
    %c8 = arith.constant 8 : index
    %c0_62 = arith.constant 0 : index
    %c0_63 = arith.constant 0 : index
    %65 = vector.load %arg4[%c8, %c0_62, %c0_63] : memref<9x128x128xbf16, #tpu.memory_space<vmem>>, vector<1x128x128xbf16>
    %66 = vector.shape_cast %65 : vector<1x128x128xbf16> to vector<128x128xbf16>
    %cst_64 = arith.constant dense<0.000000e+00> : vector<256x128xf32>
    %67 = tpu.matmul %64, %66, %cst_64 {dimension_numbers = #tpu.dot_dimension_numbers<[1], [0], [0], [1], [0, 0, 1, 1], [], []>} : vector<256x128xbf16>, vector<128x128xbf16>, vector<256x128xf32> -> vector<256x128xf32>
    %68 = arith.addf %61, %67 : vector<256x128xf32>
    %69 = vector.shape_cast %68 : vector<256x128xf32> to vector<16x16x128xf32>
    %c0_65 = arith.constant 0 : index
    %c0_66 = arith.constant 0 : index
    %c0_67 = arith.constant 0 : index
    %c0_68 = arith.constant 0 : index
    %70 = vector.load %arg5[%c0_65, %c0_66, %c0_67, %c0_68] : memref<1x16x16x128xf32, #tpu.memory_space<vmem>>, vector<1x16x16x128xf32>
    %71 = vector.shape_cast %70 : vector<1x16x16x128xf32> to vector<16x16x128xf32>
    %72 = vector.shape_cast %69 : vector<16x16x128xf32> to vector<1x16x16x128xf32>
    tpu.vector_store %arg5[%c0_65, %c0_66, %c0_67, %c0_68], %72 {strides = array<i32>} : memref<1x16x16x128xf32, #tpu.memory_space<vmem>>, vector<1x16x16x128xf32>,
    %cst_69 = arith.constant dense<0.000000e+00> : vector<128xf32>
    %73 = vector.multi_reduction <add>, %68, %cst_69 [0] : vector<256x128xf32> to vector<128xf32>
    %74 = vector.shape_cast %73 : vector<128xf32> to vector<1x128xf32>
    %c0_70 = arith.constant 0 : index
    %c0_71 = arith.constant 0 : index
    %c0_72 = arith.constant 0 : index
    %75 = vector.load %arg6[%c0_70, %c0_71, %c0_72] : memref<1x2x128xf32, #tpu.memory_space<vmem>>, vector<1x1x128xf32>
    %76 = vector.shape_cast %75 : vector<1x1x128xf32> to vector<1x128xf32>
    %77 = vector.shape_cast %74 : vector<1x128xf32> to vector<1x1x128xf32>
    tpu.vector_store %arg6[%c0_70, %c0_71, %c0_72], %77 {strides = array<i32>} : memref<1x2x128xf32, #tpu.memory_space<vmem>>, vector<1x1x128xf32>,
    %78 = arith.mulf %68, %68 : vector<256x128xf32>
    %cst_73 = arith.constant dense<0.000000e+00> : vector<128xf32>
    %79 = vector.multi_reduction <add>, %78, %cst_73 [0] : vector<256x128xf32> to vector<128xf32>
    %80 = vector.shape_cast %79 : vector<128xf32> to vector<1x128xf32>
    %c0_74 = arith.constant 0 : index
    %c1_75 = arith.constant 1 : index
    %c0_76 = arith.constant 0 : index
    %81 = vector.load %arg6[%c0_74, %c1_75, %c0_76] : memref<1x2x128xf32, #tpu.memory_space<vmem>>, vector<1x1x128xf32>
    %82 = vector.shape_cast %81 : vector<1x1x128xf32> to vector<1x128xf32>
    %83 = vector.shape_cast %80 : vector<1x128xf32> to vector<1x1x128xf32>
    tpu.vector_store %arg6[%c0_74, %c1_75, %c0_76], %83 {strides = array<i32>} : memref<1x2x128xf32, #tpu.memory_space<vmem>>, vector<1x1x128xf32>,
    return
  }
  func.func @transform_0(%arg0: i32) -> (i32, i32, i32, i32) {
    %c0_i32 = arith.constant 0 : i32
    %c0_i32_0 = arith.constant 0 : i32
    %c0_i32_1 = arith.constant 0 : i32
    %c0_i32_2 = arith.constant 0 : i32
    return %arg0, %c0_i32, %c0_i32_0, %c0_i32_1 : i32, i32, i32, i32
  }
  func.func @transform_1(%arg0: i32) -> (i32, i32) {
    %c0_i32 = arith.constant 0 : i32
    %c0_i32_0 = arith.constant 0 : i32
    %c0_i32_1 = arith.constant 0 : i32
    return %c0_i32, %c0_i32_0 : i32, i32
  }
  func.func @transform_2(%arg0: i32) -> (i32, i32) {
    %c0_i32 = arith.constant 0 : i32
    %c0_i32_0 = arith.constant 0 : i32
    %c0_i32_1 = arith.constant 0 : i32
    return %c0_i32, %c0_i32_0 : i32, i32
  }
  func.func @transform_3(%arg0: i32) -> (i32, i32, i32) {
    %c0_i32 = arith.constant 0 : i32
    %c0_i32_0 = arith.constant 0 : i32
    %c0_i32_1 = arith.constant 0 : i32
    %c0_i32_2 = arith.constant 0 : i32
    return %c0_i32, %c0_i32_0, %c0_i32_1 : i32, i32, i32
  }
  func.func @transform_4(%arg0: i32) -> (i32, i32, i32, i32) {
    %c0_i32 = arith.constant 0 : i32
    %c0_i32_0 = arith.constant 0 : i32
    %c0_i32_1 = arith.constant 0 : i32
    %c0_i32_2 = arith.constant 0 : i32
    return %arg0, %c0_i32, %c0_i32_0, %c0_i32_1 : i32, i32, i32, i32
  }
  func.func @transform_5(%arg0: i32) -> (i32, i32, i32) {
    %c0_i32 = arith.constant 0 : i32
    %c0_i32_0 = arith.constant 0 : i32
    %c0_i32_1 = arith.constant 0 : i32
    return %arg0, %c0_i32, %c0_i32_0 : i32, i32, i32
  }
}

module attributes {stable_mosaic.version = 11 : i64} {
  func.func @_conv3x3_s1_kernel(%arg0: i32, %arg1: memref<1x16x16x128xf32, #tpu.memory_space<vmem>>, %arg2: memref<1x128xf32, #tpu.memory_space<vmem>>, %arg3: memref<1x128xf32, #tpu.memory_space<vmem>>, %arg4: memref<9x128x128xbf16, #tpu.memory_space<vmem>>, %arg5: memref<1x16x16x128xf32, #tpu.memory_space<vmem>>, %arg6: memref<1x2x128xf32, #tpu.memory_space<vmem>>, %arg7: memref<18x18x128xf32, #tpu.memory_space<vmem>>) attributes {dimension_semantics = [#tpu.dimension_semantics<parallel>], iteration_bounds = array<i64: 2>, scalar_prefetch = 0 : i64, scratch_operands = 1 : i64, tpu.core_type = #tpu.core_type<tc>, window_params = [{transform_indices = @transform_0, window_bounds = array<i64: 1, 16, 16, 128>}, {pipeline_mode = #tpu.pipeline_mode<synchronous>, transform_indices = @transform_1, window_bounds = array<i64: 1, 128>}, {pipeline_mode = #tpu.pipeline_mode<synchronous>, transform_indices = @transform_2, window_bounds = array<i64: 1, 128>}, {pipeline_mode = #tpu.pipeline_mode<synchronous>, transform_indices = @transform_3, window_bounds = array<i64: 9, 128, 128>}, {transform_indices = @transform_4, window_bounds = array<i64: 1, 16, 16, 128>}, {transform_indices = @transform_5, window_bounds = array<i64: 1, 2, 128>}]} {
    %c0 = arith.constant 0 : index
    %c0_0 = arith.constant 0 : index
    %c0_1 = arith.constant 0 : index
    %c0_2 = arith.constant 0 : index
    %0 = vector.load %arg1[%c0, %c0_0, %c0_1, %c0_2] : memref<1x16x16x128xf32, #tpu.memory_space<vmem>>, vector<1x16x16x128xf32>
    %1 = vector.shape_cast %0 : vector<1x16x16x128xf32> to vector<16x16x128xf32>
    %c0_3 = arith.constant 0 : index
    %c0_4 = arith.constant 0 : index
    %2 = vector.load %arg2[%c0_3, %c0_4] : memref<1x128xf32, #tpu.memory_space<vmem>>, vector<1x128xf32>
    %3 = vector.shape_cast %2 : vector<1x128xf32> to vector<1x1x128xf32>
    %c0_5 = arith.constant 0 : index
    %c0_6 = arith.constant 0 : index
    %4 = vector.load %arg3[%c0_5, %c0_6] : memref<1x128xf32, #tpu.memory_space<vmem>>, vector<1x128xf32>
    %5 = vector.shape_cast %4 : vector<1x128xf32> to vector<1x1x128xf32>
    %6 = vector.broadcast %3 : vector<1x1x128xf32> to vector<16x16x128xf32>
    %7 = arith.mulf %1, %6 : vector<16x16x128xf32>
    %8 = vector.broadcast %5 : vector<1x1x128xf32> to vector<16x16x128xf32>
    %9 = arith.addf %7, %8 : vector<16x16x128xf32>
    %cst = arith.constant 0.000000e+00 : f32
    %10 = vector.broadcast %cst : f32 to vector<16x16x128xf32>
    %11 = arith.cmpf oge, %9, %10 : vector<16x16x128xf32>
    %cst_7 = arith.constant 2.000000e-01 : f32
    %12 = vector.broadcast %cst_7 : f32 to vector<16x16x128xf32>
    %13 = arith.mulf %12, %9 : vector<16x16x128xf32>
    %14 = arith.select %11, %9, %13 : vector<16x16x128xi1>, vector<16x16x128xf32>
    %cst_8 = arith.constant 0.000000e+00 : f32
    %15 = vector.broadcast %cst_8 : f32 to vector<18x18x128xf32>
    %c0_9 = arith.constant 0 : index
    %c0_10 = arith.constant 0 : index
    %c0_11 = arith.constant 0 : index
    %16 = vector.load %arg7[%c0_9, %c0_10, %c0_11] : memref<18x18x128xf32, #tpu.memory_space<vmem>>, vector<18x18x128xf32>
    tpu.vector_store %arg7[%c0_9, %c0_10, %c0_11], %15 {strides = array<i32>} : memref<18x18x128xf32, #tpu.memory_space<vmem>>, vector<18x18x128xf32>,
    %c1 = arith.constant 1 : index
    %c1_12 = arith.constant 1 : index
    %c0_13 = arith.constant 0 : index
    %17 = vector.load %arg7[%c1, %c1_12, %c0_13] : memref<18x18x128xf32, #tpu.memory_space<vmem>>, vector<16x16x128xf32>
    tpu.vector_store %arg7[%c1, %c1_12, %c0_13], %14 {strides = array<i32>} : memref<18x18x128xf32, #tpu.memory_space<vmem>>, vector<16x16x128xf32>,
    %cst_14 = arith.constant 0.000000e+00 : f32
    %18 = vector.broadcast %cst_14 : f32 to vector<256x128xf32>
    %c0_15 = arith.constant 0 : index
    %c0_16 = arith.constant 0 : index
    %c0_17 = arith.constant 0 : index
    %19 = vector.load %arg7[%c0_15, %c0_16, %c0_17] : memref<18x18x128xf32, #tpu.memory_space<vmem>>, vector<16x16x128xf32>
    %20 = vector.shape_cast %19 : vector<16x16x128xf32> to vector<256x128xf32>
    %21 = arith.truncf %20 : vector<256x128xf32> to vector<256x128xbf16>
    %c0_18 = arith.constant 0 : index
    %c0_19 = arith.constant 0 : index
    %c0_20 = arith.constant 0 : index
    %22 = vector.load %arg4[%c0_18, %c0_19, %c0_20] : memref<9x128x128xbf16, #tpu.memory_space<vmem>>, vector<1x128x128xbf16>
    %23 = vector.shape_cast %22 : vector<1x128x128xbf16> to vector<128x128xbf16>
    %cst_21 = arith.constant dense<0.000000e+00> : vector<256x128xf32>
    %24 = tpu.matmul %21, %23, %cst_21 {dimension_numbers = #tpu.dot_dimension_numbers<[1], [0], [0], [1], [0, 0, 1, 1], [], []>} : vector<256x128xbf16>, vector<128x128xbf16>, vector<256x128xf32> -> vector<256x128xf32>
    %25 = arith.addf %18, %24 : vector<256x128xf32>
    %c0_22 = arith.constant 0 : index
    %c1_23 = arith.constant 1 : index
    %c0_24 = arith.constant 0 : index
    %26 = vector.load %arg7[%c0_22, %c1_23, %c0_24] : memref<18x18x128xf32, #tpu.memory_space<vmem>>, vector<16x16x128xf32>
    %27 = vector.shape_cast %26 : vector<16x16x128xf32> to vector<256x128xf32>
    %28 = arith.truncf %27 : vector<256x128xf32> to vector<256x128xbf16>
    %c1_25 = arith.constant 1 : index
    %c0_26 = arith.constant 0 : index
    %c0_27 = arith.constant 0 : index
    %29 = vector.load %arg4[%c1_25, %c0_26, %c0_27] : memref<9x128x128xbf16, #tpu.memory_space<vmem>>, vector<1x128x128xbf16>
    %30 = vector.shape_cast %29 : vector<1x128x128xbf16> to vector<128x128xbf16>
    %cst_28 = arith.constant dense<0.000000e+00> : vector<256x128xf32>
    %31 = tpu.matmul %28, %30, %cst_28 {dimension_numbers = #tpu.dot_dimension_numbers<[1], [0], [0], [1], [0, 0, 1, 1], [], []>} : vector<256x128xbf16>, vector<128x128xbf16>, vector<256x128xf32> -> vector<256x128xf32>
    %32 = arith.addf %25, %31 : vector<256x128xf32>
    %c0_29 = arith.constant 0 : index
    %c2 = arith.constant 2 : index
    %c0_30 = arith.constant 0 : index
    %33 = vector.load %arg7[%c0_29, %c2, %c0_30] : memref<18x18x128xf32, #tpu.memory_space<vmem>>, vector<16x16x128xf32>
    %34 = vector.shape_cast %33 : vector<16x16x128xf32> to vector<256x128xf32>
    %35 = arith.truncf %34 : vector<256x128xf32> to vector<256x128xbf16>
    %c2_31 = arith.constant 2 : index
    %c0_32 = arith.constant 0 : index
    %c0_33 = arith.constant 0 : index
    %36 = vector.load %arg4[%c2_31, %c0_32, %c0_33] : memref<9x128x128xbf16, #tpu.memory_space<vmem>>, vector<1x128x128xbf16>
    %37 = vector.shape_cast %36 : vector<1x128x128xbf16> to vector<128x128xbf16>
    %cst_34 = arith.constant dense<0.000000e+00> : vector<256x128xf32>
    %38 = tpu.matmul %35, %37, %cst_34 {dimension_numbers = #tpu.dot_dimension_numbers<[1], [0], [0], [1], [0, 0, 1, 1], [], []>} : vector<256x128xbf16>, vector<128x128xbf16>, vector<256x128xf32> -> vector<256x128xf32>
    %39 = arith.addf %32, %38 : vector<256x128xf32>
    %c1_35 = arith.constant 1 : index
    %c0_36 = arith.constant 0 : index
    %c0_37 = arith.constant 0 : index
    %40 = vector.load %arg7[%c1_35, %c0_36, %c0_37] : memref<18x18x128xf32, #tpu.memory_space<vmem>>, vector<16x16x128xf32>
    %41 = vector.shape_cast %40 : vector<16x16x128xf32> to vector<256x128xf32>
    %42 = arith.truncf %41 : vector<256x128xf32> to vector<256x128xbf16>
    %c3 = arith.constant 3 : index
    %c0_38 = arith.constant 0 : index
    %c0_39 = arith.constant 0 : index
    %43 = vector.load %arg4[%c3, %c0_38, %c0_39] : memref<9x128x128xbf16, #tpu.memory_space<vmem>>, vector<1x128x128xbf16>
    %44 = vector.shape_cast %43 : vector<1x128x128xbf16> to vector<128x128xbf16>
    %cst_40 = arith.constant dense<0.000000e+00> : vector<256x128xf32>
    %45 = tpu.matmul %42, %44, %cst_40 {dimension_numbers = #tpu.dot_dimension_numbers<[1], [0], [0], [1], [0, 0, 1, 1], [], []>} : vector<256x128xbf16>, vector<128x128xbf16>, vector<256x128xf32> -> vector<256x128xf32>
    %46 = arith.addf %39, %45 : vector<256x128xf32>
    %c1_41 = arith.constant 1 : index
    %c1_42 = arith.constant 1 : index
    %c0_43 = arith.constant 0 : index
    %47 = vector.load %arg7[%c1_41, %c1_42, %c0_43] : memref<18x18x128xf32, #tpu.memory_space<vmem>>, vector<16x16x128xf32>
    %48 = vector.shape_cast %47 : vector<16x16x128xf32> to vector<256x128xf32>
    %49 = arith.truncf %48 : vector<256x128xf32> to vector<256x128xbf16>
    %c4 = arith.constant 4 : index
    %c0_44 = arith.constant 0 : index
    %c0_45 = arith.constant 0 : index
    %50 = vector.load %arg4[%c4, %c0_44, %c0_45] : memref<9x128x128xbf16, #tpu.memory_space<vmem>>, vector<1x128x128xbf16>
    %51 = vector.shape_cast %50 : vector<1x128x128xbf16> to vector<128x128xbf16>
    %cst_46 = arith.constant dense<0.000000e+00> : vector<256x128xf32>
    %52 = tpu.matmul %49, %51, %cst_46 {dimension_numbers = #tpu.dot_dimension_numbers<[1], [0], [0], [1], [0, 0, 1, 1], [], []>} : vector<256x128xbf16>, vector<128x128xbf16>, vector<256x128xf32> -> vector<256x128xf32>
    %53 = arith.addf %46, %52 : vector<256x128xf32>
    %c1_47 = arith.constant 1 : index
    %c2_48 = arith.constant 2 : index
    %c0_49 = arith.constant 0 : index
    %54 = vector.load %arg7[%c1_47, %c2_48, %c0_49] : memref<18x18x128xf32, #tpu.memory_space<vmem>>, vector<16x16x128xf32>
    %55 = vector.shape_cast %54 : vector<16x16x128xf32> to vector<256x128xf32>
    %56 = arith.truncf %55 : vector<256x128xf32> to vector<256x128xbf16>
    %c5 = arith.constant 5 : index
    %c0_50 = arith.constant 0 : index
    %c0_51 = arith.constant 0 : index
    %57 = vector.load %arg4[%c5, %c0_50, %c0_51] : memref<9x128x128xbf16, #tpu.memory_space<vmem>>, vector<1x128x128xbf16>
    %58 = vector.shape_cast %57 : vector<1x128x128xbf16> to vector<128x128xbf16>
    %cst_52 = arith.constant dense<0.000000e+00> : vector<256x128xf32>
    %59 = tpu.matmul %56, %58, %cst_52 {dimension_numbers = #tpu.dot_dimension_numbers<[1], [0], [0], [1], [0, 0, 1, 1], [], []>} : vector<256x128xbf16>, vector<128x128xbf16>, vector<256x128xf32> -> vector<256x128xf32>
    %60 = arith.addf %53, %59 : vector<256x128xf32>
    %c2_53 = arith.constant 2 : index
    %c0_54 = arith.constant 0 : index
    %c0_55 = arith.constant 0 : index
    %61 = vector.load %arg7[%c2_53, %c0_54, %c0_55] : memref<18x18x128xf32, #tpu.memory_space<vmem>>, vector<16x16x128xf32>
    %62 = vector.shape_cast %61 : vector<16x16x128xf32> to vector<256x128xf32>
    %63 = arith.truncf %62 : vector<256x128xf32> to vector<256x128xbf16>
    %c6 = arith.constant 6 : index
    %c0_56 = arith.constant 0 : index
    %c0_57 = arith.constant 0 : index
    %64 = vector.load %arg4[%c6, %c0_56, %c0_57] : memref<9x128x128xbf16, #tpu.memory_space<vmem>>, vector<1x128x128xbf16>
    %65 = vector.shape_cast %64 : vector<1x128x128xbf16> to vector<128x128xbf16>
    %cst_58 = arith.constant dense<0.000000e+00> : vector<256x128xf32>
    %66 = tpu.matmul %63, %65, %cst_58 {dimension_numbers = #tpu.dot_dimension_numbers<[1], [0], [0], [1], [0, 0, 1, 1], [], []>} : vector<256x128xbf16>, vector<128x128xbf16>, vector<256x128xf32> -> vector<256x128xf32>
    %67 = arith.addf %60, %66 : vector<256x128xf32>
    %c2_59 = arith.constant 2 : index
    %c1_60 = arith.constant 1 : index
    %c0_61 = arith.constant 0 : index
    %68 = vector.load %arg7[%c2_59, %c1_60, %c0_61] : memref<18x18x128xf32, #tpu.memory_space<vmem>>, vector<16x16x128xf32>
    %69 = vector.shape_cast %68 : vector<16x16x128xf32> to vector<256x128xf32>
    %70 = arith.truncf %69 : vector<256x128xf32> to vector<256x128xbf16>
    %c7 = arith.constant 7 : index
    %c0_62 = arith.constant 0 : index
    %c0_63 = arith.constant 0 : index
    %71 = vector.load %arg4[%c7, %c0_62, %c0_63] : memref<9x128x128xbf16, #tpu.memory_space<vmem>>, vector<1x128x128xbf16>
    %72 = vector.shape_cast %71 : vector<1x128x128xbf16> to vector<128x128xbf16>
    %cst_64 = arith.constant dense<0.000000e+00> : vector<256x128xf32>
    %73 = tpu.matmul %70, %72, %cst_64 {dimension_numbers = #tpu.dot_dimension_numbers<[1], [0], [0], [1], [0, 0, 1, 1], [], []>} : vector<256x128xbf16>, vector<128x128xbf16>, vector<256x128xf32> -> vector<256x128xf32>
    %74 = arith.addf %67, %73 : vector<256x128xf32>
    %c2_65 = arith.constant 2 : index
    %c2_66 = arith.constant 2 : index
    %c0_67 = arith.constant 0 : index
    %75 = vector.load %arg7[%c2_65, %c2_66, %c0_67] : memref<18x18x128xf32, #tpu.memory_space<vmem>>, vector<16x16x128xf32>
    %76 = vector.shape_cast %75 : vector<16x16x128xf32> to vector<256x128xf32>
    %77 = arith.truncf %76 : vector<256x128xf32> to vector<256x128xbf16>
    %c8 = arith.constant 8 : index
    %c0_68 = arith.constant 0 : index
    %c0_69 = arith.constant 0 : index
    %78 = vector.load %arg4[%c8, %c0_68, %c0_69] : memref<9x128x128xbf16, #tpu.memory_space<vmem>>, vector<1x128x128xbf16>
    %79 = vector.shape_cast %78 : vector<1x128x128xbf16> to vector<128x128xbf16>
    %cst_70 = arith.constant dense<0.000000e+00> : vector<256x128xf32>
    %80 = tpu.matmul %77, %79, %cst_70 {dimension_numbers = #tpu.dot_dimension_numbers<[1], [0], [0], [1], [0, 0, 1, 1], [], []>} : vector<256x128xbf16>, vector<128x128xbf16>, vector<256x128xf32> -> vector<256x128xf32>
    %81 = arith.addf %74, %80 : vector<256x128xf32>
    %82 = vector.shape_cast %81 : vector<256x128xf32> to vector<16x16x128xf32>
    %c0_71 = arith.constant 0 : index
    %c0_72 = arith.constant 0 : index
    %c0_73 = arith.constant 0 : index
    %c0_74 = arith.constant 0 : index
    %83 = vector.load %arg5[%c0_71, %c0_72, %c0_73, %c0_74] : memref<1x16x16x128xf32, #tpu.memory_space<vmem>>, vector<1x16x16x128xf32>
    %84 = vector.shape_cast %83 : vector<1x16x16x128xf32> to vector<16x16x128xf32>
    %85 = vector.shape_cast %82 : vector<16x16x128xf32> to vector<1x16x16x128xf32>
    tpu.vector_store %arg5[%c0_71, %c0_72, %c0_73, %c0_74], %85 {strides = array<i32>} : memref<1x16x16x128xf32, #tpu.memory_space<vmem>>, vector<1x16x16x128xf32>,
    %cst_75 = arith.constant dense<0.000000e+00> : vector<128xf32>
    %86 = vector.multi_reduction <add>, %81, %cst_75 [0] : vector<256x128xf32> to vector<128xf32>
    %87 = vector.shape_cast %86 : vector<128xf32> to vector<1x128xf32>
    %c0_76 = arith.constant 0 : index
    %c0_77 = arith.constant 0 : index
    %c0_78 = arith.constant 0 : index
    %88 = vector.load %arg6[%c0_76, %c0_77, %c0_78] : memref<1x2x128xf32, #tpu.memory_space<vmem>>, vector<1x1x128xf32>
    %89 = vector.shape_cast %88 : vector<1x1x128xf32> to vector<1x128xf32>
    %90 = vector.shape_cast %87 : vector<1x128xf32> to vector<1x1x128xf32>
    tpu.vector_store %arg6[%c0_76, %c0_77, %c0_78], %90 {strides = array<i32>} : memref<1x2x128xf32, #tpu.memory_space<vmem>>, vector<1x1x128xf32>,
    %91 = arith.mulf %81, %81 : vector<256x128xf32>
    %cst_79 = arith.constant dense<0.000000e+00> : vector<128xf32>
    %92 = vector.multi_reduction <add>, %91, %cst_79 [0] : vector<256x128xf32> to vector<128xf32>
    %93 = vector.shape_cast %92 : vector<128xf32> to vector<1x128xf32>
    %c0_80 = arith.constant 0 : index
    %c1_81 = arith.constant 1 : index
    %c0_82 = arith.constant 0 : index
    %94 = vector.load %arg6[%c0_80, %c1_81, %c0_82] : memref<1x2x128xf32, #tpu.memory_space<vmem>>, vector<1x1x128xf32>
    %95 = vector.shape_cast %94 : vector<1x1x128xf32> to vector<1x128xf32>
    %96 = vector.shape_cast %93 : vector<1x128xf32> to vector<1x1x128xf32>
    tpu.vector_store %arg6[%c0_80, %c1_81, %c0_82], %96 {strides = array<i32>} : memref<1x2x128xf32, #tpu.memory_space<vmem>>, vector<1x1x128xf32>,
    return
  }
  func.func @transform_0(%arg0: i32) -> (i32, i32, i32, i32) {
    %c0_i32 = arith.constant 0 : i32
    %c0_i32_0 = arith.constant 0 : i32
    %c0_i32_1 = arith.constant 0 : i32
    %c0_i32_2 = arith.constant 0 : i32
    return %arg0, %c0_i32, %c0_i32_0, %c0_i32_1 : i32, i32, i32, i32
  }
  func.func @transform_1(%arg0: i32) -> (i32, i32) {
    %c0_i32 = arith.constant 0 : i32
    %c0_i32_0 = arith.constant 0 : i32
    %c0_i32_1 = arith.constant 0 : i32
    return %c0_i32, %c0_i32_0 : i32, i32
  }
  func.func @transform_2(%arg0: i32) -> (i32, i32) {
    %c0_i32 = arith.constant 0 : i32
    %c0_i32_0 = arith.constant 0 : i32
    %c0_i32_1 = arith.constant 0 : i32
    return %c0_i32, %c0_i32_0 : i32, i32
  }
  func.func @transform_3(%arg0: i32) -> (i32, i32, i32) {
    %c0_i32 = arith.constant 0 : i32
    %c0_i32_0 = arith.constant 0 : i32
    %c0_i32_1 = arith.constant 0 : i32
    %c0_i32_2 = arith.constant 0 : i32
    return %c0_i32, %c0_i32_0, %c0_i32_1 : i32, i32, i32
  }
  func.func @transform_4(%arg0: i32) -> (i32, i32, i32, i32) {
    %c0_i32 = arith.constant 0 : i32
    %c0_i32_0 = arith.constant 0 : i32
    %c0_i32_1 = arith.constant 0 : i32
    %c0_i32_2 = arith.constant 0 : i32
    return %arg0, %c0_i32, %c0_i32_0, %c0_i32_1 : i32, i32, i32, i32
  }
  func.func @transform_5(%arg0: i32) -> (i32, i32, i32) {
    %c0_i32 = arith.constant 0 : i32
    %c0_i32_0 = arith.constant 0 : i32
    %c0_i32_1 = arith.constant 0 : i32
    return %arg0, %c0_i32, %c0_i32_0 : i32, i32, i32
  }
}

module attributes {stable_mosaic.version = 11 : i64} {
  func.func @_conv3x3_s2_bypass_kernel(%arg0: i32, %arg1: memref<1x2x2x8x8x128xf32, #tpu.memory_space<vmem>>, %arg2: memref<1x8x8x128xf32, #tpu.memory_space<vmem>>, %arg3: memref<1x128xf32, #tpu.memory_space<vmem>>, %arg4: memref<1x128xf32, #tpu.memory_space<vmem>>, %arg5: memref<9x128x128xbf16, #tpu.memory_space<vmem>>, %arg6: memref<128x128xbf16, #tpu.memory_space<vmem>>, %arg7: memref<1x8x8x128xf32, #tpu.memory_space<vmem>>, %arg8: memref<1x8x8x128xf32, #tpu.memory_space<vmem>>, %arg9: memref<1x2x128xf32, #tpu.memory_space<vmem>>, %arg10: memref<1x2x128xf32, #tpu.memory_space<vmem>>, %arg11: memref<2x2x9x9x128xf32, #tpu.memory_space<vmem>>) attributes {dimension_semantics = [#tpu.dimension_semantics<parallel>], iteration_bounds = array<i64: 2>, scalar_prefetch = 0 : i64, scratch_operands = 1 : i64, tpu.core_type = #tpu.core_type<tc>, window_params = [{transform_indices = @transform_0, window_bounds = array<i64: 1, 2, 2, 8, 8, 128>}, {transform_indices = @transform_1, window_bounds = array<i64: 1, 8, 8, 128>}, {pipeline_mode = #tpu.pipeline_mode<synchronous>, transform_indices = @transform_2, window_bounds = array<i64: 1, 128>}, {pipeline_mode = #tpu.pipeline_mode<synchronous>, transform_indices = @transform_3, window_bounds = array<i64: 1, 128>}, {pipeline_mode = #tpu.pipeline_mode<synchronous>, transform_indices = @transform_4, window_bounds = array<i64: 9, 128, 128>}, {pipeline_mode = #tpu.pipeline_mode<synchronous>, transform_indices = @transform_5, window_bounds = array<i64: 128, 128>}, {transform_indices = @transform_6, window_bounds = array<i64: 1, 8, 8, 128>}, {transform_indices = @transform_7, window_bounds = array<i64: 1, 8, 8, 128>}, {transform_indices = @transform_8, window_bounds = array<i64: 1, 2, 128>}, {transform_indices = @transform_9, window_bounds = array<i64: 1, 2, 128>}]} {
    %c0 = arith.constant 0 : index
    %c0_0 = arith.constant 0 : index
    %0 = vector.load %arg3[%c0, %c0_0] : memref<1x128xf32, #tpu.memory_space<vmem>>, vector<1x128xf32>
    %1 = vector.shape_cast %0 : vector<1x128xf32> to vector<1x1x128xf32>
    %c0_1 = arith.constant 0 : index
    %c0_2 = arith.constant 0 : index
    %2 = vector.load %arg4[%c0_1, %c0_2] : memref<1x128xf32, #tpu.memory_space<vmem>>, vector<1x128xf32>
    %3 = vector.shape_cast %2 : vector<1x128xf32> to vector<1x1x128xf32>
    %cst = arith.constant 0.000000e+00 : f32
    %4 = vector.broadcast %cst : f32 to vector<2x2x9x9x128xf32>
    %c0_3 = arith.constant 0 : index
    %c0_4 = arith.constant 0 : index
    %c0_5 = arith.constant 0 : index
    %c0_6 = arith.constant 0 : index
    %c0_7 = arith.constant 0 : index
    %5 = vector.load %arg11[%c0_3, %c0_4, %c0_5, %c0_6, %c0_7] : memref<2x2x9x9x128xf32, #tpu.memory_space<vmem>>, vector<2x2x9x9x128xf32>
    tpu.vector_store %arg11[%c0_3, %c0_4, %c0_5, %c0_6, %c0_7], %4 {strides = array<i32>} : memref<2x2x9x9x128xf32, #tpu.memory_space<vmem>>, vector<2x2x9x9x128xf32>,
    %c0_8 = arith.constant 0 : index
    %c0_9 = arith.constant 0 : index
    %c0_10 = arith.constant 0 : index
    %c0_11 = arith.constant 0 : index
    %c0_12 = arith.constant 0 : index
    %c0_13 = arith.constant 0 : index
    %6 = vector.load %arg1[%c0_8, %c0_9, %c0_10, %c0_11, %c0_12, %c0_13] : memref<1x2x2x8x8x128xf32, #tpu.memory_space<vmem>>, vector<1x1x1x8x8x128xf32>
    %7 = vector.shape_cast %6 : vector<1x1x1x8x8x128xf32> to vector<8x8x128xf32>
    %8 = vector.broadcast %1 : vector<1x1x128xf32> to vector<8x8x128xf32>
    %9 = arith.mulf %7, %8 : vector<8x8x128xf32>
    %10 = vector.broadcast %3 : vector<1x1x128xf32> to vector<8x8x128xf32>
    %11 = arith.addf %9, %10 : vector<8x8x128xf32>
    %cst_14 = arith.constant 0.000000e+00 : f32
    %12 = vector.broadcast %cst_14 : f32 to vector<8x8x128xf32>
    %13 = arith.cmpf oge, %11, %12 : vector<8x8x128xf32>
    %cst_15 = arith.constant 2.000000e-01 : f32
    %14 = vector.broadcast %cst_15 : f32 to vector<8x8x128xf32>
    %15 = arith.mulf %14, %11 : vector<8x8x128xf32>
    %16 = arith.select %13, %11, %15 : vector<8x8x128xi1>, vector<8x8x128xf32>
    %c0_16 = arith.constant 0 : index
    %c0_17 = arith.constant 0 : index
    %c1 = arith.constant 1 : index
    %c1_18 = arith.constant 1 : index
    %c0_19 = arith.constant 0 : index
    %17 = vector.load %arg11[%c0_16, %c0_17, %c1, %c1_18, %c0_19] : memref<2x2x9x9x128xf32, #tpu.memory_space<vmem>>, vector<1x1x8x8x128xf32>
    %18 = vector.shape_cast %17 : vector<1x1x8x8x128xf32> to vector<8x8x128xf32>
    %19 = vector.shape_cast %16 : vector<8x8x128xf32> to vector<1x1x8x8x128xf32>
    tpu.vector_store %arg11[%c0_16, %c0_17, %c1, %c1_18, %c0_19], %19 {strides = array<i32>} : memref<2x2x9x9x128xf32, #tpu.memory_space<vmem>>, vector<1x1x8x8x128xf32>,
    %c0_20 = arith.constant 0 : index
    %c0_21 = arith.constant 0 : index
    %c1_22 = arith.constant 1 : index
    %c0_23 = arith.constant 0 : index
    %c0_24 = arith.constant 0 : index
    %c0_25 = arith.constant 0 : index
    %20 = vector.load %arg1[%c0_20, %c0_21, %c1_22, %c0_23, %c0_24, %c0_25] : memref<1x2x2x8x8x128xf32, #tpu.memory_space<vmem>>, vector<1x1x1x8x8x128xf32>
    %21 = vector.shape_cast %20 : vector<1x1x1x8x8x128xf32> to vector<8x8x128xf32>
    %22 = vector.broadcast %1 : vector<1x1x128xf32> to vector<8x8x128xf32>
    %23 = arith.mulf %21, %22 : vector<8x8x128xf32>
    %24 = vector.broadcast %3 : vector<1x1x128xf32> to vector<8x8x128xf32>
    %25 = arith.addf %23, %24 : vector<8x8x128xf32>
    %cst_26 = arith.constant 0.000000e+00 : f32
    %26 = vector.broadcast %cst_26 : f32 to vector<8x8x128xf32>
    %27 = arith.cmpf oge, %25, %26 : vector<8x8x128xf32>
    %cst_27 = arith.constant 2.000000e-01 : f32
    %28 = vector.broadcast %cst_27 : f32 to vector<8x8x128xf32>
    %29 = arith.mulf %28, %25 : vector<8x8x128xf32>
    %30 = arith.select %27, %25, %29 : vector<8x8x128xi1>, vector<8x8x128xf32>
    %c0_28 = arith.constant 0 : index
    %c1_29 = arith.constant 1 : index
    %c1_30 = arith.constant 1 : index
    %c1_31 = arith.constant 1 : index
    %c0_32 = arith.constant 0 : index
    %31 = vector.load %arg11[%c0_28, %c1_29, %c1_30, %c1_31, %c0_32] : memref<2x2x9x9x128xf32, #tpu.memory_space<vmem>>, vector<1x1x8x8x128xf32>
    %32 = vector.shape_cast %31 : vector<1x1x8x8x128xf32> to vector<8x8x128xf32>
    %33 = vector.shape_cast %30 : vector<8x8x128xf32> to vector<1x1x8x8x128xf32>
    tpu.vector_store %arg11[%c0_28, %c1_29, %c1_30, %c1_31, %c0_32], %33 {strides = array<i32>} : memref<2x2x9x9x128xf32, #tpu.memory_space<vmem>>, vector<1x1x8x8x128xf32>,
    %c0_33 = arith.constant 0 : index
    %c1_34 = arith.constant 1 : index
    %c0_35 = arith.constant 0 : index
    %c0_36 = arith.constant 0 : index
    %c0_37 = arith.constant 0 : index
    %c0_38 = arith.constant 0 : index
    %34 = vector.load %arg1[%c0_33, %c1_34, %c0_35, %c0_36, %c0_37, %c0_38] : memref<1x2x2x8x8x128xf32, #tpu.memory_space<vmem>>, vector<1x1x1x8x8x128xf32>
    %35 = vector.shape_cast %34 : vector<1x1x1x8x8x128xf32> to vector<8x8x128xf32>
    %36 = vector.broadcast %1 : vector<1x1x128xf32> to vector<8x8x128xf32>
    %37 = arith.mulf %35, %36 : vector<8x8x128xf32>
    %38 = vector.broadcast %3 : vector<1x1x128xf32> to vector<8x8x128xf32>
    %39 = arith.addf %37, %38 : vector<8x8x128xf32>
    %cst_39 = arith.constant 0.000000e+00 : f32
    %40 = vector.broadcast %cst_39 : f32 to vector<8x8x128xf32>
    %41 = arith.cmpf oge, %39, %40 : vector<8x8x128xf32>
    %cst_40 = arith.constant 2.000000e-01 : f32
    %42 = vector.broadcast %cst_40 : f32 to vector<8x8x128xf32>
    %43 = arith.mulf %42, %39 : vector<8x8x128xf32>
    %44 = arith.select %41, %39, %43 : vector<8x8x128xi1>, vector<8x8x128xf32>
    %c1_41 = arith.constant 1 : index
    %c0_42 = arith.constant 0 : index
    %c1_43 = arith.constant 1 : index
    %c1_44 = arith.constant 1 : index
    %c0_45 = arith.constant 0 : index
    %45 = vector.load %arg11[%c1_41, %c0_42, %c1_43, %c1_44, %c0_45] : memref<2x2x9x9x128xf32, #tpu.memory_space<vmem>>, vector<1x1x8x8x128xf32>
    %46 = vector.shape_cast %45 : vector<1x1x8x8x128xf32> to vector<8x8x128xf32>
    %47 = vector.shape_cast %44 : vector<8x8x128xf32> to vector<1x1x8x8x128xf32>
    tpu.vector_store %arg11[%c1_41, %c0_42, %c1_43, %c1_44, %c0_45], %47 {strides = array<i32>} : memref<2x2x9x9x128xf32, #tpu.memory_space<vmem>>, vector<1x1x8x8x128xf32>,
    %c0_46 = arith.constant 0 : index
    %c1_47 = arith.constant 1 : index
    %c1_48 = arith.constant 1 : index
    %c0_49 = arith.constant 0 : index
    %c0_50 = arith.constant 0 : index
    %c0_51 = arith.constant 0 : index
    %48 = vector.load %arg1[%c0_46, %c1_47, %c1_48, %c0_49, %c0_50, %c0_51] : memref<1x2x2x8x8x128xf32, #tpu.memory_space<vmem>>, vector<1x1x1x8x8x128xf32>
    %49 = vector.shape_cast %48 : vector<1x1x1x8x8x128xf32> to vector<8x8x128xf32>
    %50 = vector.broadcast %1 : vector<1x1x128xf32> to vector<8x8x128xf32>
    %51 = arith.mulf %49, %50 : vector<8x8x128xf32>
    %52 = vector.broadcast %3 : vector<1x1x128xf32> to vector<8x8x128xf32>
    %53 = arith.addf %51, %52 : vector<8x8x128xf32>
    %cst_52 = arith.constant 0.000000e+00 : f32
    %54 = vector.broadcast %cst_52 : f32 to vector<8x8x128xf32>
    %55 = arith.cmpf oge, %53, %54 : vector<8x8x128xf32>
    %cst_53 = arith.constant 2.000000e-01 : f32
    %56 = vector.broadcast %cst_53 : f32 to vector<8x8x128xf32>
    %57 = arith.mulf %56, %53 : vector<8x8x128xf32>
    %58 = arith.select %55, %53, %57 : vector<8x8x128xi1>, vector<8x8x128xf32>
    %c1_54 = arith.constant 1 : index
    %c1_55 = arith.constant 1 : index
    %c1_56 = arith.constant 1 : index
    %c1_57 = arith.constant 1 : index
    %c0_58 = arith.constant 0 : index
    %59 = vector.load %arg11[%c1_54, %c1_55, %c1_56, %c1_57, %c0_58] : memref<2x2x9x9x128xf32, #tpu.memory_space<vmem>>, vector<1x1x8x8x128xf32>
    %60 = vector.shape_cast %59 : vector<1x1x8x8x128xf32> to vector<8x8x128xf32>
    %61 = vector.shape_cast %58 : vector<8x8x128xf32> to vector<1x1x8x8x128xf32>
    tpu.vector_store %arg11[%c1_54, %c1_55, %c1_56, %c1_57, %c0_58], %61 {strides = array<i32>} : memref<2x2x9x9x128xf32, #tpu.memory_space<vmem>>, vector<1x1x8x8x128xf32>,
    %cst_59 = arith.constant 0.000000e+00 : f32
    %62 = vector.broadcast %cst_59 : f32 to vector<64x128xf32>
    %c1_60 = arith.constant 1 : index
    %c1_61 = arith.constant 1 : index
    %c0_62 = arith.constant 0 : index
    %c0_63 = arith.constant 0 : index
    %c0_64 = arith.constant 0 : index
    %63 = vector.load %arg11[%c1_60, %c1_61, %c0_62, %c0_63, %c0_64] : memref<2x2x9x9x128xf32, #tpu.memory_space<vmem>>, vector<1x1x8x8x128xf32>
    %64 = vector.shape_cast %63 : vector<1x1x8x8x128xf32> to vector<8x8x128xf32>
    %65 = vector.shape_cast %64 : vector<8x8x128xf32> to vector<64x128xf32>
    %66 = arith.truncf %65 : vector<64x128xf32> to vector<64x128xbf16>
    %c0_65 = arith.constant 0 : index
    %c0_66 = arith.constant 0 : index
    %c0_67 = arith.constant 0 : index
    %67 = vector.load %arg5[%c0_65, %c0_66, %c0_67] : memref<9x128x128xbf16, #tpu.memory_space<vmem>>, vector<1x128x128xbf16>
    %68 = vector.shape_cast %67 : vector<1x128x128xbf16> to vector<128x128xbf16>
    %cst_68 = arith.constant dense<0.000000e+00> : vector<64x128xf32>
    %69 = tpu.matmul %66, %68, %cst_68 {dimension_numbers = #tpu.dot_dimension_numbers<[1], [0], [0], [1], [0, 0, 1, 1], [], []>} : vector<64x128xbf16>, vector<128x128xbf16>, vector<64x128xf32> -> vector<64x128xf32>
    %70 = arith.addf %62, %69 : vector<64x128xf32>
    %c1_69 = arith.constant 1 : index
    %c0_70 = arith.constant 0 : index
    %c0_71 = arith.constant 0 : index
    %c1_72 = arith.constant 1 : index
    %c0_73 = arith.constant 0 : index
    %71 = vector.load %arg11[%c1_69, %c0_70, %c0_71, %c1_72, %c0_73] : memref<2x2x9x9x128xf32, #tpu.memory_space<vmem>>, vector<1x1x8x8x128xf32>
    %72 = vector.shape_cast %71 : vector<1x1x8x8x128xf32> to vector<8x8x128xf32>
    %73 = vector.shape_cast %72 : vector<8x8x128xf32> to vector<64x128xf32>
    %74 = arith.truncf %73 : vector<64x128xf32> to vector<64x128xbf16>
    %c1_74 = arith.constant 1 : index
    %c0_75 = arith.constant 0 : index
    %c0_76 = arith.constant 0 : index
    %75 = vector.load %arg5[%c1_74, %c0_75, %c0_76] : memref<9x128x128xbf16, #tpu.memory_space<vmem>>, vector<1x128x128xbf16>
    %76 = vector.shape_cast %75 : vector<1x128x128xbf16> to vector<128x128xbf16>
    %cst_77 = arith.constant dense<0.000000e+00> : vector<64x128xf32>
    %77 = tpu.matmul %74, %76, %cst_77 {dimension_numbers = #tpu.dot_dimension_numbers<[1], [0], [0], [1], [0, 0, 1, 1], [], []>} : vector<64x128xbf16>, vector<128x128xbf16>, vector<64x128xf32> -> vector<64x128xf32>
    %78 = arith.addf %70, %77 : vector<64x128xf32>
    %c1_78 = arith.constant 1 : index
    %c1_79 = arith.constant 1 : index
    %c0_80 = arith.constant 0 : index
    %c1_81 = arith.constant 1 : index
    %c0_82 = arith.constant 0 : index
    %79 = vector.load %arg11[%c1_78, %c1_79, %c0_80, %c1_81, %c0_82] : memref<2x2x9x9x128xf32, #tpu.memory_space<vmem>>, vector<1x1x8x8x128xf32>
    %80 = vector.shape_cast %79 : vector<1x1x8x8x128xf32> to vector<8x8x128xf32>
    %81 = vector.shape_cast %80 : vector<8x8x128xf32> to vector<64x128xf32>
    %82 = arith.truncf %81 : vector<64x128xf32> to vector<64x128xbf16>
    %c2 = arith.constant 2 : index
    %c0_83 = arith.constant 0 : index
    %c0_84 = arith.constant 0 : index
    %83 = vector.load %arg5[%c2, %c0_83, %c0_84] : memref<9x128x128xbf16, #tpu.memory_space<vmem>>, vector<1x128x128xbf16>
    %84 = vector.shape_cast %83 : vector<1x128x128xbf16> to vector<128x128xbf16>
    %cst_85 = arith.constant dense<0.000000e+00> : vector<64x128xf32>
    %85 = tpu.matmul %82, %84, %cst_85 {dimension_numbers = #tpu.dot_dimension_numbers<[1], [0], [0], [1], [0, 0, 1, 1], [], []>} : vector<64x128xbf16>, vector<128x128xbf16>, vector<64x128xf32> -> vector<64x128xf32>
    %86 = arith.addf %78, %85 : vector<64x128xf32>
    %c0_86 = arith.constant 0 : index
    %c1_87 = arith.constant 1 : index
    %c1_88 = arith.constant 1 : index
    %c0_89 = arith.constant 0 : index
    %c0_90 = arith.constant 0 : index
    %87 = vector.load %arg11[%c0_86, %c1_87, %c1_88, %c0_89, %c0_90] : memref<2x2x9x9x128xf32, #tpu.memory_space<vmem>>, vector<1x1x8x8x128xf32>
    %88 = vector.shape_cast %87 : vector<1x1x8x8x128xf32> to vector<8x8x128xf32>
    %89 = vector.shape_cast %88 : vector<8x8x128xf32> to vector<64x128xf32>
    %90 = arith.truncf %89 : vector<64x128xf32> to vector<64x128xbf16>
    %c3 = arith.constant 3 : index
    %c0_91 = arith.constant 0 : index
    %c0_92 = arith.constant 0 : index
    %91 = vector.load %arg5[%c3, %c0_91, %c0_92] : memref<9x128x128xbf16, #tpu.memory_space<vmem>>, vector<1x128x128xbf16>
    %92 = vector.shape_cast %91 : vector<1x128x128xbf16> to vector<128x128xbf16>
    %cst_93 = arith.constant dense<0.000000e+00> : vector<64x128xf32>
    %93 = tpu.matmul %90, %92, %cst_93 {dimension_numbers = #tpu.dot_dimension_numbers<[1], [0], [0], [1], [0, 0, 1, 1], [], []>} : vector<64x128xbf16>, vector<128x128xbf16>, vector<64x128xf32> -> vector<64x128xf32>
    %94 = arith.addf %86, %93 : vector<64x128xf32>
    %c0_94 = arith.constant 0 : index
    %c0_95 = arith.constant 0 : index
    %c1_96 = arith.constant 1 : index
    %c1_97 = arith.constant 1 : index
    %c0_98 = arith.constant 0 : index
    %95 = vector.load %arg11[%c0_94, %c0_95, %c1_96, %c1_97, %c0_98] : memref<2x2x9x9x128xf32, #tpu.memory_space<vmem>>, vector<1x1x8x8x128xf32>
    %96 = vector.shape_cast %95 : vector<1x1x8x8x128xf32> to vector<8x8x128xf32>
    %97 = vector.shape_cast %96 : vector<8x8x128xf32> to vector<64x128xf32>
    %98 = arith.truncf %97 : vector<64x128xf32> to vector<64x128xbf16>
    %c4 = arith.constant 4 : index
    %c0_99 = arith.constant 0 : index
    %c0_100 = arith.constant 0 : index
    %99 = vector.load %arg5[%c4, %c0_99, %c0_100] : memref<9x128x128xbf16, #tpu.memory_space<vmem>>, vector<1x128x128xbf16>
    %100 = vector.shape_cast %99 : vector<1x128x128xbf16> to vector<128x128xbf16>
    %cst_101 = arith.constant dense<0.000000e+00> : vector<64x128xf32>
    %101 = tpu.matmul %98, %100, %cst_101 {dimension_numbers = #tpu.dot_dimension_numbers<[1], [0], [0], [1], [0, 0, 1, 1], [], []>} : vector<64x128xbf16>, vector<128x128xbf16>, vector<64x128xf32> -> vector<64x128xf32>
    %102 = arith.addf %94, %101 : vector<64x128xf32>
    %c0_102 = arith.constant 0 : index
    %c1_103 = arith.constant 1 : index
    %c1_104 = arith.constant 1 : index
    %c1_105 = arith.constant 1 : index
    %c0_106 = arith.constant 0 : index
    %103 = vector.load %arg11[%c0_102, %c1_103, %c1_104, %c1_105, %c0_106] : memref<2x2x9x9x128xf32, #tpu.memory_space<vmem>>, vector<1x1x8x8x128xf32>
    %104 = vector.shape_cast %103 : vector<1x1x8x8x128xf32> to vector<8x8x128xf32>
    %105 = vector.shape_cast %104 : vector<8x8x128xf32> to vector<64x128xf32>
    %106 = arith.truncf %105 : vector<64x128xf32> to vector<64x128xbf16>
    %c5 = arith.constant 5 : index
    %c0_107 = arith.constant 0 : index
    %c0_108 = arith.constant 0 : index
    %107 = vector.load %arg5[%c5, %c0_107, %c0_108] : memref<9x128x128xbf16, #tpu.memory_space<vmem>>, vector<1x128x128xbf16>
    %108 = vector.shape_cast %107 : vector<1x128x128xbf16> to vector<128x128xbf16>
    %cst_109 = arith.constant dense<0.000000e+00> : vector<64x128xf32>
    %109 = tpu.matmul %106, %108, %cst_109 {dimension_numbers = #tpu.dot_dimension_numbers<[1], [0], [0], [1], [0, 0, 1, 1], [], []>} : vector<64x128xbf16>, vector<128x128xbf16>, vector<64x128xf32> -> vector<64x128xf32>
    %110 = arith.addf %102, %109 : vector<64x128xf32>
    %c1_110 = arith.constant 1 : index
    %c1_111 = arith.constant 1 : index
    %c1_112 = arith.constant 1 : index
    %c0_113 = arith.constant 0 : index
    %c0_114 = arith.constant 0 : index
    %111 = vector.load %arg11[%c1_110, %c1_111, %c1_112, %c0_113, %c0_114] : memref<2x2x9x9x128xf32, #tpu.memory_space<vmem>>, vector<1x1x8x8x128xf32>
    %112 = vector.shape_cast %111 : vector<1x1x8x8x128xf32> to vector<8x8x128xf32>
    %113 = vector.shape_cast %112 : vector<8x8x128xf32> to vector<64x128xf32>
    %114 = arith.truncf %113 : vector<64x128xf32> to vector<64x128xbf16>
    %c6 = arith.constant 6 : index
    %c0_115 = arith.constant 0 : index
    %c0_116 = arith.constant 0 : index
    %115 = vector.load %arg5[%c6, %c0_115, %c0_116] : memref<9x128x128xbf16, #tpu.memory_space<vmem>>, vector<1x128x128xbf16>
    %116 = vector.shape_cast %115 : vector<1x128x128xbf16> to vector<128x128xbf16>
    %cst_117 = arith.constant dense<0.000000e+00> : vector<64x128xf32>
    %117 = tpu.matmul %114, %116, %cst_117 {dimension_numbers = #tpu.dot_dimension_numbers<[1], [0], [0], [1], [0, 0, 1, 1], [], []>} : vector<64x128xbf16>, vector<128x128xbf16>, vector<64x128xf32> -> vector<64x128xf32>
    %118 = arith.addf %110, %117 : vector<64x128xf32>
    %c1_118 = arith.constant 1 : index
    %c0_119 = arith.constant 0 : index
    %c1_120 = arith.constant 1 : index
    %c1_121 = arith.constant 1 : index
    %c0_122 = arith.constant 0 : index
    %119 = vector.load %arg11[%c1_118, %c0_119, %c1_120, %c1_121, %c0_122] : memref<2x2x9x9x128xf32, #tpu.memory_space<vmem>>, vector<1x1x8x8x128xf32>
    %120 = vector.shape_cast %119 : vector<1x1x8x8x128xf32> to vector<8x8x128xf32>
    %121 = vector.shape_cast %120 : vector<8x8x128xf32> to vector<64x128xf32>
    %122 = arith.truncf %121 : vector<64x128xf32> to vector<64x128xbf16>
    %c7 = arith.constant 7 : index
    %c0_123 = arith.constant 0 : index
    %c0_124 = arith.constant 0 : index
    %123 = vector.load %arg5[%c7, %c0_123, %c0_124] : memref<9x128x128xbf16, #tpu.memory_space<vmem>>, vector<1x128x128xbf16>
    %124 = vector.shape_cast %123 : vector<1x128x128xbf16> to vector<128x128xbf16>
    %cst_125 = arith.constant dense<0.000000e+00> : vector<64x128xf32>
    %125 = tpu.matmul %122, %124, %cst_125 {dimension_numbers = #tpu.dot_dimension_numbers<[1], [0], [0], [1], [0, 0, 1, 1], [], []>} : vector<64x128xbf16>, vector<128x128xbf16>, vector<64x128xf32> -> vector<64x128xf32>
    %126 = arith.addf %118, %125 : vector<64x128xf32>
    %c1_126 = arith.constant 1 : index
    %c1_127 = arith.constant 1 : index
    %c1_128 = arith.constant 1 : index
    %c1_129 = arith.constant 1 : index
    %c0_130 = arith.constant 0 : index
    %127 = vector.load %arg11[%c1_126, %c1_127, %c1_128, %c1_129, %c0_130] : memref<2x2x9x9x128xf32, #tpu.memory_space<vmem>>, vector<1x1x8x8x128xf32>
    %128 = vector.shape_cast %127 : vector<1x1x8x8x128xf32> to vector<8x8x128xf32>
    %129 = vector.shape_cast %128 : vector<8x8x128xf32> to vector<64x128xf32>
    %130 = arith.truncf %129 : vector<64x128xf32> to vector<64x128xbf16>
    %c8 = arith.constant 8 : index
    %c0_131 = arith.constant 0 : index
    %c0_132 = arith.constant 0 : index
    %131 = vector.load %arg5[%c8, %c0_131, %c0_132] : memref<9x128x128xbf16, #tpu.memory_space<vmem>>, vector<1x128x128xbf16>
    %132 = vector.shape_cast %131 : vector<1x128x128xbf16> to vector<128x128xbf16>
    %cst_133 = arith.constant dense<0.000000e+00> : vector<64x128xf32>
    %133 = tpu.matmul %130, %132, %cst_133 {dimension_numbers = #tpu.dot_dimension_numbers<[1], [0], [0], [1], [0, 0, 1, 1], [], []>} : vector<64x128xbf16>, vector<128x128xbf16>, vector<64x128xf32> -> vector<64x128xf32>
    %134 = arith.addf %126, %133 : vector<64x128xf32>
    %135 = vector.shape_cast %134 : vector<64x128xf32> to vector<8x8x128xf32>
    %c0_134 = arith.constant 0 : index
    %c0_135 = arith.constant 0 : index
    %c0_136 = arith.constant 0 : index
    %c0_137 = arith.constant 0 : index
    %136 = vector.load %arg7[%c0_134, %c0_135, %c0_136, %c0_137] : memref<1x8x8x128xf32, #tpu.memory_space<vmem>>, vector<1x8x8x128xf32>
    %137 = vector.shape_cast %136 : vector<1x8x8x128xf32> to vector<8x8x128xf32>
    %138 = vector.shape_cast %135 : vector<8x8x128xf32> to vector<1x8x8x128xf32>
    tpu.vector_store %arg7[%c0_134, %c0_135, %c0_136, %c0_137], %138 {strides = array<i32>} : memref<1x8x8x128xf32, #tpu.memory_space<vmem>>, vector<1x8x8x128xf32>,
    %cst_138 = arith.constant dense<0.000000e+00> : vector<128xf32>
    %139 = vector.multi_reduction <add>, %134, %cst_138 [0] : vector<64x128xf32> to vector<128xf32>
    %140 = vector.shape_cast %139 : vector<128xf32> to vector<1x128xf32>
    %c0_139 = arith.constant 0 : index
    %c0_140 = arith.constant 0 : index
    %c0_141 = arith.constant 0 : index
    %141 = vector.load %arg9[%c0_139, %c0_140, %c0_141] : memref<1x2x128xf32, #tpu.memory_space<vmem>>, vector<1x1x128xf32>
    %142 = vector.shape_cast %141 : vector<1x1x128xf32> to vector<1x128xf32>
    %143 = vector.shape_cast %140 : vector<1x128xf32> to vector<1x1x128xf32>
    tpu.vector_store %arg9[%c0_139, %c0_140, %c0_141], %143 {strides = array<i32>} : memref<1x2x128xf32, #tpu.memory_space<vmem>>, vector<1x1x128xf32>,
    %144 = arith.mulf %134, %134 : vector<64x128xf32>
    %cst_142 = arith.constant dense<0.000000e+00> : vector<128xf32>
    %145 = vector.multi_reduction <add>, %144, %cst_142 [0] : vector<64x128xf32> to vector<128xf32>
    %146 = vector.shape_cast %145 : vector<128xf32> to vector<1x128xf32>
    %c0_143 = arith.constant 0 : index
    %c1_144 = arith.constant 1 : index
    %c0_145 = arith.constant 0 : index
    %147 = vector.load %arg9[%c0_143, %c1_144, %c0_145] : memref<1x2x128xf32, #tpu.memory_space<vmem>>, vector<1x1x128xf32>
    %148 = vector.shape_cast %147 : vector<1x1x128xf32> to vector<1x128xf32>
    %149 = vector.shape_cast %146 : vector<1x128xf32> to vector<1x1x128xf32>
    tpu.vector_store %arg9[%c0_143, %c1_144, %c0_145], %149 {strides = array<i32>} : memref<1x2x128xf32, #tpu.memory_space<vmem>>, vector<1x1x128xf32>,
    %c0_146 = arith.constant 0 : index
    %c0_147 = arith.constant 0 : index
    %c0_148 = arith.constant 0 : index
    %c0_149 = arith.constant 0 : index
    %150 = vector.load %arg2[%c0_146, %c0_147, %c0_148, %c0_149] : memref<1x8x8x128xf32, #tpu.memory_space<vmem>>, vector<1x8x8x128xf32>
    %151 = vector.shape_cast %150 : vector<1x8x8x128xf32> to vector<8x8x128xf32>
    %152 = vector.shape_cast %151 : vector<8x8x128xf32> to vector<64x128xf32>
    %153 = arith.truncf %152 : vector<64x128xf32> to vector<64x128xbf16>
    %c0_150 = arith.constant 0 : index
    %c0_151 = arith.constant 0 : index
    %154 = vector.load %arg6[%c0_150, %c0_151] : memref<128x128xbf16, #tpu.memory_space<vmem>>, vector<128x128xbf16>
    %cst_152 = arith.constant dense<0.000000e+00> : vector<64x128xf32>
    %155 = tpu.matmul %153, %154, %cst_152 {dimension_numbers = #tpu.dot_dimension_numbers<[1], [0], [0], [1], [0, 0, 1, 1], [], []>} : vector<64x128xbf16>, vector<128x128xbf16>, vector<64x128xf32> -> vector<64x128xf32>
    %156 = vector.shape_cast %155 : vector<64x128xf32> to vector<8x8x128xf32>
    %c0_153 = arith.constant 0 : index
    %c0_154 = arith.constant 0 : index
    %c0_155 = arith.constant 0 : index
    %c0_156 = arith.constant 0 : index
    %157 = vector.load %arg8[%c0_153, %c0_154, %c0_155, %c0_156] : memref<1x8x8x128xf32, #tpu.memory_space<vmem>>, vector<1x8x8x128xf32>
    %158 = vector.shape_cast %157 : vector<1x8x8x128xf32> to vector<8x8x128xf32>
    %159 = vector.shape_cast %156 : vector<8x8x128xf32> to vector<1x8x8x128xf32>
    tpu.vector_store %arg8[%c0_153, %c0_154, %c0_155, %c0_156], %159 {strides = array<i32>} : memref<1x8x8x128xf32, #tpu.memory_space<vmem>>, vector<1x8x8x128xf32>,
    %cst_157 = arith.constant dense<0.000000e+00> : vector<128xf32>
    %160 = vector.multi_reduction <add>, %155, %cst_157 [0] : vector<64x128xf32> to vector<128xf32>
    %161 = vector.shape_cast %160 : vector<128xf32> to vector<1x128xf32>
    %c0_158 = arith.constant 0 : index
    %c0_159 = arith.constant 0 : index
    %c0_160 = arith.constant 0 : index
    %162 = vector.load %arg10[%c0_158, %c0_159, %c0_160] : memref<1x2x128xf32, #tpu.memory_space<vmem>>, vector<1x1x128xf32>
    %163 = vector.shape_cast %162 : vector<1x1x128xf32> to vector<1x128xf32>
    %164 = vector.shape_cast %161 : vector<1x128xf32> to vector<1x1x128xf32>
    tpu.vector_store %arg10[%c0_158, %c0_159, %c0_160], %164 {strides = array<i32>} : memref<1x2x128xf32, #tpu.memory_space<vmem>>, vector<1x1x128xf32>,
    %165 = arith.mulf %155, %155 : vector<64x128xf32>
    %cst_161 = arith.constant dense<0.000000e+00> : vector<128xf32>
    %166 = vector.multi_reduction <add>, %165, %cst_161 [0] : vector<64x128xf32> to vector<128xf32>
    %167 = vector.shape_cast %166 : vector<128xf32> to vector<1x128xf32>
    %c0_162 = arith.constant 0 : index
    %c1_163 = arith.constant 1 : index
    %c0_164 = arith.constant 0 : index
    %168 = vector.load %arg10[%c0_162, %c1_163, %c0_164] : memref<1x2x128xf32, #tpu.memory_space<vmem>>, vector<1x1x128xf32>
    %169 = vector.shape_cast %168 : vector<1x1x128xf32> to vector<1x128xf32>
    %170 = vector.shape_cast %167 : vector<1x128xf32> to vector<1x1x128xf32>
    tpu.vector_store %arg10[%c0_162, %c1_163, %c0_164], %170 {strides = array<i32>} : memref<1x2x128xf32, #tpu.memory_space<vmem>>, vector<1x1x128xf32>,
    return
  }
  func.func @transform_0(%arg0: i32) -> (i32, i32, i32, i32, i32, i32) {
    %c0_i32 = arith.constant 0 : i32
    %c0_i32_0 = arith.constant 0 : i32
    %c0_i32_1 = arith.constant 0 : i32
    %c0_i32_2 = arith.constant 0 : i32
    %c0_i32_3 = arith.constant 0 : i32
    %c0_i32_4 = arith.constant 0 : i32
    return %arg0, %c0_i32, %c0_i32_0, %c0_i32_1, %c0_i32_2, %c0_i32_3 : i32, i32, i32, i32, i32, i32
  }
  func.func @transform_1(%arg0: i32) -> (i32, i32, i32, i32) {
    %c0_i32 = arith.constant 0 : i32
    %c0_i32_0 = arith.constant 0 : i32
    %c0_i32_1 = arith.constant 0 : i32
    %c0_i32_2 = arith.constant 0 : i32
    return %arg0, %c0_i32, %c0_i32_0, %c0_i32_1 : i32, i32, i32, i32
  }
  func.func @transform_2(%arg0: i32) -> (i32, i32) {
    %c0_i32 = arith.constant 0 : i32
    %c0_i32_0 = arith.constant 0 : i32
    %c0_i32_1 = arith.constant 0 : i32
    return %c0_i32, %c0_i32_0 : i32, i32
  }
  func.func @transform_3(%arg0: i32) -> (i32, i32) {
    %c0_i32 = arith.constant 0 : i32
    %c0_i32_0 = arith.constant 0 : i32
    %c0_i32_1 = arith.constant 0 : i32
    return %c0_i32, %c0_i32_0 : i32, i32
  }
  func.func @transform_4(%arg0: i32) -> (i32, i32, i32) {
    %c0_i32 = arith.constant 0 : i32
    %c0_i32_0 = arith.constant 0 : i32
    %c0_i32_1 = arith.constant 0 : i32
    %c0_i32_2 = arith.constant 0 : i32
    return %c0_i32, %c0_i32_0, %c0_i32_1 : i32, i32, i32
  }
  func.func @transform_5(%arg0: i32) -> (i32, i32) {
    %c0_i32 = arith.constant 0 : i32
    %c0_i32_0 = arith.constant 0 : i32
    %c0_i32_1 = arith.constant 0 : i32
    return %c0_i32, %c0_i32_0 : i32, i32
  }
  func.func @transform_6(%arg0: i32) -> (i32, i32, i32, i32) {
    %c0_i32 = arith.constant 0 : i32
    %c0_i32_0 = arith.constant 0 : i32
    %c0_i32_1 = arith.constant 0 : i32
    %c0_i32_2 = arith.constant 0 : i32
    return %arg0, %c0_i32, %c0_i32_0, %c0_i32_1 : i32, i32, i32, i32
  }
  func.func @transform_7(%arg0: i32) -> (i32, i32, i32, i32) {
    %c0_i32 = arith.constant 0 : i32
    %c0_i32_0 = arith.constant 0 : i32
    %c0_i32_1 = arith.constant 0 : i32
    %c0_i32_2 = arith.constant 0 : i32
    return %arg0, %c0_i32, %c0_i32_0, %c0_i32_1 : i32, i32, i32, i32
  }
  func.func @transform_8(%arg0: i32) -> (i32, i32, i32) {
    %c0_i32 = arith.constant 0 : i32
    %c0_i32_0 = arith.constant 0 : i32
    %c0_i32_1 = arith.constant 0 : i32
    return %arg0, %c0_i32, %c0_i32_0 : i32, i32, i32
  }
  func.func @transform_9(%arg0: i32) -> (i32, i32, i32) {
    %c0_i32 = arith.constant 0 : i32
    %c0_i32_0 = arith.constant 0 : i32
    %c0_i32_1 = arith.constant 0 : i32
    return %arg0, %c0_i32, %c0_i32_0 : i32, i32, i32
  }
}

module attributes {stable_mosaic.version = 11 : i64} {
  func.func @_merge_kernel(%arg0: i32, %arg1: memref<1x8x8x128xf32, #tpu.memory_space<vmem>>, %arg2: memref<1x8x8x128xf32, #tpu.memory_space<vmem>>, %arg3: memref<1x128xf32, #tpu.memory_space<vmem>>, %arg4: memref<1x128xf32, #tpu.memory_space<vmem>>, %arg5: memref<1x128xf32, #tpu.memory_space<vmem>>, %arg6: memref<1x128xf32, #tpu.memory_space<vmem>>, %arg7: memref<1x8x8x128xf32, #tpu.memory_space<vmem>>) attributes {dimension_semantics = [#tpu.dimension_semantics<parallel>], iteration_bounds = array<i64: 2>, scalar_prefetch = 0 : i64, scratch_operands = 0 : i64, tpu.core_type = #tpu.core_type<tc>, window_params = [{transform_indices = @transform_0, window_bounds = array<i64: 1, 8, 8, 128>}, {transform_indices = @transform_1, window_bounds = array<i64: 1, 8, 8, 128>}, {pipeline_mode = #tpu.pipeline_mode<synchronous>, transform_indices = @transform_2, window_bounds = array<i64: 1, 128>}, {pipeline_mode = #tpu.pipeline_mode<synchronous>, transform_indices = @transform_3, window_bounds = array<i64: 1, 128>}, {pipeline_mode = #tpu.pipeline_mode<synchronous>, transform_indices = @transform_4, window_bounds = array<i64: 1, 128>}, {pipeline_mode = #tpu.pipeline_mode<synchronous>, transform_indices = @transform_5, window_bounds = array<i64: 1, 128>}, {transform_indices = @transform_6, window_bounds = array<i64: 1, 8, 8, 128>}]} {
    %c0 = arith.constant 0 : index
    %c0_0 = arith.constant 0 : index
    %c0_1 = arith.constant 0 : index
    %c0_2 = arith.constant 0 : index
    %0 = vector.load %arg1[%c0, %c0_0, %c0_1, %c0_2] : memref<1x8x8x128xf32, #tpu.memory_space<vmem>>, vector<1x8x8x128xf32>
    %1 = vector.shape_cast %0 : vector<1x8x8x128xf32> to vector<8x8x128xf32>
    %c0_3 = arith.constant 0 : index
    %c0_4 = arith.constant 0 : index
    %2 = vector.load %arg3[%c0_3, %c0_4] : memref<1x128xf32, #tpu.memory_space<vmem>>, vector<1x128xf32>
    %3 = vector.shape_cast %2 : vector<1x128xf32> to vector<1x1x128xf32>
    %4 = vector.broadcast %3 : vector<1x1x128xf32> to vector<8x8x128xf32>
    %5 = arith.mulf %1, %4 : vector<8x8x128xf32>
    %c0_5 = arith.constant 0 : index
    %c0_6 = arith.constant 0 : index
    %6 = vector.load %arg4[%c0_5, %c0_6] : memref<1x128xf32, #tpu.memory_space<vmem>>, vector<1x128xf32>
    %7 = vector.shape_cast %6 : vector<1x128xf32> to vector<1x1x128xf32>
    %8 = vector.broadcast %7 : vector<1x1x128xf32> to vector<8x8x128xf32>
    %9 = arith.addf %5, %8 : vector<8x8x128xf32>
    %c0_7 = arith.constant 0 : index
    %c0_8 = arith.constant 0 : index
    %c0_9 = arith.constant 0 : index
    %c0_10 = arith.constant 0 : index
    %10 = vector.load %arg2[%c0_7, %c0_8, %c0_9, %c0_10] : memref<1x8x8x128xf32, #tpu.memory_space<vmem>>, vector<1x8x8x128xf32>
    %11 = vector.shape_cast %10 : vector<1x8x8x128xf32> to vector<8x8x128xf32>
    %c0_11 = arith.constant 0 : index
    %c0_12 = arith.constant 0 : index
    %12 = vector.load %arg5[%c0_11, %c0_12] : memref<1x128xf32, #tpu.memory_space<vmem>>, vector<1x128xf32>
    %13 = vector.shape_cast %12 : vector<1x128xf32> to vector<1x1x128xf32>
    %14 = vector.broadcast %13 : vector<1x1x128xf32> to vector<8x8x128xf32>
    %15 = arith.mulf %11, %14 : vector<8x8x128xf32>
    %c0_13 = arith.constant 0 : index
    %c0_14 = arith.constant 0 : index
    %16 = vector.load %arg6[%c0_13, %c0_14] : memref<1x128xf32, #tpu.memory_space<vmem>>, vector<1x128xf32>
    %17 = vector.shape_cast %16 : vector<1x128xf32> to vector<1x1x128xf32>
    %18 = vector.broadcast %17 : vector<1x1x128xf32> to vector<8x8x128xf32>
    %19 = arith.addf %15, %18 : vector<8x8x128xf32>
    %20 = arith.addf %9, %19 : vector<8x8x128xf32>
    %c0_15 = arith.constant 0 : index
    %c0_16 = arith.constant 0 : index
    %c0_17 = arith.constant 0 : index
    %c0_18 = arith.constant 0 : index
    %21 = vector.load %arg7[%c0_15, %c0_16, %c0_17, %c0_18] : memref<1x8x8x128xf32, #tpu.memory_space<vmem>>, vector<1x8x8x128xf32>
    %22 = vector.shape_cast %21 : vector<1x8x8x128xf32> to vector<8x8x128xf32>
    %23 = vector.shape_cast %20 : vector<8x8x128xf32> to vector<1x8x8x128xf32>
    tpu.vector_store %arg7[%c0_15, %c0_16, %c0_17, %c0_18], %23 {strides = array<i32>} : memref<1x8x8x128xf32, #tpu.memory_space<vmem>>, vector<1x8x8x128xf32>,
    return
  }
  func.func @transform_0(%arg0: i32) -> (i32, i32, i32, i32) {
    %c0_i32 = arith.constant 0 : i32
    %c0_i32_0 = arith.constant 0 : i32
    %c0_i32_1 = arith.constant 0 : i32
    %c0_i32_2 = arith.constant 0 : i32
    return %arg0, %c0_i32, %c0_i32_0, %c0_i32_1 : i32, i32, i32, i32
  }
  func.func @transform_1(%arg0: i32) -> (i32, i32, i32, i32) {
    %c0_i32 = arith.constant 0 : i32
    %c0_i32_0 = arith.constant 0 : i32
    %c0_i32_1 = arith.constant 0 : i32
    %c0_i32_2 = arith.constant 0 : i32
    return %arg0, %c0_i32, %c0_i32_0, %c0_i32_1 : i32, i32, i32, i32
  }
  func.func @transform_2(%arg0: i32) -> (i32, i32) {
    %c0_i32 = arith.constant 0 : i32
    %c0_i32_0 = arith.constant 0 : i32
    %c0_i32_1 = arith.constant 0 : i32
    return %c0_i32, %c0_i32_0 : i32, i32
  }
  func.func @transform_3(%arg0: i32) -> (i32, i32) {
    %c0_i32 = arith.constant 0 : i32
    %c0_i32_0 = arith.constant 0 : i32
    %c0_i32_1 = arith.constant 0 : i32
    return %c0_i32, %c0_i32_0 : i32, i32
  }
  func.func @transform_4(%arg0: i32) -> (i32, i32) {
    %c0_i32 = arith.constant 0 : i32
    %c0_i32_0 = arith.constant 0 : i32
    %c0_i32_1 = arith.constant 0 : i32
    return %c0_i32, %c0_i32_0 : i32, i32
  }
  func.func @transform_5(%arg0: i32) -> (i32, i32) {
    %c0_i32 = arith.constant 0 : i32
    %c0_i32_0 = arith.constant 0 : i32
    %c0_i32_1 = arith.constant 0 : i32
    return %c0_i32, %c0_i32_0 : i32, i32
  }
  func.func @transform_6(%arg0: i32) -> (i32, i32, i32, i32) {
    %c0_i32 = arith.constant 0 : i32
    %c0_i32_0 = arith.constant 0 : i32
    %c0_i32_1 = arith.constant 0 : i32
    %c0_i32_2 = arith.constant 0 : i32
    return %arg0, %c0_i32, %c0_i32_0, %c0_i32_1 : i32, i32, i32, i32
  }
}

</mosaic_0001>

<bundles_post_ra>
// kernel: res_block_discriminator.7
= control target key start
LH: loop header
LB: loop body
LE: loop exit
PB: predicated region body
PF: predicated region fallthrough
CT: control target
= control target key end

     0   :  { %s502_s21 = smov 0   ;;  %s564_s0 = inlined_call_operand.vmem [shape: f32[2,8,8,128], index: 0, kind: input, shape index: {}]   ;;  %s565_s1 = inlined_call_operand.vmem [shape: f32[2,8,8,128], index: 1, kind: input, shape index: {}]   ;;  %s566_s2 = inlined_call_operand.vmem [shape: f32[1,128], index: 2, kind: input, shape index: {}]   ;;  %s567_s3 = inlined_call_operand.vmem [shape: f32[1,128], index: 3, kind: input, shape index: {}]   ;;  %s568_s4 = inlined_call_operand.vmem [shape: f32[1,128], index: 4, kind: input, shape index: {}]   ;;  %s569_s5 = inlined_call_operand.vmem [shape: f32[1,128], index: 5, kind: input, shape index: {}]   ;;  %s570_s6 = inlined_call_operand.vmem [shape: f32[2,8,8,128], index: 6, kind: output, shape index: {}]  }
   0x1 LB: > { %s431_s22 = sadd.s32 4294967295, %s465_s21   ;;  %p435_p0 = scmp.ge.s32.totalorder %s465_s21, 1  ;;  %s465_s21 = sphi %s502_s21, %s16_s21  }
   0x2   : > { %p222_p1 = scmp.lt.s32.totalorder %s465_s21, 3 }
   0x4   : > { %p223_p2 = pnand %p435_p0, %p222_p1 }
   0x5   : > { %p257_p3 = scmp.lt.s32.totalorder (!%p223_p2), %s431_s22, 1 }
   0x6   : > { %226 = sbr.rel (%p223_p2) target bundleno = 31 (0x1f), region = 44 }
   0xb   : > { %s572_s22 = smov (!%p257_p3, %s431_s22), 1  ;;  %v442_v0 = vld [vmem:[%s566_s2] ss:$0 sm:$0xff] }
   0xc   : > { %s448_s23 = sshll.u32 %s572_s22, 6  ;;  %v444_v1 = vld [vmem:[%s568_s4] ss:$0 sm:$0xff] }
   0xd   : > { %s519_s30 = scalar_lea.vmem %s564_s0, %s448_s23  ;;  %s524_s9 = scalar_lea.vmem %s565_s1, %s448_s23  ;;  %v443_v2 = vld [vmem:[%s567_s3] ss:$0 sm:$0xff] }
   0xe   : > { %v445_v3 = vld [vmem:[%s569_s5] ss:$0 sm:$0xff]  ;;  %v273_v6 = vld [vmem:[%s519_s30 + $0x8] sm:$0xff]  ;;  %v274_v11 = vld [vmem:[%s519_s30 + $0x10] sm:$0xff]  ;;  %s546_s16 = scalar_lea.vmem %s570_s6, %s448_s23 }
   0xf   : > { %v272_v4 = vld [vmem:[%s519_s30] sm:$0xff]  ;;  %v288_v9 = vmul.f32 %v442_v0, %v273_v6  ;;  %v311_v10 = vld [vmem:[%s524_s9 + $0x8] sm:$0xff]  ;;  %v312_v12 = vld [vmem:[%s524_s9 + $0x10] sm:$0xff]  ;;  %v289_v14 = vmul.f32 %v442_v0, %v274_v11 }
  0x10   : > { %v310_v5 = vld [vmem:[%s524_s9] sm:$0xff]  ;;  %v287_v7 = vmul.f32 %v442_v0, %v272_v4  ;;  %v326_v13 = vmul.f32 %v444_v1, %v311_v10  ;;  %v327_v15 = vmul.f32 %v444_v1, %v312_v12  ;;  %v275_v16 = vld [vmem:[%s519_s30 + $0x18] sm:$0xff]  ;;  %v277_v24 = vld [vmem:[%s519_s30 + $0x28] sm:$0xff] }
  0x11   : > { %v325_v8 = vmul.f32 %v444_v1, %v310_v5  ;;  %v313_v17 = vld [vmem:[%s524_s9 + $0x18] sm:$0xff]  ;;  %v276_v18 = vld [vmem:[%s519_s30 + $0x20] sm:$0xff]  ;;  %v303_v21 = vadd.f32 %v443_v2, %v288_v9  ;;  %v290_v22 = vmul.f32 %v442_v0, %v275_v16  ;;  %v304_v26 = vadd.f32 %v443_v2, %v289_v14  ;;  %v315_v29 = vld [vmem:[%s524_s9 + $0x28] sm:$0xff] }
  0x12   : > { %v302_v19 = vadd.f32 %v443_v2, %v287_v7  ;;  %v314_v23 = vld [vmem:[%s524_s9 + $0x20] sm:$0xff]  ;;  %v341_v25 = vadd.f32 %v445_v3, %v326_v13  ;;  %v342_v27 = vadd.f32 %v445_v3, %v327_v15  ;;  %v328_v28 = vmul.f32 %v444_v1, %v313_v17  ;;  %v278_v30 = vld [vmem:[%s519_s30 + $0x30] sm:$0xff]  ;;  %v279_v36 = vld [vmem:[%s519_s30 + $0x38] sm:$0xff] }
  0x13   : > { %v340_v20 = vadd.f32 %v445_v3, %v325_v8  ;;  %v305_v32 = vadd.f32 %v443_v2, %v290_v22  ;;  %v291_v33 = vmul.f32 %v442_v0, %v276_v18  ;;  %v329_v34 = vmul.f32 %v444_v1, %v314_v23  ;;  %v316_v35 = vld [vmem:[%s524_s9 + $0x30] sm:$0xff]  ;;  %v317_v41 = vld [vmem:[%s524_s9 + $0x38] sm:$0xff] }
  0x14   : > { %v349_v37 = vadd.f32 %v341_v25, %v303_v21  ;;  %v350_v38 = vadd.f32 %v342_v27, %v304_v26  ;;  %v343_v39 = vadd.f32 %v445_v3, %v328_v28  ;;  %v292_v40 = vmul.f32 %v442_v0, %v277_v24 }
  0x15   : > { %v348_v31 = vadd.f32 %v340_v20, %v302_v19  ;;  %v306_v42 = vadd.f32 %v443_v2, %v291_v33  ;;  %v344_v43 = vadd.f32 %v445_v3, %v329_v34  ;;  %v330_v44 = vmul.f32 %v444_v1, %v315_v29 }
  0x16   : > { %v293_v45 = vmul.f32 %v442_v0, %v278_v30  ;;  %357 = vst [vmem:[%s546_s16 + $0x8] sm:$0xff] %v349_v37  ;;  %358 = vst [vmem:[%s546_s16 + $0x10] sm:$0xff] %v350_v38  ;;  %v351_v46 = vadd.f32 %v343_v39, %v305_v32  ;;  %v307_v47 = vadd.f32 %v443_v2, %v292_v40 }
  0x17   : > { %356 = vst [vmem:[%s546_s16] sm:$0xff] %v348_v31  ;;  %v331_v48 = vmul.f32 %v444_v1, %v316_v35  ;;  %v294_v49 = vmul.f32 %v442_v0, %v279_v36  ;;  %v352_v50 = vadd.f32 %v344_v43, %v306_v42  ;;  %v345_v51 = vadd.f32 %v445_v3, %v330_v44 }
  0x18   : > { %v308_v52 = vadd.f32 %v443_v2, %v293_v45  ;;  %v332_v53 = vmul.f32 %v444_v1, %v317_v41  ;;  %359 = vst [vmem:[%s546_s16 + $0x18] sm:$0xff] %v351_v46 }
  0x19   : > { %v346_v54 = vadd.f32 %v445_v3, %v331_v48  ;;  %v309_v55 = vadd.f32 %v443_v2, %v294_v49  ;;  %360 = vst [vmem:[%s546_s16 + $0x20] sm:$0xff] %v352_v50  ;;  %v353_v56 = vadd.f32 %v345_v51, %v307_v47 }
  0x1a   : > { %v347_v57 = vadd.f32 %v445_v3, %v332_v53 }
  0x1b   : > { %v354_v58 = vadd.f32 %v346_v54, %v308_v52  ;;  %361 = vst [vmem:[%s546_s16 + $0x28] sm:$0xff] %v353_v56 }
  0x1c   : > { %v355_v59 = vadd.f32 %v347_v57, %v309_v55 }
  0x1d   : > { %362 = vst [vmem:[%s546_s16 + $0x30] sm:$0xff] %v354_v58 }
  0x1e   : > { %363 = vst [vmem:[%s546_s16 + $0x38] sm:$0xff] %v355_v59 }
  0x1f PF: > { %s16_s21 = sadd.s32 1, %s465_s21  }
  0x20   : > { %p13_p4 = scmp.ge.s32.totalorder %s16_s21, 4  }
  0x22   :  { %15 = sbr.rel (!%p13_p4) target bundleno = 1 (0x1), region = 77 }

// kernel: res_block_discriminator.6
= control target key start
LH: loop header
LB: loop body
LE: loop exit
PB: predicated region body
PF: predicated region fallthrough
CT: control target
= control target key end

     0   :  { %s3194_s30 = smov 0   ;;  %s3815_s0 = inlined_call_operand.vmem [shape: f32[2,2,2,8,8,128], index: 0, kind: input, shape index: {}]   ;;  %s3816_s1 = inlined_call_operand.vmem [shape: f32[2,8,8,128], index: 1, kind: input, shape index: {}]   ;;  %s3817_s2 = inlined_call_operand.vmem [shape: f32[1,128], index: 2, kind: input, shape index: {}]   ;;  %s3818_s3 = inlined_call_operand.vmem [shape: f32[1,128], index: 3, kind: input, shape index: {}]   ;;  %s3819_s4 = inlined_call_operand.vmem [shape: bf16[9,128,128], index: 4, kind: input, shape index: {}]   ;;  %s3820_s5 = inlined_call_operand.vmem [shape: bf16[128,128], index: 5, kind: input, shape index: {}]   ;;  %s3821_s6 = inlined_call_operand.vmem [shape: f32[2,8,8,128], index: 6, kind: output, shape index: {0}]   ;;  %s3822_s7 = inlined_call_operand.vmem [shape: f32[2,8,8,128], index: 7, kind: output, shape index: {1}]   ;;  %s3823_s8 = inlined_call_operand.vmem [shape: f32[2,2,128], index: 8, kind: output, shape index: {2}]   ;;  %s3824_s9 = inlined_call_operand.vmem [shape: f32[2,2,128], index: 9, kind: output, shape index: {3}]  }
   0x1 LB: > { %s2430_s10 = sadd.s32 4294967295, %s3141_s30   ;;  %p2434_p0 = scmp.ge.s32.totalorder %s3141_s30, 1  ;;  %s3141_s30 = sphi %s3194_s30, %s20_s30  }
   0x2   : > { %p304_p1 = scmp.lt.s32.totalorder %s3141_s30, 3 }
   0x4   : > { %p305_p2 = pnand %p2434_p0, %p304_p1 }
   0x6   : > { %308 = sbr.rel (%p305_p2) target bundleno = 403 (0x193), region = 44 }
   0xb   : > { %v3054_v0 = vld [vmem:[%s3819_s4 + $0x78] sm:$0xff]   ;;  %v3056_v2 = vld [vmem:[%s3819_s4 + $0x70] sm:$0xff]   ;;  %v3143_v3 = vmov 0.0   ;;  %p358_p3 = scmp.lt.s32.totalorder %s2430_s10, 1  ;;  %v3058_v5 = vld [vmem:[%s3819_s4 + $0x68] sm:$0xff]  }
   0xc   : > { %v3055_v1 = vld [vmem:[%s3819_s4 + $0x38] sm:$0xff]   ;;  %2805 = vmatprep.subr.bf16.mxu0 %v3054_v0  ;;  %425 = vst [vmem:[#allocation2 + $0x120] sm:$0xff] %v3143_v3  ;;  %426 = vst [vmem:[#allocation2 + $0x128] sm:$0x1] %v3143_v3  ;;  %v3057_v4 = vld [vmem:[%s3819_s4 + $0x30] sm:$0xff]  }
   0xd   : > { %427 = vst [vmem:[#allocation2 + $0x130] sm:$0xff] %v3143_v3  ;;  %428 = vst [vmem:[#allocation2 + $0x138] sm:$0x1] %v3143_v3  ;;  %2829 = vmatprep.subr.bf16.mxu1 %v3055_v1  ;;  %2806 = vmatpush3.bf16.msra.mxu0 %v3054_v0  ;;  %v3059_v6 = vld [vmem:[%s3819_s4 + $0x28] sm:$0xff]   ;;  %s3844_s10 = smov (!%p358_p3, %s2430_s10), 1  ;;  %v3060_v7 = vld [vmem:[%s3819_s4 + $0x60] sm:$0xff]  }
   0xe   : > { %409 = vst [vmem:[#allocation2 + $0xa0] sm:$0xff] %v3143_v3  ;;  %411 = vst [vmem:[#allocation2 + $0xb0] sm:$0xff] %v3143_v3  ;;  %2830 = vmatpush3.bf16.msra.mxu1 %v3055_v1  ;;  %2807 = vmatprep.subr.bf16.mxu0 %v3056_v2  ;;  %v3061_v8 = vld [vmem:[%s3819_s4 + $0x20] sm:$0xff]   ;;  %s2681_s27 = sshll.u32 %s3844_s10, 8  ;;  %v3062_v9 = vld [vmem:[%s3819_s4 + $0x58] sm:$0xff]   ;;  %s3676_s11 = sshll.u32 %s3844_s10, 6 }
   0xf   : > { %413 = vst [vmem:[#allocation2 + $0xc0] sm:$0xff] %v3143_v3  ;;  %415 = vst [vmem:[#allocation2 + $0xd0] sm:$0xff] %v3143_v3  ;;  %2831 = vmatprep.subr.bf16.mxu1 %v3057_v4  ;;  %v3063_v10 = vld [vmem:[%s3819_s4 + $0x18] sm:$0xff]   ;;  %s3275_s15 = scalar_lea.vmem %s3815_s0, %s2681_s27  ;;  %v3064_v11 = vld [vmem:[%s3819_s4 + $0x50] sm:$0xff]   ;;  %s3686_s14 = scalar_lea.vmem %s3816_s1, %s3676_s11 }
  0x10   : > { %417 = vst [vmem:[#allocation2 + $0xe0] sm:$0xff] %v3143_v3  ;;  %419 = vst [vmem:[#allocation2 + $0xf0] sm:$0xff] %v3143_v3  ;;  %v3065_v12 = vld [vmem:[%s3819_s4 + $0x10] sm:$0xff]   ;;  %v3286_v13 = vld [vmem:[%s3817_s2] ss:$0 sm:$0xff]  ;;  %s3775_s21 = scalar_lea.vmem %s3821_s6, %s3676_s11  ;;  %s3783_s24 = scalar_lea.vmem %s3822_s7, %s3676_s11 }
  0x11   : > { %421 = vst [vmem:[#allocation2 + $0x100] sm:$0xff] %v3143_v3  ;;  %423 = vst [vmem:[#allocation2 + $0x110] sm:$0xff] %v3143_v3  ;;  %2808 = vmatpush3.bf16.msra.mxu0 %v3056_v2  ;;  %v2455_v14 = vld [vmem:[%s3275_s15 + $0x80] sm:$0xff]  ;;  %v2456_v18 = vld [vmem:[%s3275_s15 + $0x88] sm:$0xff]  ;;  %s2443_s11 = sshll.u32 %s3844_s10, 1 }
  0x12   : > { %429 = vst [vmem:[#allocation2 + $0x140] sm:$0xff] %v3143_v3  ;;  %430 = vst [vmem:[#allocation2 + $0x148] sm:$0x1] %v3143_v3  ;;  %2832 = vmatpush3.bf16.msra.mxu1 %v3057_v4  ;;  %2809 = vmatprep.subr.bf16.mxu0 %v3058_v5  ;;  %v3292_v15 = vld [vmem:[%s3818_s3] ss:$0 sm:$0xff]  ;;  %v597_v16 = vmul.f32 %v2455_v14, %v3286_v13  ;;  %v2457_v20 = vld [vmem:[%s3275_s15 + $0x90] sm:$0xff]  ;;  %v598_v21 = vmul.f32 %v2456_v18, %v3286_v13  ;;  %s381_s27 = scalar_lea.vmem %s3823_s8, %s2443_s11  ;;  %s385_s12 = scalar_lea.vmem %s3824_s9, %s2443_s11 }
  0x13   : > { %431 = vst [vmem:[#allocation2 + $0x150] sm:$0xff] %v3143_v3  ;;  %432 = vst [vmem:[#allocation2 + $0x158] sm:$0x1] %v3143_v3  ;;  %2833 = vmatprep.subr.bf16.mxu1 %v3059_v6  ;;  %v2463_v17 = vld [vmem:[%s3275_s15 + $0xc0] sm:$0xff]  ;;  %v2464_v22 = vld [vmem:[%s3275_s15 + $0xc8] sm:$0xff]  ;;  %v599_v26 = vmul.f32 %v2457_v20, %v3286_v13 }
  0x14   : > { %443 = vst [vmem:[#allocation2 + $0x1b0] sm:$0xff] %v3143_v3  ;;  %444 = vst [vmem:[#allocation2 + $0x1b8] sm:$0x1] %v3143_v3  ;;  %v655_v19 = vmul.f32 %v2463_v17, %v3286_v13  ;;  %v2465_v23 = vld [vmem:[%s3275_s15 + $0xd0] sm:$0xff]  ;;  %v3066_v24 = vld [vmem:[%s3819_s4 + $0x48] sm:$0xff]   ;;  %v605_v25 = vadd.f32 %v3292_v15, %v597_v16  ;;  %v656_v27 = vmul.f32 %v2464_v22, %v3286_v13 }
  0x15   : > { %445 = vst [vmem:[#allocation2 + $0x1c0] sm:$0xff] %v3143_v3  ;;  %446 = vst [vmem:[#allocation2 + $0x1c8] sm:$0x1] %v3143_v3  ;;  %2810 = vmatpush3.bf16.msra.mxu0 %v3058_v5  ;;  %v657_v28 = vmul.f32 %v2465_v23, %v3286_v13  ;;  %v3067_v29 = vld [vmem:[%s3819_s4 + $0x8] sm:$0xff]   ;;  %v606_v31 = vadd.f32 %v3292_v15, %v598_v21  ;;  %v607_v34 = vadd.f32 %v3292_v15, %v599_v26  ;;  %v3068_v41 = vld [vmem:[%s3819_s4 + $0x40] sm:$0xff]  }
  0x16   : > { %447 = vst [vmem:[#allocation2 + $0x1d0] sm:$0xff] %v3143_v3  ;;  %448 = vst [vmem:[#allocation2 + $0x1d8] sm:$0x1] %v3143_v3  ;;  %2834 = vmatpush3.bf16.msra.mxu1 %v3059_v6  ;;  %2811 = vmatprep.subr.bf16.mxu0 %v3060_v7  ;;  %v663_v30 = vadd.f32 %v3292_v15, %v655_v19  ;;  %vm613_vm0 = vcmp.ge.f32.partialorder %v605_v25, 0.0  ;;  %v621_v32 = vmul.f32 0.2, %v605_v25 }
  0x17   : > { %449 = vst [vmem:[#allocation2 + $0x1e0] sm:$0xff] %v3143_v3  ;;  %450 = vst [vmem:[#allocation2 + $0x1e8] sm:$0x1] %v3143_v3  ;;  %2835 = vmatprep.subr.bf16.mxu1 %v3061_v8  ;;  %v734_v33 = vld [vmem:[#allocation2 + $0x121] sm:$0xff]  ;;  %v664_v35 = vadd.f32 %v3292_v15, %v656_v27  ;;  %vm614_vm2 = vcmp.ge.f32.partialorder %v606_v31, 0.0  ;;  %vm615_vm3 = vcmp.ge.f32.partialorder %v607_v34, 0.0  ;;  %v665_v40 = vadd.f32 %v3292_v15, %v657_v28 }
  0x18   : > { %451 = vst [vmem:[#allocation2 + $0x1f0] sm:$0xff] %v3143_v3  ;;  %452 = vst [vmem:[#allocation2 + $0x1f8] sm:$0x1] %v3143_v3  ;;  %vm671_vm1 = vcmp.ge.f32.partialorder %v663_v30, 0.0  ;;  %v679_v36 = vmul.f32 0.2, %v663_v30  ;;  %v629_v38 = vsel %vm613_vm0, %v605_v25, %v621_v32 }
  0x19   : > { %453 = vst [vmem:[#allocation2 + $0x200] sm:$0xff] %v3143_v3  ;;  %454 = vst [vmem:[#allocation2 + $0x208] sm:$0x1] %v3143_v3  ;;  %2812 = vmatpush3.bf16.msra.mxu0 %v3060_v7  ;;  %v622_v37 = vmul.f32 0.2, %v606_v31  ;;  %v742_v42 = vpack.c.bf16 %v629_v38, %v734_v33  ;;  %vm672_vm4 = vcmp.ge.f32.partialorder %v664_v35, 0.0 }
  0x1a   : > { %455 = vst [vmem:[#allocation2 + $0x210] sm:$0xff] %v3143_v3  ;;  %456 = vst [vmem:[#allocation2 + $0x218] sm:$0x1] %v3143_v3  ;;  %2836 = vmatpush3.bf16.msra.mxu1 %v3061_v8  ;;  %2813 = vmatprep.subr.bf16.mxu0 %v3062_v9  ;;  %v623_v39 = vmul.f32 0.2, %v607_v34  ;;  %v3320_v43 = vsel %vm671_vm1, %v663_v30, %v679_v36  ;;  %v3069_v45 = vld [vmem:[%s3819_s4] sm:$0xff]  }
  0x1b   : > { %457 = vst [vmem:[#allocation2 + $0x220] sm:$0xff] %v3143_v3  ;;  %458 = vst [vmem:[#allocation2 + $0x228] sm:$0x1] %v3143_v3  ;;  %2837 = vmatprep.subr.bf16.mxu1 %v3063_v10  ;;  %v630_v44 = vsel %vm614_vm2, %v606_v31, %v622_v37  ;;  %vm673_vm5 = vcmp.ge.f32.partialorder %v665_v40, 0.0  ;;  %v680_v47 = vmul.f32 0.2, %v664_v35  ;;  %2821 = vmatprep.mubr.bf16.mxu0 %v742_v42 }
  0x1c   : > { %459 = vst [vmem:[#allocation2 + $0x230] sm:$0xff] %v3143_v3  ;;  %638 = vst [vmem:[#allocation2 + $0x131] sm:$0xff] %v629_v38  ;;  %v631_v46 = vsel %vm615_vm3, %v607_v34, %v623_v39  ;;  %v681_v48 = vmul.f32 0.2, %v665_v40  ;;  %v3070_v51 = vld [vmem:[%s3819_s4 + $0xb8] sm:$0xff]   ;;  %v3072_v54 = vld [vmem:[%s3819_s4 + $0xb0] sm:$0xff]  }
  0x1d   : > { %2814 = vmatpush3.bf16.msra.mxu0 %v3062_v9  ;;  %696 = vst [vmem:[#allocation2 + $0x1c1] sm:$0xff] %v3320_v43  ;;  %639 = vst [vmem:[#allocation2 + $0x141] sm:$0xff] %v630_v44  ;;  %v3326_v49 = vsel %vm672_vm4, %v664_v35, %v680_v47  ;;  %v3071_v52 = vld [vmem:[%s3819_s4 + $0xf8] sm:$0xff]   ;;  %v743_v53 = vpack.c.bf16 %v631_v46, %v630_v44  ;;  %v2459_v56 = vld [vmem:[%s3275_s15 + $0xa0] sm:$0xff] }
  0x1e   : > { %2838 = vmatpush3.bf16.msra.mxu1 %v3063_v10  ;;  %2815 = vmatprep.subr.bf16.mxu0 %v3064_v11  ;;  %640 = vst [vmem:[#allocation2 + $0x151] sm:$0xff] %v631_v46  ;;  %v3328_v50 = vsel %vm673_vm5, %v665_v40, %v681_v48  ;;  %697 = vst [vmem:[#allocation2 + $0x1d1] sm:$0xff] %v3326_v49  ;;  %v2458_v55 = vld [vmem:[%s3275_s15 + $0x98] sm:$0xff]  ;;  %v601_v59 = vmul.f32 %v2459_v56, %v3286_v13  ;;  %v2467_v61 = vld [vmem:[%s3275_s15 + $0xe0] sm:$0xff] }
  0x1f   : > { %2839 = vmatprep.subr.bf16.mxu1 %v3065_v12  ;;  %698 = vst [vmem:[#allocation2 + $0x1e1] sm:$0xff] %v3328_v50  ;;  %v600_v58 = vmul.f32 %v2458_v55, %v3286_v13  ;;  %v2466_v60 = vld [vmem:[%s3275_s15 + $0xd8] sm:$0xff]  ;;  %v659_v0 = vmul.f32 %v2467_v61, %v3286_v13  ;;  %v2460_v1 = vld [vmem:[%s3275_s15 + $0xa8] sm:$0xff]  ;;  %v2461_v2 = vld [vmem:[%s3275_s15 + $0xb0] sm:$0xff] }
  0x20   : > { %v658_v63 = vmul.f32 %v2466_v60, %v3286_v13  ;;  %v2468_v4 = vld [vmem:[%s3275_s15 + $0xe8] sm:$0xff]  ;;  %v3073_v5 = vld [vmem:[%s3819_s4 + $0xf0] sm:$0xff]   ;;  %v609_v7 = vadd.f32 %v3292_v15, %v601_v59  ;;  %v602_v8 = vmul.f32 %v2460_v1, %v3286_v13  ;;  %v603_v9 = vmul.f32 %v2461_v2, %v3286_v13  ;;  %v3076_v30 = vld [vmem:[%s3819_s4 + $0xa0] sm:$0xff]  }
  0x21   : > { %2816 = vmatpush3.bf16.msra.mxu0 %v3064_v11  ;;  %v3074_v6 = vld [vmem:[%s3819_s4 + $0xa8] sm:$0xff]   ;;  %v667_v14 = vadd.f32 %v3292_v15, %v659_v0  ;;  %v2469_v16 = vld [vmem:[%s3275_s15 + $0xf0] sm:$0xff]  ;;  %v660_v17 = vmul.f32 %v2468_v4, %v3286_v13  ;;  %v3077_v37 = vld [vmem:[%s3819_s4 + $0xe0] sm:$0xff]  }
  0x22   : > { %2840 = vmatpush3.bf16.msra.mxu1 %v3065_v12  ;;  %2817 = vmatprep.subr.bf16.mxu0 %v3066_v24  ;;  %v666_v12 = vadd.f32 %v3292_v15, %v658_v63  ;;  %vm617_vm7 = vcmp.ge.f32.partialorder %v609_v7, 0.0  ;;  %v625_v20 = vmul.f32 0.2, %v609_v7  ;;  %v611_v25 = vadd.f32 %v3292_v15, %v603_v9  ;;  %v3078_v38 = vld [vmem:[%s3819_s4 + $0x98] sm:$0xff]   ;;  %v2447_v42 = vld [vmem:[%s3275_s15 + $0x40] sm:$0xff]  ;;  %v2448_v48 = vld [vmem:[%s3275_s15 + $0x48] sm:$0xff] }
  0x23   : > { %2841 = vmatprep.subr.bf16.mxu1 %v3067_v29  ;;  %vm675_vm9 = vcmp.ge.f32.partialorder %v667_v14, 0.0  ;;  %v683_v23 = vmul.f32 0.2, %v667_v14  ;;  %v661_v28 = vmul.f32 %v2469_v16, %v3286_v13  ;;  %v668_v35 = vadd.f32 %v3292_v15, %v660_v17  ;;  %v3079_v59 = vld [vmem:[%s3819_s4 + $0xd8] sm:$0xff]   ;;  %v3080_v1 = vld [vmem:[%s3819_s4 + $0x90] sm:$0xff]   ;;  %v3082_v9 = vld [vmem:[%s3819_s4 + $0x88] sm:$0xff]  }
  0x24   : > { %v706_v57 = vld [vmem:[#allocation2 + $0x1c0] sm:$0xff]  ;;  %vm674_vm8 = vcmp.ge.f32.partialorder %v666_v12, 0.0  ;;  %v682_v21 = vmul.f32 0.2, %v666_v12  ;;  %v3377_v26 = vsel %vm617_vm7, %v609_v7, %v625_v20  ;;  %vm619_vm11 = vcmp.ge.f32.partialorder %v611_v25, 0.0 }
  0x25   : > { %2818 = vmatpush3.bf16.msra.mxu0 %v3066_v24  ;;  %v713_v62 = vpack.c.bf16 %v706_v57, %v3143_v3  ;;  %v608_v3 = vadd.f32 %v3292_v15, %v600_v58  ;;  %v3363_v10 = vld [vmem:[#allocation2 + $0x1d0] sm:$0xff]  ;;  %v610_v24 = vadd.f32 %v3292_v15, %v602_v8  ;;  %v3391_v32 = vsel %vm675_vm9, %v667_v14, %v683_v23  ;;  %v3083_v23 = vld [vmem:[%s3819_s4 + $0xc8] sm:$0xff]  }
  0x26   : > { %2842 = vmatpush3.bf16.msra.mxu1 %v3067_v29  ;;  %2819 = vmatprep.subr.bf16.mxu0 %v3068_v41  ;;  %v3365_v11 = vld [vmem:[#allocation2 + $0x1e0] sm:$0xff]  ;;  %v3379_v27 = vsel %vm674_vm8, %v666_v12, %v682_v21  ;;  %v3075_v29 = vld [vmem:[%s3819_s4 + $0xe8] sm:$0xff]   ;;  %700 = vst [vmem:[#allocation2 + $0x201] sm:$0xff] %v3391_v32  ;;  %v627_v34 = vmul.f32 0.2, %v611_v25  ;;  %v669_v36 = vadd.f32 %v3292_v15, %v661_v28  ;;  %vm676_vm12 = vcmp.ge.f32.partialorder %v668_v35, 0.0 }
  0x27   : > { %2843 = vmatprep.subr.bf16.mxu1 %v3069_v45  ;;  %2845 = vmatprep.mubr.bf16.mxu1 %v713_v62  ;;  %v714_v18 = vpack.c.bf16 %v3365_v11, %v3363_v10  ;;  %vm616_vm6 = vcmp.ge.f32.partialorder %v608_v3, 0.0  ;;  %v624_v19 = vmul.f32 0.2, %v608_v3  ;;  %699 = vst [vmem:[#allocation2 + $0x1f1] sm:$0xff] %v3379_v27  ;;  %vm618_vm10 = vcmp.ge.f32.partialorder %v610_v24, 0.0  ;;  %v3081_v8 = vld [vmem:[%s3819_s4 + $0xd0] sm:$0xff]  }
  0x28   : > { %v626_v33 = vmul.f32 0.2, %v610_v24  ;;  %v3405_v40 = vsel %vm619_vm11, %v611_v25, %v627_v34  ;;  %vm677_vm13 = vcmp.ge.f32.partialorder %v669_v36, 0.0  ;;  %v685_v46 = vmul.f32 0.2, %v669_v36  ;;  %v3084_v34 = vld [vmem:[%s3819_s4 + $0x80] sm:$0xff]  }
  0x29   : > { %2820 = vmatpush3.bf16.msra.mxu0 %v3068_v41  ;;  %v3373_v22 = vsel %vm616_vm6, %v608_v3, %v624_v19  ;;  %v989_v41 = vld [vmem:[#allocation2 + $0x1b1] sm:$0xff]  ;;  %v2451_v19 = vld [vmem:[%s3275_s15 + $0x60] sm:$0xff] }
  0x2a   : > { %2844 = vmatpush3.bf16.msra.mxu1 %v3069_v45  ;;  %2853 = vmatprep.subr.bf16.mxu0 %v3070_v51  ;;  %v744_v31 = vpack.c.bf16 %v3377_v26, %v3373_v22  ;;  %v3403_v39 = vsel %vm618_vm10, %v610_v24, %v626_v33  ;;  %v684_v45 = vmul.f32 0.2, %v668_v35  ;;  %v997_v47 = vpack.c.bf16 %v3320_v43, %v989_v41  ;;  %v2452_v24 = vld [vmem:[%s3275_s15 + $0x68] sm:$0xff] }
  0x2b   : > { %2877 = vmatprep.subr.bf16.mxu1 %v3071_v52  ;;  %v745_v44 = vpack.c.bf16 %v3405_v40, %v3403_v39  ;;  %v1749_v56 = vpack.c.bf16 %v3403_v39, %v3377_v26  ;;  %v3423_v58 = vsel %vm677_vm13, %v669_v36, %v685_v46  ;;  %v543_v25 = vmul.f32 %v2451_v19, %v3286_v13  ;;  %v463_v19 = vld [vmem:[%s3275_s15 + $0x10] sm:$0xff]  ;;  %v3126_v26 = vld [vmem:[%s3819_s4 + $0x218] sm:$0xff]  }
  0x2c   : > { %2822 = vmatmul.mubr.bf16.vlgmr.msra.gmra.mxu0 %v743_v53  ;;  %v540_v53 = vmul.f32 %v2448_v48, %v3286_v13  ;;  %v3420_v57 = vsel %vm676_vm12, %v668_v35, %v684_v45  ;;  %702 = vst [vmem:[#allocation2 + $0x221] sm:$0xff] %v3423_v58 }
  0x2d   : > { %2854 = vmatpush3.bf16.msra.mxu0 %v3070_v51  ;;  %2846 = vmatmul.mubr.bf16.vlgmr.msra.gmra.mxu1 %v714_v18  ;;  %v2449_v51 = vld [vmem:[%s3275_s15 + $0x50] sm:$0xff]  ;;  %701 = vst [vmem:[#allocation2 + $0x211] sm:$0xff] %v3420_v57  ;;  %v3436_v0 = vld [vmem:[#allocation2 + $0x200] sm:$0xff]  ;;  %v551_v35 = vadd.f32 %v3292_v15, %v543_v25 }
  0x2e   : > { %2855 = vmatprep.subr.bf16.mxu0 %v3072_v54  ;;  %2878 = vmatpush3.bf16.msra.mxu1 %v3071_v52  ;;  %v539_v52 = vmul.f32 %v2447_v42, %v3286_v13  ;;  %v541_v55 = vmul.f32 %v2449_v51, %v3286_v13  ;;  %v3429_v60 = vld [vmem:[#allocation2 + $0x1f0] sm:$0xff]  ;;  %v548_v62 = vadd.f32 %v3292_v15, %v540_v53 }
  0x2f   : > { %2879 = vmatprep.subr.bf16.mxu1 %v3073_v5  ;;  %2825 = vmatprep.mubr.bf16.mxu0 %v744_v31  ;;  %v1598_v4 = vpack.c.bf16 %v3429_v60, %v3365_v11  ;;  %v2454_v31 = vld [vmem:[%s3275_s15 + $0x78] sm:$0xff]  ;;  %vm559_vm2 = vcmp.ge.f32.partialorder %v551_v35, 0.0  ;;  %v567_v41 = vmul.f32 0.2, %v551_v35 }
  0x30   : > { %v547_v61 = vadd.f32 %v3292_v15, %v539_v52  ;;  %v549_v63 = vadd.f32 %v3292_v15, %v541_v55  ;;  %vm556_vm15 = vcmp.ge.f32.partialorder %v548_v62, 0.0  ;;  %v564_v3 = vmul.f32 0.2, %v548_v62 }
  0x31   : > { %2856 = vmatpush3.bf16.msra.mxu0 %v3072_v54  ;;  %v2450_v54 = vld [vmem:[%s3275_s15 + $0x58] sm:$0xff]  ;;  %v3493_v51 = vsel %vm559_vm2, %v551_v35, %v567_v41 }
  0x32   : > { %2857 = vmatprep.subr.bf16.mxu0 %v3074_v6  ;;  %2880 = vmatpush3.bf16.msra.mxu1 %v3073_v5  ;;  %v542_v43 = vmul.f32 %v2450_v54, %v3286_v13  ;;  %v715_v5 = vpack.c.bf16 %v3436_v0, %v3429_v60  ;;  %vm555_vm14 = vcmp.ge.f32.partialorder %v547_v61, 0.0  ;;  %vm557_vm0 = vcmp.ge.f32.partialorder %v549_v63, 0.0  ;;  %v3086_v54 = vld [vmem:[%s3819_s4 + $0x138] sm:$0xff]   ;;  %584 = vst [vmem:[#allocation2 + $0xe1] sm:$0xff] %v3493_v51 }
  0x33   : > { %2881 = vmatprep.subr.bf16.mxu1 %v3075_v29  ;;  %v565_v7 = vmul.f32 0.2, %v549_v63  ;;  %v3454_v16 = vsel %vm556_vm15, %v548_v62, %v564_v3  ;;  %v3466_v21 = vld [vmem:[#allocation2 + $0x220] sm:$0xff]  ;;  %v3087_v62 = vld [vmem:[%s3819_s4 + $0x178] sm:$0xff]   ;;  %v3090_v3 = vld [vmem:[%s3819_s4 + $0x128] sm:$0xff]  }
  0x34   : > { %2826 = vmatmul.mubr.bf16.gmra.mxu0 %v745_v44  ;;  %v550_v2 = vadd.f32 %v3292_v15, %v542_v43  ;;  %2849 = vmatprep.mubr.bf16.mxu1 %v715_v5  ;;  %581 = vst [vmem:[#allocation2 + $0xb1] sm:$0xff] %v3454_v16  ;;  %v3464_v20 = vld [vmem:[#allocation2 + $0x210] sm:$0xff] }
  0x35   : > { %2858 = vmatpush3.bf16.msra.mxu0 %v3074_v6  ;;  %2869 = vmatprep.mubr.bf16.mxu0 %v997_v47  ;;  %v563_v6 = vmul.f32 0.2, %v547_v61  ;;  %v3457_v17 = vsel %vm557_vm0, %v549_v63, %v565_v7  ;;  %v716_v28 = vpack.c.bf16 %v3466_v21, %v3464_v20  ;;  %v1599_v33 = vpack.c.bf16 %v3464_v20, %v3436_v0  ;;  %v3085_v47 = vld [vmem:[%s3819_s4 + $0xc0] sm:$0xff]   ;;  %v1890_v60 = vld [vmem:[#allocation2 + $0x1d1] sm:$0xff]  ;;  %v3123_v0 = vld [vmem:[%s3820_s5 + $0x28] sm:$0xff]  }
  0x36   : > { %2859 = vmatprep.subr.bf16.mxu0 %v3076_v30  ;;  %2882 = vmatpush3.bf16.msra.mxu1 %v3075_v29  ;;  %vm558_vm1 = vcmp.ge.f32.partialorder %v550_v2, 0.0  ;;  %v566_v14 = vmul.f32 0.2, %v550_v2  ;;  %582 = vst [vmem:[#allocation2 + $0xc1] sm:$0xff] %v3457_v17  ;;  %v544_v29 = vmul.f32 %v2452_v24, %v3286_v13  ;;  %v1000_v24 = vpack.c.bf16 %v3423_v58, %v3420_v57  ;;  %v3092_v58 = vld [vmem:[%s3819_s4 + $0x120] sm:$0xff]  }
  0x37   : > { %2883 = vmatprep.subr.bf16.mxu1 %v3077_v37  ;;  %v3452_v12 = vsel %vm555_vm14, %v547_v61, %v563_v6  ;;  %2850 = vmatmul.mubr.bf16.gmra.mxu1 %v716_v28  ;;  %v3089_v6 = vld [vmem:[%s3819_s4 + $0x170] sm:$0xff]  }
  0x38   : > { %580 = vst [vmem:[#allocation2 + $0xa1] sm:$0xff] %v3452_v12  ;;  %v3460_v18 = vsel %vm558_vm1, %v550_v2, %v566_v14 }
  0x39   : > { %2860 = vmatpush3.bf16.msra.mxu0 %v3076_v30  ;;  %583 = vst [vmem:[#allocation2 + $0xd1] sm:$0xff] %v3460_v18  ;;  %v2453_v30 = vld [vmem:[%s3275_s15 + $0x70] sm:$0xff]  ;;  %v1143_v7 = vld [vmem:[#allocation2 + $0xe0] sm:$0xff] }
  0x3a   : > { %2861 = vmatprep.subr.bf16.mxu0 %v3078_v38  ;;  %2884 = vmatpush3.bf16.msra.mxu1 %v3077_v37  ;;  %v545_v36 = vmul.f32 %v2453_v30, %v3286_v13  ;;  %v546_v37 = vmul.f32 %v2454_v31, %v3286_v13  ;;  %v3091_v31 = vld [vmem:[%s3819_s4 + $0x168] sm:$0xff]  }
  0x3b   : > { %2885 = vmatprep.subr.bf16.mxu1 %v3079_v59  ;;  %v1140_v48 = vld [vmem:[#allocation2 + $0xb0] sm:$0xff] }
  0x3c   : > { %v553_v42 = vadd.f32 %v3292_v15, %v545_v36  ;;  %v554_v44 = vadd.f32 %v3292_v15, %v546_v37 }
  0x3d   : > { %2862 = vmatpush3.bf16.msra.mxu0 %v3078_v38  ;;  %v552_v38 = vadd.f32 %v3292_v15, %v544_v29  ;;  %v1141_v61 = vld [vmem:[#allocation2 + $0xc0] sm:$0xff]  ;;  %v477_v29 = vmul.f32 %v3286_v13, %v463_v19  ;;  %v3098_v19 = vld [vmem:[%s3819_s4 + $0x108] sm:$0xff]  }
  0x3e   : > { %2863 = vmatprep.subr.bf16.mxu0 %v3080_v1  ;;  %2886 = vmatpush3.bf16.msra.mxu1 %v3079_v59  ;;  %vm561_vm4 = vcmp.ge.f32.partialorder %v553_v42, 0.0  ;;  %vm562_vm5 = vcmp.ge.f32.partialorder %v554_v44, 0.0  ;;  %v569_v52 = vmul.f32 0.2, %v553_v42  ;;  %v570_v43 = vmul.f32 0.2, %v554_v44 }
  0x3f   : > { %2887 = vmatprep.subr.bf16.mxu1 %v3081_v8  ;;  %v1139_v45 = vld [vmem:[#allocation2 + $0xa0] sm:$0xff]  ;;  %vm560_vm3 = vcmp.ge.f32.partialorder %v552_v38, 0.0  ;;  %v568_v46 = vmul.f32 0.2, %v552_v38  ;;  %v998_v59 = vpack.c.bf16 %v3328_v50, %v3326_v49  ;;  %v3088_v49 = vld [vmem:[%s3819_s4 + $0x130] sm:$0xff]   ;;  %v999_v50 = vpack.c.bf16 %v3391_v32, %v3379_v27 }
  0x40   : > { %v1147_v53 = vpack.c.bf16 %v1140_v48, %v1139_v45  ;;  %v3507_v63 = vsel %vm561_vm4, %v553_v42, %v569_v52  ;;  %v3509_v2 = vsel %vm562_vm5, %v554_v44, %v570_v43  ;;  %v491_v37 = vadd.f32 %v3292_v15, %v477_v29  ;;  %v3094_v52 = vld [vmem:[%s3819_s4 + $0x118] sm:$0xff]  }
  0x41   : > { %2864 = vmatpush3.bf16.msra.mxu0 %v3080_v1  ;;  %v3498_v55 = vsel %vm560_vm3, %v552_v38, %v568_v46  ;;  %v1142_v1 = vld [vmem:[#allocation2 + $0xd0] sm:$0xff]  ;;  %586 = vst [vmem:[#allocation2 + $0x101] sm:$0xff] %v3507_v63  ;;  %587 = vst [vmem:[#allocation2 + $0x111] sm:$0xff] %v3509_v2  ;;  %v3093_v46 = vld [vmem:[%s3819_s4 + $0x160] sm:$0xff]  }
  0x42   : > { %2865 = vmatprep.subr.bf16.mxu0 %v3082_v9  ;;  %2888 = vmatpush3.bf16.msra.mxu1 %v3081_v8  ;;  %585 = vst [vmem:[#allocation2 + $0xf1] sm:$0xff] %v3498_v55  ;;  %v1148_v5 = vpack.c.bf16 %v1142_v1, %v1141_v61  ;;  %v461_v8 = vld [vmem:[%s3275_s15] sm:$0xff]  ;;  %vm499_vm8 = vcmp.ge.f32.partialorder %v491_v37, 0.0  ;;  %v507_v44 = vmul.f32 0.2, %v491_v37  ;;  %v1447_v61 = vpack.c.bf16 %v3454_v16, %v3452_v12  ;;  %v3096_v16 = vld [vmem:[%s3819_s4 + $0x110] sm:$0xff]  }
  0x43   : > { %2889 = vmatprep.subr.bf16.mxu1 %v3083_v23  ;;  %2893 = vmatprep.mubr.bf16.mxu1 %v1147_v53  ;;  %v475_v32 = vmul.f32 %v3286_v13, %v461_v8 }
  0x45   : > { %2866 = vmatpush3.bf16.msra.mxu0 %v3082_v9  ;;  %v462_v9 = vld [vmem:[%s3275_s15 + $0x8] sm:$0xff]  ;;  %v489_v35 = vadd.f32 %v3292_v15, %v475_v32 }
  0x46   : > { %2867 = vmatprep.subr.bf16.mxu0 %v3084_v34  ;;  %2890 = vmatpush3.bf16.msra.mxu1 %v3083_v23  ;;  %v476_v14 = vmul.f32 %v3286_v13, %v462_v9  ;;  %v464_v23 = vld [vmem:[%s3275_s15 + $0x18] sm:$0xff] }
  0x47   : > { %2891 = vmatprep.subr.bf16.mxu1 %v3085_v47  ;;  %v478_v30 = vmul.f32 %v3286_v13, %v464_v23  ;;  %vm497_vm6 = vcmp.ge.f32.partialorder %v489_v35, 0.0  ;;  %v505_v41 = vmul.f32 0.2, %v489_v35 }
  0x48   : > { %v1145_v28 = vld [vmem:[#allocation2 + $0x100] sm:$0xff]  ;;  %v490_v36 = vadd.f32 %v3292_v15, %v476_v14  ;;  %v3097_v14 = vld [vmem:[%s3819_s4 + $0x150] sm:$0xff]  }
  0x49   : > { %2868 = vmatpush3.bf16.msra.mxu0 %v3084_v34  ;;  %v1144_v27 = vld [vmem:[#allocation2 + $0xf0] sm:$0xff]  ;;  %v492_v38 = vadd.f32 %v3292_v15, %v478_v30 }
  0x4a   : > { %2901 = vmatprep.subr.bf16.mxu0 %v3086_v54  ;;  %2892 = vmatpush3.bf16.msra.mxu1 %v3085_v47  ;;  %v1149_v25 = vpack.c.bf16 %v1144_v27, %v1143_v7  ;;  %v1146_v34 = vld [vmem:[#allocation2 + $0x110] sm:$0xff]  ;;  %vm498_vm7 = vcmp.ge.f32.partialorder %v490_v36, 0.0  ;;  %v506_v42 = vmul.f32 0.2, %v490_v36  ;;  %v513_v47 = vsel %vm497_vm6, %v489_v35, %v505_v41  ;;  %v3095_v7 = vld [vmem:[%s3819_s4 + $0x158] sm:$0xff]   ;;  %v3100_v35 = vld [vmem:[%s3819_s4 + $0x100] sm:$0xff]  }
  0x4b   : > { %2925 = vmatprep.subr.bf16.mxu1 %v3087_v62  ;;  %v1150_v57 = vpack.c.bf16 %v1146_v34, %v1145_v28  ;;  %vm500_vm9 = vcmp.ge.f32.partialorder %v492_v38, 0.0  ;;  %v508_v45 = vmul.f32 0.2, %v492_v38  ;;  %v3099_v34 = vld [vmem:[%s3819_s4 + $0x148] sm:$0xff]  }
  0x4c   : > { %2870 = vmatmul.mubr.bf16.vlgmr.msra.gmra.mxu0 %v998_v59  ;;  %v514_v48 = vsel %vm498_vm7, %v490_v36, %v506_v42  ;;  %v465_v59 = vld [vmem:[%s3275_s15 + $0x20] sm:$0xff]  ;;  %v2470_v42 = vld [vmem:[%s3275_s15 + $0xf8] sm:$0xff] }
  0x4d   : > { %2902 = vmatpush3.bf16.msra.mxu0 %v3086_v54  ;;  %2873 = vmatprep.mubr.bf16.mxu0 %v999_v50  ;;  %v1297_v53 = vpack.c.bf16 %v514_v48, %v513_v47  ;;  %v3550_v54 = vsel %vm499_vm8, %v491_v37, %v507_v44  ;;  %v516_v43 = vsel %vm500_vm9, %v492_v38, %v508_v45  ;;  %v468_v50 = vld [vmem:[%s3275_s15 + $0x38] sm:$0xff]  ;;  %v3101_v36 = vld [vmem:[%s3819_s4 + $0x140] sm:$0xff]   ;;  %v3104_v38 = vld [vmem:[%s3819_s4 + $0x1b0] sm:$0xff]  }
  0x4e   : > { %2903 = vmatprep.subr.bf16.mxu0 %v3088_v49  ;;  %2894 = vmatmul.mubr.bf16.vlgmr.msra.gmra.mxu1 %v1148_v5  ;;  %v479_v1 = vmul.f32 %v3286_v13, %v465_v59  ;;  %v3103_v37 = vld [vmem:[%s3819_s4 + $0x1f8] sm:$0xff]   ;;  %v1448_v44 = vpack.c.bf16 %v3460_v18, %v3457_v17  ;;  %v662_v45 = vmul.f32 %v2470_v42, %v3286_v13  ;;  %v3106_v48 = vld [vmem:[%s3819_s4 + $0x1a8] sm:$0xff]  }
  0x4f   : > { %2926 = vmatpush3.bf16.msra.mxu1 %v3087_v62  ;;  %2897 = vmatprep.mubr.bf16.mxu1 %v1149_v25  ;;  %v466_v62 = vld [vmem:[%s3275_s15 + $0x28] sm:$0xff]  ;;  %v2462_v47 = vld [vmem:[%s3275_s15 + $0xb8] sm:$0xff]  ;;  %v1449_v17 = vpack.c.bf16 %v3498_v55, %v3493_v51 }
  0x50   : > { %2927 = vmatprep.subr.bf16.mxu1 %v3089_v6  ;;  %v480_v5 = vmul.f32 %v3286_v13, %v466_v62  ;;  %v493_v12 = vadd.f32 %v3292_v15, %v479_v1  ;;  %v1739_v51 = vld [vmem:[#allocation2 + $0x131] sm:$0xff] }
  0x51   : > { %2904 = vmatpush3.bf16.msra.mxu0 %v3088_v49  ;;  %v467_v49 = vld [vmem:[%s3275_s15 + $0x30] sm:$0xff] }
  0x52   : > { %2905 = vmatprep.subr.bf16.mxu0 %v3090_v3  ;;  %v494_v8 = vadd.f32 %v3292_v15, %v480_v5  ;;  %vm501_vm10 = vcmp.ge.f32.partialorder %v493_v12, 0.0  ;;  %v509_v32 = vmul.f32 0.2, %v493_v12 }
  0x53   : > { %2928 = vmatpush3.bf16.msra.mxu1 %v3089_v6  ;;  %v481_v6 = vmul.f32 %v3286_v13, %v467_v49  ;;  %v1450_v49 = vpack.c.bf16 %v3509_v2, %v3507_v63  ;;  %v3111_v63 = vld [vmem:[%s3819_s4 + $0x1d8] sm:$0xff]   ;;  %v3112_v2 = vld [vmem:[%s3819_s4 + $0x190] sm:$0xff]  }
  0x54   : > { %2874 = vmatmul.mubr.bf16.gmra.mxu0 %v1000_v24  ;;  %2929 = vmatprep.subr.bf16.mxu1 %v3091_v31  ;;  %vm502_vm11 = vcmp.ge.f32.partialorder %v494_v8, 0.0  ;;  %v510_v23 = vmul.f32 0.2, %v494_v8  ;;  %v517_v24 = vsel %vm501_vm10, %v493_v12, %v509_v32  ;;  %v3114_v12 = vld [vmem:[%s3819_s4 + $0x188] sm:$0xff]   ;;  %v1741_v32 = vld [vmem:[#allocation2 + $0x151] sm:$0xff] }
  0x55   : > { %2906 = vmatpush3.bf16.msra.mxu0 %v3090_v3  ;;  %2917 = vmatprep.mubr.bf16.mxu0 %v1297_v53  ;;  %v482_v3 = vmul.f32 %v3286_v13, %v468_v50  ;;  %v495_v9 = vadd.f32 %v3292_v15, %v481_v6  ;;  %v604_v53 = vmul.f32 %v2462_v47, %v3286_v13  ;;  %v3108_v13 = vld [vmem:[%s3819_s4 + $0x1a0] sm:$0xff]  }
  0x56   : > { %2907 = vmatprep.subr.bf16.mxu0 %v3092_v58  ;;  %2898 = vmatmul.mubr.bf16.gmra.mxu1 %v1150_v57  ;;  %v518_v29 = vsel %vm502_vm11, %v494_v8, %v510_v23  ;;  %v3102_v57 = vld [vmem:[%s3819_s4 + $0x1b8] sm:$0xff]   ;;  %v1740_v50 = vld [vmem:[#allocation2 + $0x141] sm:$0xff]  ;;  %v1748_v23 = vpack.c.bf16 %v3373_v22, %v1741_v32 }
  0x57   : > { %2930 = vmatpush3.bf16.msra.mxu1 %v3091_v31  ;;  %v496_v27 = vadd.f32 %v3292_v15, %v482_v3  ;;  %2941 = vmatprep.mubr.bf16.mxu1 %v1447_v61  ;;  %vm503_vm12 = vcmp.ge.f32.partialorder %v495_v9, 0.0  ;;  %v511_v25 = vmul.f32 0.2, %v495_v9  ;;  %v1299_v41 = vpack.c.bf16 %v518_v29, %v517_v24  ;;  %v3134_v61 = vld [vmem:[%s3818_s3] ss:$0 sm:$0xff]  ;;  %v1889_v22 = vld [vmem:[#allocation2 + $0x1c1] sm:$0xff] }
  0x58   : > { %2931 = vmatprep.subr.bf16.mxu1 %v3093_v46  ;;  %v3109_v6 = vld [vmem:[%s3819_s4 + $0x1e0] sm:$0xff]   ;;  %v1747_v3 = vpack.c.bf16 %v1740_v50, %v1739_v51  ;;  %v1897_v20 = vpack.c.bf16 %v1890_v60, %v1889_v22  ;;  %v2084_v29 = vld [vmem:[%s3686_s14 + $0x8] sm:$0xff] }
  0x59   : > { %2908 = vmatpush3.bf16.msra.mxu0 %v3092_v58  ;;  %vm504_vm13 = vcmp.ge.f32.partialorder %v496_v27, 0.0  ;;  %v512_v28 = vmul.f32 0.2, %v496_v27  ;;  %v519_v30 = vsel %vm503_vm12, %v495_v9, %v511_v25  ;;  %v1298_v58 = vpack.c.bf16 %v516_v43, %v3550_v54  ;;  %v3107_v54 = vld [vmem:[%s3819_s4 + $0x1e8] sm:$0xff]   ;;  %v1589_v43 = vld [vmem:[#allocation2 + $0x1c0] sm:$0xff]  ;;  %v3121_v25 = vld [vmem:[%s3820_s5 + $0x30] sm:$0xff]  }
  0x5a   : > { %2909 = vmatprep.subr.bf16.mxu0 %v3094_v52  ;;  %v1597_v1 = vpack.c.bf16 %v3363_v10, %v1589_v43  ;;  %v3110_v10 = vld [vmem:[%s3819_s4 + $0x198] sm:$0xff]   ;;  %v3116_v8 = vld [vmem:[%s3819_s4 + $0x180] sm:$0xff]  }
  0x5b   : > { %2932 = vmatpush3.bf16.msra.mxu1 %v3093_v46  ;;  %v520_v31 = vsel %vm504_vm13, %v496_v27, %v512_v28  ;;  %v3105_v46 = vld [vmem:[%s3819_s4 + $0x1f0] sm:$0xff]   ;;  %v3117_v9 = vld [vmem:[%s3819_s4 + $0x1c0] sm:$0xff]   ;;  %v3118_v27 = vld [vmem:[%s3819_s4 + $0x238] sm:$0xff]  }
  0x5c   : > { %2933 = vmatprep.subr.bf16.mxu1 %v3095_v7  ;;  %v1300_v18 = vpack.c.bf16 %v520_v31, %v519_v30  ;;  %v3122_v28 = vld [vmem:[%s3819_s4 + $0x228] sm:$0xff]   ;;  %v3125_v30 = vld [vmem:[%s3820_s5 + $0x20] sm:$0xff]   ;;  %v3129_v31 = vld [vmem:[%s3820_s5 + $0x10] sm:$0xff]  }
  0x5d   : > { %2910 = vmatpush3.bf16.msra.mxu0 %v3094_v52  ;;  %v670_v52 = vadd.f32 %v3292_v15, %v662_v45  ;;  %v612_v15 = vadd.f32 %v3134_v61, %v604_v53  ;;  %v2086_v45 = vld [vmem:[%s3686_s14 + $0x18] sm:$0xff]  ;;  %v2087_v47 = vld [vmem:[%s3686_s14 + $0x20] sm:$0xff] }
  0x5e   : > { %2911 = vmatprep.subr.bf16.mxu0 %v3096_v16  ;;  %v2090_v43 = vld [vmem:[%s3686_s14 + $0x38] sm:$0xff] }
  0x5f   : > { %2934 = vmatpush3.bf16.msra.mxu1 %v3095_v7  ;;  %vm678_vm14 = vcmp.ge.f32.partialorder %v670_v52, 0.0  ;;  %v686_v59 = vmul.f32 0.2, %v670_v52  ;;  %vm620_vm15 = vcmp.ge.f32.partialorder %v612_v15, 0.0  ;;  %v628_v62 = vmul.f32 0.2, %v612_v15 }
  0x60   : > { %2935 = vmatprep.subr.bf16.mxu1 %v3097_v14  ;;  %v3113_v7 = vld [vmem:[%s3819_s4 + $0x1d0] sm:$0xff]  }
  0x61   : > { %2912 = vmatpush3.bf16.msra.mxu0 %v3096_v16  ;;  %v3621_v55 = vsel %vm678_vm14, %v670_v52, %v686_v59  ;;  %v3627_v5 = vsel %vm620_vm15, %v612_v15, %v628_v62  ;;  %v3115_v16 = vld [vmem:[%s3819_s4 + $0x1c8] sm:$0xff]  }
  0x62   : > { %2913 = vmatprep.subr.bf16.mxu0 %v3098_v19  ;;  %703 = vst [vmem:[#allocation2 + $0x231] sm:$0xff] %v3621_v55 }
  0x63   : > { %2936 = vmatpush3.bf16.msra.mxu1 %v3097_v14  ;;  %v3119_v14 = vld [vmem:[%s3820_s5 + $0x38] sm:$0xff]  }
  0x64   : > { %2937 = vmatprep.subr.bf16.mxu1 %v3099_v34 }
  0x65   : > { %2914 = vmatpush3.bf16.msra.mxu0 %v3098_v19  ;;  %v3120_v19 = vld [vmem:[%s3819_s4 + $0x230] sm:$0xff]  }
  0x66   : > { %2915 = vmatprep.subr.bf16.mxu0 %v3100_v35 }
  0x67   : > { %2938 = vmatpush3.bf16.msra.mxu1 %v3099_v34  ;;  %v3130_v34 = vld [vmem:[%s3819_s4 + $0x208] sm:$0xff]  }
  0x68   : > { %2939 = vmatprep.subr.bf16.mxu1 %v3101_v36 }
  0x69   : > { %2916 = vmatpush3.bf16.msra.mxu0 %v3100_v35  ;;  %v1596_v24 = vld [vmem:[#allocation2 + $0x230] sm:$0xff]  ;;  %v3131_v35 = vld [vmem:[%s3820_s5 + $0x8] sm:$0xff]  }
  0x6a   : > { %2949 = vmatprep.subr.bf16.mxu0 %v3102_v57  ;;  %v1600_v11 = vpack.c.bf16 %v1596_v24, %v3466_v21  ;;  %v1750_v21 = vpack.c.bf16 %v3627_v5, %v3405_v40  ;;  %v3127_v40 = vld [vmem:[%s3820_s5 + $0x18] sm:$0xff]  }
  0x6b   : > { %2940 = vmatpush3.bf16.msra.mxu1 %v3101_v36  ;;  %v3132_v36 = vld [vmem:[%s3819_s4 + $0x200] sm:$0xff]  }
  0x6c   : > { %2918 = vmatmul.mubr.bf16.vlgmr.msra.gmra.mxu0 %v1298_v58  ;;  %2973 = vmatprep.subr.bf16.mxu1 %v3103_v37  ;;  %v1892_v58 = vld [vmem:[#allocation2 + $0x1f1] sm:$0xff] }
  0x6d   : > { %2950 = vmatpush3.bf16.msra.mxu0 %v3102_v57  ;;  %2921 = vmatprep.mubr.bf16.mxu0 %v1299_v41  ;;  %v1891_v57 = vld [vmem:[#allocation2 + $0x1e1] sm:$0xff]  ;;  %v1894_v41 = vld [vmem:[#allocation2 + $0x211] sm:$0xff] }
  0x6e   : > { %2951 = vmatprep.subr.bf16.mxu0 %v3104_v38  ;;  %2942 = vmatmul.mubr.bf16.vlgmr.msra.gmra.mxu1 %v1448_v44  ;;  %v1898_v42 = vpack.c.bf16 %v1892_v58, %v1891_v57  ;;  %v2085_v44 = vld [vmem:[%s3686_s14 + $0x10] sm:$0xff] }
  0x6f   : > { %2974 = vmatpush3.bf16.msra.mxu1 %v3103_v37  ;;  %2945 = vmatprep.mubr.bf16.mxu1 %v1449_v17  ;;  %v3133_v37 = vld [vmem:[%s3820_s5] sm:$0xff]   ;;  %v2092_v52 = vpack.c.bf16 %v2086_v45, %v2085_v44 }
  0x70   : > { %2975 = vmatprep.subr.bf16.mxu1 %v3105_v46  ;;  %v1895_v17 = vld [vmem:[#allocation2 + $0x221] sm:$0xff] }
  0x71   : > { %2952 = vmatpush3.bf16.msra.mxu0 %v3104_v38  ;;  %v1893_v38 = vld [vmem:[#allocation2 + $0x201] sm:$0xff] }
  0x72   : > { %2953 = vmatprep.subr.bf16.mxu0 %v3106_v48 }
  0x73   : > { %2976 = vmatpush3.bf16.msra.mxu1 %v3105_v46  ;;  %v1899_v46 = vpack.c.bf16 %v1894_v41, %v1893_v38 }
  0x74   : > { %2922 = vmatmul.mubr.bf16.gmra.mxu0 %v1300_v18  ;;  %2977 = vmatprep.subr.bf16.mxu1 %v3107_v54  ;;  %v1900_v18 = vpack.c.bf16 %v3621_v55, %v1895_v17 }
  0x75   : > { %2954 = vmatpush3.bf16.msra.mxu0 %v3106_v48  ;;  %2965 = vmatprep.mubr.bf16.mxu0 %v1597_v1  ;;  %v2088_v48 = vld [vmem:[%s3686_s14 + $0x28] sm:$0xff] }
  0x76   : > { %2955 = vmatprep.subr.bf16.mxu0 %v3108_v13  ;;  %2946 = vmatmul.mubr.bf16.gmra.mxu1 %v1450_v49  ;;  %v2093_v53 = vpack.c.bf16 %v2088_v48, %v2087_v47 }
  0x77   : > { %2978 = vmatpush3.bf16.msra.mxu1 %v3107_v54  ;;  %2989 = vmatprep.mubr.bf16.mxu1 %v1747_v3  ;;  %v2089_v54 = vld [vmem:[%s3686_s14 + $0x30] sm:$0xff] }
  0x78   : > { %2979 = vmatprep.subr.bf16.mxu1 %v3109_v6  ;;  %v2094_v59 = vpack.c.bf16 %v2090_v43, %v2089_v54 }
  0x79   : > { %2956 = vmatpush3.bf16.msra.mxu0 %v3108_v13 }
  0x7a   : > { %2957 = vmatprep.subr.bf16.mxu0 %v3110_v10 }
  0x7b   : > { %2980 = vmatpush3.bf16.msra.mxu1 %v3109_v6 }
  0x7c   : > { %2981 = vmatprep.subr.bf16.mxu1 %v3111_v63 }
  0x7d   : > { %2958 = vmatpush3.bf16.msra.mxu0 %v3110_v10 }
  0x7e   : > { %2959 = vmatprep.subr.bf16.mxu0 %v3112_v2 }
  0x7f   : > { %2982 = vmatpush3.bf16.msra.mxu1 %v3111_v63 }
  0x80   : > { %2983 = vmatprep.subr.bf16.mxu1 %v3113_v7 }
  0x81   : > { %2960 = vmatpush3.bf16.msra.mxu0 %v3112_v2 }
  0x82   : > { %2961 = vmatprep.subr.bf16.mxu0 %v3114_v12 }
  0x83   : > { %2984 = vmatpush3.bf16.msra.mxu1 %v3113_v7 }
  0x84   : > { %2985 = vmatprep.subr.bf16.mxu1 %v3115_v16 }
  0x85   : > { %2962 = vmatpush3.bf16.msra.mxu0 %v3114_v12 }
  0x86   : > { %2963 = vmatprep.subr.bf16.mxu0 %v3116_v8 }
  0x87   : > { %2986 = vmatpush3.bf16.msra.mxu1 %v3115_v16 }
  0x88   : > { %2987 = vmatprep.subr.bf16.mxu1 %v3117_v9 }
  0x89   : > { %2964 = vmatpush3.bf16.msra.mxu0 %v3116_v8 }
  0x8a   : > { %2997 = vmatprep.subr.bf16.mxu0 %v3118_v27 }
  0x8b   : > { %2988 = vmatpush3.bf16.msra.mxu1 %v3117_v9 }
  0x8c   : > { %2966 = vmatmul.mubr.bf16.vlgmr.msra.gmra.mxu0 %v1598_v4  ;;  %3021 = vmatprep.subr.bf16.mxu1 %v3119_v14  ;;  %v3124_v4 = vld [vmem:[%s3819_s4 + $0x220] sm:$0xff]  }
  0x8d   : > { %2998 = vmatpush3.bf16.msra.mxu0 %v3118_v27  ;;  %2969 = vmatprep.mubr.bf16.mxu0 %v1599_v33  ;;  %v2083_v33 = vld [vmem:[%s3686_s14] sm:$0xff] }
  0x8e   : > { %2999 = vmatprep.subr.bf16.mxu0 %v3120_v19  ;;  %2990 = vmatmul.mubr.bf16.vlgmr.msra.gmra.mxu1 %v1748_v23  ;;  %v2091_v39 = vpack.c.bf16 %v2084_v29, %v2083_v33 }
  0x8f   : > { %3022 = vmatpush3.bf16.msra.mxu1 %v3119_v14  ;;  %2993 = vmatprep.mubr.bf16.mxu1 %v1749_v56  ;;  %v3128_v56 = vld [vmem:[%s3819_s4 + $0x210] sm:$0xff]  }
  0x90   : > { %3023 = vmatprep.subr.bf16.mxu1 %v3121_v25 }
  0x91   : > { %3000 = vmatpush3.bf16.msra.mxu0 %v3120_v19 }
  0x92   : > { %3001 = vmatprep.subr.bf16.mxu0 %v3122_v28 }
  0x93   : > { %3024 = vmatpush3.bf16.msra.mxu1 %v3121_v25 }
  0x94   : > { %2970 = vmatmul.mubr.bf16.gmra.mxu0 %v1600_v11  ;;  %3025 = vmatprep.subr.bf16.mxu1 %v3123_v0 }
  0x95   : > { %3002 = vmatpush3.bf16.msra.mxu0 %v3122_v28  ;;  %3013 = vmatprep.mubr.bf16.mxu0 %v1897_v20 }
  0x96   : > { %3003 = vmatprep.subr.bf16.mxu0 %v3124_v4  ;;  %2994 = vmatmul.mubr.bf16.gmra.mxu1 %v1750_v21 }
  0x97   : > { %3026 = vmatpush3.bf16.msra.mxu1 %v3123_v0  ;;  %3037 = vmatprep.mubr.bf16.mxu1 %v2091_v39 }
  0x98   : > { %3027 = vmatprep.subr.bf16.mxu1 %v3125_v30 }
  0x99   : > { %3004 = vmatpush3.bf16.msra.mxu0 %v3124_v4 }
  0x9a   : > { %3005 = vmatprep.subr.bf16.mxu0 %v3126_v26 }
  0x9b   : > { %3028 = vmatpush3.bf16.msra.mxu1 %v3125_v30 }
  0x9c   : > { %3029 = vmatprep.subr.bf16.mxu1 %v3127_v40 }
  0x9d   : > { %3006 = vmatpush3.bf16.msra.mxu0 %v3126_v26 }
  0x9e   : > { %3007 = vmatprep.subr.bf16.mxu0 %v3128_v56 }
  0x9f   : > { %3030 = vmatpush3.bf16.msra.mxu1 %v3127_v40 }
  0xa0   : > { %3031 = vmatprep.subr.bf16.mxu1 %v3129_v31 }
  0xa1   : > { %3008 = vmatpush3.bf16.msra.mxu0 %v3128_v56 }
  0xa2   : > { %3009 = vmatprep.subr.bf16.mxu0 %v3130_v34 }
  0xa3   : > { %3032 = vmatpush3.bf16.msra.mxu1 %v3129_v31 }
  0xa4   : > { %3033 = vmatprep.subr.bf16.mxu1 %v3131_v35 }
  0xa5   : > { %3010 = vmatpush3.bf16.msra.mxu0 %v3130_v34 }
  0xa6   : > { %3011 = vmatprep.subr.bf16.mxu0 %v3132_v36 }
  0xa7   : > { %3034 = vmatpush3.bf16.msra.mxu1 %v3131_v35 }
  0xa8   : > { %3035 = vmatprep.subr.bf16.mxu1 %v3133_v37 }
  0xa9   : > { %3012 = vmatpush3.bf16.msra.mxu0 %v3132_v36 }
  0xab   : > { %3036 = vmatpush3.bf16.msra.mxu1 %v3133_v37 }
  0xac   : > { %3014 = vmatmul.mubr.bf16.vlgmr.msra.gmra.mxu0 %v1898_v42 }
  0xad   : > { %3017 = vmatprep.mubr.bf16.mxu0 %v1899_v46 }
  0xae   : > { %3038 = vmatmul.mubr.bf16.vlgmr.msra.gmra.mxu1 %v2092_v52 }
  0xaf   : > { %3041 = vmatprep.mubr.bf16.mxu1 %v2093_v53 }
  0xb4   : > { %3018 = vmatmul.mubr.bf16.gmra.mxu0 %v1900_v18 }
  0xb6   : > { %3042 = vmatmul.mubr.bf16.gmra.mxu1 %v2094_v59 }
  0xec   : > { %v2823_v61 = vpop.f32.mrf.mxu0 }
  0xed   : > { %v2847_v51 = vpop.f32.mrf.mxu1 }
  0xee   : > { %v845_v15 = vpop.f32.mrf.mxu0  ;;  %v967_v45 = vadd.f32 %v2847_v51, %v2823_v61 }
  0xef   : > { %v958_v1 = vpop.f32.mrf.mxu1 }
  0xf0   : > { %v2824_v13 = vpop.f32.mrf.mxu0  ;;  %v959_v47 = vadd.f32 %v958_v1, %v845_v15 }
  0xf1   : > { %v2848_v50 = vpop.f32.mrf.mxu1 }
  0xf2   : > { %v848_v62 = vpop.f32.mrf.mxu0  ;;  %v970_v53 = vadd.f32 %v2848_v50, %v2824_v13 }
  0xf3   : > { %v961_v6 = vpop.f32.mrf.mxu1 }
  0xf4   : > { %v2827_v49 = vpop.f32.mrf.mxu0  ;;  %v962_v54 = vadd.f32 %v961_v6, %v848_v62 }
  0xf6   : > { %v3735_v5 = vpop.f32.mrf.mxu0 }
  0xf7   : > { %v2851_v55 = vpop.f32.mrf.mxu1 }
  0xf8   : > { %v3737_v10 = vpop.f32.mrf.mxu0 }
  0xf9   : > { %v974_v63 = vpop.f32.mrf.mxu1 }
  0xfa   : > { %v3739_v3 = vpop.f32.mrf.mxu0  ;;  %v975_v15 = vadd.f32 %v974_v63, %v3735_v5 }
  0xfb   : > { %v3741_v7 = vpop.f32.mrf.mxu1 }
  0xfc   : > { %v986_v62 = vadd.f32 %v3741_v7, %v3737_v10 }
  0xfd   : > { %v3743_v16 = vpop.f32.mrf.mxu1 }
 0x10c   : > { %v2871_v2 = vpop.f32.mrf.mxu0 }
 0x10d   : > { %v1133_v48 = vadd.f32 %v2871_v2, %v967_v45 }
 0x10e   : > { %v1100_v12 = vpop.f32.mrf.mxu0  ;;  %v2895_v9 = vpop.f32.mrf.mxu1 }
 0x10f   : > { %v1131_v17 = vadd.f32 %v1100_v12, %v959_v47  ;;  %v1283_v43 = vadd.f32 %v2895_v9, %v1133_v48  ;;  %v978_v9 = vadd.f32 %v3743_v16, %v3739_v3 }
 0x110   : > { %v2872_v8 = vpop.f32.mrf.mxu0  ;;  %v1250_v32 = vpop.f32.mrf.mxu1 }
 0x111   : > { %v1134_v59 = vadd.f32 %v2872_v8, %v970_v53 }
 0x112   : > { %v1103_v27 = vpop.f32.mrf.mxu0  ;;  %v2896_v19 = vpop.f32.mrf.mxu1 }
 0x114   : > { %v2875_v14 = vpop.f32.mrf.mxu0  ;;  %v1253_v24 = vpop.f32.mrf.mxu1 }
 0x116   : > { %v1116_v23 = vpop.f32.mrf.mxu0  ;;  %v2899_v25 = vpop.f32.mrf.mxu1 }
 0x117   : > { %v1135_v50 = vadd.f32 %v1116_v23, %v975_v15 }
 0x118   : > { %v2876_v28 = vpop.f32.mrf.mxu0  ;;  %v3745_v11 = vpop.f32.mrf.mxu1 }
 0x119   : > { %3825 = vst [vmem:[#allocation3_spill] sm:$0xff] %v3745_v11 }
 0x11a   : > { %v3747_v22 = vpop.f32.mrf.mxu0  ;;  %v3749_v0 = vpop.f32.mrf.mxu1 }
 0x11b   : > { %3826 = vst [vmem:[#allocation4_spill] sm:$0xff] %v3747_v22  ;;  %3827 = vst [vmem:[#allocation5_spill] sm:$0xff] %v3749_v0  ;;  %v1284_v22 = vadd.f32 %v2896_v19, %v1134_v59 }
 0x11c   : > { %v3751_v20 = vpop.f32.mrf.mxu1 }
 0x11d   : > { %3828 = vst [vmem:[#allocation6_spill] sm:$0xff] %v3751_v20 }
 0x12c   : > { %v2919_v60 = vpop.f32.mrf.mxu0 }
 0x12e   : > { %v1400_v4 = vpop.f32.mrf.mxu0  ;;  %v2943_v21 = vpop.f32.mrf.mxu1 }
 0x130   : > { %v2920_v33 = vpop.f32.mrf.mxu0  ;;  %v1550_v29 = vpop.f32.mrf.mxu1 }
 0x131   : > { %v1434_v13 = vadd.f32 %v2920_v33, %v1284_v22 }
 0x132   : > { %v1403_v30 = vpop.f32.mrf.mxu0  ;;  %v2944_v26 = vpop.f32.mrf.mxu1 }
 0x134   : > { %v2923_v39 = vpop.f32.mrf.mxu0  ;;  %v1553_v40 = vpop.f32.mrf.mxu1 }
 0x136   : > { %v1416_v56 = vpop.f32.mrf.mxu0  ;;  %v2947_v31 = vpop.f32.mrf.mxu1 }
 0x138   : > { %v3753_v34 = vpop.f32.mrf.mxu0  ;;  %v3755_v35 = vpop.f32.mrf.mxu1 }
 0x139   : > { %3829 = vst [vmem:[#allocation7_spill] sm:$0xff] %v3753_v34  ;;  %3830 = vst [vmem:[#allocation8_spill] sm:$0xff] %v3755_v35  ;;  %v1281_v35 = vadd.f32 %v1250_v32, %v1131_v17  ;;  %v1132_v34 = vadd.f32 %v1103_v27, %v962_v54  ;;  %v1138_v27 = vadd.f32 %v2876_v28, %v986_v62 }
 0x13a   : > { %v3757_v36 = vpop.f32.mrf.mxu0  ;;  %v3759_v57 = vpop.f32.mrf.mxu1  ;;  %v1584_v32 = vadd.f32 %v2944_v26, %v1434_v13 }
 0x13b   : > { %3831 = vst [vmem:[#allocation9_spill] sm:$0xff] %v3757_v36  ;;  %3832 = vst [vmem:[#allocation10_spill] sm:$0xff] %v3759_v57  ;;  %v983_v57 = vadd.f32 %v2851_v55, %v2827_v49  ;;  %v1431_v61 = vadd.f32 %v1400_v4, %v1281_v35  ;;  %v1282_v51 = vadd.f32 %v1253_v24, %v1132_v34  ;;  %v3835_v24 = vld [vmem:[#allocation4_spill] sm:$0xff] }
 0x13c   : > { %v3761_v37 = vpop.f32.mrf.mxu1  ;;  %v1136_v22 = vadd.f32 %v3835_v24, %v978_v9 }
 0x13d   : > { %3833 = vst [vmem:[#allocation11_spill] sm:$0xff] %v3761_v37  ;;  %v1433_v37 = vadd.f32 %v2919_v60, %v1283_v43  ;;  %v1137_v11 = vadd.f32 %v2875_v14, %v983_v57  ;;  %v1581_v55 = vadd.f32 %v1550_v29, %v1431_v61  ;;  %v1432_v12 = vadd.f32 %v1403_v30, %v1282_v51  ;;  %v3834_v14 = vld [vmem:[#allocation3_spill] sm:$0xff]  ;;  %v3836_v60 = vld [vmem:[#allocation5_spill] sm:$0xff]  ;;  %v3837_v30 = vld [vmem:[#allocation6_spill] sm:$0xff] }
 0x13e   : > { %v1285_v19 = vadd.f32 %v3834_v14, %v1135_v50  ;;  %v1288_v4 = vadd.f32 %v3836_v60, %v1138_v27  ;;  %v1286_v26 = vadd.f32 %v3837_v30, %v1136_v22 }
 0x13f   : > { %v1583_v1 = vadd.f32 %v2943_v21, %v1433_v37  ;;  %v1287_v49 = vadd.f32 %v2899_v25, %v1137_v11  ;;  %v1582_v23 = vadd.f32 %v1553_v40, %v1432_v12 }
 0x140   : > { %v1435_v21 = vadd.f32 %v1416_v56, %v1285_v19 }
 0x141   : > { %v1437_v5 = vadd.f32 %v2923_v39, %v1287_v49  ;;  %v3838_v39 = vld [vmem:[#allocation7_spill] sm:$0xff] }
 0x142   : > { %v1438_v40 = vadd.f32 %v3838_v39, %v1288_v4  ;;  %v3841_v47 = vld [vmem:[#allocation10_spill] sm:$0xff] }
 0x143   : > { %v1587_v16 = vadd.f32 %v2947_v31, %v1437_v5 }
 0x144   : > { %v1588_v48 = vadd.f32 %v3841_v47, %v1438_v40  ;;  %v3842_v43 = vld [vmem:[#allocation11_spill] sm:$0xff] }
 0x14c   : > { %v2967_v58 = vpop.f32.mrf.mxu0 }
 0x14d   : > { %v1733_v8 = vadd.f32 %v2967_v58, %v1583_v1  ;;  %v3839_v58 = vld [vmem:[#allocation8_spill] sm:$0xff] }
 0x14e   : > { %v1700_v38 = vpop.f32.mrf.mxu0  ;;  %v2991_v41 = vpop.f32.mrf.mxu1  ;;  %v1585_v37 = vadd.f32 %v3839_v58, %v1435_v21 }
 0x14f   : > { %v1731_v63 = vadd.f32 %v1700_v38, %v1581_v55  ;;  %v1883_v25 = vadd.f32 %v2991_v41, %v1733_v8  ;;  %v3840_v38 = vld [vmem:[#allocation9_spill] sm:$0xff] }
 0x150   : > { %v2968_v42 = vpop.f32.mrf.mxu0  ;;  %v1850_v44 = vpop.f32.mrf.mxu1  ;;  %v1436_v41 = vadd.f32 %v3840_v38, %v1286_v26 }
 0x151   : > { %v1734_v11 = vadd.f32 %v2968_v42, %v1584_v32  ;;  %v1881_v28 = vadd.f32 %v1850_v44, %v1731_v63 }
 0x152   : > { %v1703_v46 = vpop.f32.mrf.mxu0  ;;  %v2992_v52 = vpop.f32.mrf.mxu1  ;;  %v1586_v59 = vadd.f32 %v3842_v43, %v1436_v41 }
 0x153   : > { %v1732_v33 = vadd.f32 %v1703_v46, %v1582_v23  ;;  %v1884_v35 = vadd.f32 %v2992_v52, %v1734_v11 }
 0x154   : > { %v2971_v18 = vpop.f32.mrf.mxu0  ;;  %v1853_v36 = vpop.f32.mrf.mxu1 }
 0x155   : > { %v1737_v57 = vadd.f32 %v2971_v18, %v1587_v16  ;;  %v1882_v45 = vadd.f32 %v1853_v36, %v1732_v33 }
 0x156   : > { %v1716_v20 = vpop.f32.mrf.mxu0  ;;  %v2995_v0 = vpop.f32.mrf.mxu1 }
 0x157   : > { %v1735_v52 = vadd.f32 %v1716_v20, %v1585_v37  ;;  %v1887_v18 = vadd.f32 %v2995_v0, %v1737_v57 }
 0x158   : > { %v2972_v6 = vpop.f32.mrf.mxu0  ;;  %v1866_v2 = vpop.f32.mrf.mxu1 }
 0x159   : > { %v1738_v61 = vadd.f32 %v2972_v6, %v1588_v48  ;;  %v1885_v20 = vadd.f32 %v1866_v2, %v1735_v52 }
 0x15a   : > { %v1719_v10 = vpop.f32.mrf.mxu0  ;;  %v2996_v7 = vpop.f32.mrf.mxu1 }
 0x15b   : > { %v1736_v50 = vadd.f32 %v1719_v10, %v1586_v59  ;;  %v1888_v32 = vadd.f32 %v2996_v7, %v1738_v61 }
 0x15c   : > { %v1869_v34 = vpop.f32.mrf.mxu1 }
 0x15d   : > { %v1886_v23 = vadd.f32 %v1869_v34, %v1736_v50 }
 0x16c   : > { %v3015_v3 = vpop.f32.mrf.mxu0 }
 0x16d   : > { %v2033_v29 = vadd.f32 %v3015_v3, %v1883_v25 }
 0x16e   : > { %v2000_v56 = vpop.f32.mrf.mxu0  ;;  %v3039_v42 = vpop.f32.mrf.mxu1 }
 0x16f   : > { %2041 = vst [vmem:[%s3775_s21 + $0x10] sm:$0xff] %v2033_v29  ;;  %v2031_v31 = vadd.f32 %v2000_v56, %v1881_v28  ;;  %2226 = vst [vmem:[%s3783_s24 + $0x10] sm:$0xff] %v3039_v42  ;;  %v2063_v49 = vmul.f32 %v2033_v29, %v2033_v29  ;;  %v2248_v5 = vmul.f32 %v3039_v42, %v3039_v42 }
 0x170   : > { %v3016_v44 = vpop.f32.mrf.mxu0  ;;  %v2193_v53 = vpop.f32.mrf.mxu1 }
 0x171   : > { %2039 = vst [vmem:[%s3775_s21] sm:$0xff] %v2031_v31  ;;  %v2034_v46 = vadd.f32 %v3016_v44, %v1884_v35  ;;  %2224 = vst [vmem:[%s3783_s24] sm:$0xff] %v2193_v53  ;;  %v2061_v51 = vmul.f32 %v2031_v31, %v2031_v31  ;;  %v2246_v0 = vmul.f32 %v2193_v53, %v2193_v53 }
 0x172   : > { %v2003_v17 = vpop.f32.mrf.mxu0  ;;  %v3040_v15 = vpop.f32.mrf.mxu1 }
 0x173   : > { %2042 = vst [vmem:[%s3775_s21 + $0x18] sm:$0xff] %v2034_v46  ;;  %v2032_v54 = vadd.f32 %v2003_v17, %v1882_v45  ;;  %2227 = vst [vmem:[%s3783_s24 + $0x18] sm:$0xff] %v3040_v15  ;;  %v2064_v2 = vmul.f32 %v2034_v46, %v2034_v46  ;;  %v2249_v25 = vmul.f32 %v3040_v15, %v3040_v15 }
 0x174   : > { %v3019_v36 = vpop.f32.mrf.mxu0  ;;  %v2196_v55 = vpop.f32.mrf.mxu1 }
 0x175   : > { %2040 = vst [vmem:[%s3775_s21 + $0x8] sm:$0xff] %v2032_v54  ;;  %v2047_v1 = vadd.f32 %v2032_v54, %v2031_v31  ;;  %v2062_v13 = vmul.f32 %v2032_v54, %v2032_v54  ;;  %v2037_v62 = vadd.f32 %v3019_v36, %v1887_v18  ;;  %2225 = vst [vmem:[%s3783_s24 + $0x8] sm:$0xff] %v2196_v55 }
 0x176   : > { %v2016_v12 = vpop.f32.mrf.mxu0  ;;  %v2232_v6 = vadd.f32 %v2196_v55, %v2193_v53  ;;  %v2247_v27 = vmul.f32 %v2196_v55, %v2196_v55  ;;  %v3043_v63 = vpop.f32.mrf.mxu1 }
 0x177   : > { %v2048_v8 = vadd.f32 %v2047_v1, %v2033_v29  ;;  %v2069_v9 = vadd.f32 %v2062_v13, %v2061_v51  ;;  %2045 = vst [vmem:[%s3775_s21 + $0x30] sm:$0xff] %v2037_v62  ;;  %v2035_v14 = vadd.f32 %v2016_v12, %v1885_v20  ;;  %2230 = vst [vmem:[%s3783_s24 + $0x30] sm:$0xff] %v3043_v63 }
 0x178   : > { %v3020_v19 = vpop.f32.mrf.mxu0  ;;  %v2233_v22 = vadd.f32 %v3039_v42, %v2232_v6  ;;  %v2254_v10 = vadd.f32 %v2247_v27, %v2246_v0  ;;  %v2209_v60 = vpop.f32.mrf.mxu1  ;;  %v2067_v38 = vmul.f32 %v2037_v62, %v2037_v62  ;;  %v2252_v44 = vmul.f32 %v3043_v63, %v3043_v63 }
 0x179   : > { %v2070_v24 = vadd.f32 %v2069_v9, %v2063_v49  ;;  %2043 = vst [vmem:[%s3775_s21 + $0x20] sm:$0xff] %v2035_v14  ;;  %v2049_v11 = vadd.f32 %v2048_v8, %v2034_v46  ;;  %v2038_v4 = vadd.f32 %v3020_v19, %v1888_v32  ;;  %v2065_v3 = vmul.f32 %v2035_v14, %v2035_v14 }
 0x17a   : > { %v2019_v7 = vpop.f32.mrf.mxu0  ;;  %v2255_v21 = vadd.f32 %v2254_v10, %v2248_v5  ;;  %2228 = vst [vmem:[%s3783_s24 + $0x20] sm:$0xff] %v2209_v60  ;;  %v2234_v28 = vadd.f32 %v3040_v15, %v2233_v22  ;;  %v3044_v29 = vpop.f32.mrf.mxu1  ;;  %v2250_v40 = vmul.f32 %v2209_v60, %v2209_v60 }
 0x17b   : > { %v2071_v16 = vadd.f32 %v2070_v24, %v2064_v2  ;;  %v2050_v33 = vadd.f32 %v2049_v11, %v2035_v14  ;;  %2046 = vst [vmem:[%s3775_s21 + $0x38] sm:$0xff] %v2038_v4  ;;  %v2036_v30 = vadd.f32 %v2019_v7, %v1886_v23  ;;  %2231 = vst [vmem:[%s3783_s24 + $0x38] sm:$0xff] %v3044_v29 }
 0x17c   : > { %v2235_v39 = vadd.f32 %v2234_v28, %v2209_v60  ;;  %v2256_v34 = vadd.f32 %v2255_v21, %v2249_v25  ;;  %v2212_v57 = vpop.f32.mrf.mxu1  ;;  %v2068_v47 = vmul.f32 %v2038_v4, %v2038_v4  ;;  %v2253_v53 = vmul.f32 %v3044_v29, %v3044_v29 }
 0x17d   : > { %v2072_v26 = vadd.f32 %v2071_v16, %v2065_v3  ;;  %2044 = vst [vmem:[%s3775_s21 + $0x28] sm:$0xff] %v2036_v30  ;;  %v2051_v56 = vadd.f32 %v2050_v33, %v2036_v30  ;;  %v2066_v35 = vmul.f32 %v2036_v30, %v2036_v30  ;;  %2229 = vst [vmem:[%s3783_s24 + $0x28] sm:$0xff] %v2212_v57 }
 0x17e   : > { %v2257_v31 = vadd.f32 %v2256_v34, %v2250_v40  ;;  %v2236_v58 = vadd.f32 %v2235_v39, %v2212_v57  ;;  %v2251_v37 = vmul.f32 %v2212_v57, %v2212_v57 }
 0x17f   : > { %v2052_v41 = vadd.f32 %v2051_v56, %v2037_v62  ;;  %v2073_v42 = vadd.f32 %v2072_v26, %v2066_v35 }
 0x180   : > { %v2237_v45 = vadd.f32 %v3043_v63, %v2236_v58  ;;  %v2258_v46 = vadd.f32 %v2257_v31, %v2251_v37 }
 0x181   : > { %v2053_v48 = vadd.f32 %v2052_v41, %v2038_v4  ;;  %v2074_v52 = vadd.f32 %v2073_v42, %v2067_v38 }
 0x182   : > { %v2238_v17 = vadd.f32 %v3044_v29, %v2237_v45  ;;  %v2259_v18 = vadd.f32 %v2258_v46, %v2252_v44 }
 0x183   : > { %v2054_v54 = vrot.slane %v2053_v48, 4  ;;  %v2075_v43 = vadd.f32 %v2074_v52, %v2068_v47 }
 0x184   : > { %v2239_v59 = vrot.slane %v2238_v17, 4  ;;  %v2260_v61 = vadd.f32 %v2259_v18, %v2253_v53 }
 0x185   : > { %v2055_v15 = vadd.f32 %v2054_v54, %v2053_v48  ;;  %v2076_v36 = vrot.slane %v2075_v43, 4 }
 0x186   : > { %v2240_v51 = vadd.f32 %v2239_v59, %v2238_v17  ;;  %v2261_v1 = vrot.slane %v2260_v61, 4 }
 0x187   : > { %v2056_v13 = vrot.slane %v2055_v15, 2  ;;  %v2077_v62 = vadd.f32 %v2076_v36, %v2075_v43 }
 0x188   : > { %v2241_v20 = vrot.slane %v2240_v51, 2  ;;  %v2262_v50 = vadd.f32 %v2261_v1, %v2260_v61 }
 0x189   : > { %v2057_v49 = vadd.f32 %v2056_v13, %v2055_v15  ;;  %v2078_v0 = vrot.slane %v2077_v62, 2 }
 0x18a   : > { %v2242_v55 = vadd.f32 %v2241_v20, %v2240_v51  ;;  %v2263_v12 = vrot.slane %v2262_v50, 2 }
 0x18b   : > { %v2058_v8 = vrot.slane %v2057_v49, 1  ;;  %v2079_v9 = vadd.f32 %v2078_v0, %v2077_v62 }
 0x18c   : > { %v2243_v6 = vrot.slane %v2242_v55, 1  ;;  %v2264_v27 = vadd.f32 %v2263_v12, %v2262_v50 }
 0x18d   : > { %v2059_v32 = vadd.f32 %v2058_v8, %v2057_v49  ;;  %v2080_v5 = vrot.slane %v2079_v9, 1 }
 0x18e   : > { %v2244_v63 = vadd.f32 %v2243_v6, %v2242_v55  ;;  %v2265_v14 = vrot.slane %v2264_v27, 1 }
 0x18f   : > { %v2081_v19 = vadd.f32 %v2080_v5, %v2079_v9  ;;  %2060 = vst [vmem:[%s381_s27] sm:$0x1] %v2059_v32 }
 0x190   : > { %2245 = vst [vmem:[%s385_s12] sm:$0x1] %v2244_v63  ;;  %v2266_v2 = vadd.f32 %v2265_v14, %v2264_v27 }
 0x191   : > { %2082 = vst [vmem:[%s381_s27 + $0x1] sm:$0x1] %v2081_v19 }
 0x192   : > { %2267 = vst [vmem:[%s385_s12 + $0x1] sm:$0x1] %v2266_v2 }
 0x193 PF: > { %s20_s30 = sadd.s32 1, %s3141_s30  }
 0x194   : > { %p17_p4 = scmp.ge.s32.totalorder %s20_s30, 4  }
 0x196   :  { %19 = sbr.rel (!%p17_p4) target bundleno = 1 (0x1), region = 130 }

// kernel: res_block_discriminator.4
= control target key start
LH: loop header
LB: loop body
LE: loop exit
PB: predicated region body
PF: predicated region fallthrough
CT: control target
= control target key end

     0   :  { %s4272_s18 = smov 0   ;;  %s5378_s0 = inlined_call_operand.vmem [shape: f32[2,16,16,128], index: 0, kind: input, shape index: {}]   ;;  %s5379_s1 = inlined_call_operand.vmem [shape: f32[1,128], index: 1, kind: input, shape index: {}]   ;;  %s5380_s2 = inlined_call_operand.vmem [shape: f32[1,128], index: 2, kind: input, shape index: {}]   ;;  %s5381_s3 = inlined_call_operand.vmem [shape: bf16[9,128,128], index: 3, kind: input, shape index: {}]   ;;  %s5382_s4 = inlined_call_operand.vmem [shape: f32[2,16,16,128], index: 4, kind: output, shape index: {0}]   ;;  %s5383_s5 = inlined_call_operand.vmem [shape: f32[2,2,128], index: 5, kind: output, shape index: {1}]  }
   0x1 LB: > { %s3272_s1 = sadd.s32 4294967295, %s4238_s18   ;;  %p3276_p0 = scmp.ge.s32.totalorder %s4238_s18, 1  ;;  %s4238_s18 = sphi %s4272_s18, %s16_s18  }
   0x2   : > { %p190_p1 = scmp.lt.s32.totalorder %s4238_s18, 3 }
   0x4   : > { %p191_p2 = pnand %p3276_p0, %p190_p1 }
   0x6   : > { %194 = sbr.rel (%p191_p2) target bundleno = 549 (0x225), region = 36 }
   0xb   : > { %v4159_v0 = vld [vmem:[%s5381_s3 + $0x78] sm:$0xff]   ;;  %v4286_v1 = vld [vmem:[%s5381_s3 + $0x70] sm:$0xff]   ;;  %v4240_v2 = vmov 0.0   ;;  %p222_p3 = scmp.lt.s32.totalorder %s3272_s1, 1  ;;  %v4161_v3 = vld [vmem:[%s5381_s3 + $0x68] sm:$0xff]  }
   0xc   : > { %269 = vst [vmem:[#allocation2] sm:$0xff] %v4240_v2  ;;  %270 = vst [vmem:[#allocation2 + $0x8] sm:$0xff] %v4240_v2  ;;  %3702 = vmatprep.subr.bf16.mxu0 %v4159_v0  ;;  %4134 = vmatprep.subr.bf16.mxu1 %v4159_v0  ;;  %v4162_v4 = vld [vmem:[%s5381_s3 + $0x60] sm:$0xff]   ;;  %v4163_v15 = vld [vmem:[%s5381_s3 + $0x58] sm:$0xff]  }
   0xd   : > { %271 = vst [vmem:[#allocation2 + $0x10] sm:$0x3] %v4240_v2  ;;  %272 = vst [vmem:[#allocation2 + $0x18] sm:$0xff] %v4240_v2  ;;  %3703 = vmatpush3.bf16.msra.mxu0 %v4159_v0  ;;  %4142 = vmatpush3.bf16.msra.mxu1 %v4159_v0  ;;  %s5467_s1 = smov (!%p222_p3, %s3272_s1), 1  ;;  %v4164_v16 = vld [vmem:[%s5381_s3 + $0x50] sm:$0xff]   ;;  %v4165_v25 = vld [vmem:[%s5381_s3 + $0x48] sm:$0xff]  }
   0xe   : > { %273 = vst [vmem:[#allocation2 + $0x20] sm:$0xff] %v4240_v2  ;;  %274 = vst [vmem:[#allocation2 + $0x28] sm:$0x3] %v4240_v2  ;;  %3704 = vmatprep.subr.bf16.mxu0 %v4286_v1  ;;  %4135 = vmatprep.subr.bf16.mxu1 %v4286_v1  ;;  %s3484_s24 = sshll.u32 %s5467_s1, 8  ;;  %v4166_v34 = vld [vmem:[%s5381_s3 + $0x40] sm:$0xff]   ;;  %v4167_v35 = vld [vmem:[%s5381_s3 + $0x38] sm:$0xff]  }
   0xf   : > { %275 = vst [vmem:[#allocation2 + $0x30] sm:$0xff] %v4240_v2  ;;  %276 = vst [vmem:[#allocation2 + $0x38] sm:$0xff] %v4240_v2  ;;  %s4305_s27 = scalar_lea.vmem %s5378_s0, %s3484_s24  ;;  %v4168_v36 = vld [vmem:[%s5381_s3 + $0xb8] sm:$0xff]   ;;  %v4169_v47 = vld [vmem:[%s5381_s3 + $0x30] sm:$0xff]   ;;  %s5251_s26 = scalar_lea.vmem %s5382_s4, %s3484_s24 }
  0x10   : > { %277 = vst [vmem:[#allocation2 + $0x40] sm:$0x3] %v4240_v2  ;;  %278 = vst [vmem:[#allocation2 + $0x48] sm:$0xff] %v4240_v2  ;;  %v251_v7 = vld [vmem:[%s4305_s27 + $0x70] sm:$0xff]  ;;  %v252_v9 = vld [vmem:[%s4305_s27 + $0x78] sm:$0xff]  ;;  %s3281_s24 = sshll.u32 %s5467_s1, 1 }
  0x11   : > { %279 = vst [vmem:[#allocation2 + $0x50] sm:$0xff] %v4240_v2  ;;  %280 = vst [vmem:[#allocation2 + $0x58] sm:$0x3] %v4240_v2  ;;  %3705 = vmatpush3.bf16.msra.mxu0 %v4286_v1  ;;  %4143 = vmatpush3.bf16.msra.mxu1 %v4286_v1  ;;  %v4315_v10 = vld [vmem:[%s4305_s27] sm:$0xff]  ;;  %v4318_v11 = vld [vmem:[%s4305_s27 + $0x8] sm:$0xff]  ;;  %v4320_v12 = vpack.c.bf16 %v252_v9, %v251_v7  ;;  %s235_s30 = scalar_lea.vmem %s5383_s5, %s3281_s24 }
  0x12   : > { %281 = vst [vmem:[#allocation2 + $0x60] sm:$0xff] %v4240_v2  ;;  %282 = vst [vmem:[#allocation2 + $0x68] sm:$0xff] %v4240_v2  ;;  %3706 = vmatprep.subr.bf16.mxu0 %v4161_v3  ;;  %4136 = vmatprep.subr.bf16.mxu1 %v4161_v3  ;;  %v4325_v13 = vld [vmem:[%s4305_s27 + $0x80] sm:$0xff]  ;;  %v4328_v14 = vld [vmem:[%s4305_s27 + $0x88] sm:$0xff]  ;;  %v4436_v43 = vpack.c.bf16 %v4318_v11, %v4315_v10 }
  0x13   : > { %283 = vst [vmem:[#allocation2 + $0x70] sm:$0x3] %v4240_v2  ;;  %284 = vst [vmem:[#allocation2 + $0x78] sm:$0xff] %v4240_v2  ;;  %v420_v5 = vld [vmem:[#allocation2 + $0x1] sm:$0xff]  ;;  %3734 = vmatprep.mubr.bf16.mxu1 %v4320_v12  ;;  %v4340_v17 = vld [vmem:[%s4305_s27 + $0x10] sm:$0xff]  ;;  %v4440_v44 = vpack.c.bf16 %v4328_v14, %v4325_v13 }
  0x14   : > { %285 = vst [vmem:[#allocation2 + $0x80] sm:$0xff] %v4240_v2  ;;  %286 = vst [vmem:[#allocation2 + $0x88] sm:$0x3] %v4240_v2  ;;  %v421_v6 = vld [vmem:[#allocation2 + $0x9] sm:$0xff]  ;;  %v4343_v18 = vld [vmem:[%s4305_s27 + $0x18] sm:$0xff] }
  0x15   : > { %287 = vst [vmem:[#allocation2 + $0x90] sm:$0xff] %v4240_v2  ;;  %288 = vst [vmem:[#allocation2 + $0x98] sm:$0xff] %v4240_v2  ;;  %v452_v8 = vpack.c.bf16 %v421_v6, %v420_v5  ;;  %3707 = vmatpush3.bf16.msra.mxu0 %v4161_v3  ;;  %4144 = vmatpush3.bf16.msra.mxu1 %v4161_v3  ;;  %v4347_v19 = vld [vmem:[%s4305_s27 + $0x90] sm:$0xff]  ;;  %v4350_v20 = vld [vmem:[%s4305_s27 + $0x98] sm:$0xff]  ;;  %v4457_v49 = vpack.c.bf16 %v4343_v18, %v4340_v17 }
  0x16   : > { %289 = vst [vmem:[#allocation2 + $0xa0] sm:$0x3] %v4240_v2  ;;  %290 = vst [vmem:[#allocation2 + $0xa8] sm:$0xff] %v4240_v2  ;;  %3708 = vmatprep.subr.bf16.mxu0 %v4162_v4  ;;  %4137 = vmatprep.subr.bf16.mxu1 %v4162_v4  ;;  %v4356_v21 = vld [vmem:[%s4305_s27 + $0x20] sm:$0xff]  ;;  %v4359_v22 = vld [vmem:[%s4305_s27 + $0x28] sm:$0xff]  ;;  %v4461_v50 = vpack.c.bf16 %v4350_v20, %v4347_v19 }
  0x17   : > { %291 = vst [vmem:[#allocation2 + $0xb0] sm:$0xff] %v4240_v2  ;;  %292 = vst [vmem:[#allocation2 + $0xb8] sm:$0x3] %v4240_v2  ;;  %3718 = vmatprep.mubr.bf16.mxu0 %v452_v8  ;;  %v4362_v23 = vld [vmem:[%s4305_s27 + $0xa0] sm:$0xff]  ;;  %v4367_v24 = vld [vmem:[%s4305_s27 + $0xa8] sm:$0xff]  ;;  %v4475_v53 = vpack.c.bf16 %v4359_v22, %v4356_v21 }
  0x18   : > { %293 = vst [vmem:[#allocation2 + $0xc0] sm:$0xff] %v4240_v2  ;;  %294 = vst [vmem:[#allocation2 + $0xc8] sm:$0xff] %v4240_v2  ;;  %v4375_v26 = vld [vmem:[%s4305_s27 + $0x30] sm:$0xff]  ;;  %v4378_v27 = vld [vmem:[%s4305_s27 + $0x38] sm:$0xff]  ;;  %v4479_v54 = vpack.c.bf16 %v4367_v24, %v4362_v23 }
  0x19   : > { %295 = vst [vmem:[#allocation2 + $0xd0] sm:$0x3] %v4240_v2  ;;  %296 = vst [vmem:[#allocation2 + $0xd8] sm:$0xff] %v4240_v2  ;;  %3709 = vmatpush3.bf16.msra.mxu0 %v4162_v4  ;;  %4145 = vmatpush3.bf16.msra.mxu1 %v4162_v4  ;;  %v4383_v28 = vld [vmem:[%s4305_s27 + $0xb0] sm:$0xff]  ;;  %v4386_v29 = vld [vmem:[%s4305_s27 + $0xb8] sm:$0xff]  ;;  %v4489_v57 = vpack.c.bf16 %v4378_v27, %v4375_v26 }
  0x1a   : > { %297 = vst [vmem:[#allocation2 + $0xe0] sm:$0xff] %v4240_v2  ;;  %298 = vst [vmem:[#allocation2 + $0xe8] sm:$0x3] %v4240_v2  ;;  %3710 = vmatprep.subr.bf16.mxu0 %v4163_v15  ;;  %4138 = vmatprep.subr.bf16.mxu1 %v4163_v15  ;;  %v4389_v30 = vld [vmem:[%s4305_s27 + $0x40] sm:$0xff]  ;;  %v4394_v31 = vld [vmem:[%s4305_s27 + $0x48] sm:$0xff]  ;;  %v4493_v58 = vpack.c.bf16 %v4386_v29, %v4383_v28 }
  0x1b   : > { %299 = vst [vmem:[#allocation2 + $0xf0] sm:$0xff] %v4240_v2  ;;  %300 = vst [vmem:[#allocation2 + $0xf8] sm:$0xff] %v4240_v2  ;;  %v4398_v32 = vld [vmem:[%s4305_s27 + $0xc0] sm:$0xff]  ;;  %v4401_v33 = vld [vmem:[%s4305_s27 + $0xc8] sm:$0xff]  ;;  %v4507_v61 = vpack.c.bf16 %v4394_v31, %v4389_v30 }
  0x1c   : > { %301 = vst [vmem:[#allocation2 + $0x100] sm:$0x3] %v4240_v2  ;;  %302 = vst [vmem:[#allocation2 + $0x108] sm:$0xff] %v4240_v2  ;;  %v4416_v37 = vld [vmem:[%s4305_s27 + $0x50] sm:$0xff]  ;;  %v4419_v38 = vld [vmem:[%s4305_s27 + $0x58] sm:$0xff]  ;;  %v4511_v62 = vpack.c.bf16 %v4401_v33, %v4398_v32 }
  0x1d   : > { %303 = vst [vmem:[#allocation2 + $0x110] sm:$0xff] %v4240_v2  ;;  %304 = vst [vmem:[#allocation2 + $0x118] sm:$0x3] %v4240_v2  ;;  %3711 = vmatpush3.bf16.msra.mxu0 %v4163_v15  ;;  %4146 = vmatpush3.bf16.msra.mxu1 %v4163_v15  ;;  %v4422_v39 = vld [vmem:[%s4305_s27 + $0xd0] sm:$0xff]  ;;  %v264_v40 = vld [vmem:[%s4305_s27 + $0xd8] sm:$0xff]  ;;  %v4521_v1 = vpack.c.bf16 %v4419_v38, %v4416_v37 }
  0x1e   : > { %305 = vst [vmem:[#allocation2 + $0x120] sm:$0xff] %v4240_v2  ;;  %306 = vst [vmem:[#allocation2 + $0x128] sm:$0xff] %v4240_v2  ;;  %3712 = vmatprep.subr.bf16.mxu0 %v4164_v16  ;;  %4139 = vmatprep.subr.bf16.mxu1 %v4164_v16  ;;  %v4429_v41 = vld [vmem:[%s4305_s27 + $0x60] sm:$0xff]  ;;  %v4432_v42 = vld [vmem:[%s4305_s27 + $0x68] sm:$0xff] }
  0x1f   : > { %307 = vst [vmem:[#allocation2 + $0x130] sm:$0x3] %v4240_v2  ;;  %308 = vst [vmem:[#allocation2 + $0x138] sm:$0xff] %v4240_v2  ;;  %v4445_v45 = vld [vmem:[%s4305_s27 + $0xe0] sm:$0xff]  ;;  %v266_v46 = vld [vmem:[%s4305_s27 + $0xe8] sm:$0xff]  ;;  %v4538_v5 = vpack.c.bf16 %v4432_v42, %v4429_v41 }
  0x20   : > { %309 = vst [vmem:[#allocation2 + $0x140] sm:$0xff] %v4240_v2  ;;  %310 = vst [vmem:[#allocation2 + $0x148] sm:$0x3] %v4240_v2  ;;  %v4170_v48 = vld [vmem:[%s5381_s3 + $0xb0] sm:$0xff]   ;;  %v4171_v51 = vld [vmem:[%s5381_s3 + $0x28] sm:$0xff]   ;;  %v4541_v6 = vpack.c.bf16 %v266_v46, %v4445_v45 }
  0x21   : > { %311 = vst [vmem:[#allocation2 + $0x150] sm:$0xff] %v4240_v2  ;;  %312 = vst [vmem:[#allocation2 + $0x158] sm:$0xff] %v4240_v2  ;;  %3713 = vmatpush3.bf16.msra.mxu0 %v4164_v16  ;;  %4147 = vmatpush3.bf16.msra.mxu1 %v4164_v16  ;;  %v4172_v52 = vld [vmem:[%s5381_s3 + $0xa8] sm:$0xff]   ;;  %v4173_v55 = vld [vmem:[%s5381_s3 + $0x20] sm:$0xff]  }
  0x22   : > { %313 = vst [vmem:[#allocation2 + $0x160] sm:$0x3] %v4240_v2  ;;  %314 = vst [vmem:[#allocation2 + $0x168] sm:$0xff] %v4240_v2  ;;  %3714 = vmatprep.subr.bf16.mxu0 %v4165_v25  ;;  %4140 = vmatprep.subr.bf16.mxu1 %v4165_v25  ;;  %v4174_v56 = vld [vmem:[%s5381_s3 + $0xa0] sm:$0xff]   ;;  %v4175_v59 = vld [vmem:[%s5381_s3 + $0x18] sm:$0xff]  }
  0x23   : > { %315 = vst [vmem:[#allocation2 + $0x170] sm:$0xff] %v4240_v2  ;;  %316 = vst [vmem:[#allocation2 + $0x178] sm:$0x3] %v4240_v2  ;;  %v4176_v60 = vld [vmem:[%s5381_s3 + $0x98] sm:$0xff]   ;;  %v4177_v63 = vld [vmem:[%s5381_s3 + $0x10] sm:$0xff]  }
  0x24   : > { %317 = vst [vmem:[#allocation2 + $0x180] sm:$0xff] %v4240_v2  ;;  %318 = vst [vmem:[#allocation2 + $0x188] sm:$0xff] %v4240_v2  ;;  %v4178_v0 = vld [vmem:[%s5381_s3 + $0x90] sm:$0xff]   ;;  %v4179_v3 = vld [vmem:[%s5381_s3 + $0x8] sm:$0xff]  }
  0x25   : > { %319 = vst [vmem:[#allocation2 + $0x190] sm:$0x3] %v4240_v2  ;;  %320 = vst [vmem:[#allocation2 + $0x198] sm:$0xff] %v4240_v2  ;;  %3715 = vmatpush3.bf16.msra.mxu0 %v4165_v25  ;;  %4148 = vmatpush3.bf16.msra.mxu1 %v4165_v25  ;;  %v4180_v4 = vld [vmem:[%s5381_s3 + $0x88] sm:$0xff]  }
  0x26   : > { %321 = vst [vmem:[#allocation2 + $0x1a0] sm:$0xff] %v4240_v2  ;;  %322 = vst [vmem:[#allocation2 + $0x1a8] sm:$0x3] %v4240_v2  ;;  %3716 = vmatprep.subr.bf16.mxu0 %v4166_v34  ;;  %4141 = vmatprep.subr.bf16.mxu1 %v4166_v34  ;;  %v4524_v2 = vpack.c.bf16 %v264_v40, %v4422_v39  ;;  %v904_v8 = vld [vmem:[#allocation2 + $0xa] sm:$0xff] }
  0x27   : > { %338 = vst [vmem:[#allocation2 + $0xc1] sm:$0xff] %v251_v7  ;;  %339 = vst [vmem:[#allocation2 + $0xc9] sm:$0xff] %v252_v9  ;;  %v903_v7 = vld [vmem:[#allocation2 + $0x2] sm:$0xff] }
  0x28   : > { %324 = vst [vmem:[#allocation2 + $0x19] sm:$0xff] %v4315_v10  ;;  %325 = vst [vmem:[#allocation2 + $0x21] sm:$0xff] %v4318_v11  ;;  %v4181_v9 = vld [vmem:[%s5381_s3] sm:$0xff]   ;;  %v935_v11 = vpack.c.bf16 %v904_v8, %v903_v7 }
  0x29   : > { %340 = vst [vmem:[#allocation2 + $0xd9] sm:$0xff] %v4325_v13  ;;  %341 = vst [vmem:[#allocation2 + $0xe1] sm:$0xff] %v4328_v14  ;;  %3717 = vmatpush3.bf16.msra.mxu0 %v4166_v34  ;;  %4149 = vmatpush3.bf16.msra.mxu1 %v4166_v34  ;;  %v4182_v10 = vld [vmem:[%s5381_s3 + $0x80] sm:$0xff]  }
  0x2a   : > { %326 = vst [vmem:[#allocation2 + $0x31] sm:$0xff] %v4340_v17  ;;  %327 = vst [vmem:[#allocation2 + $0x39] sm:$0xff] %v4343_v18  ;;  %3750 = vmatprep.subr.bf16.mxu1 %v4167_v35  ;;  %3798 = vmatprep.subr.bf16.mxu0 %v4168_v36  ;;  %v4183_v17 = vld [vmem:[%s5381_s3 + $0xf8] sm:$0xff]  }
  0x2b   : > { %342 = vst [vmem:[#allocation2 + $0xf1] sm:$0xff] %v4347_v19  ;;  %343 = vst [vmem:[#allocation2 + $0xf9] sm:$0xff] %v4350_v20  ;;  %v4184_v18 = vld [vmem:[%s5381_s3 + $0x138] sm:$0xff]  }
  0x2c   : > { %328 = vst [vmem:[#allocation2 + $0x49] sm:$0xff] %v4356_v21  ;;  %329 = vst [vmem:[#allocation2 + $0x51] sm:$0xff] %v4359_v22  ;;  %3719 = vmatmul.mubr.bf16.vlgmr.msra.gmra.mxu0 %v4436_v43  ;;  %3735 = vmatmul.mubr.bf16.vlgmr.msra.gmra.mxu1 %v4440_v44  ;;  %v4241_v22 = vmov 0.0|0.0  }
  0x2d   : > { %344 = vst [vmem:[#allocation2 + $0x109] sm:$0xff] %v4362_v23  ;;  %345 = vst [vmem:[#allocation2 + $0x111] sm:$0xff] %v4367_v24  ;;  %3751 = vmatpush3.bf16.msra.mxu1 %v4167_v35  ;;  %3799 = vmatpush3.bf16.msra.mxu0 %v4168_v36 }
  0x2e   : > { %330 = vst [vmem:[#allocation2 + $0x61] sm:$0xff] %v4375_v26  ;;  %331 = vst [vmem:[#allocation2 + $0x69] sm:$0xff] %v4378_v27  ;;  %3752 = vmatprep.subr.bf16.mxu1 %v4169_v47  ;;  %3800 = vmatprep.subr.bf16.mxu0 %v4170_v48 }
  0x2f   : > { %346 = vst [vmem:[#allocation2 + $0x121] sm:$0xff] %v4383_v28  ;;  %347 = vst [vmem:[#allocation2 + $0x129] sm:$0xff] %v4386_v29  ;;  %3722 = vmatprep.mubr.bf16.mxu0 %v4457_v49  ;;  %3738 = vmatprep.mubr.bf16.mxu1 %v4461_v50  ;;  %v358_v13 = vld [vmem:[#allocation2 + $0x18] sm:$0xff]  ;;  %v359_v14 = vld [vmem:[#allocation2 + $0x20] sm:$0xff] }
  0x30   : > { %332 = vst [vmem:[#allocation2 + $0x79] sm:$0xff] %v4389_v30  ;;  %333 = vst [vmem:[#allocation2 + $0x81] sm:$0xff] %v4394_v31  ;;  %v905_v15 = vld [vmem:[#allocation2 + $0x1a] sm:$0xff]  ;;  %v906_v16 = vld [vmem:[#allocation2 + $0x22] sm:$0xff]  ;;  %v4557_v24 = vpack.c.bf16 %v359_v14, %v358_v13 }
  0x31   : > { %348 = vst [vmem:[#allocation2 + $0x139] sm:$0xff] %v4398_v32  ;;  %349 = vst [vmem:[#allocation2 + $0x141] sm:$0xff] %v4401_v33  ;;  %3753 = vmatpush3.bf16.msra.mxu1 %v4169_v47  ;;  %3801 = vmatpush3.bf16.msra.mxu0 %v4170_v48  ;;  %v360_v19 = vld [vmem:[#allocation2 + $0x30] sm:$0xff]  ;;  %v361_v20 = vld [vmem:[#allocation2 + $0x38] sm:$0xff]  ;;  %v4559_v25 = vpack.c.bf16 %v906_v16, %v905_v15 }
  0x32   : > { %334 = vst [vmem:[#allocation2 + $0x91] sm:$0xff] %v4416_v37  ;;  %335 = vst [vmem:[#allocation2 + $0x99] sm:$0xff] %v4419_v38  ;;  %3754 = vmatprep.subr.bf16.mxu1 %v4171_v51  ;;  %3802 = vmatprep.subr.bf16.mxu0 %v4172_v52  ;;  %v907_v21 = vld [vmem:[#allocation2 + $0x32] sm:$0xff]  ;;  %v908_v23 = vld [vmem:[#allocation2 + $0x3a] sm:$0xff]  ;;  %v4561_v26 = vpack.c.bf16 %v361_v20, %v360_v19 }
  0x33   : > { %350 = vst [vmem:[#allocation2 + $0x151] sm:$0xff] %v4422_v39  ;;  %351 = vst [vmem:[#allocation2 + $0x159] sm:$0xff] %v264_v40  ;;  %v4563_v27 = vpack.c.bf16 %v908_v23, %v907_v21  ;;  %v4185_v28 = vld [vmem:[%s5381_s3 + $0xf0] sm:$0xff]   ;;  %v362_v29 = vld [vmem:[#allocation2 + $0x48] sm:$0xff] }
  0x34   : > { %336 = vst [vmem:[#allocation2 + $0xa9] sm:$0xff] %v4429_v41  ;;  %337 = vst [vmem:[#allocation2 + $0xb1] sm:$0xff] %v4432_v42  ;;  %3723 = vmatmul.mubr.bf16.gmra.mxu0 %v4475_v53  ;;  %3739 = vmatmul.mubr.bf16.gmra.mxu1 %v4479_v54  ;;  %v363_v30 = vld [vmem:[#allocation2 + $0x50] sm:$0xff]  ;;  %v4187_v38 = vld [vmem:[%s5381_s3 + $0xe8] sm:$0xff]  }
  0x35   : > { %352 = vst [vmem:[#allocation2 + $0x169] sm:$0xff] %v4445_v45  ;;  %353 = vst [vmem:[#allocation2 + $0x171] sm:$0xff] %v266_v46  ;;  %3755 = vmatpush3.bf16.msra.mxu1 %v4171_v51  ;;  %3803 = vmatpush3.bf16.msra.mxu0 %v4172_v52  ;;  %v4186_v31 = vld [vmem:[%s5381_s3 + $0x130] sm:$0xff]   ;;  %v364_v34 = vld [vmem:[#allocation2 + $0x60] sm:$0xff]  ;;  %v4581_v40 = vpack.c.bf16 %v363_v30, %v362_v29 }
  0x36   : > { %3756 = vmatprep.subr.bf16.mxu1 %v4173_v55  ;;  %3804 = vmatprep.subr.bf16.mxu0 %v4174_v56  ;;  %v909_v32 = vld [vmem:[#allocation2 + $0x4a] sm:$0xff]  ;;  %v910_v33 = vld [vmem:[#allocation2 + $0x52] sm:$0xff]  ;;  %v911_v36 = vld [vmem:[#allocation2 + $0x62] sm:$0xff] }
  0x37   : > { %3726 = vmatprep.mubr.bf16.mxu0 %v4489_v57  ;;  %3742 = vmatprep.mubr.bf16.mxu1 %v4493_v58  ;;  %v365_v35 = vld [vmem:[#allocation2 + $0x68] sm:$0xff]  ;;  %v4583_v41 = vpack.c.bf16 %v910_v33, %v909_v32  ;;  %v4189_v46 = vld [vmem:[%s5381_s3 + $0xe0] sm:$0xff]   ;;  %v366_v47 = vld [vmem:[#allocation2 + $0x78] sm:$0xff] }
  0x38   : > { %v912_v37 = vld [vmem:[#allocation2 + $0x6a] sm:$0xff]  ;;  %v4585_v42 = vpack.c.bf16 %v365_v35, %v364_v34  ;;  %v367_v48 = vld [vmem:[#allocation2 + $0x80] sm:$0xff]  ;;  %v374_v35 = vld [vmem:[#allocation2 + $0xd8] sm:$0xff] }
  0x39   : > { %3757 = vmatpush3.bf16.msra.mxu1 %v4173_v55  ;;  %3805 = vmatpush3.bf16.msra.mxu0 %v4174_v56  ;;  %v4188_v39 = vld [vmem:[%s5381_s3 + $0x128] sm:$0xff]   ;;  %v4587_v45 = vpack.c.bf16 %v912_v37, %v911_v36  ;;  %v913_v51 = vld [vmem:[#allocation2 + $0x7a] sm:$0xff]  ;;  %v368_v56 = vld [vmem:[#allocation2 + $0x90] sm:$0xff] }
  0x3a   : > { %3758 = vmatprep.subr.bf16.mxu1 %v4175_v59  ;;  %3806 = vmatprep.subr.bf16.mxu0 %v4176_v60  ;;  %v914_v52 = vld [vmem:[#allocation2 + $0x82] sm:$0xff]  ;;  %v4194_v16 = vld [vmem:[%s5381_s3 + $0x110] sm:$0xff]   ;;  %v921_v37 = vld [vmem:[#allocation2 + $0xda] sm:$0xff] }
  0x3b   : > { %v4190_v55 = vld [vmem:[%s5381_s3 + $0x120] sm:$0xff]   ;;  %v4607_v7 = vpack.c.bf16 %v914_v52, %v913_v51  ;;  %v371_v13 = vld [vmem:[#allocation2 + $0xb0] sm:$0xff]  ;;  %v4195_v21 = vld [vmem:[%s5381_s3 + $0xc8] sm:$0xff]  }
  0x3c   : > { %3727 = vmatmul.mubr.bf16.gmra.mxu0 %v4507_v61  ;;  %3743 = vmatmul.mubr.bf16.gmra.mxu1 %v4511_v62  ;;  %v917_v14 = vld [vmem:[#allocation2 + $0xaa] sm:$0xff]  ;;  %v918_v15 = vld [vmem:[#allocation2 + $0xb2] sm:$0xff]  ;;  %v919_v19 = vld [vmem:[#allocation2 + $0xc2] sm:$0xff] }
  0x3d   : > { %3759 = vmatpush3.bf16.msra.mxu1 %v4175_v59  ;;  %3807 = vmatpush3.bf16.msra.mxu0 %v4176_v60  ;;  %v369_v59 = vld [vmem:[#allocation2 + $0x98] sm:$0xff]  ;;  %v920_v20 = vld [vmem:[#allocation2 + $0xca] sm:$0xff]  ;;  %v4633_v30 = vpack.c.bf16 %v918_v15, %v917_v14  ;;  %v4197_v34 = vld [vmem:[%s5381_s3 + $0xc0] sm:$0xff]  }
  0x3e   : > { %3760 = vmatprep.subr.bf16.mxu1 %v4177_v63  ;;  %3808 = vmatprep.subr.bf16.mxu0 %v4178_v0  ;;  %v915_v60 = vld [vmem:[#allocation2 + $0x92] sm:$0xff]  ;;  %v4609_v8 = vpack.c.bf16 %v369_v59, %v368_v56  ;;  %v4639_v33 = vpack.c.bf16 %v920_v20, %v919_v19  ;;  %v375_v36 = vld [vmem:[#allocation2 + $0xe0] sm:$0xff]  ;;  %v381_v14 = vld [vmem:[#allocation2 + $0x128] sm:$0xff] }
  0x3f   : > { %3730 = vmatprep.mubr.bf16.mxu0 %v4521_v1  ;;  %3746 = vmatprep.mubr.bf16.mxu1 %v4524_v2  ;;  %v267_v23 = vld [vmem:[%s4305_s27 + $0xf0] sm:$0xff]  ;;  %v924_v51 = vld [vmem:[#allocation2 + $0xfa] sm:$0xff]  ;;  %v4657_v56 = vpack.c.bf16 %v375_v36, %v374_v35  ;;  %v927_v15 = vld [vmem:[#allocation2 + $0x122] sm:$0xff] }
  0x40   : > { %354 = vst [vmem:[#allocation2 + $0x181] sm:$0xff] %v267_v23  ;;  %v4199_v52 = vld [vmem:[%s5381_s3 + $0x178] sm:$0xff]  }
  0x41   : > { %3761 = vmatpush3.bf16.msra.mxu1 %v4177_v63  ;;  %3809 = vmatpush3.bf16.msra.mxu0 %v4178_v0  ;;  %v916_v63 = vld [vmem:[#allocation2 + $0x9a] sm:$0xff]  ;;  %v931_v36 = vld [vmem:[#allocation2 + $0x152] sm:$0xff] }
  0x42   : > { %3762 = vmatprep.subr.bf16.mxu1 %v4179_v3  ;;  %3810 = vmatprep.subr.bf16.mxu0 %v4180_v4  ;;  %v4191_v0 = vld [vmem:[%s5381_s3 + $0xd8] sm:$0xff]  }
  0x43   : > { %v385_v35 = vld [vmem:[#allocation2 + $0x158] sm:$0xff] }
  0x44   : > { %3731 = vmatmul.mubr.bf16.gmra.mxu0 %v4538_v5  ;;  %3747 = vmatmul.mubr.bf16.gmra.mxu1 %v4541_v6 }
  0x45   : > { %3763 = vmatpush3.bf16.msra.mxu1 %v4179_v3  ;;  %3811 = vmatpush3.bf16.msra.mxu0 %v4180_v4  ;;  %v4192_v3 = vld [vmem:[%s5381_s3 + $0x118] sm:$0xff]   ;;  %v4605_v4 = vpack.c.bf16 %v367_v48, %v366_v47 }
  0x46   : > { %3764 = vmatprep.subr.bf16.mxu1 %v4181_v9  ;;  %3812 = vmatprep.subr.bf16.mxu0 %v4182_v10  ;;  %v377_v47 = vld [vmem:[#allocation2 + $0xf8] sm:$0xff] }
  0x47   : > { %3766 = vmatprep.mubr.bf16.mxu1 %v4241_v22  ;;  %3814 = vmatprep.mubr.bf16.mxu0 %v935_v11  ;;  %v370_v11 = vld [vmem:[#allocation2 + $0xa8] sm:$0xff]  ;;  %v923_v48 = vld [vmem:[#allocation2 + $0xf2] sm:$0xff] }
  0x48   : > { %v4196_v22 = vld [vmem:[%s5381_s3 + $0x108] sm:$0xff]   ;;  %v4631_v29 = vpack.c.bf16 %v371_v13, %v370_v11  ;;  %v926_v11 = vld [vmem:[#allocation2 + $0x112] sm:$0xff]  ;;  %v380_v13 = vld [vmem:[#allocation2 + $0x120] sm:$0xff] }
  0x49   : > { %3765 = vmatpush3.bf16.msra.mxu1 %v4181_v9  ;;  %3813 = vmatpush3.bf16.msra.mxu0 %v4182_v10  ;;  %v4611_v9 = vpack.c.bf16 %v916_v63, %v915_v60  ;;  %v4193_v10 = vld [vmem:[%s5381_s3 + $0xd0] sm:$0xff]   ;;  %v4663_v63 = vpack.c.bf16 %v924_v51, %v923_v48  ;;  %v4673_v19 = vpack.c.bf16 %v381_v14, %v380_v13  ;;  %v386_v48 = vld [vmem:[#allocation2 + $0x168] sm:$0xff] }
  0x4a   : > { %3846 = vmatprep.subr.bf16.mxu1 %v4183_v17  ;;  %3894 = vmatprep.subr.bf16.mxu0 %v4184_v18  ;;  %v387_v51 = vld [vmem:[#allocation2 + $0x170] sm:$0xff] }
  0x4b   : > { %v4201_v13 = vld [vmem:[%s5381_s3 + $0x170] sm:$0xff]  }
  0x4c   : > { %3767 = vmatmul.mubr.bf16.vlgmr.msra.gmra.mxu1 %v4557_v24  ;;  %3815 = vmatmul.mubr.bf16.vlgmr.msra.gmra.mxu0 %v4559_v25  ;;  %v4202_v14 = vld [vmem:[%s5381_s3 + $0x1b0] sm:$0xff]  }
  0x4d   : > { %3847 = vmatpush3.bf16.msra.mxu1 %v4183_v17  ;;  %3895 = vmatpush3.bf16.msra.mxu0 %v4184_v18  ;;  %v372_v17 = vld [vmem:[#allocation2 + $0xc0] sm:$0xff]  ;;  %v373_v18 = vld [vmem:[#allocation2 + $0xc8] sm:$0xff] }
  0x4e   : > { %3770 = vmatprep.mubr.bf16.mxu1 %v4561_v26  ;;  %3818 = vmatprep.mubr.bf16.mxu0 %v4563_v27  ;;  %v4637_v32 = vpack.c.bf16 %v373_v18, %v372_v17 }
  0x4f   : > { %3848 = vmatprep.subr.bf16.mxu1 %v4185_v28  ;;  %3896 = vmatprep.subr.bf16.mxu0 %v4186_v31 }
  0x51   : > { %3849 = vmatpush3.bf16.msra.mxu1 %v4185_v28  ;;  %3897 = vmatpush3.bf16.msra.mxu0 %v4186_v31  ;;  %v268_v28 = vld [vmem:[%s4305_s27 + $0xf8] sm:$0xff] }
  0x52   : > { %3850 = vmatprep.subr.bf16.mxu1 %v4187_v38  ;;  %3898 = vmatprep.subr.bf16.mxu0 %v4188_v39  ;;  %355 = vst [vmem:[#allocation2 + $0x189] sm:$0xff] %v268_v28  ;;  %v4635_v31 = vpack.c.bf16 %v268_v28, %v267_v23  ;;  %v929_v23 = vld [vmem:[#allocation2 + $0x13a] sm:$0xff]  ;;  %v930_v28 = vld [vmem:[#allocation2 + $0x142] sm:$0xff] }
  0x54   : > { %3771 = vmatmul.mubr.bf16.gmra.mxu1 %v4581_v40  ;;  %3819 = vmatmul.mubr.bf16.gmra.mxu0 %v4583_v41 }
  0x55   : > { %3774 = vmatprep.mubr.bf16.mxu1 %v4585_v42  ;;  %3822 = vmatprep.mubr.bf16.mxu0 %v4587_v45 }
  0x56   : > { %3851 = vmatpush3.bf16.msra.mxu1 %v4187_v38  ;;  %3899 = vmatpush3.bf16.msra.mxu0 %v4188_v39  ;;  %v922_v38 = vld [vmem:[#allocation2 + $0xe2] sm:$0xff] }
  0x57   : > { %3852 = vmatprep.subr.bf16.mxu1 %v4189_v46  ;;  %3900 = vmatprep.subr.bf16.mxu0 %v4190_v55  ;;  %v4198_v39 = vld [vmem:[%s5381_s3 + $0x100] sm:$0xff]   ;;  %v4659_v59 = vpack.c.bf16 %v922_v38, %v921_v37 }
  0x58   : > { %v932_v37 = vld [vmem:[#allocation2 + $0x15a] sm:$0xff] }
  0x5a   : > { %3853 = vmatpush3.bf16.msra.mxu1 %v4189_v46  ;;  %3901 = vmatpush3.bf16.msra.mxu0 %v4190_v55  ;;  %v376_v46 = vld [vmem:[#allocation2 + $0xf0] sm:$0xff]  ;;  %v4200_v55 = vld [vmem:[%s5381_s3 + $0x1b8] sm:$0xff]  }
  0x5b   : > { %3854 = vmatprep.subr.bf16.mxu1 %v4191_v0  ;;  %3902 = vmatprep.subr.bf16.mxu0 %v4192_v3  ;;  %v4661_v60 = vpack.c.bf16 %v377_v47, %v376_v46  ;;  %v4687_v47 = vpack.c.bf16 %v932_v37, %v931_v36  ;;  %v1851_v36 = vld [vmem:[#allocation2 + $0x182] sm:$0xff]  ;;  %v1852_v37 = vld [vmem:[#allocation2 + $0x18a] sm:$0xff] }
  0x5c   : > { %3775 = vmatmul.mubr.bf16.gmra.mxu1 %v4605_v4  ;;  %3823 = vmatmul.mubr.bf16.gmra.mxu0 %v4607_v7 }
  0x5d   : > { %3778 = vmatprep.mubr.bf16.mxu1 %v4609_v8  ;;  %3826 = vmatprep.mubr.bf16.mxu0 %v4611_v9 }
  0x5e   : > { %3855 = vmatpush3.bf16.msra.mxu1 %v4191_v0  ;;  %3903 = vmatpush3.bf16.msra.mxu0 %v4192_v3  ;;  %v378_v0 = vld [vmem:[#allocation2 + $0x108] sm:$0xff]  ;;  %v379_v3 = vld [vmem:[#allocation2 + $0x110] sm:$0xff] }
  0x5f   : > { %3856 = vmatprep.subr.bf16.mxu1 %v4193_v10  ;;  %3904 = vmatprep.subr.bf16.mxu0 %v4194_v16  ;;  %v4669_v17 = vpack.c.bf16 %v379_v3, %v378_v0  ;;  %v933_v0 = vld [vmem:[#allocation2 + $0x16a] sm:$0xff]  ;;  %v934_v3 = vld [vmem:[#allocation2 + $0x172] sm:$0xff] }
  0x62   : > { %3857 = vmatpush3.bf16.msra.mxu1 %v4193_v10  ;;  %3905 = vmatpush3.bf16.msra.mxu0 %v4194_v16  ;;  %v925_v10 = vld [vmem:[#allocation2 + $0x10a] sm:$0xff] }
  0x63   : > { %3858 = vmatprep.subr.bf16.mxu1 %v4195_v21  ;;  %3906 = vmatprep.subr.bf16.mxu0 %v4196_v22  ;;  %v928_v16 = vld [vmem:[#allocation2 + $0x12a] sm:$0xff]  ;;  %v4671_v18 = vpack.c.bf16 %v926_v11, %v925_v10  ;;  %v4693_v10 = vpack.c.bf16 %v387_v51, %v386_v48  ;;  %v4695_v11 = vpack.c.bf16 %v934_v3, %v933_v0  ;;  %v2435_v48 = vld [vmem:[#allocation2 + $0x39] sm:$0xff] }
  0x64   : > { %3779 = vmatmul.mubr.bf16.gmra.mxu1 %v4631_v29  ;;  %3827 = vmatmul.mubr.bf16.gmra.mxu0 %v4633_v30  ;;  %v4675_v20 = vpack.c.bf16 %v928_v16, %v927_v15  ;;  %v4211_v15 = vld [vmem:[%s5381_s3 + $0x148] sm:$0xff]   ;;  %v2740_v51 = vld [vmem:[#allocation2 + $0x32] sm:$0xff]  ;;  %v2741_v0 = vld [vmem:[#allocation2 + $0x3a] sm:$0xff] }
  0x65   : > { %3782 = vmatprep.mubr.bf16.mxu1 %v4637_v32  ;;  %3830 = vmatprep.mubr.bf16.mxu0 %v4639_v33  ;;  %v4212_v16 = vld [vmem:[%s5381_s3 + $0x188] sm:$0xff]  }
  0x66   : > { %3859 = vmatpush3.bf16.msra.mxu1 %v4195_v21  ;;  %3907 = vmatpush3.bf16.msra.mxu0 %v4196_v22  ;;  %v382_v21 = vld [vmem:[#allocation2 + $0x138] sm:$0xff]  ;;  %v383_v22 = vld [vmem:[#allocation2 + $0x140] sm:$0xff] }
  0x67   : > { %3860 = vmatprep.subr.bf16.mxu1 %v4197_v34  ;;  %3908 = vmatprep.subr.bf16.mxu0 %v4198_v39  ;;  %v4681_v38 = vpack.c.bf16 %v383_v22, %v382_v21  ;;  %v4215_v21 = vld [vmem:[%s5381_s3 + $0x1f8] sm:$0xff]  }
  0x68   : > { %v4216_v22 = vld [vmem:[%s5381_s3 + $0x238] sm:$0xff]  }
  0x6a   : > { %3861 = vmatpush3.bf16.msra.mxu1 %v4197_v34  ;;  %3909 = vmatpush3.bf16.msra.mxu0 %v4198_v39  ;;  %v384_v34 = vld [vmem:[#allocation2 + $0x150] sm:$0xff]  ;;  %v4683_v39 = vpack.c.bf16 %v930_v28, %v929_v23 }
  0x6b   : > { %3942 = vmatprep.subr.bf16.mxu1 %v4199_v52  ;;  %3990 = vmatprep.subr.bf16.mxu0 %v4200_v55  ;;  %v4685_v46 = vpack.c.bf16 %v385_v35, %v384_v34 }
  0x6c   : > { %3783 = vmatmul.mubr.bf16.gmra.mxu1 %v4657_v56  ;;  %3831 = vmatmul.mubr.bf16.gmra.mxu0 %v4659_v59 }
  0x6d   : > { %3786 = vmatprep.mubr.bf16.mxu1 %v4661_v60  ;;  %3834 = vmatprep.mubr.bf16.mxu0 %v4663_v63 }
  0x74   : > { %3787 = vmatmul.mubr.bf16.gmra.mxu1 %v4669_v17  ;;  %3835 = vmatmul.mubr.bf16.gmra.mxu0 %v4671_v18 }
  0x75   : > { %3790 = vmatprep.mubr.bf16.mxu1 %v4673_v19  ;;  %3838 = vmatprep.mubr.bf16.mxu0 %v4675_v20 }
  0x7c   : > { %3791 = vmatmul.mubr.bf16.gmra.mxu1 %v4681_v38  ;;  %3839 = vmatmul.mubr.bf16.gmra.mxu0 %v4683_v39 }
  0x7d   : > { %3794 = vmatprep.mubr.bf16.mxu1 %v4685_v46  ;;  %3842 = vmatprep.mubr.bf16.mxu0 %v4687_v47 }
  0x84   : > { %3795 = vmatmul.mubr.bf16.gmra.mxu1 %v4693_v10  ;;  %3843 = vmatmul.mubr.bf16.gmra.mxu0 %v4695_v11 }
  0x85   : > { %3862 = vmatprep.mubr.bf16.mxu1 %v4557_v24  ;;  %3910 = vmatprep.mubr.bf16.mxu0 %v4436_v43  ;;  %v4203_v43 = vld [vmem:[%s5381_s3 + $0x168] sm:$0xff]  }
  0x86   : > { %v4204_v24 = vld [vmem:[%s5381_s3 + $0x1a8] sm:$0xff]  }
  0x8c   : > { %3863 = vmatmul.mubr.bf16.vlgmr.msra.gmra.mxu1 %v4561_v26  ;;  %3911 = vmatmul.mubr.bf16.vlgmr.msra.gmra.mxu0 %v4457_v49  ;;  %v4205_v49 = vld [vmem:[%s5381_s3 + $0x160] sm:$0xff]  }
  0x8d   : > { %3943 = vmatpush3.bf16.msra.mxu1 %v4199_v52  ;;  %3991 = vmatpush3.bf16.msra.mxu0 %v4200_v55  ;;  %v4207_v52 = vld [vmem:[%s5381_s3 + $0x158] sm:$0xff]  }
  0x8e   : > { %3866 = vmatprep.mubr.bf16.mxu1 %v4581_v40  ;;  %3914 = vmatprep.mubr.bf16.mxu0 %v4475_v53  ;;  %v4206_v53 = vld [vmem:[%s5381_s3 + $0x1a0] sm:$0xff]   ;;  %v4208_v55 = vld [vmem:[%s5381_s3 + $0x198] sm:$0xff]  }
  0x8f   : > { %3944 = vmatprep.subr.bf16.mxu1 %v4201_v13  ;;  %3992 = vmatprep.subr.bf16.mxu0 %v4202_v14 }
  0x91   : > { %3945 = vmatpush3.bf16.msra.mxu1 %v4201_v13  ;;  %3993 = vmatpush3.bf16.msra.mxu0 %v4202_v14 }
  0x92   : > { %3946 = vmatprep.subr.bf16.mxu1 %v4203_v43  ;;  %3994 = vmatprep.subr.bf16.mxu0 %v4204_v24 }
  0x94   : > { %3867 = vmatmul.mubr.bf16.gmra.mxu1 %v4585_v42  ;;  %3915 = vmatmul.mubr.bf16.gmra.mxu0 %v4489_v57  ;;  %v4209_v57 = vld [vmem:[%s5381_s3 + $0x150] sm:$0xff]  }
  0x95   : > { %3870 = vmatprep.mubr.bf16.mxu1 %v4605_v4  ;;  %3918 = vmatprep.mubr.bf16.mxu0 %v4507_v61  ;;  %v4210_v61 = vld [vmem:[%s5381_s3 + $0x190] sm:$0xff]  }
  0x96   : > { %3947 = vmatpush3.bf16.msra.mxu1 %v4203_v43  ;;  %3995 = vmatpush3.bf16.msra.mxu0 %v4204_v24  ;;  %v2772_v43 = vpack.c.bf16 %v2741_v0, %v2740_v51  ;;  %v2749_v51 = vld [vmem:[#allocation2 + $0x9a] sm:$0xff] }
  0x97   : > { %3948 = vmatprep.subr.bf16.mxu1 %v4205_v49  ;;  %3996 = vmatprep.subr.bf16.mxu0 %v4206_v53 }
  0x9a   : > { %3949 = vmatpush3.bf16.msra.mxu1 %v4205_v49  ;;  %3997 = vmatpush3.bf16.msra.mxu0 %v4206_v53 }
  0x9b   : > { %3950 = vmatprep.subr.bf16.mxu1 %v4207_v52  ;;  %3998 = vmatprep.subr.bf16.mxu0 %v4208_v55 }
  0x9c   : > { %3871 = vmatmul.mubr.bf16.gmra.mxu1 %v4609_v8  ;;  %3919 = vmatmul.mubr.bf16.gmra.mxu0 %v4521_v1  ;;  %v4213_v1 = vld [vmem:[%s5381_s3 + $0x140] sm:$0xff]  }
  0x9d   : > { %3874 = vmatprep.mubr.bf16.mxu1 %v4631_v29  ;;  %3922 = vmatprep.mubr.bf16.mxu0 %v4538_v5  ;;  %v4214_v5 = vld [vmem:[%s5381_s3 + $0x180] sm:$0xff]  }
  0x9e   : > { %3951 = vmatpush3.bf16.msra.mxu1 %v4207_v52  ;;  %3999 = vmatpush3.bf16.msra.mxu0 %v4208_v55  ;;  %v2436_v55 = vld [vmem:[#allocation2 + $0x49] sm:$0xff] }
  0x9f   : > { %3952 = vmatprep.subr.bf16.mxu1 %v4209_v57  ;;  %4000 = vmatprep.subr.bf16.mxu0 %v4210_v61 }
  0xa2   : > { %3953 = vmatpush3.bf16.msra.mxu1 %v4209_v57  ;;  %4001 = vmatpush3.bf16.msra.mxu0 %v4210_v61  ;;  %v2437_v57 = vld [vmem:[#allocation2 + $0x51] sm:$0xff] }
  0xa3   : > { %3954 = vmatprep.subr.bf16.mxu1 %v4211_v15  ;;  %4002 = vmatprep.subr.bf16.mxu0 %v4212_v16  ;;  %v2742_v61 = vld [vmem:[#allocation2 + $0x4a] sm:$0xff] }
  0xa4   : > { %3875 = vmatmul.mubr.bf16.gmra.mxu1 %v4637_v32  ;;  %3923 = vmatmul.mubr.bf16.gmra.mxu0 %v4320_v12  ;;  %v1239_v12 = vld [vmem:[#allocation2 + $0x180] sm:$0xff] }
  0xa5   : > { %3878 = vmatprep.mubr.bf16.mxu1 %v4657_v56  ;;  %3926 = vmatprep.mubr.bf16.mxu0 %v4440_v44  ;;  %v1240_v44 = vld [vmem:[#allocation2 + $0x188] sm:$0xff] }
  0xa6   : > { %3955 = vmatpush3.bf16.msra.mxu1 %v4211_v15  ;;  %4003 = vmatpush3.bf16.msra.mxu0 %v4212_v16  ;;  %v2743_v15 = vld [vmem:[#allocation2 + $0x52] sm:$0xff]  ;;  %v2438_v16 = vld [vmem:[#allocation2 + $0x61] sm:$0xff] }
  0xa7   : > { %3956 = vmatprep.subr.bf16.mxu1 %v4213_v1  ;;  %4004 = vmatprep.subr.bf16.mxu0 %v4214_v5 }
  0xaa   : > { %3957 = vmatpush3.bf16.msra.mxu1 %v4213_v1  ;;  %4005 = vmatpush3.bf16.msra.mxu0 %v4214_v5 }
  0xab   : > { %4038 = vmatprep.subr.bf16.mxu1 %v4215_v21  ;;  %4086 = vmatprep.subr.bf16.mxu0 %v4216_v22 }
  0xac   : > { %3879 = vmatmul.mubr.bf16.gmra.mxu1 %v4661_v60  ;;  %3927 = vmatmul.mubr.bf16.gmra.mxu0 %v4461_v50  ;;  %v4777_v50 = vpack.c.bf16 %v1240_v44, %v1239_v12  ;;  %v2745_v12 = vld [vmem:[#allocation2 + $0x6a] sm:$0xff] }
  0xad   : > { %3882 = vmatprep.mubr.bf16.mxu1 %v4669_v17  ;;  %3930 = vmatprep.mubr.bf16.mxu0 %v4479_v54  ;;  %v4217_v54 = vld [vmem:[%s5381_s3 + $0x1f0] sm:$0xff]  }
  0xb4   : > { %3883 = vmatmul.mubr.bf16.gmra.mxu1 %v4673_v19  ;;  %3931 = vmatmul.mubr.bf16.gmra.mxu0 %v4493_v58  ;;  %v4218_v58 = vld [vmem:[%s5381_s3 + $0x230] sm:$0xff]  }
  0xb5   : > { %3886 = vmatprep.mubr.bf16.mxu1 %v4681_v38  ;;  %3934 = vmatprep.mubr.bf16.mxu0 %v4511_v62  ;;  %v4219_v62 = vld [vmem:[%s5381_s3 + $0x1e8] sm:$0xff]  }
  0xbc   : > { %3887 = vmatmul.mubr.bf16.gmra.mxu1 %v4685_v46  ;;  %3935 = vmatmul.mubr.bf16.gmra.mxu0 %v4524_v2  ;;  %v4220_v2 = vld [vmem:[%s5381_s3 + $0x228] sm:$0xff]  }
  0xbd   : > { %3890 = vmatprep.mubr.bf16.mxu1 %v4693_v10  ;;  %3938 = vmatprep.mubr.bf16.mxu0 %v4541_v6  ;;  %v4221_v6 = vld [vmem:[%s5381_s3 + $0x1e0] sm:$0xff]  }
  0xc4   : > { %3891 = vmatmul.mubr.bf16.gmra.mxu1 %v4777_v50  ;;  %3939 = vmatmul.mubr.bf16.gmra.mxu0 %v4635_v31 }
  0xc5   : > { %3958 = vmatprep.mubr.bf16.mxu1 %v4559_v25  ;;  %4006 = vmatprep.mubr.bf16.mxu0 %v4561_v26  ;;  %v4222_v25 = vld [vmem:[%s5381_s3 + $0x220] sm:$0xff]   ;;  %v4223_v26 = vld [vmem:[%s5381_s3 + $0x1d8] sm:$0xff]  }
  0xcc   : > { %3959 = vmatmul.mubr.bf16.vlgmr.msra.gmra.mxu1 %v4563_v27  ;;  %4007 = vmatmul.mubr.bf16.vlgmr.msra.gmra.mxu0 %v4581_v40  ;;  %v4224_v27 = vld [vmem:[%s5381_s3 + $0x218] sm:$0xff]   ;;  %v4225_v40 = vld [vmem:[%s5381_s3 + $0x1d0] sm:$0xff]  }
  0xcd   : > { %4039 = vmatpush3.bf16.msra.mxu1 %v4215_v21  ;;  %4087 = vmatpush3.bf16.msra.mxu0 %v4216_v22  ;;  %v2439_v21 = vld [vmem:[#allocation2 + $0x69] sm:$0xff] }
  0xce   : > { %3962 = vmatprep.mubr.bf16.mxu1 %v4583_v41  ;;  %4010 = vmatprep.mubr.bf16.mxu0 %v4585_v42  ;;  %v4226_v41 = vld [vmem:[%s5381_s3 + $0x210] sm:$0xff]   ;;  %v4227_v42 = vld [vmem:[%s5381_s3 + $0x1c8] sm:$0xff]  }
  0xcf   : > { %4040 = vmatprep.subr.bf16.mxu1 %v4217_v54  ;;  %4088 = vmatprep.subr.bf16.mxu0 %v4218_v58  ;;  %v2744_v22 = vld [vmem:[#allocation2 + $0x62] sm:$0xff] }
  0xd1   : > { %4041 = vmatpush3.bf16.msra.mxu1 %v4217_v54  ;;  %4089 = vmatpush3.bf16.msra.mxu0 %v4218_v58  ;;  %v2467_v54 = vpack.c.bf16 %v2437_v57, %v2436_v55  ;;  %v2773_v58 = vpack.c.bf16 %v2743_v15, %v2742_v61 }
  0xd2   : > { %4042 = vmatprep.subr.bf16.mxu1 %v4219_v62  ;;  %4090 = vmatprep.subr.bf16.mxu0 %v4220_v2 }
  0xd4   : > { %3963 = vmatmul.mubr.bf16.gmra.mxu1 %v4587_v45  ;;  %4011 = vmatmul.mubr.bf16.gmra.mxu0 %v4605_v4  ;;  %v4228_v45 = vld [vmem:[%s5381_s3 + $0x208] sm:$0xff]   ;;  %v4229_v4 = vld [vmem:[%s5381_s3 + $0x1c0] sm:$0xff]  }
  0xd5   : > { %3966 = vmatprep.mubr.bf16.mxu1 %v4607_v7  ;;  %4014 = vmatprep.mubr.bf16.mxu0 %v4609_v8  ;;  %v4230_v7 = vld [vmem:[%s5381_s3 + $0x200] sm:$0xff]  }
  0xd6   : > { %4043 = vmatpush3.bf16.msra.mxu1 %v4219_v62  ;;  %4091 = vmatpush3.bf16.msra.mxu0 %v4220_v2  ;;  %v2468_v62 = vpack.c.bf16 %v2439_v21, %v2438_v16  ;;  %v2774_v2 = vpack.c.bf16 %v2745_v12, %v2744_v22 }
  0xd7   : > { %4044 = vmatprep.subr.bf16.mxu1 %v4221_v6  ;;  %4092 = vmatprep.subr.bf16.mxu0 %v4222_v25 }
  0xda   : > { %4045 = vmatpush3.bf16.msra.mxu1 %v4221_v6  ;;  %4093 = vmatpush3.bf16.msra.mxu0 %v4222_v25 }
  0xdb   : > { %4046 = vmatprep.subr.bf16.mxu1 %v4223_v26  ;;  %4094 = vmatprep.subr.bf16.mxu0 %v4224_v27 }
  0xdc   : > { %3967 = vmatmul.mubr.bf16.gmra.mxu1 %v4611_v9  ;;  %4015 = vmatmul.mubr.bf16.gmra.mxu0 %v4631_v29 }
  0xdd   : > { %3970 = vmatprep.mubr.bf16.mxu1 %v4633_v30  ;;  %4018 = vmatprep.mubr.bf16.mxu0 %v4637_v32 }
  0xde   : > { %4047 = vmatpush3.bf16.msra.mxu1 %v4223_v26  ;;  %4095 = vmatpush3.bf16.msra.mxu0 %v4224_v27 }
  0xdf   : > { %4048 = vmatprep.subr.bf16.mxu1 %v4225_v40  ;;  %4096 = vmatprep.subr.bf16.mxu0 %v4226_v41 }
  0xe2   : > { %4049 = vmatpush3.bf16.msra.mxu1 %v4225_v40  ;;  %4097 = vmatpush3.bf16.msra.mxu0 %v4226_v41  ;;  %v2440_v40 = vld [vmem:[#allocation2 + $0x79] sm:$0xff]  ;;  %v2441_v41 = vld [vmem:[#allocation2 + $0x81] sm:$0xff] }
  0xe3   : > { %4050 = vmatprep.subr.bf16.mxu1 %v4227_v42  ;;  %4098 = vmatprep.subr.bf16.mxu0 %v4228_v45 }
  0xe4   : > { %3971 = vmatmul.mubr.bf16.gmra.mxu1 %v4639_v33  ;;  %4019 = vmatmul.mubr.bf16.gmra.mxu0 %v4657_v56 }
  0xe5   : > { %3974 = vmatprep.mubr.bf16.mxu1 %v4659_v59  ;;  %4022 = vmatprep.mubr.bf16.mxu0 %v4661_v60 }
  0xe6   : > { %4051 = vmatpush3.bf16.msra.mxu1 %v4227_v42  ;;  %4099 = vmatpush3.bf16.msra.mxu0 %v4228_v45  ;;  %v2746_v45 = vld [vmem:[#allocation2 + $0x7a] sm:$0xff] }
  0xe7   : > { %4052 = vmatprep.subr.bf16.mxu1 %v4229_v4  ;;  %4100 = vmatprep.subr.bf16.mxu0 %v4230_v7 }
  0xea   : > { %4053 = vmatpush3.bf16.msra.mxu1 %v4229_v4  ;;  %4101 = vmatpush3.bf16.msra.mxu0 %v4230_v7  ;;  %v2747_v4 = vld [vmem:[#allocation2 + $0x82] sm:$0xff]  ;;  %v2442_v7 = vld [vmem:[#allocation2 + $0x91] sm:$0xff] }
  0xeb   : > { %v2775_v55 = vpack.c.bf16 %v2747_v4, %v2746_v45  ;;  %v2447_v45 = vld [vmem:[#allocation2 + $0xc9] sm:$0xff] }
  0xec   : > { %v4841_v8 = vpop.f32.mrf.mxu0  ;;  %v4843_v9 = vpop.f32.mrf.mxu1  ;;  %3975 = vmatmul.mubr.bf16.gmra.mxu1 %v4663_v63  ;;  %4023 = vmatmul.mubr.bf16.gmra.mxu0 %v4669_v17  ;;  %v2752_v4 = vld [vmem:[#allocation2 + $0xc2] sm:$0xff] }
  0xed   : > { %3978 = vmatprep.mubr.bf16.mxu1 %v4671_v18  ;;  %4026 = vmatprep.mubr.bf16.mxu0 %v4673_v19 }
  0xee   : > { %v4849_v29 = vpop.f32.mrf.mxu0  ;;  %v4851_v30 = vpop.f32.mrf.mxu1 }
  0xf0   : > { %v4853_v32 = vpop.f32.mrf.mxu0  ;;  %v4855_v33 = vpop.f32.mrf.mxu1 }
  0xf2   : > { %v4857_v56 = vpop.f32.mrf.mxu0  ;;  %v4859_v59 = vpop.f32.mrf.mxu1 }
  0xf4   : > { %v4861_v60 = vpop.f32.mrf.mxu0  ;;  %v4863_v63 = vpop.f32.mrf.mxu1  ;;  %3979 = vmatmul.mubr.bf16.gmra.mxu1 %v4675_v20  ;;  %4027 = vmatmul.mubr.bf16.gmra.mxu0 %v4681_v38  ;;  %v2434_v38 = vld [vmem:[#allocation2 + $0x31] sm:$0xff] }
  0xf5   : > { %3982 = vmatprep.mubr.bf16.mxu1 %v4683_v39  ;;  %4030 = vmatprep.mubr.bf16.mxu0 %v4685_v46  ;;  %v2466_v14 = vpack.c.bf16 %v2435_v48, %v2434_v38  ;;  %v2443_v38 = vld [vmem:[#allocation2 + $0x99] sm:$0xff] }
  0xf6   : > { %v4869_v17 = vpop.f32.mrf.mxu0  ;;  %v4871_v18 = vpop.f32.mrf.mxu1  ;;  %v2748_v48 = vld [vmem:[#allocation2 + $0x92] sm:$0xff]  ;;  %v2470_v61 = vpack.c.bf16 %v2443_v38, %v2442_v7 }
  0xf7   : > { %v2776_v15 = vpack.c.bf16 %v2749_v51, %v2748_v48 }
  0xf8   : > { %v4873_v19 = vpop.f32.mrf.mxu0  ;;  %v4875_v23 = vpop.f32.mrf.mxu1 }
  0xfa   : > { %v4877_v28 = vpop.f32.mrf.mxu0  ;;  %v4879_v34 = vpop.f32.mrf.mxu1 }
  0xfc   : > { %v4881_v35 = vpop.f32.mrf.mxu0  ;;  %v4883_v20 = vpop.f32.mrf.mxu1  ;;  %3983 = vmatmul.mubr.bf16.gmra.mxu1 %v4687_v47  ;;  %4031 = vmatmul.mubr.bf16.gmra.mxu0 %v4693_v10  ;;  %v4897_v47 = vpack.c.bf16 %v1852_v37, %v1851_v36  ;;  %v4231_v10 = vld [vmem:[#allocation2] sm:$0xff] }
  0xfd   : > { %3986 = vmatprep.mubr.bf16.mxu1 %v4695_v11  ;;  %4034 = vmatprep.mubr.bf16.mxu0 %v4777_v50  ;;  %v2175_v11 = vpack.c.bf16 %v4231_v10, %v4231_v10 }
  0xfe   : > { %v4889_v39 = vpop.f32.mrf.mxu0  ;;  %v4891_v46 = vpop.f32.mrf.mxu1 }
 0x100   : > { %v4893_v3 = vpop.f32.mrf.mxu0  ;;  %v4895_v13 = vpop.f32.mrf.mxu1 }
 0x102   : > { %v4899_v24 = vpop.f32.mrf.mxu0  ;;  %v4901_v49 = vpop.f32.mrf.mxu1 }
 0x104   : > { %v4903_v53 = vpop.f32.mrf.mxu0  ;;  %v4905_v52 = vpop.f32.mrf.mxu1  ;;  %3987 = vmatmul.mubr.bf16.gmra.mxu1 %v4897_v47  ;;  %4035 = vmatmul.mubr.bf16.gmra.mxu0 %v2175_v11 }
 0x105   : > { %4054 = vmatprep.mubr.bf16.mxu1 %v2466_v14  ;;  %4102 = vmatprep.mubr.bf16.mxu0 %v2772_v43  ;;  %v2469_v43 = vpack.c.bf16 %v2441_v41, %v2440_v40  ;;  %v2446_v40 = vld [vmem:[#allocation2 + $0xc1] sm:$0xff] }
 0x106   : > { %v4908_v1 = vpop.f32.mrf.mxu0  ;;  %v4910_v5 = vpop.f32.mrf.mxu1 }
 0x108   : > { %v4912_v44 = vpop.f32.mrf.mxu0  ;;  %v4914_v50 = vpop.f32.mrf.mxu1 }
 0x10a   : > { %v4916_v6 = vpop.f32.mrf.mxu0  ;;  %v4918_v25 = vpop.f32.mrf.mxu1 }
 0x10c   : > { %v3768_v26 = vpop.f32.mrf.mxu1  ;;  %v3816_v27 = vpop.f32.mrf.mxu0  ;;  %4055 = vmatmul.mubr.bf16.vlgmr.msra.gmra.mxu1 %v2467_v54  ;;  %4103 = vmatmul.mubr.bf16.vlgmr.msra.gmra.mxu0 %v2773_v58 }
 0x10d   : > { %v785_v42 = vadd.f32 %v3768_v26, %v4841_v8  ;;  %4058 = vmatprep.mubr.bf16.mxu1 %v2468_v62  ;;  %4106 = vmatprep.mubr.bf16.mxu0 %v2774_v2  ;;  %v2445_v62 = vld [vmem:[#allocation2 + $0xb1] sm:$0xff] }
 0x10e   : > { %v776_v36 = vpop.f32.mrf.mxu1  ;;  %v1050_v37 = vpop.f32.mrf.mxu0 }
 0x10f   : > { %v4921_v0 = vadd.f32 %v3816_v27, %v785_v42  ;;  %v777_v10 = vadd.f32 %v776_v36, %v4849_v29  ;;  %v2444_v29 = vld [vmem:[#allocation2 + $0xa9] sm:$0xff]  ;;  %v2751_v27 = vld [vmem:[#allocation2 + $0xb2] sm:$0xff] }
 0x110   : > { %v3769_v11 = vpop.f32.mrf.mxu1  ;;  %v3817_v14 = vpop.f32.mrf.mxu0  ;;  %v2471_v48 = vpack.c.bf16 %v2445_v62, %v2444_v29  ;;  %v2450_v29 = vld [vmem:[#allocation2 + $0xf1] sm:$0xff] }
 0x111   : > { %v4924_v57 = vadd.f32 %v1050_v37, %v777_v10  ;;  %v788_v8 = vadd.f32 %v3769_v11, %v4853_v32  ;;  %v2750_v32 = vld [vmem:[#allocation2 + $0xaa] sm:$0xff]  ;;  %v2472_v11 = vpack.c.bf16 %v2447_v45, %v2446_v40 }
 0x112   : > { %v779_v16 = vpop.f32.mrf.mxu1  ;;  %v1053_v21 = vpop.f32.mrf.mxu0  ;;  %v2777_v51 = vpack.c.bf16 %v2751_v27, %v2750_v32  ;;  %v2451_v32 = vld [vmem:[#allocation2 + $0xf9] sm:$0xff] }
 0x113   : > { %v4927_v22 = vadd.f32 %v3817_v14, %v788_v8  ;;  %v780_v12 = vadd.f32 %v779_v16, %v4857_v56  ;;  %v2753_v56 = vld [vmem:[#allocation2 + $0xca] sm:$0xff]  ;;  %v2756_v27 = vld [vmem:[#allocation2 + $0xf2] sm:$0xff] }
 0x114   : > { %v3772_v54 = vpop.f32.mrf.mxu1  ;;  %v3820_v58 = vpop.f32.mrf.mxu0  ;;  %4059 = vmatmul.mubr.bf16.gmra.mxu1 %v2469_v43  ;;  %4107 = vmatmul.mubr.bf16.gmra.mxu0 %v2775_v55  ;;  %v2778_v14 = vpack.c.bf16 %v2753_v56, %v2752_v4 }
 0x115   : > { %v4930_v2 = vadd.f32 %v1053_v21, %v780_v12  ;;  %v801_v26 = vadd.f32 %v3772_v54, %v4861_v60  ;;  %4062 = vmatprep.mubr.bf16.mxu1 %v2470_v61  ;;  %4110 = vmatprep.mubr.bf16.mxu0 %v2776_v15  ;;  %v2449_v21 = vld [vmem:[#allocation2 + $0xe1] sm:$0xff] }
 0x116   : > { %v792_v41 = vpop.f32.mrf.mxu1  ;;  %v1066_v42 = vpop.f32.mrf.mxu0 }
 0x117   : > { %v4933_v7 = vadd.f32 %v3820_v58, %v801_v26  ;;  %v793_v36 = vadd.f32 %v792_v41, %v4869_v17  ;;  %v2448_v17 = vld [vmem:[#allocation2 + $0xd9] sm:$0xff]  ;;  %v2755_v58 = vld [vmem:[#allocation2 + $0xe2] sm:$0xff] }
 0x118   : > { %v3773_v37 = vpop.f32.mrf.mxu1  ;;  %v3821_v38 = vpop.f32.mrf.mxu0  ;;  %v2473_v4 = vpack.c.bf16 %v2449_v21, %v2448_v17  ;;  %v2454_v17 = vld [vmem:[#allocation2 + $0x121] sm:$0xff] }
 0x119   : > { %v4936_v10 = vadd.f32 %v1066_v42, %v793_v36  ;;  %v804_v60 = vadd.f32 %v3773_v37, %v4873_v19  ;;  %v2754_v19 = vld [vmem:[#allocation2 + $0xda] sm:$0xff]  ;;  %v2474_v37 = vpack.c.bf16 %v2451_v32, %v2450_v29 }
 0x11a   : > { %v795_v43 = vpop.f32.mrf.mxu1  ;;  %v1069_v55 = vpop.f32.mrf.mxu0  ;;  %v2779_v56 = vpack.c.bf16 %v2755_v58, %v2754_v19  ;;  %v2455_v19 = vld [vmem:[#allocation2 + $0x129] sm:$0xff] }
 0x11b   : > { %v4939_v8 = vadd.f32 %v3821_v38, %v804_v60  ;;  %v796_v61 = vadd.f32 %v795_v43, %v4877_v28  ;;  %v2757_v28 = vld [vmem:[#allocation2 + $0xfa] sm:$0xff]  ;;  %v2760_v58 = vld [vmem:[#allocation2 + $0x122] sm:$0xff] }
 0x11c   : > { %v3776_v15 = vpop.f32.mrf.mxu1  ;;  %v3824_v16 = vpop.f32.mrf.mxu0  ;;  %4063 = vmatmul.mubr.bf16.gmra.mxu1 %v2471_v48  ;;  %4111 = vmatmul.mubr.bf16.gmra.mxu0 %v2777_v51  ;;  %v2780_v38 = vpack.c.bf16 %v2757_v28, %v2756_v27 }
 0x11d   : > { %v4942_v12 = vadd.f32 %v1069_v55, %v796_v61  ;;  %v817_v54 = vadd.f32 %v3776_v15, %v4881_v35  ;;  %4066 = vmatprep.mubr.bf16.mxu1 %v2472_v11  ;;  %4114 = vmatprep.mubr.bf16.mxu0 %v2778_v14  ;;  %v2453_v55 = vld [vmem:[#allocation2 + $0x111] sm:$0xff] }
 0x11e   : > { %v808_v62 = vpop.f32.mrf.mxu1  ;;  %v1082_v26 = vpop.f32.mrf.mxu0 }
 0x11f   : > { %v4945_v40 = vadd.f32 %v3824_v16, %v817_v54  ;;  %v809_v41 = vadd.f32 %v808_v62, %v4889_v39  ;;  %v2452_v39 = vld [vmem:[#allocation2 + $0x109] sm:$0xff]  ;;  %v2759_v16 = vld [vmem:[#allocation2 + $0x112] sm:$0xff] }
 0x120   : > { %v3777_v42 = vpop.f32.mrf.mxu1  ;;  %v3825_v45 = vpop.f32.mrf.mxu0  ;;  %v2475_v27 = vpack.c.bf16 %v2453_v55, %v2452_v39  ;;  %v2458_v39 = vld [vmem:[#allocation2 + $0x151] sm:$0xff] }
 0x121   : > { %v4948_v36 = vadd.f32 %v1082_v26, %v809_v41  ;;  %v820_v35 = vadd.f32 %v3777_v42, %v4893_v3  ;;  %v2758_v3 = vld [vmem:[#allocation2 + $0x10a] sm:$0xff]  ;;  %v2476_v42 = vpack.c.bf16 %v2455_v19, %v2454_v17 }
 0x122   : > { %v811_v48 = vpop.f32.mrf.mxu1  ;;  %v1085_v51 = vpop.f32.mrf.mxu0  ;;  %v2781_v28 = vpack.c.bf16 %v2759_v16, %v2758_v3  ;;  %v2459_v3 = vld [vmem:[#allocation2 + $0x159] sm:$0xff] }
 0x123   : > { %v4951_v60 = vadd.f32 %v3825_v45, %v820_v35  ;;  %v812_v11 = vadd.f32 %v811_v48, %v4899_v24  ;;  %v2761_v24 = vld [vmem:[#allocation2 + $0x12a] sm:$0xff]  ;;  %v2764_v16 = vld [vmem:[#allocation2 + $0x152] sm:$0xff] }
 0x124   : > { %v3780_v14 = vpop.f32.mrf.mxu1  ;;  %v3828_v43 = vpop.f32.mrf.mxu0  ;;  %4067 = vmatmul.mubr.bf16.gmra.mxu1 %v2473_v4  ;;  %4115 = vmatmul.mubr.bf16.gmra.mxu0 %v2779_v56  ;;  %v2782_v45 = vpack.c.bf16 %v2761_v24, %v2760_v58 }
 0x125   : > { %v4954_v61 = vadd.f32 %v1085_v51, %v812_v11  ;;  %v833_v15 = vadd.f32 %v3780_v14, %v4903_v53  ;;  %4070 = vmatprep.mubr.bf16.mxu1 %v2474_v37  ;;  %4118 = vmatprep.mubr.bf16.mxu0 %v2780_v38  ;;  %v2457_v51 = vld [vmem:[#allocation2 + $0x141] sm:$0xff] }
 0x126   : > { %v824_v21 = vpop.f32.mrf.mxu1  ;;  %v1098_v54 = vpop.f32.mrf.mxu0 }
 0x127   : > { %v4957_v29 = vadd.f32 %v3828_v43, %v833_v15  ;;  %v825_v62 = vadd.f32 %v824_v21, %v4908_v1  ;;  %v2456_v1 = vld [vmem:[#allocation2 + $0x139] sm:$0xff]  ;;  %v2763_v43 = vld [vmem:[#allocation2 + $0x142] sm:$0xff] }
 0x128   : > { %v3781_v26 = vpop.f32.mrf.mxu1  ;;  %v3829_v32 = vpop.f32.mrf.mxu0  ;;  %v2477_v58 = vpack.c.bf16 %v2457_v51, %v2456_v1 }
 0x129   : > { %v4960_v41 = vadd.f32 %v1098_v54, %v825_v62  ;;  %v836_v53 = vadd.f32 %v3781_v26, %v4912_v44  ;;  %v2762_v44 = vld [vmem:[#allocation2 + $0x13a] sm:$0xff]  ;;  %v2478_v26 = vpack.c.bf16 %v2459_v3, %v2458_v39 }
 0x12a   : > { %v827_v4 = vpop.f32.mrf.mxu1  ;;  %v1101_v56 = vpop.f32.mrf.mxu0  ;;  %v2783_v24 = vpack.c.bf16 %v2763_v43, %v2762_v44 }
 0x12b   : > { %v4963_v35 = vadd.f32 %v3829_v32, %v836_v53  ;;  %v828_v37 = vadd.f32 %v827_v4, %v4916_v6  ;;  %v2765_v6 = vld [vmem:[#allocation2 + $0x15a] sm:$0xff] }
 0x12c   : > { %v3784_v38 = vpop.f32.mrf.mxu1  ;;  %v3832_v48 = vpop.f32.mrf.mxu0  ;;  %4071 = vmatmul.mubr.bf16.gmra.mxu1 %v2475_v27  ;;  %4119 = vmatmul.mubr.bf16.gmra.mxu0 %v2781_v28  ;;  %v2784_v32 = vpack.c.bf16 %v2765_v6, %v2764_v16 }
 0x12d   : > { %v4966_v11 = vadd.f32 %v1101_v56, %v828_v37  ;;  %v849_v14 = vadd.f32 %v3784_v38, %v4843_v9  ;;  %4074 = vmatprep.mubr.bf16.mxu1 %v2476_v42  ;;  %4122 = vmatprep.mubr.bf16.mxu0 %v2782_v45  ;;  %v2766_v38 = vld [vmem:[#allocation2 + $0x16a] sm:$0xff] }
 0x12e   : > { %v840_v55 = vpop.f32.mrf.mxu1  ;;  %v1114_v15 = vpop.f32.mrf.mxu0 }
 0x12f   : > { %v4969_v17 = vadd.f32 %v3832_v48, %v849_v14  ;;  %v841_v21 = vadd.f32 %v840_v55, %v4851_v30  ;;  %v2460_v30 = vld [vmem:[#allocation2 + $0x169] sm:$0xff]  ;;  %v2767_v48 = vld [vmem:[#allocation2 + $0x172] sm:$0xff] }
 0x130   : > { %v3785_v54 = vpop.f32.mrf.mxu1  ;;  %v3833_v19 = vpop.f32.mrf.mxu0  ;;  %v2785_v55 = vpack.c.bf16 %v2767_v48, %v2766_v38 }
 0x131   : > { %v4972_v62 = vadd.f32 %v1114_v15, %v841_v21  ;;  %v852_v9 = vadd.f32 %v3785_v54, %v4855_v33  ;;  %v2461_v33 = vld [vmem:[#allocation2 + $0x171] sm:$0xff] }
 0x132   : > { %v843_v27 = vpop.f32.mrf.mxu1  ;;  %v1117_v28 = vpop.f32.mrf.mxu0  ;;  %v2479_v39 = vpack.c.bf16 %v2461_v33, %v2460_v30 }
 0x133   : > { %v4975_v53 = vadd.f32 %v3833_v19, %v852_v9  ;;  %v844_v42 = vadd.f32 %v843_v27, %v4859_v59  ;;  %v2770_v9 = vld [vmem:[#allocation2 + $0x19a] sm:$0xff] }
 0x134   : > { %v3788_v45 = vpop.f32.mrf.mxu1  ;;  %v3836_v4 = vpop.f32.mrf.mxu0  ;;  %4075 = vmatmul.mubr.bf16.gmra.mxu1 %v2477_v58  ;;  %4123 = vmatmul.mubr.bf16.gmra.mxu0 %v2783_v24  ;;  %v2464_v58 = vld [vmem:[#allocation2 + $0x199] sm:$0xff] }
 0x135   : > { %v4978_v56 = vadd.f32 %v1117_v28, %v844_v42  ;;  %v865_v37 = vadd.f32 %v3788_v45, %v4863_v63  ;;  %4078 = vmatprep.mubr.bf16.mxu1 %v2478_v26  ;;  %4126 = vmatprep.mubr.bf16.mxu0 %v2784_v32  ;;  %v2771_v26 = vld [vmem:[#allocation2 + $0x1a2] sm:$0xff] }
 0x136   : > { %v856_v1 = vpop.f32.mrf.mxu1  ;;  %v1130_v51 = vpop.f32.mrf.mxu0  ;;  %v2787_v30 = vpack.c.bf16 %v2771_v26, %v2770_v9 }
 0x137   : > { %v4981_v14 = vadd.f32 %v3836_v4, %v865_v37  ;;  %v857_v59 = vadd.f32 %v856_v1, %v4871_v18 }
 0x138   : > { %v3789_v44 = vpop.f32.mrf.mxu1  ;;  %v3837_v43 = vpop.f32.mrf.mxu0 }
 0x139   : > { %v4984_v15 = vadd.f32 %v1130_v51, %v857_v59  ;;  %v868_v3 = vadd.f32 %v3789_v44, %v4875_v23  ;;  %v2465_v23 = vld [vmem:[#allocation2 + $0x1a1] sm:$0xff] }
 0x13a   : > { %v859_v63 = vpop.f32.mrf.mxu1  ;;  %v1133_v16 = vpop.f32.mrf.mxu0  ;;  %v2481_v4 = vpack.c.bf16 %v2465_v23, %v2464_v58 }
 0x13b   : > { %v4987_v6 = vadd.f32 %v3837_v43, %v868_v3  ;;  %v860_v21 = vadd.f32 %v859_v63, %v4879_v34 }
 0x13c   : > { %v3792_v54 = vpop.f32.mrf.mxu1  ;;  %v3840_v19 = vpop.f32.mrf.mxu0  ;;  %4079 = vmatmul.mubr.bf16.gmra.mxu1 %v2479_v39  ;;  %4127 = vmatmul.mubr.bf16.gmra.mxu0 %v2785_v55 }
 0x13d   : > { %v4990_v18 = vadd.f32 %v1133_v16, %v860_v21  ;;  %v881_v24 = vadd.f32 %v3792_v54, %v4883_v20  ;;  %4082 = vmatprep.mubr.bf16.mxu1 %v4635_v31  ;;  %4130 = vmatprep.mubr.bf16.mxu0 %v4897_v47 }
 0x13e   : > { %v872_v32 = vpop.f32.mrf.mxu1  ;;  %v1146_v27 = vpop.f32.mrf.mxu0 }
 0x13f   : > { %v4995_v28 = vadd.f32 %v3840_v19, %v881_v24  ;;  %v873_v34 = vadd.f32 %v872_v32, %v4891_v46 }
 0x140   : > { %v3793_v42 = vpop.f32.mrf.mxu1  ;;  %v3841_v45 = vpop.f32.mrf.mxu0 }
 0x141   : > { %v4998_v37 = vadd.f32 %v1146_v27, %v873_v34  ;;  %v884_v20 = vadd.f32 %v3793_v42, %v4895_v13 }
 0x142   : > { %v875_v31 = vpop.f32.mrf.mxu1  ;;  %v1149_v33 = vpop.f32.mrf.mxu0 }
 0x143   : > { %v5001_v47 = vadd.f32 %v3841_v45, %v884_v20  ;;  %v876_v38 = vadd.f32 %v875_v31, %v4901_v49 }
 0x144   : > { %v3796_v48 = vpop.f32.mrf.mxu1  ;;  %v3844_v1 = vpop.f32.mrf.mxu0  ;;  %4083 = vmatmul.mubr.bf16.gmra.mxu1 %v2481_v4  ;;  %4131 = vmatmul.mubr.bf16.gmra.mxu0 %v2787_v30 }
 0x145   : > { %v5004_v51 = vadd.f32 %v1149_v33, %v876_v38  ;;  %v897_v46 = vadd.f32 %v3796_v48, %v4905_v52 }
 0x146   : > { %v888_v59 = vpop.f32.mrf.mxu1  ;;  %v1162_v44 = vpop.f32.mrf.mxu0 }
 0x147   : > { %v5007_v43 = vadd.f32 %v3844_v1, %v897_v46  ;;  %v889_v13 = vadd.f32 %v888_v59, %v4910_v5 }
 0x148   : > { %v3797_v39 = vpop.f32.mrf.mxu1  ;;  %v3845_v55 = vpop.f32.mrf.mxu0 }
 0x149   : > { %v5010_v3 = vadd.f32 %v1162_v44, %v889_v13  ;;  %v900_v49 = vadd.f32 %v3797_v39, %v4914_v50 }
 0x14a   : > { %v891_v63 = vpop.f32.mrf.mxu1  ;;  %v1165_v16 = vpop.f32.mrf.mxu0 }
 0x14b   : > { %v5013_v21 = vadd.f32 %v3845_v55, %v900_v49  ;;  %v892_v54 = vadd.f32 %v891_v63, %v4918_v25 }
 0x14c   : > { %v3864_v19 = vpop.f32.mrf.mxu1  ;;  %v3912_v52 = vpop.f32.mrf.mxu0 }
 0x14d   : > { %v5016_v58 = vadd.f32 %v1165_v16, %v892_v54  ;;  %v1485_v24 = vadd.f32 %v3864_v19, %v4921_v0 }
 0x14e   : > { %v1356_v23 = vpop.f32.mrf.mxu1  ;;  %v1662_v5 = vpop.f32.mrf.mxu0 }
 0x14f   : > { %v5019_v9 = vadd.f32 %v3912_v52, %v1485_v24  ;;  %v1483_v26 = vadd.f32 %v1356_v23, %v4924_v57 }
 0x150   : > { %v3865_v32 = vpop.f32.mrf.mxu1  ;;  %v3913_v50 = vpop.f32.mrf.mxu0 }
 0x151   : > { %v5022_v27 = vadd.f32 %v1662_v5, %v1483_v26  ;;  %v1486_v34 = vadd.f32 %v3865_v32, %v4927_v22 }
 0x152   : > { %v1359_v42 = vpop.f32.mrf.mxu1  ;;  %v1665_v25 = vpop.f32.mrf.mxu0 }
 0x153   : > { %v5025_v45 = vadd.f32 %v3913_v50, %v1486_v34  ;;  %v1484_v4 = vadd.f32 %v1359_v42, %v4930_v2 }
 0x154   : > { %v3868_v30 = vpop.f32.mrf.mxu1  ;;  %v3916_v0 = vpop.f32.mrf.mxu0 }
 0x155   : > { %v5028_v20 = vadd.f32 %v1665_v25, %v1484_v4  ;;  %v1489_v31 = vadd.f32 %v3868_v30, %v4933_v7 }
 0x156   : > { %v1372_v33 = vpop.f32.mrf.mxu1  ;;  %v1678_v57 = vpop.f32.mrf.mxu0 }
 0x157   : > { %v5031_v38 = vadd.f32 %v3916_v0, %v1489_v31  ;;  %v1487_v48 = vadd.f32 %v1372_v33, %v4936_v10 }
 0x158   : > { %v3869_v1 = vpop.f32.mrf.mxu1  ;;  %v3917_v22 = vpop.f32.mrf.mxu0 }
 0x159   : > { %v5034_v46 = vadd.f32 %v1678_v57, %v1487_v48  ;;  %v1490_v59 = vadd.f32 %v3869_v1, %v4939_v8 }
 0x15a   : > { %v1375_v44 = vpop.f32.mrf.mxu1  ;;  %v1681_v2 = vpop.f32.mrf.mxu0 }
 0x15b   : > { %v5037_v13 = vadd.f32 %v3917_v22, %v1490_v59  ;;  %v1488_v39 = vadd.f32 %v1375_v44, %v4942_v12 }
 0x15c   : > { %v3872_v55 = vpop.f32.mrf.mxu1  ;;  %v3920_v7 = vpop.f32.mrf.mxu0 }
 0x15d   : > { %v5040_v49 = vadd.f32 %v1681_v2, %v1488_v39  ;;  %v1493_v63 = vadd.f32 %v3872_v55, %v4945_v40 }
 0x15e   : > { %v1388_v16 = vpop.f32.mrf.mxu1  ;;  %v1694_v10 = vpop.f32.mrf.mxu0 }
 0x15f   : > { %v5043_v54 = vadd.f32 %v3920_v7, %v1493_v63  ;;  %v1491_v19 = vadd.f32 %v1388_v16, %v4948_v36 }
 0x160   : > { %v3873_v52 = vpop.f32.mrf.mxu1  ;;  %v3921_v8 = vpop.f32.mrf.mxu0 }
 0x161   : > { %v5046_v24 = vadd.f32 %v1694_v10, %v1491_v19  ;;  %v1494_v23 = vadd.f32 %v3873_v52, %v4951_v60 }
 0x162   : > { %v1391_v5 = vpop.f32.mrf.mxu1  ;;  %v1697_v12 = vpop.f32.mrf.mxu0 }
 0x163   : > { %v5049_v26 = vadd.f32 %v3921_v8, %v1494_v23  ;;  %v1492_v32 = vadd.f32 %v1391_v5, %v4954_v61 }
 0x164   : > { %v3876_v50 = vpop.f32.mrf.mxu1  ;;  %v3924_v40 = vpop.f32.mrf.mxu0 }
 0x165   : > { %v5052_v34 = vadd.f32 %v1697_v12, %v1492_v32  ;;  %v1497_v42 = vadd.f32 %v3876_v50, %v4957_v29 }
 0x166   : > { %v1404_v25 = vpop.f32.mrf.mxu1  ;;  %v1710_v36 = vpop.f32.mrf.mxu0 }
 0x167   : > { %v5055_v4 = vadd.f32 %v3924_v40, %v1497_v42  ;;  %v1495_v30 = vadd.f32 %v1404_v25, %v4960_v41 }
 0x168   : > { %v3877_v0 = vpop.f32.mrf.mxu1  ;;  %v3925_v60 = vpop.f32.mrf.mxu0 }
 0x169   : > { %v5058_v31 = vadd.f32 %v1710_v36, %v1495_v30  ;;  %v1498_v33 = vadd.f32 %v3877_v0, %v4963_v35 }
 0x16a   : > { %v1407_v57 = vpop.f32.mrf.mxu1  ;;  %v1713_v61 = vpop.f32.mrf.mxu0 }
 0x16b   : > { %v5061_v48 = vadd.f32 %v3925_v60, %v1498_v33  ;;  %v1496_v1 = vadd.f32 %v1407_v57, %v4966_v11 }
 0x16c   : > { %v3880_v22 = vpop.f32.mrf.mxu1  ;;  %v3928_v29 = vpop.f32.mrf.mxu0 }
 0x16d   : > { %v5064_v59 = vadd.f32 %v1713_v61, %v1496_v1  ;;  %v1501_v44 = vadd.f32 %v3880_v22, %v4969_v17 }
 0x16e   : > { %v1420_v2 = vpop.f32.mrf.mxu1  ;;  %v1726_v41 = vpop.f32.mrf.mxu0 }
 0x16f   : > { %v5067_v39 = vadd.f32 %v3928_v29, %v1501_v44  ;;  %v1499_v55 = vadd.f32 %v1420_v2, %v4972_v62 }
 0x170   : > { %v3881_v7 = vpop.f32.mrf.mxu1  ;;  %v3929_v35 = vpop.f32.mrf.mxu0 }
 0x171   : > { %v5070_v63 = vadd.f32 %v1726_v41, %v1499_v55  ;;  %v1502_v16 = vadd.f32 %v3881_v7, %v4975_v53 }
 0x172   : > { %v1423_v10 = vpop.f32.mrf.mxu1  ;;  %v1729_v11 = vpop.f32.mrf.mxu0 }
 0x173   : > { %v5073_v19 = vadd.f32 %v3929_v35, %v1502_v16  ;;  %v1500_v52 = vadd.f32 %v1423_v10, %v4978_v56 }
 0x174   : > { %v3884_v8 = vpop.f32.mrf.mxu1  ;;  %v3932_v17 = vpop.f32.mrf.mxu0 }
 0x175   : > { %5384 = vst [vmem:[#allocation3_spill] sm:$0xff] %v5073_v19  ;;  %v5076_v23 = vadd.f32 %v1729_v11, %v1500_v52  ;;  %v1505_v5 = vadd.f32 %v3884_v8, %v4981_v14 }
 0x176   : > { %v1436_v12 = vpop.f32.mrf.mxu1  ;;  %v1742_v62 = vpop.f32.mrf.mxu0 }
 0x177   : > { %5385 = vst [vmem:[#allocation4_spill] sm:$0xff] %v5076_v23  ;;  %v5079_v32 = vadd.f32 %v3932_v17, %v1505_v5  ;;  %v1503_v50 = vadd.f32 %v1436_v12, %v4984_v15 }
 0x178   : > { %v3885_v40 = vpop.f32.mrf.mxu1  ;;  %v3933_v53 = vpop.f32.mrf.mxu0 }
 0x179   : > { %5386 = vst [vmem:[#allocation5_spill] sm:$0xff] %v5079_v32  ;;  %v5082_v42 = vadd.f32 %v1742_v62, %v1503_v50  ;;  %v1506_v25 = vadd.f32 %v3885_v40, %v4987_v6 }
 0x17a   : > { %v1439_v36 = vpop.f32.mrf.mxu1  ;;  %v1745_v56 = vpop.f32.mrf.mxu0 }
 0x17b   : > { %5387 = vst [vmem:[#allocation6_spill] sm:$0xff] %v5082_v42  ;;  %v5085_v30 = vadd.f32 %v3933_v53, %v1506_v25  ;;  %v1504_v0 = vadd.f32 %v1439_v36, %v4990_v18 }
 0x17c   : > { %v3888_v60 = vpop.f32.mrf.mxu1  ;;  %v3936_v14 = vpop.f32.mrf.mxu0 }
 0x17d   : > { %5388 = vst [vmem:[#allocation7_spill] sm:$0xff] %v5085_v30  ;;  %v5088_v33 = vadd.f32 %v1745_v56, %v1504_v0  ;;  %v1509_v57 = vadd.f32 %v3888_v60, %v4995_v28 }
 0x17e   : > { %v1452_v61 = vpop.f32.mrf.mxu1  ;;  %v1758_v15 = vpop.f32.mrf.mxu0 }
 0x17f   : > { %5389 = vst [vmem:[#allocation8_spill] sm:$0xff] %v5088_v33  ;;  %v5091_v1 = vadd.f32 %v3936_v14, %v1509_v57  ;;  %v1507_v22 = vadd.f32 %v1452_v61, %v4998_v37 }
 0x180   : > { %v3889_v29 = vpop.f32.mrf.mxu1  ;;  %v3937_v6 = vpop.f32.mrf.mxu0 }
 0x181   : > { %5390 = vst [vmem:[#allocation9_spill] sm:$0xff] %v5091_v1  ;;  %v5094_v44 = vadd.f32 %v1758_v15, %v1507_v22  ;;  %v1510_v2 = vadd.f32 %v3889_v29, %v5001_v47 }
 0x182   : > { %v1455_v41 = vpop.f32.mrf.mxu1  ;;  %v1761_v18 = vpop.f32.mrf.mxu0 }
 0x183   : > { %5391 = vst [vmem:[#allocation10_spill] sm:$0xff] %v5094_v44  ;;  %v5097_v55 = vadd.f32 %v3937_v6, %v1510_v2  ;;  %v1508_v7 = vadd.f32 %v1455_v41, %v5004_v51 }
 0x184   : > { %v3892_v35 = vpop.f32.mrf.mxu1  ;;  %v3940_v28 = vpop.f32.mrf.mxu0 }
 0x185   : > { %5392 = vst [vmem:[#allocation11_spill] sm:$0xff] %v5097_v55  ;;  %v5100_v16 = vadd.f32 %v1761_v18, %v1508_v7  ;;  %v1513_v10 = vadd.f32 %v3892_v35, %v5007_v43 }
 0x186   : > { %v1468_v11 = vpop.f32.mrf.mxu1  ;;  %v1774_v37 = vpop.f32.mrf.mxu0 }
 0x187   : > { %5393 = vst [vmem:[#allocation12_spill] sm:$0xff] %v5100_v16  ;;  %v5103_v52 = vadd.f32 %v3940_v28, %v1513_v10  ;;  %v1511_v8 = vadd.f32 %v1468_v11, %v5010_v3 }
 0x188   : > { %v3893_v17 = vpop.f32.mrf.mxu1  ;;  %v3941_v47 = vpop.f32.mrf.mxu0 }
 0x189   : > { %5394 = vst [vmem:[#allocation13_spill] sm:$0xff] %v5103_v52  ;;  %v5106_v5 = vadd.f32 %v1774_v37, %v1511_v8  ;;  %v1514_v12 = vadd.f32 %v3893_v17, %v5013_v21 }
 0x18a   : > { %v1471_v62 = vpop.f32.mrf.mxu1  ;;  %v1777_v51 = vpop.f32.mrf.mxu0 }
 0x18b   : > { %5395 = vst [vmem:[#allocation14_spill] sm:$0xff] %v5106_v5  ;;  %v5109_v50 = vadd.f32 %v3941_v47, %v1514_v12  ;;  %v1512_v40 = vadd.f32 %v1471_v62, %v5016_v58 }
 0x18c   : > { %v3960_v53 = vpop.f32.mrf.mxu1  ;;  %v5112_v43 = vpop.f32.mrf.mxu0 }
 0x18d   : > { %5396 = vst [vmem:[#allocation15_spill] sm:$0xff] %v5109_v50  ;;  %v5114_v25 = vadd.f32 %v1777_v51, %v1512_v40 }
 0x18e   : > { %v1968_v36 = vpop.f32.mrf.mxu1  ;;  %v5116_v56 = vpop.f32.mrf.mxu0 }
 0x18f   : > { %5397 = vst [vmem:[#allocation16_spill] sm:$0xff] %v5114_v25 }
 0x190   : > { %v5118_v3 = vpop.f32.mrf.mxu1  ;;  %v5120_v0 = vpop.f32.mrf.mxu0 }
 0x192   : > { %v5122_v60 = vpop.f32.mrf.mxu1  ;;  %v5124_v21 = vpop.f32.mrf.mxu0 }
 0x194   : > { %v5126_v14 = vpop.f32.mrf.mxu1  ;;  %v5128_v57 = vpop.f32.mrf.mxu0 }
 0x196   : > { %v5130_v58 = vpop.f32.mrf.mxu1  ;;  %v5132_v61 = vpop.f32.mrf.mxu0 }
 0x198   : > { %v5134_v15 = vpop.f32.mrf.mxu1  ;;  %v5136_v22 = vpop.f32.mrf.mxu0 }
 0x19a   : > { %v5138_v29 = vpop.f32.mrf.mxu1  ;;  %v5140_v6 = vpop.f32.mrf.mxu0 }
 0x19c   : > { %v5142_v2 = vpop.f32.mrf.mxu1  ;;  %v5144_v41 = vpop.f32.mrf.mxu0 }
 0x19e   : > { %v5146_v18 = vpop.f32.mrf.mxu1  ;;  %v5148_v7 = vpop.f32.mrf.mxu0 }
 0x1a0   : > { %v5150_v35 = vpop.f32.mrf.mxu1  ;;  %v5152_v28 = vpop.f32.mrf.mxu0 }
 0x1a2   : > { %v5154_v10 = vpop.f32.mrf.mxu1  ;;  %v5156_v11 = vpop.f32.mrf.mxu0 }
 0x1a4   : > { %v5158_v37 = vpop.f32.mrf.mxu1  ;;  %v5160_v8 = vpop.f32.mrf.mxu0 }
 0x1a6   : > { %v5162_v17 = vpop.f32.mrf.mxu1  ;;  %v5164_v47 = vpop.f32.mrf.mxu0 }
 0x1a8   : > { %v5166_v12 = vpop.f32.mrf.mxu1  ;;  %v5168_v62 = vpop.f32.mrf.mxu0 }
 0x1aa   : > { %v5170_v51 = vpop.f32.mrf.mxu1  ;;  %v5172_v40 = vpop.f32.mrf.mxu0 }
 0x1ac   : > { %v5174_v25 = vpop.f32.mrf.mxu1  ;;  %v5176_v50 = vpop.f32.mrf.mxu0 }
 0x1ae   : > { %v5178_v5 = vpop.f32.mrf.mxu1  ;;  %v5180_v52 = vpop.f32.mrf.mxu0 }
 0x1af   : > { %5398 = vst [vmem:[#allocation17_spill] sm:$0xff] %v5180_v52 }
 0x1b0   : > { %v5182_v16 = vpop.f32.mrf.mxu1  ;;  %v5184_v55 = vpop.f32.mrf.mxu0 }
 0x1b1   : > { %5399 = vst [vmem:[#allocation18_spill] sm:$0xff] %v5182_v16  ;;  %5400 = vst [vmem:[#allocation19_spill] sm:$0xff] %v5184_v55 }
 0x1b2   : > { %v5186_v44 = vpop.f32.mrf.mxu1  ;;  %v5188_v1 = vpop.f32.mrf.mxu0 }
 0x1b3   : > { %5401 = vst [vmem:[#allocation20_spill] sm:$0xff] %v5186_v44  ;;  %5402 = vst [vmem:[#allocation21_spill] sm:$0xff] %v5188_v1 }
 0x1b4   : > { %v5190_v33 = vpop.f32.mrf.mxu1  ;;  %v5192_v30 = vpop.f32.mrf.mxu0 }
 0x1b5   : > { %5403 = vst [vmem:[#allocation22_spill] sm:$0xff] %v5190_v33  ;;  %5404 = vst [vmem:[#allocation23_spill] sm:$0xff] %v5192_v30 }
 0x1b6   : > { %v5194_v42 = vpop.f32.mrf.mxu1  ;;  %v5196_v32 = vpop.f32.mrf.mxu0 }
 0x1b7   : > { %5405 = vst [vmem:[#allocation24_spill] sm:$0xff] %v5194_v42  ;;  %5406 = vst [vmem:[#allocation25_spill] sm:$0xff] %v5196_v32 }
 0x1b8   : > { %v5198_v23 = vpop.f32.mrf.mxu1  ;;  %v5200_v19 = vpop.f32.mrf.mxu0 }
 0x1b9   : > { %5407 = vst [vmem:[#allocation26_spill] sm:$0xff] %v5198_v23  ;;  %5408 = vst [vmem:[#allocation27_spill] sm:$0xff] %v5200_v19 }
 0x1ba   : > { %v5202_v52 = vpop.f32.mrf.mxu1  ;;  %v5204_v16 = vpop.f32.mrf.mxu0 }
 0x1bb   : > { %5409 = vst [vmem:[#allocation28_spill] sm:$0xff] %v5202_v52  ;;  %5410 = vst [vmem:[#allocation29_spill] sm:$0xff] %v5204_v16 }
 0x1bc   : > { %v5206_v55 = vpop.f32.mrf.mxu1  ;;  %v5208_v44 = vpop.f32.mrf.mxu0 }
 0x1bd   : > { %5411 = vst [vmem:[#allocation30_spill] sm:$0xff] %v5206_v55  ;;  %5412 = vst [vmem:[#allocation31_spill] sm:$0xff] %v5208_v44 }
 0x1be   : > { %v5210_v1 = vpop.f32.mrf.mxu1  ;;  %v5212_v33 = vpop.f32.mrf.mxu0 }
 0x1bf   : > { %5413 = vst [vmem:[#allocation32_spill] sm:$0xff] %v5210_v1  ;;  %5414 = vst [vmem:[#allocation33_spill] sm:$0xff] %v5212_v33  ;;  %v2097_v1 = vadd.f32 %v3960_v53, %v5019_v9  ;;  %v2096_v9 = vadd.f32 %v5122_v60, %v5028_v20 }
 0x1c0   : > { %v5214_v30 = vpop.f32.mrf.mxu1  ;;  %v5216_v42 = vpop.f32.mrf.mxu0 }
 0x1c1   : > { %5415 = vst [vmem:[#allocation34_spill] sm:$0xff] %v5214_v30  ;;  %5416 = vst [vmem:[#allocation35_spill] sm:$0xff] %v5216_v42  ;;  %v2095_v42 = vadd.f32 %v1968_v36, %v5022_v27 }
 0x1c2   : > { %v5218_v32 = vpop.f32.mrf.mxu1  ;;  %v5220_v23 = vpop.f32.mrf.mxu0 }
 0x1c3   : > { %5417 = vst [vmem:[#allocation36_spill] sm:$0xff] %v5218_v32  ;;  %5418 = vst [vmem:[#allocation37_spill] sm:$0xff] %v5220_v23 }
 0x1c4   : > { %v5222_v19 = vpop.f32.mrf.mxu1  ;;  %v5224_v52 = vpop.f32.mrf.mxu0 }
 0x1c5   : > { %5419 = vst [vmem:[#allocation38_spill] sm:$0xff] %v5222_v19  ;;  %5420 = vst [vmem:[#allocation39_spill] sm:$0xff] %v5224_v52  ;;  %v2404_v19 = vadd.f32 %v5112_v43, %v2097_v1  ;;  %v2098_v52 = vadd.f32 %v5118_v3, %v5025_v45  ;;  %v2101_v43 = vadd.f32 %v5126_v14, %v5031_v38 }
 0x1c6   : > { %v5226_v16 = vpop.f32.mrf.mxu1  ;;  %v5228_v44 = vpop.f32.mrf.mxu0 }
 0x1c7   : > { %5421 = vst [vmem:[#allocation40_spill] sm:$0xff] %v5226_v16  ;;  %5422 = vst [vmem:[#allocation41_spill] sm:$0xff] %v5228_v44  ;;  %v2402_v44 = vadd.f32 %v5116_v56, %v2095_v42  ;;  %v2405_v45 = vadd.f32 %v5120_v0, %v2098_v52  ;;  %v2408_v52 = vadd.f32 %v5128_v57, %v2101_v43 }
 0x1c8   : > { %v5231_v33 = vpop.f32.mrf.mxu1  ;;  %v5233_v30 = vpop.f32.mrf.mxu0  ;;  %v2100_v0 = vadd.f32 %v5138_v29, %v5040_v49  ;;  %v2105_v57 = vadd.f32 %v5142_v2, %v5043_v54 }
 0x1c9   : > { %5423 = vst [vmem:[#allocation42_spill] sm:$0xff] %v5233_v30 }
 0x1ca   : > { %v5236_v32 = vpop.f32.mrf.mxu1  ;;  %v5238_v23 = vpop.f32.mrf.mxu0  ;;  %v2407_v29 = vadd.f32 %v5140_v6, %v2100_v0  ;;  %v2412_v2 = vadd.f32 %v5144_v41, %v2105_v57 }
 0x1cb   : > { %5424 = vst [vmem:[#allocation43_spill] sm:$0xff] %v5238_v23 }
 0x1cc   : > { %v4056_v16 = vpop.f32.mrf.mxu1  ;;  %v4104_v55 = vpop.f32.mrf.mxu0 }
 0x1cd   : > { %v2710_v53 = vadd.f32 %v4056_v16, %v2404_v19  ;;  %v2403_v19 = vadd.f32 %v5124_v21, %v2096_v9  ;;  %v2099_v16 = vadd.f32 %v5130_v58, %v5034_v46 }
 0x1ce   : > { %v2581_v27 = vpop.f32.mrf.mxu1  ;;  %v2887_v1 = vpop.f32.mrf.mxu0 }
 0x1cf   : > { %v3016_v42 = vadd.f32 %v4104_v55, %v2710_v53  ;;  %v2708_v36 = vadd.f32 %v2581_v27, %v2402_v44  ;;  %v2102_v44 = vadd.f32 %v5134_v15, %v5037_v13  ;;  %v2406_v46 = vadd.f32 %v5132_v61, %v2099_v16 }
 0x1d0   : > { %v4057_v56 = vpop.f32.mrf.mxu1  ;;  %v4105_v20 = vpop.f32.mrf.mxu0 }
 0x1d1   : > { %3048 = vst [vmem:[%s5251_s26 + $0x10] sm:$0xff] %v3016_v42  ;;  %v3014_v3 = vadd.f32 %v2887_v1, %v2708_v36  ;;  %v2711_v60 = vadd.f32 %v4057_v56, %v2405_v45  ;;  %v2409_v49 = vadd.f32 %v5136_v22, %v2102_v44  ;;  %v3118_v43 = vmul.f32 %v3016_v42, %v3016_v42 }
 0x1d2   : > { %v2584_v23 = vpop.f32.mrf.mxu1  ;;  %v2890_v30 = vpop.f32.mrf.mxu0 }
 0x1d3   : > { %3046 = vst [vmem:[%s5251_s26] sm:$0xff] %v3014_v3  ;;  %v3017_v38 = vadd.f32 %v4105_v20, %v2711_v60  ;;  %v2709_v55 = vadd.f32 %v2584_v23, %v2403_v19  ;;  %v3116_v53 = vmul.f32 %v3014_v3, %v3014_v3  ;;  %v2103_v20 = vadd.f32 %v5146_v18, %v5046_v24 }
 0x1d4   : > { %v4060_v21 = vpop.f32.mrf.mxu1  ;;  %v4108_v14 = vpop.f32.mrf.mxu0  ;;  %v2106_v19 = vadd.f32 %v5150_v35, %v5049_v26 }
 0x1d5   : > { %3049 = vst [vmem:[%s5251_s26 + $0x18] sm:$0xff] %v3017_v38  ;;  %v3015_v58 = vadd.f32 %v2890_v30, %v2709_v55  ;;  %v2714_v9 = vadd.f32 %v4060_v21, %v2408_v52  ;;  %v3119_v6 = vmul.f32 %v3017_v38, %v3017_v38  ;;  %v2104_v55 = vadd.f32 %v5154_v10, %v5052_v34 }
 0x1d6   : > { %v2597_v27 = vpop.f32.mrf.mxu1  ;;  %v2903_v23 = vpop.f32.mrf.mxu0 }
 0x1d7   : > { %3047 = vst [vmem:[%s5251_s26 + $0x8] sm:$0xff] %v3015_v58  ;;  %v3078_v1 = vadd.f32 %v3015_v58, %v3014_v3  ;;  %v3117_v13 = vmul.f32 %v3015_v58, %v3015_v58  ;;  %v3020_v15 = vadd.f32 %v4108_v14, %v2714_v9  ;;  %v2712_v45 = vadd.f32 %v2597_v27, %v2406_v46 }
 0x1d8   : > { %v4061_v61 = vpop.f32.mrf.mxu1  ;;  %v4109_v30 = vpop.f32.mrf.mxu0  ;;  %v2410_v14 = vadd.f32 %v5148_v7, %v2103_v20  ;;  %v2413_v46 = vadd.f32 %v5152_v28, %v2106_v19  ;;  %v2109_v27 = vadd.f32 %v5158_v37, %v5055_v4 }
 0x1d9   : > { %v3079_v36 = vadd.f32 %v3078_v1, %v3016_v42  ;;  %v3148_v56 = vadd.f32 %v3117_v13, %v3116_v53  ;;  %3052 = vst [vmem:[%s5251_s26 + $0x30] sm:$0xff] %v3020_v15  ;;  %v3018_v54 = vadd.f32 %v2903_v23, %v2712_v45  ;;  %v2715_v16 = vadd.f32 %v4061_v61, %v2409_v49 }
 0x1da   : > { %v2600_v22 = vpop.f32.mrf.mxu1  ;;  %v2906_v3 = vpop.f32.mrf.mxu0  ;;  %v2411_v53 = vadd.f32 %v5156_v11, %v2104_v55  ;;  %v2107_v23 = vadd.f32 %v5162_v17, %v5058_v31  ;;  %v3122_v13 = vmul.f32 %v3020_v15, %v3020_v15  ;;  %v2110_v61 = vadd.f32 %v5166_v12, %v5061_v48 }
 0x1db   : > { %v3149_v60 = vadd.f32 %v3148_v56, %v3118_v43  ;;  %3050 = vst [vmem:[%s5251_s26 + $0x20] sm:$0xff] %v3018_v54  ;;  %v3080_v52 = vadd.f32 %v3079_v36, %v3017_v38  ;;  %v2713_v42 = vadd.f32 %v2600_v22, %v2407_v29  ;;  %v3120_v41 = vmul.f32 %v3018_v54, %v3018_v54 }
 0x1dc   : > { %v3021_v44 = vadd.f32 %v4109_v30, %v2715_v16  ;;  %v4064_v0 = vpop.f32.mrf.mxu1  ;;  %v4112_v24 = vpop.f32.mrf.mxu0  ;;  %v2416_v56 = vadd.f32 %v5160_v8, %v2109_v27  ;;  %v2417_v16 = vadd.f32 %v5168_v62, %v2110_v61  ;;  %v2108_v22 = vadd.f32 %v5170_v51, %v5064_v59 }
 0x1dd   : > { %v3081_v18 = vadd.f32 %v3080_v52, %v3018_v54  ;;  %v3150_v21 = vadd.f32 %v3149_v60, %v3119_v6  ;;  %v3019_v26 = vadd.f32 %v2906_v3, %v2713_v42  ;;  %v2718_v35 = vadd.f32 %v4064_v0, %v2412_v2 }
 0x1de   : > { %3053 = vst [vmem:[%s5251_s26 + $0x38] sm:$0xff] %v3021_v44  ;;  %v2613_v58 = vpop.f32.mrf.mxu1  ;;  %v2919_v38 = vpop.f32.mrf.mxu0  ;;  %v3123_v30 = vmul.f32 %v3021_v44, %v3021_v44  ;;  %v2414_v54 = vadd.f32 %v5164_v47, %v2107_v23  ;;  %v2113_v3 = vadd.f32 %v5174_v25, %v5067_v39 }
 0x1df   : > { %v3151_v9 = vadd.f32 %v3150_v21, %v3120_v41  ;;  %3051 = vst [vmem:[%s5251_s26 + $0x28] sm:$0xff] %v3019_v26  ;;  %v3082_v57 = vadd.f32 %v3081_v18, %v3019_v26  ;;  %v3121_v34 = vmul.f32 %v3019_v26, %v3019_v26  ;;  %v3024_v10 = vadd.f32 %v4112_v24, %v2718_v35  ;;  %v5425_v26 = vld [vmem:[#allocation3_spill] sm:$0xff]  ;;  %v5426_v35 = vld [vmem:[#allocation18_spill] sm:$0xff] }
 0x1e0   : > { %v2716_v7 = vadd.f32 %v2613_v58, %v2410_v14  ;;  %v4065_v1 = vpop.f32.mrf.mxu1  ;;  %v4113_v28 = vpop.f32.mrf.mxu0  ;;  %v2111_v41 = vadd.f32 %v5178_v5, %v5070_v63  ;;  %v2415_v18 = vadd.f32 %v5172_v40, %v2108_v22  ;;  %v2420_v21 = vadd.f32 %v5176_v50, %v2113_v3  ;;  %v5436_v3 = vld [vmem:[#allocation7_spill] sm:$0xff] }
 0x1e1   : > { %v3083_v45 = vadd.f32 %v3082_v57, %v3020_v15  ;;  %v3152_v49 = vadd.f32 %v3151_v9, %v3121_v34  ;;  %3056 = vst [vmem:[%s5251_s26 + $0x50] sm:$0xff] %v3024_v10  ;;  %v2719_v29 = vadd.f32 %v4065_v1, %v2413_v46  ;;  %v2114_v14 = vadd.f32 %v5426_v35, %v5425_v26  ;;  %v5427_v57 = vld [vmem:[#allocation17_spill] sm:$0xff]  ;;  %v5440_v35 = vld [vmem:[#allocation8_spill] sm:$0xff] }
 0x1e2   : > { %v3022_v11 = vadd.f32 %v2919_v38, %v2716_v7  ;;  %v2616_v43 = vpop.f32.mrf.mxu1  ;;  %v2922_v4 = vpop.f32.mrf.mxu0  ;;  %v2418_v34 = vadd.f32 %v5427_v57, %v2111_v41  ;;  %v5438_v41 = vld [vmem:[#allocation23_spill] sm:$0xff] }
 0x1e3   : > { %v3153_v37 = vadd.f32 %v3152_v49, %v3122_v13  ;;  %v3084_v36 = vadd.f32 %v3083_v45, %v3021_v44  ;;  %v3025_v31 = vadd.f32 %v4113_v28, %v2719_v29  ;;  %v2717_v17 = vadd.f32 %v2616_v43, %v2411_v53  ;;  %v5429_v53 = vld [vmem:[#allocation20_spill] sm:$0xff]  ;;  %v5430_v45 = vld [vmem:[#allocation19_spill] sm:$0xff]  ;;  %v5432_v43 = vld [vmem:[#allocation22_spill] sm:$0xff] }
 0x1e4   : > { %3054 = vst [vmem:[%s5251_s26 + $0x40] sm:$0xff] %v3022_v11  ;;  %v4068_v15 = vpop.f32.mrf.mxu1  ;;  %v4116_v2 = vpop.f32.mrf.mxu0  ;;  %v3124_v19 = vmul.f32 %v3022_v11, %v3022_v11  ;;  %v3126_v44 = vmul.f32 %v3024_v10, %v3024_v10  ;;  %v2421_v49 = vadd.f32 %v5430_v45, %v2114_v14  ;;  %v5441_v14 = vld [vmem:[#allocation28_spill] sm:$0xff] }
 0x1e5   : > { %v3085_v20 = vadd.f32 %v3084_v36, %v3022_v11  ;;  %v3154_v48 = vadd.f32 %v3153_v37, %v3123_v30  ;;  %3057 = vst [vmem:[%s5251_s26 + $0x58] sm:$0xff] %v3025_v31  ;;  %v3023_v12 = vadd.f32 %v2922_v4, %v2717_v17  ;;  %v2722_v8 = vadd.f32 %v4068_v15, %v2416_v56  ;;  %v5431_v11 = vld [vmem:[#allocation5_spill] sm:$0xff] }
 0x1e6   : > { %v2629_v6 = vpop.f32.mrf.mxu1  ;;  %v2935_v47 = vpop.f32.mrf.mxu0  ;;  %v3127_v5 = vmul.f32 %v3025_v31, %v3025_v31  ;;  %v2117_v4 = vadd.f32 %v5432_v43, %v5431_v11 }
 0x1e7   : > { %v3155_v60 = vadd.f32 %v3154_v48, %v3124_v19  ;;  %3055 = vst [vmem:[%s5251_s26 + $0x48] sm:$0xff] %v3023_v12  ;;  %v3086_v52 = vadd.f32 %v3085_v20, %v3023_v12  ;;  %v3125_v42 = vmul.f32 %v3023_v12, %v3023_v12  ;;  %v2720_v55 = vadd.f32 %v2629_v6, %v2414_v54  ;;  %v5434_v19 = vld [vmem:[#allocation6_spill] sm:$0xff]  ;;  %v5435_v48 = vld [vmem:[#allocation24_spill] sm:$0xff] }
 0x1e8   : > { %v3028_v62 = vadd.f32 %v4116_v2, %v2722_v8  ;;  %v4069_v0 = vpop.f32.mrf.mxu1  ;;  %v4117_v59 = vpop.f32.mrf.mxu0  ;;  %v5433_v2 = vld [vmem:[#allocation21_spill] sm:$0xff]  ;;  %v2115_v12 = vadd.f32 %v5435_v48, %v5434_v19  ;;  %v5437_v8 = vld [vmem:[#allocation26_spill] sm:$0xff]  ;;  %v5450_v19 = vld [vmem:[#allocation31_spill] sm:$0xff] }
 0x1e9   : > { %v3087_v51 = vadd.f32 %v3086_v52, %v3024_v10  ;;  %v3156_v24 = vadd.f32 %v3155_v60, %v3125_v42  ;;  %v3026_v39 = vadd.f32 %v2935_v47, %v2720_v55  ;;  %v2723_v25 = vadd.f32 %v4069_v0, %v2417_v16  ;;  %v5428_v10 = vld [vmem:[#allocation4_spill] sm:$0xff] }
 0x1ea   : > { %3060 = vst [vmem:[%s5251_s26 + $0x70] sm:$0xff] %v3028_v62  ;;  %v2632_v46 = vpop.f32.mrf.mxu1  ;;  %v2938_v63 = vpop.f32.mrf.mxu0  ;;  %v2112_v27 = vadd.f32 %v5429_v53, %v5428_v10  ;;  %v2118_v6 = vadd.f32 %v5437_v8, %v5436_v3  ;;  %v3130_v47 = vmul.f32 %v3028_v62, %v3028_v62 }
 0x1eb   : > { %v3157_v58 = vadd.f32 %v3156_v24, %v3126_v44  ;;  %3058 = vst [vmem:[%s5251_s26 + $0x60] sm:$0xff] %v3026_v39  ;;  %v3088_v38 = vadd.f32 %v3087_v51, %v3025_v31  ;;  %v3029_v9 = vadd.f32 %v4117_v59, %v2723_v25  ;;  %v2721_v40 = vadd.f32 %v2632_v46, %v2415_v18 }
 0x1ec   : > { %v4072_v50 = vpop.f32.mrf.mxu1  ;;  %v4120_v23 = vpop.f32.mrf.mxu0  ;;  %v3128_v1 = vmul.f32 %v3026_v39, %v3026_v39  ;;  %v2419_v20 = vadd.f32 %v5433_v2, %v2112_v27  ;;  %v2424_v44 = vadd.f32 %v5438_v41, %v2117_v4  ;;  %v2116_v46 = vadd.f32 %v5441_v14, %v5440_v35  ;;  %v5443_v27 = vld [vmem:[#allocation9_spill] sm:$0xff] }
 0x1ed   : > { %v3089_v7 = vadd.f32 %v3088_v38, %v3026_v39  ;;  %v3158_v28 = vadd.f32 %v3157_v58, %v3127_v5  ;;  %3061 = vst [vmem:[%s5251_s26 + $0x78] sm:$0xff] %v3029_v9  ;;  %v2726_v13 = vadd.f32 %v4072_v50, %v2420_v21  ;;  %v3027_v29 = vadd.f32 %v2938_v63, %v2721_v40  ;;  %v5439_v21 = vld [vmem:[#allocation25_spill] sm:$0xff]  ;;  %v5442_v5 = vld [vmem:[#allocation27_spill] sm:$0xff] }
 0x1ee   : > { %v2645_v61 = vpop.f32.mrf.mxu1  ;;  %v2951_v30 = vpop.f32.mrf.mxu0  ;;  %v3131_v51 = vmul.f32 %v3029_v9, %v3029_v9  ;;  %v2422_v26 = vadd.f32 %v5439_v21, %v2115_v12  ;;  %v2425_v58 = vadd.f32 %v5442_v5, %v2118_v6 }
 0x1ef   : > { %v3159_v37 = vadd.f32 %v3158_v28, %v3128_v1  ;;  %v3032_v36 = vadd.f32 %v4120_v23, %v2726_v13  ;;  %v2724_v31 = vadd.f32 %v2645_v61, %v2418_v34  ;;  %3059 = vst [vmem:[%s5251_s26 + $0x68] sm:$0xff] %v3027_v29  ;;  %v3090_v17 = vadd.f32 %v3089_v7, %v3027_v29  ;;  %v5446_v61 = vld [vmem:[#allocation10_spill] sm:$0xff] }
 0x1f0   : > { %v3129_v56 = vmul.f32 %v3027_v29, %v3027_v29  ;;  %v4073_v54 = vpop.f32.mrf.mxu1  ;;  %v4121_v15 = vpop.f32.mrf.mxu0 }
 0x1f1   : > { %3064 = vst [vmem:[%s5251_s26 + $0x90] sm:$0xff] %v3032_v36  ;;  %v3030_v16 = vadd.f32 %v2951_v30, %v2724_v31  ;;  %v2727_v22 = vadd.f32 %v4073_v54, %v2421_v49  ;;  %v3091_v60 = vadd.f32 %v3090_v17, %v3028_v62  ;;  %v5445_v49 = vld [vmem:[#allocation29_spill] sm:$0xff]  ;;  %v5447_v30 = vld [vmem:[#allocation32_spill] sm:$0xff]  ;;  %v5449_v31 = vld [vmem:[#allocation34_spill] sm:$0xff] }
 0x1f2   : > { %v3160_v52 = vadd.f32 %v3159_v37, %v3129_v56  ;;  %v2648_v42 = vpop.f32.mrf.mxu1  ;;  %v2954_v55 = vpop.f32.mrf.mxu0  ;;  %v2423_v29 = vadd.f32 %v5445_v49, %v2116_v46  ;;  %v2119_v11 = vadd.f32 %v5447_v30, %v5446_v61  ;;  %v5448_v37 = vld [vmem:[#allocation11_spill] sm:$0xff]  ;;  %v3134_v56 = vmul.f32 %v3032_v36, %v3032_v36 }
 0x1f3   : > { %3062 = vst [vmem:[%s5251_s26 + $0x80] sm:$0xff] %v3030_v16  ;;  %v3033_v0 = vadd.f32 %v4121_v15, %v2727_v22  ;;  %v2725_v59 = vadd.f32 %v2648_v42, %v2419_v20  ;;  %v3092_v39 = vadd.f32 %v3091_v60, %v3029_v9  ;;  %v3132_v57 = vmul.f32 %v3030_v16, %v3030_v16  ;;  %v5444_v9 = vld [vmem:[#allocation30_spill] sm:$0xff]  ;;  %v5451_v60 = vld [vmem:[#allocation33_spill] sm:$0xff]  ;;  %v5452_v42 = vld [vmem:[#allocation12_spill] sm:$0xff] }
 0x1f4   : > { %v3161_v24 = vadd.f32 %v3160_v52, %v3130_v47  ;;  %v4076_v25 = vpop.f32.mrf.mxu1  ;;  %v4124_v18 = vpop.f32.mrf.mxu0  ;;  %v2121_v40 = vadd.f32 %v5444_v9, %v5443_v27  ;;  %v2122_v17 = vadd.f32 %v5449_v31, %v5448_v37  ;;  %v2426_v52 = vadd.f32 %v5451_v60, %v2119_v11 }
 0x1f5   : > { %3065 = vst [vmem:[%s5251_s26 + $0x98] sm:$0xff] %v3033_v0  ;;  %v3031_v62 = vadd.f32 %v2954_v55, %v2725_v59  ;;  %v2730_v63 = vadd.f32 %v4076_v25, %v2424_v44  ;;  %v3093_v38 = vadd.f32 %v3092_v39, %v3030_v16  ;;  %v3135_v22 = vmul.f32 %v3033_v0, %v3033_v0  ;;  %v5453_v55 = vld [vmem:[#allocation36_spill] sm:$0xff]  ;;  %v5454_v59 = vld [vmem:[#allocation35_spill] sm:$0xff] }
 0x1f6   : > { %v3162_v34 = vadd.f32 %v3161_v24, %v3131_v51  ;;  %v2661_v10 = vpop.f32.mrf.mxu1  ;;  %v2967_v53 = vpop.f32.mrf.mxu0  ;;  %v2428_v48 = vadd.f32 %v5450_v19, %v2121_v40  ;;  %v2120_v41 = vadd.f32 %v5453_v55, %v5452_v42  ;;  %v2429_v51 = vadd.f32 %v5454_v59, %v2122_v17  ;;  %v5465_v55 = vld [vmem:[#allocation43_spill] sm:$0xff] }
 0x1f7   : > { %3063 = vst [vmem:[%s5251_s26 + $0x88] sm:$0xff] %v3031_v62  ;;  %v3133_v50 = vmul.f32 %v3031_v62, %v3031_v62  ;;  %v3036_v23 = vadd.f32 %v4124_v18, %v2730_v63  ;;  %v2728_v7 = vadd.f32 %v2661_v10, %v2422_v26  ;;  %v3094_v28 = vadd.f32 %v3093_v38, %v3031_v62  ;;  %v5455_v26 = vld [vmem:[#allocation13_spill] sm:$0xff]  ;;  %v5458_v10 = vld [vmem:[#allocation14_spill] sm:$0xff] }
 0x1f8   : > { %v3163_v1 = vadd.f32 %v3162_v34, %v3132_v57  ;;  %v4077_v13 = vpop.f32.mrf.mxu1  ;;  %v4125_v45 = vpop.f32.mrf.mxu0  ;;  %v5457_v57 = vld [vmem:[#allocation37_spill] sm:$0xff] }
 0x1f9   : > { %3068 = vst [vmem:[%s5251_s26 + $0xb0] sm:$0xff] %v3036_v23  ;;  %v3034_v43 = vadd.f32 %v2967_v53, %v2728_v7  ;;  %v2731_v4 = vadd.f32 %v4077_v13, %v2425_v58  ;;  %v3095_v54 = vadd.f32 %v3094_v28, %v3032_v36  ;;  %v2427_v34 = vadd.f32 %v5457_v57, %v2120_v41  ;;  %v5459_v53 = vld [vmem:[#allocation40_spill] sm:$0xff] }
 0x1fa   : > { %v3164_v15 = vadd.f32 %v3163_v1, %v3133_v50  ;;  %v2664_v2 = vpop.f32.mrf.mxu1  ;;  %v2970_v20 = vpop.f32.mrf.mxu0  ;;  %v2123_v27 = vadd.f32 %v5459_v53, %v5458_v10  ;;  %v3138_v50 = vmul.f32 %v3036_v23, %v3036_v23 }
 0x1fb   : > { %3066 = vst [vmem:[%s5251_s26 + $0xa0] sm:$0xff] %v3034_v43  ;;  %v3037_v12 = vadd.f32 %v4125_v45, %v2731_v4  ;;  %v2729_v16 = vadd.f32 %v2664_v2, %v2423_v29  ;;  %v3096_v8 = vadd.f32 %v3095_v54, %v3033_v0  ;;  %v3136_v39 = vmul.f32 %v3034_v43, %v3034_v43  ;;  %v5456_v0 = vld [vmem:[#allocation38_spill] sm:$0xff]  ;;  %v5460_v45 = vld [vmem:[#allocation39_spill] sm:$0xff]  ;;  %v5463_v54 = vld [vmem:[#allocation16_spill] sm:$0xff] }
 0x1fc   : > { %v3165_v3 = vadd.f32 %v3164_v15, %v3134_v56  ;;  %v4080_v6 = vpop.f32.mrf.mxu1  ;;  %v4128_v47 = vpop.f32.mrf.mxu0  ;;  %v2125_v35 = vadd.f32 %v5456_v0, %v5455_v26  ;;  %v5461_v29 = vld [vmem:[#allocation15_spill] sm:$0xff]  ;;  %v5462_v56 = vld [vmem:[#allocation41_spill] sm:$0xff]  ;;  %v2124_v15 = vadd.f32 %v5236_v32, %v5463_v54 }
 0x1fd   : > { %3069 = vst [vmem:[%s5251_s26 + $0xb8] sm:$0xff] %v3037_v12  ;;  %v3035_v36 = vadd.f32 %v2970_v20, %v2729_v16  ;;  %v2734_v44 = vadd.f32 %v4080_v6, %v2428_v48  ;;  %v3097_v24 = vadd.f32 %v3096_v8, %v3034_v43  ;;  %v2126_v61 = vadd.f32 %v5231_v33, %v5461_v29 }
 0x1fe   : > { %v3166_v25 = vadd.f32 %v3165_v3, %v3135_v22  ;;  %v2677_v18 = vpop.f32.mrf.mxu1  ;;  %v2983_v21 = vpop.f32.mrf.mxu0  ;;  %v2432_v49 = vadd.f32 %v5460_v45, %v2125_v35  ;;  %v3139_v43 = vmul.f32 %v3037_v12, %v3037_v12  ;;  %v5464_v3 = vld [vmem:[#allocation42_spill] sm:$0xff]  ;;  %v2431_v41 = vadd.f32 %v5465_v55, %v2124_v15 }
 0x1ff   : > { %3067 = vst [vmem:[%s5251_s26 + $0xa8] sm:$0xff] %v3035_v36  ;;  %v3137_v14 = vmul.f32 %v3035_v36, %v3035_v36  ;;  %v3040_v46 = vadd.f32 %v4128_v47, %v2734_v44  ;;  %v2732_v62 = vadd.f32 %v2677_v18, %v2426_v52  ;;  %v3098_v5 = vadd.f32 %v3097_v24, %v3035_v36 }
 0x200   : > { %v3167_v63 = vadd.f32 %v3166_v25, %v3136_v39  ;;  %v4081_v58 = vpop.f32.mrf.mxu1  ;;  %v4129_v38 = vpop.f32.mrf.mxu0  ;;  %v2433_v8 = vadd.f32 %v5464_v3, %v2126_v61 }
 0x201   : > { %3072 = vst [vmem:[%s5251_s26 + $0xd0] sm:$0xff] %v3040_v46  ;;  %v3038_v9 = vadd.f32 %v2983_v21, %v2732_v62  ;;  %v2735_v40 = vadd.f32 %v4081_v58, %v2429_v51  ;;  %v3099_v7 = vadd.f32 %v3098_v5, %v3036_v23  ;;  %v2430_v23 = vadd.f32 %v5462_v56, %v2123_v27 }
 0x202   : > { %v3168_v1 = vadd.f32 %v3167_v63, %v3137_v14  ;;  %v2680_v28 = vpop.f32.mrf.mxu1  ;;  %v2986_v13 = vpop.f32.mrf.mxu0  ;;  %v3142_v59 = vmul.f32 %v3040_v46, %v3040_v46 }
 0x203   : > { %3070 = vst [vmem:[%s5251_s26 + $0xc0] sm:$0xff] %v3038_v9  ;;  %v3041_v30 = vadd.f32 %v4129_v38, %v2735_v40  ;;  %v2733_v11 = vadd.f32 %v2680_v28, %v2427_v34  ;;  %v3100_v37 = vadd.f32 %v3099_v7, %v3037_v12  ;;  %v3140_v33 = vmul.f32 %v3038_v9, %v3038_v9 }
 0x204   : > { %v3169_v4 = vadd.f32 %v3168_v1, %v3138_v50  ;;  %v4084_v31 = vpop.f32.mrf.mxu1  ;;  %v4132_v17 = vpop.f32.mrf.mxu0 }
 0x205   : > { %3073 = vst [vmem:[%s5251_s26 + $0xd8] sm:$0xff] %v3041_v30  ;;  %v3039_v2 = vadd.f32 %v2986_v13, %v2733_v11  ;;  %v2738_v20 = vadd.f32 %v4084_v31, %v2432_v49  ;;  %v3101_v19 = vadd.f32 %v3100_v37, %v3038_v9  ;;  %v3143_v21 = vmul.f32 %v3041_v30, %v3041_v30 }
 0x206   : > { %v3170_v48 = vadd.f32 %v3169_v4, %v3139_v43  ;;  %v2693_v16 = vpop.f32.mrf.mxu1  ;;  %v2999_v22 = vpop.f32.mrf.mxu0 }
 0x207   : > { %3071 = vst [vmem:[%s5251_s26 + $0xc8] sm:$0xff] %v3039_v2  ;;  %v3141_v12 = vmul.f32 %v3039_v2, %v3039_v2  ;;  %v3044_v6 = vadd.f32 %v4132_v17, %v2738_v20  ;;  %v2736_v47 = vadd.f32 %v2693_v16, %v2430_v23  ;;  %v3102_v52 = vadd.f32 %v3101_v19, %v3039_v2 }
 0x208   : > { %v3171_v60 = vadd.f32 %v3170_v48, %v3140_v33  ;;  %v4085_v42 = vpop.f32.mrf.mxu1  ;;  %v4133_v32 = vpop.f32.mrf.mxu0 }
 0x209   : > { %3076 = vst [vmem:[%s5251_s26 + $0xf0] sm:$0xff] %v3044_v6  ;;  %v3042_v36 = vadd.f32 %v2999_v22, %v2736_v47  ;;  %v2739_v44 = vadd.f32 %v4085_v42, %v2433_v8  ;;  %v3103_v51 = vadd.f32 %v3102_v52, %v3040_v46  ;;  %v3146_v46 = vmul.f32 %v3044_v6, %v3044_v6 }
 0x20a   : > { %v3172_v24 = vadd.f32 %v3171_v60, %v3141_v12  ;;  %v2696_v39 = vpop.f32.mrf.mxu1  ;;  %v3002_v35 = vpop.f32.mrf.mxu0 }
 0x20b   : > { %3074 = vst [vmem:[%s5251_s26 + $0xe0] sm:$0xff] %v3042_v36  ;;  %v3045_v25 = vadd.f32 %v4133_v32, %v2739_v44  ;;  %v2737_v18 = vadd.f32 %v2696_v39, %v2431_v41  ;;  %v3104_v0 = vadd.f32 %v3103_v51, %v3041_v30  ;;  %v3144_v63 = vmul.f32 %v3042_v36, %v3042_v36 }
 0x20c   : > { %v3173_v26 = vadd.f32 %v3172_v24, %v3142_v59 }
 0x20d   : > { %3077 = vst [vmem:[%s5251_s26 + $0xf8] sm:$0xff] %v3045_v25  ;;  %v3043_v14 = vadd.f32 %v3002_v35, %v2737_v18  ;;  %v3105_v62 = vadd.f32 %v3104_v0, %v3042_v36  ;;  %v3147_v53 = vmul.f32 %v3045_v25, %v3045_v25 }
 0x20e   : > { %v3174_v5 = vadd.f32 %v3173_v26, %v3143_v21 }
 0x20f   : > { %3075 = vst [vmem:[%s5251_s26 + $0xe8] sm:$0xff] %v3043_v14  ;;  %v3145_v58 = vmul.f32 %v3043_v14, %v3043_v14  ;;  %v3106_v57 = vadd.f32 %v3105_v62, %v3043_v14 }
 0x210   : > { %v3175_v38 = vadd.f32 %v3174_v5, %v3144_v63 }
 0x211   : > { %v3107_v34 = vadd.f32 %v3106_v57, %v3044_v6 }
 0x212   : > { %v3176_v10 = vadd.f32 %v3175_v38, %v3145_v58 }
 0x213   : > { %v3108_v27 = vadd.f32 %v3107_v34, %v3045_v25 }
 0x214   : > { %v3177_v9 = vadd.f32 %v3176_v10, %v3146_v46 }
 0x215   : > { %v3109_v40 = vrot.slane %v3108_v27, 4 }
 0x216   : > { %v3178_v50 = vadd.f32 %v3177_v9, %v3147_v53 }
 0x217   : > { %v3110_v7 = vadd.f32 %v3109_v40, %v3108_v27 }
 0x218   : > { %v3179_v1 = vrot.slane %v3178_v50, 4 }
 0x219   : > { %v3111_v28 = vrot.slane %v3110_v7, 2 }
 0x21a   : > { %v3180_v13 = vadd.f32 %v3179_v1, %v3178_v50 }
 0x21b   : > { %v3112_v45 = vadd.f32 %v3111_v28, %v3110_v7 }
 0x21c   : > { %v3181_v49 = vrot.slane %v3180_v13, 2 }
 0x21d   : > { %v3113_v29 = vrot.slane %v3112_v45, 1 }
 0x21e   : > { %v3182_v61 = vadd.f32 %v3181_v49, %v3180_v13 }
 0x21f   : > { %v3114_v30 = vadd.f32 %v3113_v29, %v3112_v45 }
 0x220   : > { %v3183_v11 = vrot.slane %v3182_v61, 1 }
 0x221   : > { %3115 = vst [vmem:[%s235_s30] sm:$0x1] %v3114_v30 }
 0x222   : > { %v3184_v43 = vadd.f32 %v3183_v11, %v3182_v61 }
 0x224   : > { %3185 = vst [vmem:[%s235_s30 + $0x1] sm:$0x1] %v3184_v43 }
 0x225 PF: > { %s16_s18 = sadd.s32 1, %s4238_s18  }
 0x226   : > { %p13_p4 = scmp.ge.s32.totalorder %s16_s18, 4  }
 0x228   :  { %15 = sbr.rel (!%p13_p4) target bundleno = 1 (0x1), region = 88 }

// kernel: res_block_discriminator.5
= control target key start
LH: loop header
LB: loop body
LE: loop exit
PB: predicated region body
PF: predicated region fallthrough
CT: control target
= control target key end

     0   :  { %s4450_s18 = smov 0   ;;  %s5580_s0 = inlined_call_operand.vmem [shape: f32[2,16,16,128], index: 0, kind: input, shape index: {}]   ;;  %s5581_s1 = inlined_call_operand.vmem [shape: f32[1,128], index: 1, kind: input, shape index: {}]   ;;  %s5582_s2 = inlined_call_operand.vmem [shape: f32[1,128], index: 2, kind: input, shape index: {}]   ;;  %s5583_s3 = inlined_call_operand.vmem [shape: bf16[9,128,128], index: 3, kind: input, shape index: {}]   ;;  %s5584_s4 = inlined_call_operand.vmem [shape: f32[2,16,16,128], index: 4, kind: output, shape index: {0}]   ;;  %s5585_s5 = inlined_call_operand.vmem [shape: f32[2,2,128], index: 5, kind: output, shape index: {1}]  }
   0x1 LB: > { %s3446_s19 = sadd.s32 4294967295, %s4416_s18   ;;  %p3450_p0 = scmp.ge.s32.totalorder %s4416_s18, 1  ;;  %s4416_s18 = sphi %s4450_s18, %s16_s18  }
   0x2   : > { %p190_p1 = scmp.lt.s32.totalorder %s4416_s18, 3 }
   0x4   : > { %p191_p2 = pnand %p3450_p0, %p190_p1 }
   0x6   : > { %194 = sbr.rel (%p191_p2) target bundleno = 550 (0x226), region = 36 }
   0xb   : > { %v4335_v0 = vld [vmem:[%s5583_s3 + $0x78] sm:$0xff]   ;;  %v4464_v1 = vld [vmem:[%s5583_s3 + $0x70] sm:$0xff]   ;;  %v4418_v2 = vmov 0.0   ;;  %p222_p3 = scmp.lt.s32.totalorder %s3446_s19, 1  ;;  %v4337_v3 = vld [vmem:[%s5583_s3 + $0x68] sm:$0xff]  }
   0xc   : > { %443 = vst [vmem:[#allocation2] sm:$0xff] %v4418_v2  ;;  %444 = vst [vmem:[#allocation2 + $0x8] sm:$0xff] %v4418_v2  ;;  %3878 = vmatprep.subr.bf16.mxu0 %v4335_v0  ;;  %4310 = vmatprep.subr.bf16.mxu1 %v4335_v0  ;;  %v4338_v4 = vld [vmem:[%s5583_s3 + $0x60] sm:$0xff]   ;;  %v4339_v21 = vld [vmem:[%s5583_s3 + $0x58] sm:$0xff]  }
   0xd   : > { %445 = vst [vmem:[#allocation2 + $0x10] sm:$0x3] %v4418_v2  ;;  %446 = vst [vmem:[#allocation2 + $0x18] sm:$0xff] %v4418_v2  ;;  %3879 = vmatpush3.bf16.msra.mxu0 %v4335_v0  ;;  %4318 = vmatpush3.bf16.msra.mxu1 %v4335_v0  ;;  %s5669_s19 = smov (!%p222_p3, %s3446_s19), 1  ;;  %v4495_v10 = vld [vmem:[%s5581_s1] ss:$0 sm:$0xff] }
   0xe   : > { %447 = vst [vmem:[#allocation2 + $0x20] sm:$0xff] %v4418_v2  ;;  %448 = vst [vmem:[#allocation2 + $0x28] sm:$0x3] %v4418_v2  ;;  %3880 = vmatprep.subr.bf16.mxu0 %v4464_v1  ;;  %4311 = vmatprep.subr.bf16.mxu1 %v4464_v1  ;;  %s3660_s26 = sshll.u32 %s5669_s19, 8  ;;  %v4500_v11 = vld [vmem:[%s5582_s2] ss:$0 sm:$0xff] }
   0xf   : > { %449 = vst [vmem:[#allocation2 + $0x30] sm:$0xff] %v4418_v2  ;;  %450 = vst [vmem:[#allocation2 + $0x38] sm:$0xff] %v4418_v2  ;;  %s4483_s29 = scalar_lea.vmem %s5580_s0, %s3660_s26  ;;  %v4340_v32 = vld [vmem:[%s5583_s3 + $0x50] sm:$0xff]   ;;  %v4341_v52 = vld [vmem:[%s5583_s3 + $0x48] sm:$0xff]   ;;  %s5453_s27 = scalar_lea.vmem %s5584_s4, %s3660_s26 }
  0x10   : > { %451 = vst [vmem:[#allocation2 + $0x40] sm:$0x3] %v4418_v2  ;;  %452 = vst [vmem:[#allocation2 + $0x48] sm:$0xff] %v4418_v2  ;;  %v251_v7 = vld [vmem:[%s4483_s29 + $0x70] sm:$0xff]  ;;  %v252_v9 = vld [vmem:[%s4483_s29 + $0x78] sm:$0xff]  ;;  %s3455_s26 = sshll.u32 %s5669_s19, 1 }
  0x11   : > { %453 = vst [vmem:[#allocation2 + $0x50] sm:$0xff] %v4418_v2  ;;  %454 = vst [vmem:[#allocation2 + $0x58] sm:$0x3] %v4418_v2  ;;  %3881 = vmatpush3.bf16.msra.mxu0 %v4464_v1  ;;  %4319 = vmatpush3.bf16.msra.mxu1 %v4464_v1  ;;  %v291_v12 = vmul.f32 %v4495_v10, %v251_v7  ;;  %v292_v13 = vmul.f32 %v4495_v10, %v252_v9  ;;  %v237_v14 = vld [vmem:[%s4483_s29] sm:$0xff]  ;;  %v238_v15 = vld [vmem:[%s4483_s29 + $0x8] sm:$0xff]  ;;  %s235_s30 = scalar_lea.vmem %s5585_s5, %s3455_s26 }
  0x12   : > { %455 = vst [vmem:[#allocation2 + $0x60] sm:$0xff] %v4418_v2  ;;  %456 = vst [vmem:[#allocation2 + $0x68] sm:$0xff] %v4418_v2  ;;  %3882 = vmatprep.subr.bf16.mxu0 %v4337_v3  ;;  %4312 = vmatprep.subr.bf16.mxu1 %v4337_v3  ;;  %v253_v16 = vld [vmem:[%s4483_s29 + $0x80] sm:$0xff]  ;;  %v277_v17 = vmul.f32 %v4495_v10, %v237_v14  ;;  %v278_v18 = vmul.f32 %v4495_v10, %v238_v15  ;;  %v254_v19 = vld [vmem:[%s4483_s29 + $0x88] sm:$0xff] }
  0x13   : > { %457 = vst [vmem:[#allocation2 + $0x70] sm:$0x3] %v4418_v2  ;;  %458 = vst [vmem:[#allocation2 + $0x78] sm:$0xff] %v4418_v2  ;;  %v594_v5 = vld [vmem:[#allocation2 + $0x1] sm:$0xff]  ;;  %v293_v20 = vmul.f32 %v4495_v10, %v253_v16  ;;  %v329_v22 = vadd.f32 %v4500_v11, %v291_v12  ;;  %v330_v23 = vadd.f32 %v4500_v11, %v292_v13  ;;  %v239_v40 = vld [vmem:[%s4483_s29 + $0x10] sm:$0xff] }
  0x14   : > { %459 = vst [vmem:[#allocation2 + $0x80] sm:$0xff] %v4418_v2  ;;  %460 = vst [vmem:[#allocation2 + $0x88] sm:$0x3] %v4418_v2  ;;  %v595_v6 = vld [vmem:[#allocation2 + $0x9] sm:$0xff]  ;;  %v294_v24 = vmul.f32 %v4495_v10, %v254_v19  ;;  %v315_v25 = vadd.f32 %v4500_v11, %v277_v17  ;;  %v316_v26 = vadd.f32 %v4500_v11, %v278_v18  ;;  %v240_v41 = vld [vmem:[%s4483_s29 + $0x18] sm:$0xff] }
  0x15   : > { %461 = vst [vmem:[#allocation2 + $0x90] sm:$0xff] %v4418_v2  ;;  %462 = vst [vmem:[#allocation2 + $0x98] sm:$0xff] %v4418_v2  ;;  %v626_v8 = vpack.c.bf16 %v595_v6, %v594_v5  ;;  %3883 = vmatpush3.bf16.msra.mxu0 %v4337_v3  ;;  %4320 = vmatpush3.bf16.msra.mxu1 %v4337_v3  ;;  %v331_v27 = vadd.f32 %v4500_v11, %v293_v20  ;;  %vm361_vm0 = vcmp.ge.f32.partialorder %v329_v22, 0.0  ;;  %v255_v45 = vld [vmem:[%s4483_s29 + $0x90] sm:$0xff]  ;;  %v256_v46 = vld [vmem:[%s4483_s29 + $0x98] sm:$0xff] }
  0x16   : > { %463 = vst [vmem:[#allocation2 + $0xa0] sm:$0x3] %v4418_v2  ;;  %464 = vst [vmem:[#allocation2 + $0xa8] sm:$0xff] %v4418_v2  ;;  %3884 = vmatprep.subr.bf16.mxu0 %v4338_v4  ;;  %4313 = vmatprep.subr.bf16.mxu1 %v4338_v4  ;;  %vm362_vm1 = vcmp.ge.f32.partialorder %v330_v23, 0.0  ;;  %v393_v28 = vmul.f32 0.2, %v329_v22  ;;  %v332_v35 = vadd.f32 %v4500_v11, %v294_v24 }
  0x17   : > { %465 = vst [vmem:[#allocation2 + $0xb0] sm:$0xff] %v4418_v2  ;;  %466 = vst [vmem:[#allocation2 + $0xb8] sm:$0x3] %v4418_v2  ;;  %3894 = vmatprep.mubr.bf16.mxu0 %v626_v8  ;;  %v394_v29 = vmul.f32 0.2, %v330_v23  ;;  %vm347_vm2 = vcmp.ge.f32.partialorder %v315_v25, 0.0  ;;  %v279_v44 = vmul.f32 %v4495_v10, %v239_v40  ;;  %v280_v49 = vmul.f32 %v4495_v10, %v240_v41 }
  0x18   : > { %467 = vst [vmem:[#allocation2 + $0xc0] sm:$0xff] %v4418_v2  ;;  %468 = vst [vmem:[#allocation2 + $0xc8] sm:$0xff] %v4418_v2  ;;  %vm348_vm3 = vcmp.ge.f32.partialorder %v316_v26, 0.0  ;;  %v379_v30 = vmul.f32 0.2, %v315_v25  ;;  %v425_v33 = vsel %vm361_vm0, %v329_v22, %v393_v28  ;;  %vm363_vm4 = vcmp.ge.f32.partialorder %v331_v27, 0.0 }
  0x19   : > { %469 = vst [vmem:[#allocation2 + $0xd0] sm:$0x3] %v4418_v2  ;;  %470 = vst [vmem:[#allocation2 + $0xd8] sm:$0xff] %v4418_v2  ;;  %3885 = vmatpush3.bf16.msra.mxu0 %v4338_v4  ;;  %4321 = vmatpush3.bf16.msra.mxu1 %v4338_v4  ;;  %v380_v31 = vmul.f32 0.2, %v316_v26  ;;  %v426_v34 = vsel %vm362_vm1, %v330_v23, %v394_v29  ;;  %vm364_vm5 = vcmp.ge.f32.partialorder %v332_v35, 0.0 }
  0x1a   : > { %471 = vst [vmem:[#allocation2 + $0xe0] sm:$0xff] %v4418_v2  ;;  %472 = vst [vmem:[#allocation2 + $0xe8] sm:$0x3] %v4418_v2  ;;  %3886 = vmatprep.subr.bf16.mxu0 %v4339_v21  ;;  %4314 = vmatprep.subr.bf16.mxu1 %v4339_v21  ;;  %v634_v36 = vpack.c.bf16 %v426_v34, %v425_v33  ;;  %v4524_v37 = vsel %vm347_vm2, %v315_v25, %v379_v30  ;;  %v395_v39 = vmul.f32 0.2, %v331_v27  ;;  %v241_v47 = vld [vmem:[%s4483_s29 + $0x20] sm:$0xff] }
  0x1b   : > { %473 = vst [vmem:[#allocation2 + $0xf0] sm:$0xff] %v4418_v2  ;;  %474 = vst [vmem:[#allocation2 + $0xf8] sm:$0xff] %v4418_v2  ;;  %v4526_v38 = vsel %vm348_vm3, %v316_v26, %v380_v31  ;;  %v396_v43 = vmul.f32 0.2, %v332_v35  ;;  %v295_v50 = vmul.f32 %v4495_v10, %v255_v45  ;;  %v242_v51 = vld [vmem:[%s4483_s29 + $0x28] sm:$0xff]  ;;  %v317_v54 = vadd.f32 %v4500_v11, %v279_v44  ;;  %v4342_v60 = vld [vmem:[%s5583_s3 + $0x40] sm:$0xff]  }
  0x1c   : > { %475 = vst [vmem:[#allocation2 + $0x100] sm:$0x3] %v4418_v2  ;;  %476 = vst [vmem:[#allocation2 + $0x108] sm:$0xff] %v4418_v2  ;;  %v627_v42 = vpack.c.bf16 %v4526_v38, %v4524_v37  ;;  %v4539_v48 = vsel %vm363_vm4, %v331_v27, %v395_v39  ;;  %v296_v55 = vmul.f32 %v4495_v10, %v256_v46  ;;  %3910 = vmatprep.mubr.bf16.mxu1 %v634_v36  ;;  %v257_v0 = vld [vmem:[%s4483_s29 + $0xa0] sm:$0xff]  ;;  %v258_v6 = vld [vmem:[%s4483_s29 + $0xa8] sm:$0xff] }
  0x1d   : > { %477 = vst [vmem:[#allocation2 + $0x110] sm:$0xff] %v4418_v2  ;;  %478 = vst [vmem:[#allocation2 + $0x118] sm:$0x3] %v4418_v2  ;;  %3887 = vmatpush3.bf16.msra.mxu0 %v4339_v21  ;;  %4322 = vmatpush3.bf16.msra.mxu1 %v4339_v21  ;;  %v4547_v53 = vsel %vm364_vm5, %v332_v35, %v396_v43  ;;  %v318_v57 = vadd.f32 %v4500_v11, %v280_v49  ;;  %vm349_vm6 = vcmp.ge.f32.partialorder %v317_v54, 0.0  ;;  %v243_v13 = vld [vmem:[%s4483_s29 + $0x30] sm:$0xff]  ;;  %v244_v17 = vld [vmem:[%s4483_s29 + $0x38] sm:$0xff] }
  0x1e   : > { %479 = vst [vmem:[#allocation2 + $0x120] sm:$0xff] %v4418_v2  ;;  %480 = vst [vmem:[#allocation2 + $0x128] sm:$0xff] %v4418_v2  ;;  %3888 = vmatprep.subr.bf16.mxu0 %v4340_v32  ;;  %4315 = vmatprep.subr.bf16.mxu1 %v4340_v32  ;;  %v635_v56 = vpack.c.bf16 %v4547_v53, %v4539_v48  ;;  %v333_v58 = vadd.f32 %v4500_v11, %v295_v50  ;;  %v381_v61 = vmul.f32 0.2, %v317_v54  ;;  %v259_v18 = vld [vmem:[%s4483_s29 + $0xb0] sm:$0xff]  ;;  %v4343_v19 = vld [vmem:[%s5583_s3 + $0x38] sm:$0xff]  }
  0x1f   : > { %481 = vst [vmem:[#allocation2 + $0x130] sm:$0x3] %v4418_v2  ;;  %482 = vst [vmem:[#allocation2 + $0x138] sm:$0xff] %v4418_v2  ;;  %v281_v59 = vmul.f32 %v4495_v10, %v241_v47  ;;  %v334_v62 = vadd.f32 %v4500_v11, %v296_v55  ;;  %v282_v63 = vmul.f32 %v4495_v10, %v242_v51  ;;  %vm350_vm7 = vcmp.ge.f32.partialorder %v318_v57, 0.0  ;;  %v4344_v20 = vld [vmem:[%s5583_s3 + $0xb8] sm:$0xff]   ;;  %v4346_v36 = vld [vmem:[%s5583_s3 + $0xb0] sm:$0xff]  }
  0x20   : > { %483 = vst [vmem:[#allocation2 + $0x140] sm:$0xff] %v4418_v2  ;;  %484 = vst [vmem:[#allocation2 + $0x148] sm:$0x3] %v4418_v2  ;;  %v382_v1 = vmul.f32 0.2, %v318_v57  ;;  %vm365_vm8 = vcmp.ge.f32.partialorder %v333_v58, 0.0  ;;  %v413_v3 = vsel %vm349_vm6, %v317_v54, %v381_v61  ;;  %v297_v12 = vmul.f32 %v4495_v10, %v257_v0 }
  0x21   : > { %485 = vst [vmem:[#allocation2 + $0x150] sm:$0xff] %v4418_v2  ;;  %486 = vst [vmem:[#allocation2 + $0x158] sm:$0xff] %v4418_v2  ;;  %3889 = vmatpush3.bf16.msra.mxu0 %v4340_v32  ;;  %4323 = vmatpush3.bf16.msra.mxu1 %v4340_v32  ;;  %vm366_vm9 = vcmp.ge.f32.partialorder %v334_v62, 0.0  ;;  %v398_v4 = vmul.f32 0.2, %v334_v62  ;;  %v319_v5 = vadd.f32 %v4500_v11, %v281_v59  ;;  %v260_v27 = vld [vmem:[%s4483_s29 + $0xb8] sm:$0xff] }
  0x22   : > { %487 = vst [vmem:[#allocation2 + $0x160] sm:$0x3] %v4418_v2  ;;  %488 = vst [vmem:[#allocation2 + $0x168] sm:$0xff] %v4418_v2  ;;  %3890 = vmatprep.subr.bf16.mxu0 %v4341_v52  ;;  %4316 = vmatprep.subr.bf16.mxu1 %v4341_v52  ;;  %v414_v7 = vsel %vm350_vm7, %v318_v57, %v382_v1  ;;  %v320_v9 = vadd.f32 %v4500_v11, %v282_v63  ;;  %v4597_v32 = vld [vmem:[%s5583_s3 + $0x30] sm:$0xff]   ;;  %v245_v46 = vld [vmem:[%s4483_s29 + $0x40] sm:$0xff] }
  0x23   : > { %489 = vst [vmem:[#allocation2 + $0x170] sm:$0xff] %v4418_v2  ;;  %490 = vst [vmem:[#allocation2 + $0x178] sm:$0x3] %v4418_v2  ;;  %v4571_v14 = vpack.c.bf16 %v414_v7, %v413_v3  ;;  %v4573_v15 = vsel %vm366_vm9, %v334_v62, %v398_v4  ;;  %vm351_vm10 = vcmp.ge.f32.partialorder %v319_v5, 0.0  ;;  %v383_v16 = vmul.f32 0.2, %v319_v5 }
  0x24   : > { %491 = vst [vmem:[#allocation2 + $0x180] sm:$0xff] %v4418_v2  ;;  %492 = vst [vmem:[#allocation2 + $0x188] sm:$0xff] %v4418_v2  ;;  %vm352_vm11 = vcmp.ge.f32.partialorder %v320_v9, 0.0  ;;  %v384_v22 = vmul.f32 0.2, %v320_v9  ;;  %v298_v23 = vmul.f32 %v4495_v10, %v258_v6  ;;  %v335_v25 = vadd.f32 %v4500_v11, %v297_v12  ;;  %v246_v51 = vld [vmem:[%s4483_s29 + $0x48] sm:$0xff] }
  0x25   : > { %493 = vst [vmem:[#allocation2 + $0x190] sm:$0x3] %v4418_v2  ;;  %494 = vst [vmem:[#allocation2 + $0x198] sm:$0xff] %v4418_v2  ;;  %3891 = vmatpush3.bf16.msra.mxu0 %v4341_v52  ;;  %4324 = vmatpush3.bf16.msra.mxu1 %v4341_v52  ;;  %v415_v24 = vsel %vm351_vm10, %v319_v5, %v383_v16  ;;  %v283_v26 = vmul.f32 %v4495_v10, %v243_v13  ;;  %v4347_v54 = vld [vmem:[%s5583_s3 + $0x28] sm:$0xff]   ;;  %v248_v62 = vld [vmem:[%s4483_s29 + $0x58] sm:$0xff] }
  0x26   : > { %495 = vst [vmem:[#allocation2 + $0x1a0] sm:$0xff] %v4418_v2  ;;  %496 = vst [vmem:[#allocation2 + $0x1a8] sm:$0x3] %v4418_v2  ;;  %v397_v2 = vmul.f32 0.2, %v333_v58  ;;  %3892 = vmatprep.subr.bf16.mxu0 %v4342_v60  ;;  %4317 = vmatprep.subr.bf16.mxu1 %v4342_v60  ;;  %v416_v28 = vsel %vm352_vm11, %v320_v9, %v384_v22  ;;  %v336_v29 = vadd.f32 %v4500_v11, %v298_v23  ;;  %v4349_v6 = vld [vmem:[%s5583_s3 + $0x20] sm:$0xff]  }
  0x27   : > { %512 = vst [vmem:[#allocation2 + $0xc1] sm:$0xff] %v425_v33  ;;  %513 = vst [vmem:[#allocation2 + $0xc9] sm:$0xff] %v426_v34  ;;  %v284_v30 = vmul.f32 %v4495_v10, %v244_v17  ;;  %v299_v31 = vmul.f32 %v4495_v10, %v259_v18  ;;  %v4599_v33 = vpack.c.bf16 %v416_v28, %v415_v24  ;;  %vm367_vm12 = vcmp.ge.f32.partialorder %v335_v25, 0.0  ;;  %v4350_v12 = vld [vmem:[%s5583_s3 + $0xa0] sm:$0xff]  }
  0x28   : > { %498 = vst [vmem:[#allocation2 + $0x19] sm:$0xff] %v4524_v37  ;;  %499 = vst [vmem:[#allocation2 + $0x21] sm:$0xff] %v4526_v38  ;;  %v4566_v8 = vsel %vm365_vm8, %v333_v58, %v397_v2  ;;  %v399_v34 = vmul.f32 0.2, %v335_v25  ;;  %v321_v35 = vadd.f32 %v4500_v11, %v283_v26  ;;  %vm368_vm13 = vcmp.ge.f32.partialorder %v336_v29, 0.0  ;;  %v261_v37 = vld [vmem:[%s4483_s29 + $0xc0] sm:$0xff] }
  0x29   : > { %514 = vst [vmem:[#allocation2 + $0xd9] sm:$0xff] %v4539_v48  ;;  %515 = vst [vmem:[#allocation2 + $0xe1] sm:$0xff] %v4547_v53  ;;  %v636_v21 = vpack.c.bf16 %v4573_v15, %v4566_v8  ;;  %3893 = vmatpush3.bf16.msra.mxu0 %v4342_v60  ;;  %4325 = vmatpush3.bf16.msra.mxu1 %v4342_v60  ;;  %v400_v39 = vmul.f32 0.2, %v336_v29  ;;  %v322_v40 = vadd.f32 %v4500_v11, %v284_v30  ;;  %v4348_v38 = vld [vmem:[%s5583_s3 + $0xa8] sm:$0xff]   ;;  %v247_v58 = vld [vmem:[%s4483_s29 + $0x50] sm:$0xff] }
  0x2a   : > { %500 = vst [vmem:[#allocation2 + $0x31] sm:$0xff] %v413_v3  ;;  %501 = vst [vmem:[#allocation2 + $0x39] sm:$0xff] %v414_v7  ;;  %v300_v41 = vmul.f32 %v4495_v10, %v260_v27  ;;  %3926 = vmatprep.subr.bf16.mxu1 %v4343_v19  ;;  %3974 = vmatprep.subr.bf16.mxu0 %v4344_v20  ;;  %v4607_v43 = vsel %vm367_vm12, %v335_v25, %v399_v34  ;;  %vm353_vm14 = vcmp.ge.f32.partialorder %v321_v35, 0.0  ;;  %v249_v25 = vld [vmem:[%s4483_s29 + $0x60] sm:$0xff] }
  0x2b   : > { %516 = vst [vmem:[#allocation2 + $0xf1] sm:$0xff] %v4566_v8  ;;  %517 = vst [vmem:[#allocation2 + $0xf9] sm:$0xff] %v4573_v15  ;;  %v385_v44 = vmul.f32 0.2, %v321_v35  ;;  %v337_v45 = vadd.f32 %v4500_v11, %v299_v31  ;;  %v4611_v47 = vsel %vm368_vm13, %v336_v29, %v400_v39  ;;  %vm354_vm15 = vcmp.ge.f32.partialorder %v322_v40, 0.0  ;;  %v250_v29 = vld [vmem:[%s4483_s29 + $0x68] sm:$0xff] }
  0x2c   : > { %502 = vst [vmem:[#allocation2 + $0x49] sm:$0xff] %v415_v24  ;;  %503 = vst [vmem:[#allocation2 + $0x51] sm:$0xff] %v416_v28  ;;  %v386_v49 = vmul.f32 0.2, %v322_v40  ;;  %v338_v50 = vadd.f32 %v4500_v11, %v300_v41  ;;  %3895 = vmatmul.mubr.bf16.vlgmr.msra.gmra.mxu0 %v627_v42  ;;  %3911 = vmatmul.mubr.bf16.vlgmr.msra.gmra.mxu1 %v635_v56  ;;  %v637_v52 = vpack.c.bf16 %v4611_v47, %v4607_v43  ;;  %v262_v56 = vld [vmem:[%s4483_s29 + $0xc8] sm:$0xff]  ;;  %v4351_v24 = vld [vmem:[%s5583_s3 + $0x18] sm:$0xff]  }
  0x2d   : > { %518 = vst [vmem:[#allocation2 + $0x109] sm:$0xff] %v4607_v43  ;;  %519 = vst [vmem:[#allocation2 + $0x111] sm:$0xff] %v4611_v47  ;;  %v417_v55 = vsel %vm353_vm14, %v321_v35, %v385_v44  ;;  %vm369_vm0 = vcmp.ge.f32.partialorder %v337_v45, 0.0  ;;  %v401_v57 = vmul.f32 0.2, %v337_v45  ;;  %3927 = vmatpush3.bf16.msra.mxu1 %v4343_v19  ;;  %3975 = vmatpush3.bf16.msra.mxu0 %v4344_v20  ;;  %v263_v20 = vld [vmem:[%s4483_s29 + $0xd0] sm:$0xff] }
  0x2e   : > { %v418_v42 = vsel %vm354_vm15, %v322_v40, %v386_v49  ;;  %504 = vst [vmem:[#allocation2 + $0x61] sm:$0xff] %v417_v55  ;;  %vm370_vm1 = vcmp.ge.f32.partialorder %v338_v50, 0.0  ;;  %v402_v48 = vmul.f32 0.2, %v338_v50  ;;  %v285_v53 = vmul.f32 %v4495_v10, %v245_v46  ;;  %3928 = vmatprep.subr.bf16.mxu1 %v4597_v32  ;;  %3976 = vmatprep.subr.bf16.mxu0 %v4346_v36  ;;  %v4352_v31 = vld [vmem:[%s5583_s3 + $0x98] sm:$0xff]   ;;  %v266_v47 = vld [vmem:[%s4483_s29 + $0xe8] sm:$0xff] }
  0x2f   : > { %505 = vst [vmem:[#allocation2 + $0x69] sm:$0xff] %v418_v42  ;;  %v4637_v59 = vpack.c.bf16 %v418_v42, %v417_v55  ;;  %v433_v60 = vsel %vm369_vm0, %v337_v45, %v401_v57  ;;  %v286_v61 = vmul.f32 %v4495_v10, %v246_v51  ;;  %3898 = vmatprep.mubr.bf16.mxu0 %v4571_v14  ;;  %v4353_v49 = vld [vmem:[%s5583_s3 + $0x10] sm:$0xff]  }
  0x30   : > { %3914 = vmatprep.mubr.bf16.mxu1 %v636_v21  ;;  %v434_v63 = vsel %vm370_vm1, %v338_v50, %v402_v48  ;;  %520 = vst [vmem:[#allocation2 + $0x121] sm:$0xff] %v433_v60  ;;  %v323_v0 = vadd.f32 %v4500_v11, %v285_v53  ;;  %v301_v1 = vmul.f32 %v4495_v10, %v261_v37  ;;  %v264_v21 = vld [vmem:[%s4483_s29 + $0xd8] sm:$0xff]  ;;  %v4354_v50 = vld [vmem:[%s5583_s3 + $0x90] sm:$0xff]  }
  0x31   : > { %521 = vst [vmem:[#allocation2 + $0x129] sm:$0xff] %v434_v63  ;;  %v4648_v2 = vpack.c.bf16 %v434_v63, %v433_v60  ;;  %v324_v3 = vadd.f32 %v4500_v11, %v286_v61  ;;  %v302_v4 = vmul.f32 %v4495_v10, %v262_v56  ;;  %v287_v5 = vmul.f32 %v4495_v10, %v247_v58  ;;  %v4355_v63 = vld [vmem:[%s5583_s3 + $0x8] sm:$0xff]  }
  0x32   : > { %3929 = vmatpush3.bf16.msra.mxu1 %v4597_v32  ;;  %3977 = vmatpush3.bf16.msra.mxu0 %v4346_v36  ;;  %vm355_vm2 = vcmp.ge.f32.partialorder %v323_v0, 0.0  ;;  %v387_v7 = vmul.f32 0.2, %v323_v0  ;;  %v339_v8 = vadd.f32 %v4500_v11, %v301_v1  ;;  %v288_v9 = vmul.f32 %v4495_v10, %v248_v62  ;;  %v265_v36 = vld [vmem:[%s4483_s29 + $0xe0] sm:$0xff] }
  0x33   : > { %3930 = vmatprep.subr.bf16.mxu1 %v4347_v54  ;;  %3978 = vmatprep.subr.bf16.mxu0 %v4348_v38  ;;  %vm356_vm3 = vcmp.ge.f32.partialorder %v324_v3, 0.0  ;;  %v388_v13 = vmul.f32 0.2, %v324_v3  ;;  %v340_v15 = vadd.f32 %v4500_v11, %v302_v4  ;;  %v325_v16 = vadd.f32 %v4500_v11, %v287_v5  ;;  %v1077_v5 = vld [vmem:[#allocation2 + $0x2] sm:$0xff] }
  0x34   : > { %v419_v17 = vsel %vm355_vm2, %v323_v0, %v387_v7  ;;  %vm371_vm4 = vcmp.ge.f32.partialorder %v339_v8, 0.0  ;;  %v403_v18 = vmul.f32 0.2, %v339_v8  ;;  %v326_v19 = vadd.f32 %v4500_v11, %v288_v9  ;;  %3899 = vmatmul.mubr.bf16.gmra.mxu0 %v4599_v33  ;;  %3915 = vmatmul.mubr.bf16.gmra.mxu1 %v637_v52  ;;  %v4356_v0 = vld [vmem:[%s5583_s3 + $0x88] sm:$0xff]  }
  0x35   : > { %v420_v22 = vsel %vm356_vm3, %v324_v3, %v388_v13  ;;  %506 = vst [vmem:[#allocation2 + $0x79] sm:$0xff] %v419_v17  ;;  %vm372_vm5 = vcmp.ge.f32.partialorder %v340_v15, 0.0  ;;  %v404_v23 = vmul.f32 0.2, %v340_v15  ;;  %vm357_vm6 = vcmp.ge.f32.partialorder %v325_v16, 0.0  ;;  %3902 = vmatprep.mubr.bf16.mxu0 %v4637_v59  ;;  %3918 = vmatprep.mubr.bf16.mxu1 %v4648_v2 }
  0x36   : > { %3931 = vmatpush3.bf16.msra.mxu1 %v4347_v54  ;;  %3979 = vmatpush3.bf16.msra.mxu0 %v4348_v38  ;;  %507 = vst [vmem:[#allocation2 + $0x81] sm:$0xff] %v420_v22  ;;  %v4672_v26 = vpack.c.bf16 %v420_v22, %v419_v17  ;;  %v435_v27 = vsel %vm371_vm4, %v339_v8, %v403_v18  ;;  %vm358_vm7 = vcmp.ge.f32.partialorder %v326_v19, 0.0  ;;  %v389_v28 = vmul.f32 0.2, %v325_v16  ;;  %v4358_v8 = vld [vmem:[%s5583_s3 + $0x80] sm:$0xff]   ;;  %v532_v17 = vld [vmem:[#allocation2 + $0x18] sm:$0xff] }
  0x37   : > { %3932 = vmatprep.subr.bf16.mxu1 %v4349_v6  ;;  %3980 = vmatprep.subr.bf16.mxu0 %v4350_v12  ;;  %v436_v30 = vsel %vm372_vm5, %v340_v15, %v404_v23  ;;  %522 = vst [vmem:[#allocation2 + $0x139] sm:$0xff] %v435_v27  ;;  %v390_v32 = vmul.f32 0.2, %v326_v19  ;;  %v303_v34 = vmul.f32 %v4495_v10, %v263_v20  ;;  %v1079_v15 = vld [vmem:[#allocation2 + $0x1a] sm:$0xff]  ;;  %v4419_v20 = vmov 0.0|0.0   ;;  %v534_v22 = vld [vmem:[#allocation2 + $0x30] sm:$0xff] }
  0x38   : > { %v304_v35 = vmul.f32 %v4495_v10, %v264_v21  ;;  %523 = vst [vmem:[#allocation2 + $0x141] sm:$0xff] %v436_v30  ;;  %v4684_v39 = vpack.c.bf16 %v436_v30, %v435_v27  ;;  %v421_v40 = vsel %vm357_vm6, %v325_v16, %v389_v28  ;;  %v289_v41 = vmul.f32 %v4495_v10, %v249_v25  ;;  %v1080_v16 = vld [vmem:[#allocation2 + $0x22] sm:$0xff]  ;;  %v4359_v21 = vld [vmem:[%s5583_s3 + $0xf8] sm:$0xff]  }
  0x39   : > { %v422_v43 = vsel %vm358_vm7, %v326_v19, %v390_v32  ;;  %508 = vst [vmem:[#allocation2 + $0x91] sm:$0xff] %v421_v40  ;;  %v341_v44 = vadd.f32 %v4500_v11, %v303_v34  ;;  %v290_v46 = vmul.f32 %v4495_v10, %v250_v29  ;;  %v305_v54 = vmul.f32 %v4495_v10, %v265_v36  ;;  %v533_v18 = vld [vmem:[#allocation2 + $0x20] sm:$0xff]  ;;  %v4360_v19 = vld [vmem:[%s5583_s3 + $0x138] sm:$0xff]   ;;  %v536_v32 = vld [vmem:[#allocation2 + $0x48] sm:$0xff] }
  0x3a   : > { %v342_v45 = vadd.f32 %v4500_v11, %v304_v35  ;;  %3933 = vmatpush3.bf16.msra.mxu1 %v4349_v6  ;;  %3981 = vmatpush3.bf16.msra.mxu0 %v4350_v12  ;;  %509 = vst [vmem:[#allocation2 + $0x99] sm:$0xff] %v422_v43  ;;  %v4699_v51 = vpack.c.bf16 %v422_v43, %v421_v40  ;;  %v1078_v6 = vld [vmem:[#allocation2 + $0xa] sm:$0xff]  ;;  %v4357_v12 = vld [vmem:[%s5583_s3] sm:$0xff]   ;;  %v535_v23 = vld [vmem:[#allocation2 + $0x38] sm:$0xff] }
  0x3b   : > { %v327_v52 = vadd.f32 %v4500_v11, %v289_v41  ;;  %3934 = vmatprep.subr.bf16.mxu1 %v4351_v24  ;;  %3982 = vmatprep.subr.bf16.mxu0 %v4352_v31  ;;  %vm373_vm8 = vcmp.ge.f32.partialorder %v341_v44, 0.0  ;;  %v405_v55 = vmul.f32 0.2, %v341_v44  ;;  %v328_v37 = vadd.f32 %v4500_v11, %v290_v46  ;;  %v1081_v25 = vld [vmem:[#allocation2 + $0x32] sm:$0xff]  ;;  %v1082_v27 = vld [vmem:[#allocation2 + $0x3a] sm:$0xff]  ;;  %v1083_v35 = vld [vmem:[#allocation2 + $0x4a] sm:$0xff] }
  0x3c   : > { %vm374_vm9 = vcmp.ge.f32.partialorder %v342_v45, 0.0  ;;  %v406_v57 = vmul.f32 0.2, %v342_v45  ;;  %v306_v42 = vmul.f32 %v4495_v10, %v266_v47  ;;  %3903 = vmatmul.mubr.bf16.gmra.mxu0 %v4672_v26  ;;  %3919 = vmatmul.mubr.bf16.gmra.mxu1 %v4684_v39  ;;  %v343_v56 = vadd.f32 %v4500_v11, %v305_v54  ;;  %v537_v34 = vld [vmem:[#allocation2 + $0x50] sm:$0xff]  ;;  %v538_v41 = vld [vmem:[#allocation2 + $0x60] sm:$0xff]  ;;  %v539_v43 = vld [vmem:[#allocation2 + $0x68] sm:$0xff] }
  0x3d   : > { %vm359_vm10 = vcmp.ge.f32.partialorder %v327_v52, 0.0  ;;  %v391_v38 = vmul.f32 0.2, %v327_v52  ;;  %v437_v48 = vsel %vm373_vm8, %v341_v44, %v405_v55  ;;  %vm360_vm11 = vcmp.ge.f32.partialorder %v328_v37, 0.0  ;;  %3906 = vmatprep.mubr.bf16.mxu0 %v4699_v51  ;;  %v1084_v36 = vld [vmem:[#allocation2 + $0x52] sm:$0xff]  ;;  %v1085_v44 = vld [vmem:[#allocation2 + $0x62] sm:$0xff] }
  0x3e   : > { %v438_v53 = vsel %vm374_vm9, %v342_v45, %v406_v57  ;;  %3935 = vmatpush3.bf16.msra.mxu1 %v4351_v24  ;;  %3983 = vmatpush3.bf16.msra.mxu0 %v4352_v31  ;;  %524 = vst [vmem:[#allocation2 + $0x151] sm:$0xff] %v437_v48  ;;  %v392_v60 = vmul.f32 0.2, %v328_v37  ;;  %v344_v10 = vadd.f32 %v4500_v11, %v306_v42  ;;  %vm375_vm12 = vcmp.ge.f32.partialorder %v343_v56, 0.0  ;;  %v4361_v31 = vld [vmem:[%s5583_s3 + $0xf0] sm:$0xff]   ;;  %v4364_v46 = vld [vmem:[%s5583_s3 + $0x128] sm:$0xff]  }
  0x3f   : > { %525 = vst [vmem:[#allocation2 + $0x159] sm:$0xff] %v438_v53  ;;  %v4708_v58 = vpack.c.bf16 %v438_v53, %v437_v48  ;;  %v423_v61 = vsel %vm359_vm10, %v327_v52, %v391_v38  ;;  %3936 = vmatprep.subr.bf16.mxu1 %v4353_v49  ;;  %3984 = vmatprep.subr.bf16.mxu0 %v4354_v50  ;;  %v407_v62 = vmul.f32 0.2, %v343_v56  ;;  %v4362_v40 = vld [vmem:[%s5583_s3 + $0x130] sm:$0xff]   ;;  %v4363_v47 = vld [vmem:[%s5583_s3 + $0xe8] sm:$0xff]   ;;  %v4365_v55 = vld [vmem:[%s5583_s3 + $0xe0] sm:$0xff]  }
  0x40   : > { %510 = vst [vmem:[#allocation2 + $0xa9] sm:$0xff] %v423_v61  ;;  %v424_v1 = vsel %vm360_vm11, %v328_v37, %v392_v60  ;;  %vm376_vm13 = vcmp.ge.f32.partialorder %v344_v10, 0.0  ;;  %v408_v11 = vmul.f32 0.2, %v344_v10  ;;  %v1109_v13 = vpack.c.bf16 %v1078_v6, %v1077_v5  ;;  %v1086_v45 = vld [vmem:[#allocation2 + $0x6a] sm:$0xff]  ;;  %v4366_v57 = vld [vmem:[%s5583_s3 + $0x120] sm:$0xff]  }
  0x41   : > { %3922 = vmatprep.mubr.bf16.mxu1 %v4708_v58  ;;  %511 = vst [vmem:[#allocation2 + $0xb1] sm:$0xff] %v424_v1  ;;  %v4719_v3 = vpack.c.bf16 %v424_v1, %v423_v61  ;;  %v439_v4 = vsel %vm375_vm12, %v343_v56, %v407_v62  ;;  %v4737_v24 = vpack.c.bf16 %v1080_v16, %v1079_v15  ;;  %v540_v37 = vld [vmem:[#allocation2 + $0x78] sm:$0xff]  ;;  %v1088_v42 = vld [vmem:[#allocation2 + $0x82] sm:$0xff]  ;;  %v542_v60 = vld [vmem:[#allocation2 + $0x90] sm:$0xff] }
  0x42   : > { %3937 = vmatpush3.bf16.msra.mxu1 %v4353_v49  ;;  %3985 = vmatpush3.bf16.msra.mxu0 %v4354_v50  ;;  %526 = vst [vmem:[#allocation2 + $0x169] sm:$0xff] %v439_v4  ;;  %v440_v7 = vsel %vm376_vm13, %v344_v10, %v408_v11  ;;  %v4739_v28 = vpack.c.bf16 %v533_v18, %v532_v17  ;;  %v1087_v38 = vld [vmem:[#allocation2 + $0x7a] sm:$0xff]  ;;  %v1089_v53 = vld [vmem:[#allocation2 + $0x92] sm:$0xff]  ;;  %v547_v15 = vld [vmem:[#allocation2 + $0xc8] sm:$0xff] }
  0x43   : > { %3938 = vmatprep.subr.bf16.mxu1 %v4355_v63  ;;  %3986 = vmatprep.subr.bf16.mxu0 %v4356_v0  ;;  %527 = vst [vmem:[#allocation2 + $0x171] sm:$0xff] %v440_v7  ;;  %v4724_v9 = vpack.c.bf16 %v440_v7, %v439_v4  ;;  %v4741_v29 = vpack.c.bf16 %v535_v23, %v534_v22  ;;  %v541_v48 = vld [vmem:[#allocation2 + $0x80] sm:$0xff]  ;;  %v543_v61 = vld [vmem:[#allocation2 + $0x98] sm:$0xff]  ;;  %v4369_v6 = vld [vmem:[%s5583_s3 + $0xd0] sm:$0xff]  }
  0x44   : > { %3907 = vmatmul.mubr.bf16.gmra.mxu0 %v4719_v3  ;;  %v4743_v30 = vpack.c.bf16 %v1082_v27, %v1081_v25  ;;  %v4761_v49 = vpack.c.bf16 %v1084_v36, %v1083_v35  ;;  %v4763_v50 = vpack.c.bf16 %v537_v34, %v536_v32  ;;  %v4765_v52 = vpack.c.bf16 %v1086_v45, %v1085_v44  ;;  %v1090_v56 = vld [vmem:[#allocation2 + $0x9a] sm:$0xff]  ;;  %v1093_v16 = vld [vmem:[#allocation2 + $0xc2] sm:$0xff]  ;;  %v1094_v17 = vld [vmem:[#allocation2 + $0xca] sm:$0xff] }
  0x45   : > { %3923 = vmatmul.mubr.bf16.gmra.mxu1 %v4724_v9  ;;  %3990 = vmatprep.mubr.bf16.mxu0 %v1109_v13  ;;  %v4767_v54 = vpack.c.bf16 %v539_v43, %v538_v41  ;;  %v4367_v10 = vld [vmem:[%s5583_s3 + $0xd8] sm:$0xff]   ;;  %v4782_v62 = vpack.c.bf16 %v1088_v42, %v1087_v38  ;;  %v4789_v1 = vpack.c.bf16 %v1090_v56, %v1089_v53  ;;  %v546_v13 = vld [vmem:[#allocation2 + $0xc0] sm:$0xff]  ;;  %v4371_v18 = vld [vmem:[%s5583_s3 + $0xc8] sm:$0xff]  }
  0x46   : > { %3987 = vmatpush3.bf16.msra.mxu0 %v4356_v0  ;;  %3939 = vmatpush3.bf16.msra.mxu1 %v4355_v63  ;;  %v4368_v63 = vld [vmem:[%s5583_s3 + $0x118] sm:$0xff]   ;;  %v4787_v0 = vpack.c.bf16 %v541_v48, %v540_v37  ;;  %v4791_v11 = vpack.c.bf16 %v543_v61, %v542_v60  ;;  %v4813_v22 = vpack.c.bf16 %v1094_v17, %v1093_v16  ;;  %v4373_v27 = vld [vmem:[%s5583_s3 + $0xc0] sm:$0xff]   ;;  %v550_v36 = vld [vmem:[#allocation2 + $0xf0] sm:$0xff] }
  0x47   : > { %3988 = vmatprep.subr.bf16.mxu0 %v4358_v8  ;;  %3940 = vmatprep.subr.bf16.mxu1 %v4357_v12  ;;  %v544_v7 = vld [vmem:[#allocation2 + $0xa8] sm:$0xff]  ;;  %v4815_v23 = vpack.c.bf16 %v547_v15, %v546_v13  ;;  %v1095_v25 = vld [vmem:[#allocation2 + $0xda] sm:$0xff]  ;;  %v1097_v41 = vld [vmem:[#allocation2 + $0xf2] sm:$0xff] }
  0x48   : > { %3942 = vmatprep.mubr.bf16.mxu1 %v4419_v20  ;;  %v1091_v4 = vld [vmem:[#allocation2 + $0xaa] sm:$0xff]  ;;  %v1092_v5 = vld [vmem:[#allocation2 + $0xb2] sm:$0xff]  ;;  %v549_v32 = vld [vmem:[#allocation2 + $0xe0] sm:$0xff] }
  0x49   : > { %v4372_v20 = vld [vmem:[%s5583_s3 + $0x108] sm:$0xff]   ;;  %v4374_v35 = vld [vmem:[%s5583_s3 + $0x100] sm:$0xff]   ;;  %v4830_v44 = vld [vmem:[%s5583_s3 + $0x178] sm:$0xff]  }
  0x4a   : > { %3989 = vmatpush3.bf16.msra.mxu0 %v4358_v8  ;;  %3941 = vmatpush3.bf16.msra.mxu1 %v4357_v12  ;;  %v545_v8 = vld [vmem:[#allocation2 + $0xb0] sm:$0xff]  ;;  %v1096_v34 = vld [vmem:[#allocation2 + $0xe2] sm:$0xff]  ;;  %v1098_v43 = vld [vmem:[#allocation2 + $0xfa] sm:$0xff] }
  0x4b   : > { %4070 = vmatprep.subr.bf16.mxu0 %v4360_v19  ;;  %4022 = vmatprep.subr.bf16.mxu1 %v4359_v21  ;;  %v4370_v12 = vld [vmem:[%s5583_s3 + $0x110] sm:$0xff]   ;;  %v4832_v45 = vpack.c.bf16 %v1096_v34, %v1095_v25  ;;  %v268_v42 = vld [vmem:[%s4483_s29 + $0xf8] sm:$0xff]  ;;  %v552_v48 = vld [vmem:[#allocation2 + $0x108] sm:$0xff] }
  0x4c   : > { %v1099_v37 = vld [vmem:[#allocation2 + $0x10a] sm:$0xff]  ;;  %v1100_v56 = vld [vmem:[#allocation2 + $0x112] sm:$0xff]  ;;  %v4407_v60 = vld [vmem:[%s5581_s1] ss:$0 sm:$0xff] }
  0x4d   : > { %3991 = vmatmul.mubr.bf16.vlgmr.msra.gmra.mxu0 %v4737_v24  ;;  %3943 = vmatmul.mubr.bf16.vlgmr.msra.gmra.mxu1 %v4739_v28  ;;  %v267_v38 = vld [vmem:[%s4483_s29 + $0xf0] sm:$0xff]  ;;  %v555_v13 = vld [vmem:[#allocation2 + $0x128] sm:$0xff]  ;;  %v556_v34 = vld [vmem:[#allocation2 + $0x138] sm:$0xff] }
  0x4e   : > { %4071 = vmatpush3.bf16.msra.mxu0 %v4360_v19  ;;  %4023 = vmatpush3.bf16.msra.mxu1 %v4359_v21  ;;  %v4806_v19 = vpack.c.bf16 %v1092_v5, %v1091_v4  ;;  %v4811_v21 = vpack.c.bf16 %v545_v8, %v544_v7  ;;  %v553_v53 = vld [vmem:[#allocation2 + $0x110] sm:$0xff]  ;;  %v307_v61 = vmul.f32 %v4407_v60, %v267_v38  ;;  %v1101_v4 = vld [vmem:[#allocation2 + $0x122] sm:$0xff] }
  0x4f   : > { %3946 = vmatprep.mubr.bf16.mxu1 %v4741_v29  ;;  %3994 = vmatprep.mubr.bf16.mxu0 %v4743_v30  ;;  %v1102_v5 = vld [vmem:[#allocation2 + $0x12a] sm:$0xff]  ;;  %v4861_v17 = vpack.c.bf16 %v553_v53, %v552_v48 }
  0x50   : > { %4024 = vmatprep.subr.bf16.mxu1 %v4361_v31  ;;  %4072 = vmatprep.subr.bf16.mxu0 %v4362_v40 }
  0x52   : > { %4073 = vmatpush3.bf16.msra.mxu0 %v4362_v40  ;;  %4025 = vmatpush3.bf16.msra.mxu1 %v4361_v31  ;;  %v548_v31 = vld [vmem:[#allocation2 + $0xd8] sm:$0xff] }
  0x53   : > { %4074 = vmatprep.subr.bf16.mxu0 %v4364_v46  ;;  %4026 = vmatprep.subr.bf16.mxu1 %v4363_v47  ;;  %v551_v40 = vld [vmem:[#allocation2 + $0xf8] sm:$0xff] }
  0x55   : > { %3995 = vmatmul.mubr.bf16.gmra.mxu0 %v4761_v49  ;;  %3947 = vmatmul.mubr.bf16.gmra.mxu1 %v4763_v50 }
  0x56   : > { %3998 = vmatprep.mubr.bf16.mxu0 %v4765_v52  ;;  %3950 = vmatprep.mubr.bf16.mxu1 %v4767_v54 }
  0x57   : > { %4027 = vmatpush3.bf16.msra.mxu1 %v4363_v47  ;;  %4075 = vmatpush3.bf16.msra.mxu0 %v4364_v46  ;;  %v4837_v46 = vld [vmem:[%s5583_s3 + $0x1b8] sm:$0xff]   ;;  %v4839_v47 = vpack.c.bf16 %v549_v32, %v548_v31 }
  0x58   : > { %4028 = vmatprep.subr.bf16.mxu1 %v4365_v55  ;;  %4076 = vmatprep.subr.bf16.mxu0 %v4366_v57  ;;  %v1103_v31 = vld [vmem:[#allocation2 + $0x13a] sm:$0xff] }
  0x5b   : > { %4029 = vmatpush3.bf16.msra.mxu1 %v4365_v55  ;;  %4077 = vmatpush3.bf16.msra.mxu0 %v4366_v57  ;;  %v4841_v55 = vpack.c.bf16 %v1098_v43, %v1097_v41  ;;  %v4843_v57 = vpack.c.bf16 %v551_v40, %v550_v36  ;;  %v1104_v36 = vld [vmem:[#allocation2 + $0x142] sm:$0xff]  ;;  %v558_v40 = vld [vmem:[#allocation2 + $0x150] sm:$0xff]  ;;  %v1106_v43 = vld [vmem:[#allocation2 + $0x15a] sm:$0xff] }
  0x5c   : > { %4030 = vmatprep.subr.bf16.mxu1 %v4367_v10  ;;  %4078 = vmatprep.subr.bf16.mxu0 %v4368_v63  ;;  %v1105_v41 = vld [vmem:[#allocation2 + $0x152] sm:$0xff]  ;;  %v4873_v38 = vpack.c.bf16 %v1104_v36, %v1103_v31  ;;  %v1706_v31 = vld [vmem:[#allocation2 + $0xe1] sm:$0xff] }
  0x5d   : > { %3999 = vmatmul.mubr.bf16.gmra.mxu0 %v4782_v62  ;;  %3951 = vmatmul.mubr.bf16.gmra.mxu1 %v4787_v0  ;;  %v4877_v48 = vpack.c.bf16 %v1106_v43, %v1105_v41  ;;  %v4389_v36 = vld [vmem:[%s5583_s3 + $0x140] sm:$0xff]   ;;  %v1707_v41 = vld [vmem:[#allocation2 + $0xf1] sm:$0xff] }
  0x5e   : > { %4002 = vmatprep.mubr.bf16.mxu0 %v4789_v1  ;;  %3954 = vmatprep.mubr.bf16.mxu1 %v4791_v11  ;;  %v1708_v43 = vld [vmem:[#allocation2 + $0xf9] sm:$0xff] }
  0x5f   : > { %4031 = vmatpush3.bf16.msra.mxu1 %v4367_v10  ;;  %4079 = vmatpush3.bf16.msra.mxu0 %v4368_v63  ;;  %v308_v10 = vmul.f32 %v4407_v60, %v268_v42  ;;  %v554_v63 = vld [vmem:[#allocation2 + $0x120] sm:$0xff]  ;;  %v1108_v60 = vld [vmem:[#allocation2 + $0x172] sm:$0xff] }
  0x60   : > { %4032 = vmatprep.subr.bf16.mxu1 %v4369_v6  ;;  %4080 = vmatprep.subr.bf16.mxu0 %v4370_v12 }
  0x63   : > { %4033 = vmatpush3.bf16.msra.mxu1 %v4369_v6  ;;  %4081 = vmatpush3.bf16.msra.mxu0 %v4370_v12  ;;  %v4408_v6 = vld [vmem:[%s5582_s2] ss:$0 sm:$0xff]  ;;  %v4859_v12 = vpack.c.bf16 %v1100_v56, %v1099_v37  ;;  %v559_v37 = vld [vmem:[#allocation2 + $0x158] sm:$0xff]  ;;  %v1107_v56 = vld [vmem:[#allocation2 + $0x16a] sm:$0xff] }
  0x64   : > { %4034 = vmatprep.subr.bf16.mxu1 %v4371_v18  ;;  %4082 = vmatprep.subr.bf16.mxu0 %v4372_v20  ;;  %v345_v7 = vadd.f32 %v4408_v6, %v307_v61  ;;  %v346_v8 = vadd.f32 %v4408_v6, %v308_v10  ;;  %v4879_v53 = vpack.c.bf16 %v559_v37, %v558_v40  ;;  %v560_v61 = vld [vmem:[#allocation2 + $0x168] sm:$0xff]  ;;  %v561_v10 = vld [vmem:[#allocation2 + $0x170] sm:$0xff]  ;;  %v4390_v40 = vld [vmem:[%s5583_s3 + $0x180] sm:$0xff]  }
  0x65   : > { %4003 = vmatmul.mubr.bf16.gmra.mxu0 %v4806_v19  ;;  %3955 = vmatmul.mubr.bf16.gmra.mxu1 %v4811_v21  ;;  %v4887_v6 = vpack.c.bf16 %v561_v10, %v560_v61  ;;  %v1709_v37 = vld [vmem:[#allocation2 + $0x109] sm:$0xff]  ;;  %v4959_v61 = vpack.c.bf16 %v1708_v43, %v1707_v41  ;;  %v4392_v10 = vld [vmem:[%s5583_s3 + $0x238] sm:$0xff]  }
  0x66   : > { %4006 = vmatprep.mubr.bf16.mxu0 %v4813_v22  ;;  %3958 = vmatprep.mubr.bf16.mxu1 %v4815_v23  ;;  %vm377_vm14 = vcmp.ge.f32.partialorder %v345_v7, 0.0  ;;  %vm378_vm15 = vcmp.ge.f32.partialorder %v346_v8, 0.0  ;;  %v409_v15 = vmul.f32 0.2, %v345_v7  ;;  %v410_v16 = vmul.f32 0.2, %v346_v8 }
  0x67   : > { %4035 = vmatpush3.bf16.msra.mxu1 %v4371_v18  ;;  %4083 = vmatpush3.bf16.msra.mxu0 %v4372_v20  ;;  %v4863_v18 = vpack.c.bf16 %v1102_v5, %v1101_v4  ;;  %v4865_v20 = vpack.c.bf16 %v555_v13, %v554_v63  ;;  %v1689_v63 = vld [vmem:[#allocation2 + $0x19] sm:$0xff]  ;;  %v1690_v4 = vld [vmem:[#allocation2 + $0x21] sm:$0xff]  ;;  %v4885_v5 = vpack.c.bf16 %v1108_v60, %v1107_v56  ;;  %v4378_v13 = vld [vmem:[%s5583_s3 + $0x1b0] sm:$0xff]  }
  0x68   : > { %4036 = vmatprep.subr.bf16.mxu1 %v4373_v27  ;;  %4084 = vmatprep.subr.bf16.mxu0 %v4374_v35  ;;  %v441_v25 = vsel %vm377_vm14, %v345_v7, %v409_v15  ;;  %v1721_v7 = vpack.c.bf16 %v1690_v4, %v1689_v63  ;;  %v4386_v15 = vld [vmem:[%s5583_s3 + $0x190] sm:$0xff]   ;;  %v4391_v60 = vld [vmem:[%s5583_s3 + $0x1f8] sm:$0xff]  }
  0x69   : > { %528 = vst [vmem:[#allocation2 + $0x181] sm:$0xff] %v441_v25  ;;  %v1710_v56 = vld [vmem:[#allocation2 + $0x111] sm:$0xff]  ;;  %v2610_v43 = vld [vmem:[#allocation2 + $0x49] sm:$0xff] }
  0x6a   : > { %v4964_v63 = vpack.c.bf16 %v1710_v56, %v1709_v37  ;;  %v2916_v37 = vld [vmem:[#allocation2 + $0x4a] sm:$0xff]  ;;  %v2917_v56 = vld [vmem:[#allocation2 + $0x52] sm:$0xff] }
  0x6b   : > { %4037 = vmatpush3.bf16.msra.mxu1 %v4373_v27  ;;  %4085 = vmatpush3.bf16.msra.mxu0 %v4374_v35  ;;  %v442_v27 = vsel %vm378_vm15, %v346_v8, %v410_v16  ;;  %v557_v35 = vld [vmem:[#allocation2 + $0x140] sm:$0xff]  ;;  %v4377_v8 = vld [vmem:[%s5583_s3 + $0x170] sm:$0xff]  }
  0x6c   : > { %4118 = vmatprep.subr.bf16.mxu1 %v4830_v44  ;;  %4166 = vmatprep.subr.bf16.mxu0 %v4837_v46  ;;  %529 = vst [vmem:[#allocation2 + $0x189] sm:$0xff] %v442_v27  ;;  %v4867_v32 = vpack.c.bf16 %v442_v27, %v441_v25  ;;  %v4875_v42 = vpack.c.bf16 %v557_v35, %v556_v34  ;;  %v1703_v16 = vld [vmem:[#allocation2 + $0xc1] sm:$0xff]  ;;  %v1704_v25 = vld [vmem:[#allocation2 + $0xc9] sm:$0xff]  ;;  %v1705_v27 = vld [vmem:[#allocation2 + $0xd9] sm:$0xff] }
  0x6d   : > { %4007 = vmatmul.mubr.bf16.gmra.mxu0 %v4832_v45  ;;  %3959 = vmatmul.mubr.bf16.gmra.mxu1 %v4839_v47  ;;  %v4939_v34 = vpack.c.bf16 %v1704_v25, %v1703_v16  ;;  %v4944_v35 = vpack.c.bf16 %v1706_v31, %v1705_v27  ;;  %v2609_v16 = vld [vmem:[#allocation2 + $0x39] sm:$0xff] }
  0x6e   : > { %4010 = vmatprep.mubr.bf16.mxu0 %v4841_v55  ;;  %3962 = vmatprep.mubr.bf16.mxu1 %v4843_v57 }
  0x70   : > { %v1413_v4 = vld [vmem:[#allocation2 + $0x180] sm:$0xff] }
  0x75   : > { %4011 = vmatmul.mubr.bf16.gmra.mxu0 %v4859_v12  ;;  %3963 = vmatmul.mubr.bf16.gmra.mxu1 %v4861_v17 }
  0x76   : > { %4014 = vmatprep.mubr.bf16.mxu0 %v4863_v18  ;;  %3966 = vmatprep.mubr.bf16.mxu1 %v4865_v20 }
  0x7d   : > { %4015 = vmatmul.mubr.bf16.gmra.mxu0 %v4873_v38  ;;  %3967 = vmatmul.mubr.bf16.gmra.mxu1 %v4875_v42 }
  0x7e   : > { %4018 = vmatprep.mubr.bf16.mxu0 %v4877_v48  ;;  %3970 = vmatprep.mubr.bf16.mxu1 %v4879_v53 }
  0x85   : > { %4019 = vmatmul.mubr.bf16.gmra.mxu0 %v4885_v5  ;;  %3971 = vmatmul.mubr.bf16.gmra.mxu1 %v4887_v6 }
  0x86   : > { %4086 = vmatprep.mubr.bf16.mxu0 %v1721_v7  ;;  %4038 = vmatprep.mubr.bf16.mxu1 %v4739_v28  ;;  %v4380_v28 = vld [vmem:[%s5583_s3 + $0x1a8] sm:$0xff]  }
  0x87   : > { %v1414_v7 = vld [vmem:[#allocation2 + $0x188] sm:$0xff] }
  0x8d   : > { %4087 = vmatmul.mubr.bf16.vlgmr.msra.gmra.mxu0 %v4571_v14  ;;  %4039 = vmatmul.mubr.bf16.vlgmr.msra.gmra.mxu1 %v4741_v29  ;;  %v4379_v14 = vld [vmem:[%s5583_s3 + $0x168] sm:$0xff]  }
  0x8e   : > { %4167 = vmatpush3.bf16.msra.mxu0 %v4837_v46  ;;  %4119 = vmatpush3.bf16.msra.mxu1 %v4830_v44  ;;  %v4381_v44 = vld [vmem:[%s5583_s3 + $0x160] sm:$0xff]   ;;  %v4383_v46 = vld [vmem:[%s5583_s3 + $0x158] sm:$0xff]  }
  0x8f   : > { %4042 = vmatprep.mubr.bf16.mxu1 %v4763_v50  ;;  %4090 = vmatprep.mubr.bf16.mxu0 %v4599_v33  ;;  %v4382_v33 = vld [vmem:[%s5583_s3 + $0x1a0] sm:$0xff]  }
  0x90   : > { %4120 = vmatprep.subr.bf16.mxu1 %v4377_v8  ;;  %4168 = vmatprep.subr.bf16.mxu0 %v4378_v13 }
  0x92   : > { %4169 = vmatpush3.bf16.msra.mxu0 %v4378_v13  ;;  %4121 = vmatpush3.bf16.msra.mxu1 %v4377_v8  ;;  %v4978_v8 = vpack.c.bf16 %v1414_v7, %v1413_v4  ;;  %v2918_v4 = vld [vmem:[#allocation2 + $0x62] sm:$0xff]  ;;  %v2919_v7 = vld [vmem:[#allocation2 + $0x6a] sm:$0xff] }
  0x93   : > { %4170 = vmatprep.subr.bf16.mxu0 %v4380_v28  ;;  %4122 = vmatprep.subr.bf16.mxu1 %v4379_v14 }
  0x95   : > { %4091 = vmatmul.mubr.bf16.gmra.mxu0 %v4637_v59  ;;  %4043 = vmatmul.mubr.bf16.gmra.mxu1 %v4767_v54  ;;  %v4384_v59 = vld [vmem:[%s5583_s3 + $0x198] sm:$0xff]  }
  0x96   : > { %4094 = vmatprep.mubr.bf16.mxu0 %v4672_v26  ;;  %4046 = vmatprep.mubr.bf16.mxu1 %v4787_v0  ;;  %v4385_v26 = vld [vmem:[%s5583_s3 + $0x150] sm:$0xff]  }
  0x97   : > { %4123 = vmatpush3.bf16.msra.mxu1 %v4379_v14  ;;  %4171 = vmatpush3.bf16.msra.mxu0 %v4380_v28 }
  0x98   : > { %4124 = vmatprep.subr.bf16.mxu1 %v4381_v44  ;;  %4172 = vmatprep.subr.bf16.mxu0 %v4382_v33 }
  0x9b   : > { %4125 = vmatpush3.bf16.msra.mxu1 %v4381_v44  ;;  %4173 = vmatpush3.bf16.msra.mxu0 %v4382_v33 }
  0x9c   : > { %4126 = vmatprep.subr.bf16.mxu1 %v4383_v46  ;;  %4174 = vmatprep.subr.bf16.mxu0 %v4384_v59 }
  0x9d   : > { %4095 = vmatmul.mubr.bf16.gmra.mxu0 %v4699_v51  ;;  %4047 = vmatmul.mubr.bf16.gmra.mxu1 %v4791_v11  ;;  %v4387_v51 = vld [vmem:[%s5583_s3 + $0x148] sm:$0xff]  }
  0x9e   : > { %4098 = vmatprep.mubr.bf16.mxu0 %v4719_v3  ;;  %4050 = vmatprep.mubr.bf16.mxu1 %v4811_v21  ;;  %v4388_v3 = vld [vmem:[%s5583_s3 + $0x188] sm:$0xff]  }
  0x9f   : > { %4127 = vmatpush3.bf16.msra.mxu1 %v4383_v46  ;;  %4175 = vmatpush3.bf16.msra.mxu0 %v4384_v59  ;;  %v2026_v46 = vld [vmem:[#allocation2 + $0x18a] sm:$0xff]  ;;  %v2914_v59 = vld [vmem:[#allocation2 + $0x32] sm:$0xff] }
  0xa0   : > { %4128 = vmatprep.subr.bf16.mxu1 %v4385_v26  ;;  %4176 = vmatprep.subr.bf16.mxu0 %v4386_v15 }
  0xa3   : > { %4129 = vmatpush3.bf16.msra.mxu1 %v4385_v26  ;;  %4177 = vmatpush3.bf16.msra.mxu0 %v4386_v15  ;;  %v2915_v26 = vld [vmem:[#allocation2 + $0x3a] sm:$0xff]  ;;  %v2608_v15 = vld [vmem:[#allocation2 + $0x31] sm:$0xff] }
  0xa4   : > { %4130 = vmatprep.subr.bf16.mxu1 %v4387_v51  ;;  %4178 = vmatprep.subr.bf16.mxu0 %v4388_v3 }
  0xa5   : > { %4099 = vmatmul.mubr.bf16.gmra.mxu0 %v4939_v34  ;;  %4051 = vmatmul.mubr.bf16.gmra.mxu1 %v4815_v23 }
  0xa6   : > { %4102 = vmatprep.mubr.bf16.mxu0 %v4944_v35  ;;  %4054 = vmatprep.mubr.bf16.mxu1 %v4839_v47 }
  0xa7   : > { %4131 = vmatpush3.bf16.msra.mxu1 %v4387_v51  ;;  %4179 = vmatpush3.bf16.msra.mxu0 %v4388_v3  ;;  %v2946_v51 = vpack.c.bf16 %v2915_v26, %v2914_v59  ;;  %v2615_v26 = vld [vmem:[#allocation2 + $0x81] sm:$0xff] }
  0xa8   : > { %4132 = vmatprep.subr.bf16.mxu1 %v4389_v36  ;;  %4180 = vmatprep.subr.bf16.mxu0 %v4390_v40 }
  0xab   : > { %4133 = vmatpush3.bf16.msra.mxu1 %v4389_v36  ;;  %4181 = vmatpush3.bf16.msra.mxu0 %v4390_v40  ;;  %v2640_v40 = vpack.c.bf16 %v2609_v16, %v2608_v15  ;;  %v2922_v15 = vld [vmem:[#allocation2 + $0x92] sm:$0xff]  ;;  %v2923_v16 = vld [vmem:[#allocation2 + $0x9a] sm:$0xff] }
  0xac   : > { %4214 = vmatprep.subr.bf16.mxu1 %v4391_v60  ;;  %4262 = vmatprep.subr.bf16.mxu0 %v4392_v10 }
  0xad   : > { %4103 = vmatmul.mubr.bf16.gmra.mxu0 %v4959_v61  ;;  %4055 = vmatmul.mubr.bf16.gmra.mxu1 %v4843_v57 }
  0xae   : > { %4106 = vmatprep.mubr.bf16.mxu0 %v4964_v63  ;;  %4058 = vmatprep.mubr.bf16.mxu1 %v4861_v17 }
  0xb5   : > { %4107 = vmatmul.mubr.bf16.gmra.mxu0 %v4648_v2  ;;  %4059 = vmatmul.mubr.bf16.gmra.mxu1 %v4865_v20  ;;  %v4393_v2 = vld [vmem:[%s5583_s3 + $0x1f0] sm:$0xff]  }
  0xb6   : > { %4110 = vmatprep.mubr.bf16.mxu0 %v4684_v39  ;;  %4062 = vmatprep.mubr.bf16.mxu1 %v4875_v42  ;;  %v4394_v39 = vld [vmem:[%s5583_s3 + $0x230] sm:$0xff]  }
  0xbd   : > { %4111 = vmatmul.mubr.bf16.gmra.mxu0 %v4708_v58  ;;  %4063 = vmatmul.mubr.bf16.gmra.mxu1 %v4879_v53  ;;  %v4396_v58 = vld [vmem:[%s5583_s3 + $0x228] sm:$0xff]  }
  0xbe   : > { %4114 = vmatprep.mubr.bf16.mxu0 %v4724_v9  ;;  %4066 = vmatprep.mubr.bf16.mxu1 %v4887_v6  ;;  %v4395_v9 = vld [vmem:[%s5583_s3 + $0x1e8] sm:$0xff]  }
  0xc5   : > { %4115 = vmatmul.mubr.bf16.gmra.mxu0 %v4867_v32  ;;  %4067 = vmatmul.mubr.bf16.gmra.mxu1 %v4978_v8 }
  0xc6   : > { %4182 = vmatprep.mubr.bf16.mxu0 %v4741_v29  ;;  %4134 = vmatprep.mubr.bf16.mxu1 %v4737_v24  ;;  %v4397_v24 = vld [vmem:[%s5583_s3 + $0x1e0] sm:$0xff]  }
  0xc7   : > { %v4398_v29 = vld [vmem:[%s5583_s3 + $0x220] sm:$0xff]  }
  0xcd   : > { %4183 = vmatmul.mubr.bf16.vlgmr.msra.gmra.mxu0 %v4763_v50  ;;  %4135 = vmatmul.mubr.bf16.vlgmr.msra.gmra.mxu1 %v4743_v30  ;;  %v4399_v30 = vld [vmem:[%s5583_s3 + $0x1d8] sm:$0xff]   ;;  %v4401_v50 = vld [vmem:[%s5583_s3 + $0x1d0] sm:$0xff]  }
  0xce   : > { %4263 = vmatpush3.bf16.msra.mxu0 %v4392_v10  ;;  %4215 = vmatpush3.bf16.msra.mxu1 %v4391_v60  ;;  %v2611_v10 = vld [vmem:[#allocation2 + $0x51] sm:$0xff] }
  0xcf   : > { %4138 = vmatprep.mubr.bf16.mxu1 %v4761_v49  ;;  %4186 = vmatprep.mubr.bf16.mxu0 %v4767_v54  ;;  %v4400_v49 = vld [vmem:[%s5583_s3 + $0x218] sm:$0xff]   ;;  %v4403_v54 = vld [vmem:[%s5583_s3 + $0x1c8] sm:$0xff]  }
  0xd0   : > { %4216 = vmatprep.subr.bf16.mxu1 %v4393_v2  ;;  %4264 = vmatprep.subr.bf16.mxu0 %v4394_v39 }
  0xd2   : > { %4265 = vmatpush3.bf16.msra.mxu0 %v4394_v39  ;;  %4217 = vmatpush3.bf16.msra.mxu1 %v4393_v2  ;;  %v2612_v2 = vld [vmem:[#allocation2 + $0x61] sm:$0xff]  ;;  %v2613_v39 = vld [vmem:[#allocation2 + $0x69] sm:$0xff] }
  0xd3   : > { %4266 = vmatprep.subr.bf16.mxu0 %v4396_v58  ;;  %4218 = vmatprep.subr.bf16.mxu1 %v4395_v9 }
  0xd5   : > { %4187 = vmatmul.mubr.bf16.gmra.mxu0 %v4787_v0  ;;  %4139 = vmatmul.mubr.bf16.gmra.mxu1 %v4765_v52  ;;  %v4402_v52 = vld [vmem:[%s5583_s3 + $0x210] sm:$0xff]   ;;  %v4405_v0 = vld [vmem:[%s5583_s3 + $0x1c0] sm:$0xff]  }
  0xd6   : > { %4190 = vmatprep.mubr.bf16.mxu0 %v4791_v11  ;;  %4142 = vmatprep.mubr.bf16.mxu1 %v4782_v62  ;;  %v4404_v62 = vld [vmem:[%s5583_s3 + $0x208] sm:$0xff]  }
  0xd7   : > { %4219 = vmatpush3.bf16.msra.mxu1 %v4395_v9  ;;  %4267 = vmatpush3.bf16.msra.mxu0 %v4396_v58  ;;  %v2947_v9 = vpack.c.bf16 %v2917_v56, %v2916_v37 }
  0xd8   : > { %4220 = vmatprep.subr.bf16.mxu1 %v4397_v24  ;;  %4268 = vmatprep.subr.bf16.mxu0 %v4398_v29 }
  0xdb   : > { %4221 = vmatpush3.bf16.msra.mxu1 %v4397_v24  ;;  %4269 = vmatpush3.bf16.msra.mxu0 %v4398_v29  ;;  %v2641_v29 = vpack.c.bf16 %v2611_v10, %v2610_v43 }
  0xdc   : > { %4222 = vmatprep.subr.bf16.mxu1 %v4399_v30  ;;  %4270 = vmatprep.subr.bf16.mxu0 %v4400_v49 }
  0xdd   : > { %4191 = vmatmul.mubr.bf16.gmra.mxu0 %v4811_v21  ;;  %4143 = vmatmul.mubr.bf16.gmra.mxu1 %v4789_v1  ;;  %v4406_v1 = vld [vmem:[%s5583_s3 + $0x200] sm:$0xff]  }
  0xde   : > { %4194 = vmatprep.mubr.bf16.mxu0 %v4815_v23  ;;  %4146 = vmatprep.mubr.bf16.mxu1 %v4806_v19 }
  0xdf   : > { %4223 = vmatpush3.bf16.msra.mxu1 %v4399_v30  ;;  %4271 = vmatpush3.bf16.msra.mxu0 %v4400_v49  ;;  %v2948_v30 = vpack.c.bf16 %v2919_v7, %v2918_v4  ;;  %v2950_v7 = vpack.c.bf16 %v2923_v16, %v2922_v15  ;;  %v2927_v15 = vld [vmem:[#allocation2 + $0xca] sm:$0xff] }
  0xe0   : > { %4224 = vmatprep.subr.bf16.mxu1 %v4401_v50  ;;  %4272 = vmatprep.subr.bf16.mxu0 %v4402_v52 }
  0xe3   : > { %4225 = vmatpush3.bf16.msra.mxu1 %v4401_v50  ;;  %4273 = vmatpush3.bf16.msra.mxu0 %v4402_v52  ;;  %v2642_v50 = vpack.c.bf16 %v2613_v39, %v2612_v2 }
  0xe4   : > { %4226 = vmatprep.subr.bf16.mxu1 %v4403_v54  ;;  %4274 = vmatprep.subr.bf16.mxu0 %v4404_v62 }
  0xe5   : > { %4195 = vmatmul.mubr.bf16.gmra.mxu0 %v4839_v47  ;;  %4147 = vmatmul.mubr.bf16.gmra.mxu1 %v4813_v22 }
  0xe6   : > { %4198 = vmatprep.mubr.bf16.mxu0 %v4843_v57  ;;  %4150 = vmatprep.mubr.bf16.mxu1 %v4832_v45 }
  0xe7   : > { %4227 = vmatpush3.bf16.msra.mxu1 %v4403_v54  ;;  %4275 = vmatpush3.bf16.msra.mxu0 %v4404_v62 }
  0xe8   : > { %4228 = vmatprep.subr.bf16.mxu1 %v4405_v0  ;;  %4276 = vmatprep.subr.bf16.mxu0 %v4406_v1 }
  0xeb   : > { %4229 = vmatpush3.bf16.msra.mxu1 %v4405_v0  ;;  %4277 = vmatpush3.bf16.msra.mxu0 %v4406_v1  ;;  %v2614_v0 = vld [vmem:[#allocation2 + $0x79] sm:$0xff] }
  0xec   : > { %v5042_v11 = vpop.f32.mrf.mxu0  ;;  %v5044_v19 = vpop.f32.mrf.mxu1  ;;  %v2920_v1 = vld [vmem:[#allocation2 + $0x7a] sm:$0xff]  ;;  %v2643_v4 = vpack.c.bf16 %v2615_v26, %v2614_v0  ;;  %v2925_v0 = vld [vmem:[#allocation2 + $0xb2] sm:$0xff]  ;;  %v2926_v26 = vld [vmem:[#allocation2 + $0xc2] sm:$0xff] }
  0xed   : > { %4199 = vmatmul.mubr.bf16.gmra.mxu0 %v4861_v17  ;;  %4151 = vmatmul.mubr.bf16.gmra.mxu1 %v4841_v55 }
  0xee   : > { %4202 = vmatprep.mubr.bf16.mxu0 %v4865_v20  ;;  %v5049_v21 = vpop.f32.mrf.mxu0  ;;  %v5051_v22 = vpop.f32.mrf.mxu1  ;;  %4154 = vmatprep.mubr.bf16.mxu1 %v4859_v12 }
  0xf0   : > { %v5054_v23 = vpop.f32.mrf.mxu0  ;;  %v5056_v45 = vpop.f32.mrf.mxu1 }
  0xf2   : > { %v5058_v47 = vpop.f32.mrf.mxu0  ;;  %v5060_v57 = vpop.f32.mrf.mxu1 }
  0xf4   : > { %v5062_v13 = vpop.f32.mrf.mxu0  ;;  %v5064_v17 = vpop.f32.mrf.mxu1 }
  0xf5   : > { %4203 = vmatmul.mubr.bf16.gmra.mxu0 %v4875_v42  ;;  %4155 = vmatmul.mubr.bf16.gmra.mxu1 %v4863_v18  ;;  %v2025_v18 = vld [vmem:[#allocation2 + $0x182] sm:$0xff] }
  0xf6   : > { %4206 = vmatprep.mubr.bf16.mxu0 %v4879_v53  ;;  %v5069_v55 = vpop.f32.mrf.mxu0  ;;  %v5071_v12 = vpop.f32.mrf.mxu1  ;;  %4158 = vmatprep.mubr.bf16.mxu1 %v4873_v38  ;;  %v5098_v31 = vpack.c.bf16 %v2026_v46, %v2025_v18  ;;  %v2921_v18 = vld [vmem:[#allocation2 + $0x82] sm:$0xff] }
  0xf7   : > { %v2949_v56 = vpack.c.bf16 %v2921_v18, %v2920_v1  ;;  %v2924_v1 = vld [vmem:[#allocation2 + $0xaa] sm:$0xff] }
  0xf8   : > { %v5074_v20 = vpop.f32.mrf.mxu0  ;;  %v5076_v28 = vpop.f32.mrf.mxu1 }
  0xfa   : > { %v5078_v14 = vpop.f32.mrf.mxu0  ;;  %v5080_v44 = vpop.f32.mrf.mxu1 }
  0xfc   : > { %v5082_v33 = vpop.f32.mrf.mxu0  ;;  %v5084_v42 = vpop.f32.mrf.mxu1 }
  0xfd   : > { %4207 = vmatmul.mubr.bf16.gmra.mxu0 %v4887_v6  ;;  %4159 = vmatmul.mubr.bf16.gmra.mxu1 %v4877_v48  ;;  %v4409_v6 = vld [vmem:[#allocation2] sm:$0xff] }
  0xfe   : > { %4210 = vmatprep.mubr.bf16.mxu0 %v4978_v8  ;;  %v5089_v38 = vpop.f32.mrf.mxu0  ;;  %v5091_v53 = vpop.f32.mrf.mxu1  ;;  %4162 = vmatprep.mubr.bf16.mxu1 %v4885_v5  ;;  %v2349_v48 = vpack.c.bf16 %v4409_v6, %v4409_v6 }
 0x100   : > { %v5094_v25 = vpop.f32.mrf.mxu0  ;;  %v5096_v27 = vpop.f32.mrf.mxu1 }
 0x102   : > { %v5100_v3 = vpop.f32.mrf.mxu0  ;;  %v5102_v36 = vpop.f32.mrf.mxu1 }
 0x104   : > { %v5104_v5 = vpop.f32.mrf.mxu0 }
 0x105   : > { %4211 = vmatmul.mubr.bf16.gmra.mxu0 %v2349_v48  ;;  %v5106_v41 = vpop.f32.mrf.mxu1  ;;  %4163 = vmatmul.mubr.bf16.gmra.mxu1 %v5098_v31  ;;  %v2616_v48 = vld [vmem:[#allocation2 + $0x91] sm:$0xff] }
 0x106   : > { %4278 = vmatprep.mubr.bf16.mxu0 %v2946_v51  ;;  %v5109_v60 = vpop.f32.mrf.mxu0  ;;  %4230 = vmatprep.mubr.bf16.mxu1 %v2640_v40  ;;  %v2617_v51 = vld [vmem:[#allocation2 + $0x99] sm:$0xff] }
 0x107   : > { %v5111_v8 = vpop.f32.mrf.mxu1 }
 0x108   : > { %v5113_v58 = vpop.f32.mrf.mxu0 }
 0x109   : > { %v5115_v24 = vpop.f32.mrf.mxu1 }
 0x10a   : > { %v5117_v49 = vpop.f32.mrf.mxu0 }
 0x10b   : > { %v5119_v52 = vpop.f32.mrf.mxu1 }
 0x10d   : > { %v3992_v54 = vpop.f32.mrf.mxu0  ;;  %4279 = vmatmul.mubr.bf16.vlgmr.msra.gmra.mxu0 %v2947_v9  ;;  %v3944_v62 = vpop.f32.mrf.mxu1  ;;  %4231 = vmatmul.mubr.bf16.vlgmr.msra.gmra.mxu1 %v2641_v29  ;;  %v2644_v9 = vpack.c.bf16 %v2617_v51, %v2616_v48  ;;  %v2951_v51 = vpack.c.bf16 %v2925_v0, %v2924_v1  ;;  %v2931_v1 = vld [vmem:[#allocation2 + $0xfa] sm:$0xff] }
 0x10e   : > { %4282 = vmatprep.mubr.bf16.mxu0 %v2948_v30  ;;  %v959_v46 = vadd.f32 %v3944_v62, %v5042_v11  ;;  %4234 = vmatprep.mubr.bf16.mxu1 %v2642_v50 }
 0x10f   : > { %v1224_v59 = vpop.f32.mrf.mxu0  ;;  %v950_v6 = vpop.f32.mrf.mxu1 }
 0x110   : > { %v5122_v40 = vadd.f32 %v3992_v54, %v959_v46  ;;  %v951_v43 = vadd.f32 %v950_v6, %v5049_v21  ;;  %v2618_v21 = vld [vmem:[#allocation2 + $0xa9] sm:$0xff] }
 0x111   : > { %v3993_v37 = vpop.f32.mrf.mxu0  ;;  %v3945_v10 = vpop.f32.mrf.mxu1 }
 0x112   : > { %v5125_v2 = vadd.f32 %v1224_v59, %v951_v43  ;;  %v962_v11 = vadd.f32 %v3945_v10, %v5054_v23  ;;  %v2619_v59 = vld [vmem:[#allocation2 + $0xb1] sm:$0xff] }
 0x113   : > { %v1227_v39 = vpop.f32.mrf.mxu0  ;;  %v953_v29 = vpop.f32.mrf.mxu1 }
 0x114   : > { %v5128_v30 = vadd.f32 %v3993_v37, %v962_v11  ;;  %v954_v50 = vadd.f32 %v953_v29, %v5058_v47  ;;  %v2645_v37 = vpack.c.bf16 %v2619_v59, %v2618_v21 }
 0x115   : > { %v3996_v54 = vpop.f32.mrf.mxu0  ;;  %4283 = vmatmul.mubr.bf16.gmra.mxu0 %v2949_v56  ;;  %v3948_v62 = vpop.f32.mrf.mxu1  ;;  %4235 = vmatmul.mubr.bf16.gmra.mxu1 %v2643_v4  ;;  %v2952_v56 = vpack.c.bf16 %v2927_v15, %v2926_v26 }
 0x116   : > { %4286 = vmatprep.mubr.bf16.mxu0 %v2950_v7  ;;  %v5131_v18 = vadd.f32 %v1227_v39, %v954_v50  ;;  %v975_v46 = vadd.f32 %v3948_v62, %v5062_v13  ;;  %4238 = vmatprep.mubr.bf16.mxu1 %v2644_v9  ;;  %v2929_v50 = vld [vmem:[#allocation2 + $0xe2] sm:$0xff] }
 0x117   : > { %v1240_v23 = vpop.f32.mrf.mxu0  ;;  %v966_v16 = vpop.f32.mrf.mxu1 }
 0x118   : > { %v5134_v6 = vadd.f32 %v3996_v54, %v975_v46  ;;  %v967_v47 = vadd.f32 %v966_v16, %v5069_v55  ;;  %v2928_v55 = vld [vmem:[#allocation2 + $0xda] sm:$0xff] }
 0x119   : > { %v3997_v48 = vpop.f32.mrf.mxu0  ;;  %v3949_v43 = vpop.f32.mrf.mxu1  ;;  %v2953_v59 = vpack.c.bf16 %v2929_v50, %v2928_v55 }
 0x11a   : > { %v5137_v10 = vadd.f32 %v1240_v23, %v967_v47  ;;  %v978_v4 = vadd.f32 %v3949_v43, %v5074_v20  ;;  %v2930_v20 = vld [vmem:[#allocation2 + $0xf2] sm:$0xff] }
 0x11b   : > { %v1243_v13 = vpop.f32.mrf.mxu0  ;;  %v969_v7 = vpop.f32.mrf.mxu1  ;;  %v2954_v15 = vpack.c.bf16 %v2931_v1, %v2930_v20 }
 0x11c   : > { %v5140_v11 = vadd.f32 %v3997_v48, %v978_v4  ;;  %v970_v39 = vadd.f32 %v969_v7, %v5078_v14 }
 0x11d   : > { %v4000_v9 = vpop.f32.mrf.mxu0  ;;  %4287 = vmatmul.mubr.bf16.gmra.mxu0 %v2951_v51  ;;  %v3952_v29 = vpop.f32.mrf.mxu1  ;;  %4239 = vmatmul.mubr.bf16.gmra.mxu1 %v2645_v37 }
 0x11e   : > { %4290 = vmatprep.mubr.bf16.mxu0 %v2952_v56  ;;  %v5143_v54 = vadd.f32 %v1243_v13, %v970_v39  ;;  %v991_v62 = vadd.f32 %v3952_v29, %v5082_v33  ;;  %4242 = vmatprep.mubr.bf16.mxu1 %v4939_v34  ;;  %v2933_v56 = vld [vmem:[#allocation2 + $0x112] sm:$0xff]  ;;  %v2935_v39 = vld [vmem:[#allocation2 + $0x12a] sm:$0xff]  ;;  %v2628_v29 = vld [vmem:[#allocation2 + $0x121] sm:$0xff] }
 0x11f   : > { %v1256_v21 = vpop.f32.mrf.mxu0  ;;  %v982_v0 = vpop.f32.mrf.mxu1 }
 0x120   : > { %v5147_v46 = vadd.f32 %v4000_v9, %v991_v62  ;;  %v983_v14 = vadd.f32 %v982_v0, %v5089_v38  ;;  %v2932_v38 = vld [vmem:[#allocation2 + $0x10a] sm:$0xff] }
 0x121   : > { %v4001_v23 = vpop.f32.mrf.mxu0  ;;  %v3953_v26 = vpop.f32.mrf.mxu1  ;;  %v2955_v62 = vpack.c.bf16 %v2933_v56, %v2932_v38  ;;  %v2939_v38 = vld [vmem:[#allocation2 + $0x15a] sm:$0xff] }
 0x122   : > { %v5150_v16 = vadd.f32 %v1256_v21, %v983_v14  ;;  %v994_v47 = vadd.f32 %v3953_v26, %v5094_v25  ;;  %v2934_v25 = vld [vmem:[#allocation2 + $0x122] sm:$0xff] }
 0x123   : > { %v1259_v48 = vpop.f32.mrf.mxu0  ;;  %v985_v33 = vpop.f32.mrf.mxu1  ;;  %v2956_v20 = vpack.c.bf16 %v2935_v39, %v2934_v25 }
 0x124   : > { %v5153_v51 = vadd.f32 %v4001_v23, %v994_v47  ;;  %v986_v34 = vadd.f32 %v985_v33, %v5100_v3  ;;  %v2629_v3 = vld [vmem:[#allocation2 + $0x129] sm:$0xff]  ;;  %v2936_v47 = vld [vmem:[#allocation2 + $0x13a] sm:$0xff] }
 0x125   : > { %v4004_v43 = vpop.f32.mrf.mxu0  ;;  %4291 = vmatmul.mubr.bf16.gmra.mxu0 %v2953_v59  ;;  %v3956_v37 = vpop.f32.mrf.mxu1  ;;  %4243 = vmatmul.mubr.bf16.gmra.mxu1 %v4944_v35  ;;  %v2650_v14 = vpack.c.bf16 %v2629_v3, %v2628_v29 }
 0x126   : > { %4294 = vmatprep.mubr.bf16.mxu0 %v2954_v15  ;;  %v5157_v4 = vadd.f32 %v1259_v48, %v986_v34  ;;  %v1007_v13 = vadd.f32 %v3956_v37, %v5104_v5  ;;  %4246 = vmatprep.mubr.bf16.mxu1 %v4959_v61  ;;  %v2937_v48 = vld [vmem:[#allocation2 + $0x142] sm:$0xff]  ;;  %v2938_v37 = vld [vmem:[#allocation2 + $0x152] sm:$0xff] }
 0x127   : > { %v1272_v7 = vpop.f32.mrf.mxu0  ;;  %v998_v9 = vpop.f32.mrf.mxu1  ;;  %v2957_v39 = vpack.c.bf16 %v2937_v48, %v2936_v47  ;;  %v2958_v3 = vpack.c.bf16 %v2939_v38, %v2938_v37 }
 0x128   : > { %v5161_v55 = vadd.f32 %v4004_v43, %v1007_v13  ;;  %v999_v50 = vadd.f32 %v998_v9, %v5109_v60  ;;  %v2630_v60 = vld [vmem:[#allocation2 + $0x139] sm:$0xff]  ;;  %v2631_v43 = vld [vmem:[#allocation2 + $0x141] sm:$0xff] }
 0x129   : > { %v4005_v35 = vpop.f32.mrf.mxu0  ;;  %v3957_v21 = vpop.f32.mrf.mxu1  ;;  %v2633_v13 = vld [vmem:[#allocation2 + $0x159] sm:$0xff]  ;;  %v2651_v29 = vpack.c.bf16 %v2631_v43, %v2630_v60  ;;  %v2635_v60 = vld [vmem:[#allocation2 + $0x171] sm:$0xff] }
 0x12a   : > { %v5164_v1 = vadd.f32 %v1272_v7, %v999_v50  ;;  %v1010_v5 = vadd.f32 %v3957_v21, %v5113_v58 }
 0x12b   : > { %v1275_v0 = vpop.f32.mrf.mxu0  ;;  %v1001_v61 = vpop.f32.mrf.mxu1 }
 0x12c   : > { %v5167_v23 = vadd.f32 %v4005_v35, %v1010_v5  ;;  %v1002_v59 = vadd.f32 %v1001_v61, %v5117_v49  ;;  %v2632_v49 = vld [vmem:[#allocation2 + $0x151] sm:$0xff] }
 0x12d   : > { %v4008_v26 = vpop.f32.mrf.mxu0  ;;  %4295 = vmatmul.mubr.bf16.gmra.mxu0 %v2955_v62  ;;  %v3960_v15 = vpop.f32.mrf.mxu1  ;;  %4247 = vmatmul.mubr.bf16.gmra.mxu1 %v4964_v63  ;;  %v2652_v62 = vpack.c.bf16 %v2633_v13, %v2632_v49  ;;  %v2941_v61 = vld [vmem:[#allocation2 + $0x172] sm:$0xff] }
 0x12e   : > { %4298 = vmatprep.mubr.bf16.mxu0 %v2956_v20  ;;  %v5171_v33 = vadd.f32 %v1275_v0, %v1002_v59  ;;  %v1023_v58 = vadd.f32 %v3960_v15, %v5044_v19  ;;  %4250 = vmatprep.mubr.bf16.mxu1 %v2650_v14 }
 0x12f   : > { %v1288_v34 = vpop.f32.mrf.mxu0  ;;  %v1014_v56 = vpop.f32.mrf.mxu1 }
 0x130   : > { %v5174_v7 = vadd.f32 %v4008_v26, %v1023_v58  ;;  %v1015_v63 = vadd.f32 %v1014_v56, %v5051_v22  ;;  %v2940_v22 = vld [vmem:[#allocation2 + $0x16a] sm:$0xff] }
 0x131   : > { %v4009_v25 = vpop.f32.mrf.mxu0  ;;  %v3961_v9 = vpop.f32.mrf.mxu1 }
 0x132   : > { %v5177_v50 = vadd.f32 %v1288_v34, %v1015_v63  ;;  %v1026_v19 = vadd.f32 %v3961_v9, %v5056_v45  ;;  %v2634_v45 = vld [vmem:[#allocation2 + $0x169] sm:$0xff]  ;;  %v2959_v34 = vpack.c.bf16 %v2941_v61, %v2940_v22 }
 0x133   : > { %v1291_v35 = vpop.f32.mrf.mxu0  ;;  %v1017_v21 = vpop.f32.mrf.mxu1  ;;  %v2653_v37 = vpack.c.bf16 %v2635_v60, %v2634_v45  ;;  %v2945_v9 = vld [vmem:[#allocation2 + $0x1a2] sm:$0xff] }
 0x134   : > { %v5180_v20 = vadd.f32 %v4009_v25, %v1026_v19  ;;  %v1018_v5 = vadd.f32 %v1017_v21, %v5060_v57 }
 0x135   : > { %v4012_v0 = vpop.f32.mrf.mxu0  ;;  %4299 = vmatmul.mubr.bf16.gmra.mxu0 %v2957_v39  ;;  %v3964_v14 = vpop.f32.mrf.mxu1  ;;  %4251 = vmatmul.mubr.bf16.gmra.mxu1 %v2651_v29 }
 0x136   : > { %4302 = vmatprep.mubr.bf16.mxu0 %v2958_v3  ;;  %v5183_v59 = vadd.f32 %v1291_v35, %v1018_v5  ;;  %v1039_v26 = vadd.f32 %v3964_v14, %v5064_v17  ;;  %4254 = vmatprep.mubr.bf16.mxu1 %v2652_v62  ;;  %v2639_v35 = vld [vmem:[#allocation2 + $0x1a1] sm:$0xff] }
 0x137   : > { %v1304_v15 = vpop.f32.mrf.mxu0  ;;  %v1030_v47 = vpop.f32.mrf.mxu1 }
 0x138   : > { %v5186_v48 = vadd.f32 %v4012_v0, %v1039_v26  ;;  %v1031_v57 = vadd.f32 %v1030_v47, %v5071_v12  ;;  %v2944_v12 = vld [vmem:[#allocation2 + $0x19a] sm:$0xff] }
 0x139   : > { %v4013_v58 = vpop.f32.mrf.mxu0  ;;  %v3965_v43 = vpop.f32.mrf.mxu1  ;;  %v2961_v0 = vpack.c.bf16 %v2945_v9, %v2944_v12 }
 0x13a   : > { %v5189_v38 = vadd.f32 %v1304_v15, %v1031_v57  ;;  %v1042_v56 = vadd.f32 %v3965_v43, %v5076_v28  ;;  %v2638_v28 = vld [vmem:[#allocation2 + $0x199] sm:$0xff] }
 0x13b   : > { %v1307_v49 = vpop.f32.mrf.mxu0  ;;  %v1033_v13 = vpop.f32.mrf.mxu1 }
 0x13c   : > { %v5192_v17 = vadd.f32 %v4013_v58, %v1042_v56  ;;  %v1034_v63 = vadd.f32 %v1033_v13, %v5080_v44 }
 0x13d   : > { %v4016_v25 = vpop.f32.mrf.mxu0  ;;  %4303 = vmatmul.mubr.bf16.gmra.mxu0 %v2959_v34  ;;  %v3968_v39 = vpop.f32.mrf.mxu1  ;;  %4255 = vmatmul.mubr.bf16.gmra.mxu1 %v2653_v37 }
 0x13e   : > { %4306 = vmatprep.mubr.bf16.mxu0 %v5098_v31  ;;  %v5196_v29 = vadd.f32 %v1307_v49, %v1034_v63  ;;  %v1055_v3 = vadd.f32 %v3968_v39, %v5084_v42  ;;  %4258 = vmatprep.mubr.bf16.mxu1 %v4867_v32  ;;  %v2655_v31 = vpack.c.bf16 %v2639_v35, %v2638_v28 }
 0x13f   : > { %v1320_v19 = vpop.f32.mrf.mxu0  ;;  %v1046_v62 = vpop.f32.mrf.mxu1 }
 0x140   : > { %v5200_v21 = vadd.f32 %v4016_v25, %v1055_v3  ;;  %v1047_v44 = vadd.f32 %v1046_v62, %v5091_v53 }
 0x141   : > { %v4017_v5 = vpop.f32.mrf.mxu0  ;;  %v3969_v14 = vpop.f32.mrf.mxu1 }
 0x142   : > { %v5203_v22 = vadd.f32 %v1320_v19, %v1047_v44  ;;  %v1058_v61 = vadd.f32 %v3969_v14, %v5096_v27 }
 0x143   : > { %v1323_v26 = vpop.f32.mrf.mxu0  ;;  %v1049_v42 = vpop.f32.mrf.mxu1 }
 0x144   : > { %v5206_v15 = vadd.f32 %v4017_v5, %v1058_v61  ;;  %v1050_v32 = vadd.f32 %v1049_v42, %v5102_v36 }
 0x145   : > { %v4020_v45 = vpop.f32.mrf.mxu0  ;;  %4307 = vmatmul.mubr.bf16.gmra.mxu0 %v2961_v0  ;;  %v3972_v60 = vpop.f32.mrf.mxu1  ;;  %4259 = vmatmul.mubr.bf16.gmra.mxu1 %v2655_v31 }
 0x146   : > { %v5209_v47 = vadd.f32 %v1323_v26, %v1050_v32  ;;  %v1071_v53 = vadd.f32 %v3972_v60, %v5106_v41 }
 0x147   : > { %v1336_v57 = vpop.f32.mrf.mxu0  ;;  %v1062_v58 = vpop.f32.mrf.mxu1 }
 0x148   : > { %v5212_v34 = vadd.f32 %v4020_v45, %v1071_v53  ;;  %v1063_v27 = vadd.f32 %v1062_v58, %v5111_v8 }
 0x149   : > { %v4021_v43 = vpop.f32.mrf.mxu0  ;;  %v3973_v37 = vpop.f32.mrf.mxu1 }
 0x14a   : > { %v5215_v56 = vadd.f32 %v1336_v57, %v1063_v27  ;;  %v1074_v36 = vadd.f32 %v3973_v37, %v5115_v24 }
 0x14b   : > { %v1339_v49 = vpop.f32.mrf.mxu0  ;;  %v1065_v13 = vpop.f32.mrf.mxu1 }
 0x14c   : > { %v5218_v63 = vadd.f32 %v4021_v43, %v1074_v36  ;;  %v1066_v25 = vadd.f32 %v1065_v13, %v5119_v52 }
 0x14d   : > { %v4088_v39 = vpop.f32.mrf.mxu0  ;;  %v4040_v41 = vpop.f32.mrf.mxu1 }
 0x14e   : > { %v5221_v12 = vadd.f32 %v1339_v49, %v1066_v25  ;;  %v1659_v9 = vadd.f32 %v4040_v41, %v5122_v40 }
 0x14f   : > { %v1836_v3 = vpop.f32.mrf.mxu0  ;;  %v1530_v8 = vpop.f32.mrf.mxu1 }
 0x150   : > { %v5224_v19 = vadd.f32 %v4088_v39, %v1659_v9  ;;  %v1657_v28 = vadd.f32 %v1530_v8, %v5125_v2 }
 0x151   : > { %v4089_v35 = vpop.f32.mrf.mxu0  ;;  %v4041_v24 = vpop.f32.mrf.mxu1 }
 0x152   : > { %v5227_v62 = vadd.f32 %v1836_v3, %v1657_v28  ;;  %v1660_v44 = vadd.f32 %v4041_v24, %v5128_v30 }
 0x153   : > { %v1839_v5 = vpop.f32.mrf.mxu0  ;;  %v1533_v52 = vpop.f32.mrf.mxu1 }
 0x154   : > { %v5230_v0 = vadd.f32 %v4089_v35, %v1660_v44  ;;  %v1658_v14 = vadd.f32 %v1533_v52, %v5131_v18 }
 0x155   : > { %v4092_v31 = vpop.f32.mrf.mxu0  ;;  %v4044_v40 = vpop.f32.mrf.mxu1 }
 0x156   : > { %v5233_v61 = vadd.f32 %v1839_v5, %v1658_v14  ;;  %v1663_v26 = vadd.f32 %v4044_v40, %v5134_v6 }
 0x157   : > { %v1852_v42 = vpop.f32.mrf.mxu0  ;;  %v1546_v2 = vpop.f32.mrf.mxu1 }
 0x158   : > { %v5236_v32 = vadd.f32 %v4092_v31, %v1663_v26  ;;  %v1661_v45 = vadd.f32 %v1546_v2, %v5137_v10 }
 0x159   : > { %v4093_v60 = vpop.f32.mrf.mxu0  ;;  %v4045_v30 = vpop.f32.mrf.mxu1 }
 0x15a   : > { %v5239_v53 = vadd.f32 %v1852_v42, %v1661_v45  ;;  %v1664_v57 = vadd.f32 %v4045_v30, %v5140_v11 }
 0x15b   : > { %v1855_v58 = vpop.f32.mrf.mxu0  ;;  %v1549_v18 = vpop.f32.mrf.mxu1 }
 0x15c   : > { %v5242_v27 = vadd.f32 %v4093_v60, %v1664_v57  ;;  %v1662_v43 = vadd.f32 %v1549_v18, %v5143_v54 }
 0x15d   : > { %v4096_v37 = vpop.f32.mrf.mxu0  ;;  %v4048_v6 = vpop.f32.mrf.mxu1 }
 0x15e   : > { %v5245_v36 = vadd.f32 %v1855_v58, %v1662_v43  ;;  %v1667_v49 = vadd.f32 %v4048_v6, %v5147_v46 }
 0x15f   : > { %v1868_v13 = vpop.f32.mrf.mxu0  ;;  %v1562_v10 = vpop.f32.mrf.mxu1 }
 0x160   : > { %v5248_v25 = vadd.f32 %v4096_v37, %v1667_v49  ;;  %v1665_v39 = vadd.f32 %v1562_v10, %v5150_v16 }
 0x161   : > { %v4097_v41 = vpop.f32.mrf.mxu0  ;;  %v4049_v11 = vpop.f32.mrf.mxu1 }
 0x162   : > { %v5251_v9 = vadd.f32 %v1868_v13, %v1665_v39  ;;  %v1668_v3 = vadd.f32 %v4049_v11, %v5153_v51 }
 0x163   : > { %v1871_v8 = vpop.f32.mrf.mxu0  ;;  %v1565_v54 = vpop.f32.mrf.mxu1 }
 0x164   : > { %v5254_v28 = vadd.f32 %v4097_v41, %v1668_v3  ;;  %v1666_v35 = vadd.f32 %v1565_v54, %v5157_v4 }
 0x165   : > { %v4100_v24 = vpop.f32.mrf.mxu0  ;;  %v4052_v46 = vpop.f32.mrf.mxu1 }
 0x166   : > { %v5257_v44 = vadd.f32 %v1871_v8, %v1666_v35  ;;  %v1671_v5 = vadd.f32 %v4052_v46, %v5161_v55 }
 0x167   : > { %v1884_v52 = vpop.f32.mrf.mxu0  ;;  %v1578_v16 = vpop.f32.mrf.mxu1 }
 0x168   : > { %v5260_v14 = vadd.f32 %v4100_v24, %v1671_v5  ;;  %v1669_v31 = vadd.f32 %v1578_v16, %v5164_v1 }
 0x169   : > { %v4101_v40 = vpop.f32.mrf.mxu0  ;;  %v4053_v51 = vpop.f32.mrf.mxu1 }
 0x16a   : > { %v5263_v26 = vadd.f32 %v1884_v52, %v1669_v31  ;;  %v1672_v42 = vadd.f32 %v4053_v51, %v5167_v23 }
 0x16b   : > { %v1887_v2 = vpop.f32.mrf.mxu0  ;;  %v1581_v4 = vpop.f32.mrf.mxu1 }
 0x16c   : > { %v5266_v45 = vadd.f32 %v4101_v40, %v1672_v42  ;;  %v1670_v60 = vadd.f32 %v1581_v4, %v5171_v33 }
 0x16d   : > { %v4104_v30 = vpop.f32.mrf.mxu0  ;;  %v4056_v55 = vpop.f32.mrf.mxu1 }
 0x16e   : > { %v5269_v57 = vadd.f32 %v1887_v2, %v1670_v60  ;;  %v1675_v58 = vadd.f32 %v4056_v55, %v5174_v7 }
 0x16f   : > { %v1900_v18 = vpop.f32.mrf.mxu0  ;;  %v1594_v1 = vpop.f32.mrf.mxu1 }
 0x170   : > { %v5272_v43 = vadd.f32 %v4104_v30, %v1675_v58  ;;  %v1673_v37 = vadd.f32 %v1594_v1, %v5177_v50 }
 0x171   : > { %v4105_v6 = vpop.f32.mrf.mxu0  ;;  %v4057_v23 = vpop.f32.mrf.mxu1 }
 0x172   : > { %v5275_v49 = vadd.f32 %v1900_v18, %v1673_v37  ;;  %v1676_v13 = vadd.f32 %v4057_v23, %v5180_v20 }
 0x173   : > { %v1903_v10 = vpop.f32.mrf.mxu0  ;;  %v1597_v33 = vpop.f32.mrf.mxu1 }
 0x174   : > { %v5278_v39 = vadd.f32 %v4105_v6, %v1676_v13  ;;  %v1674_v41 = vadd.f32 %v1597_v33, %v5183_v59 }
 0x175   : > { %v4108_v11 = vpop.f32.mrf.mxu0  ;;  %v4060_v7 = vpop.f32.mrf.mxu1 }
 0x176   : > { %5586 = vst [vmem:[#allocation3_spill] sm:$0xff] %v5278_v39  ;;  %v5281_v3 = vadd.f32 %v1903_v10, %v1674_v41  ;;  %v1679_v8 = vadd.f32 %v4060_v7, %v5186_v48 }
 0x177   : > { %v1916_v54 = vpop.f32.mrf.mxu0  ;;  %v1610_v50 = vpop.f32.mrf.mxu1 }
 0x178   : > { %5587 = vst [vmem:[#allocation4_spill] sm:$0xff] %v5281_v3  ;;  %v5284_v35 = vadd.f32 %v4108_v11, %v1679_v8  ;;  %v1677_v24 = vadd.f32 %v1610_v50, %v5189_v38 }
 0x179   : > { %v4109_v46 = vpop.f32.mrf.mxu0  ;;  %v4061_v20 = vpop.f32.mrf.mxu1 }
 0x17a   : > { %5588 = vst [vmem:[#allocation5_spill] sm:$0xff] %v5284_v35  ;;  %v5287_v5 = vadd.f32 %v1916_v54, %v1677_v24  ;;  %v1680_v52 = vadd.f32 %v4061_v20, %v5192_v17 }
 0x17b   : > { %v1919_v16 = vpop.f32.mrf.mxu0  ;;  %v1613_v59 = vpop.f32.mrf.mxu1 }
 0x17c   : > { %5589 = vst [vmem:[#allocation6_spill] sm:$0xff] %v5287_v5  ;;  %v5290_v31 = vadd.f32 %v4109_v46, %v1680_v52  ;;  %v1678_v40 = vadd.f32 %v1613_v59, %v5196_v29 }
 0x17d   : > { %v4112_v51 = vpop.f32.mrf.mxu0  ;;  %v4064_v48 = vpop.f32.mrf.mxu1 }
 0x17e   : > { %5590 = vst [vmem:[#allocation7_spill] sm:$0xff] %v5290_v31  ;;  %v5293_v42 = vadd.f32 %v1919_v16, %v1678_v40  ;;  %v1683_v2 = vadd.f32 %v4064_v48, %v5200_v21 }
 0x17f   : > { %v1932_v4 = vpop.f32.mrf.mxu0  ;;  %v1626_v38 = vpop.f32.mrf.mxu1 }
 0x180   : > { %5591 = vst [vmem:[#allocation8_spill] sm:$0xff] %v5293_v42  ;;  %v5296_v60 = vadd.f32 %v4112_v51, %v1683_v2  ;;  %v1681_v30 = vadd.f32 %v1626_v38, %v5203_v22 }
 0x181   : > { %v4113_v55 = vpop.f32.mrf.mxu0  ;;  %v4065_v17 = vpop.f32.mrf.mxu1 }
 0x182   : > { %5592 = vst [vmem:[#allocation9_spill] sm:$0xff] %v5296_v60  ;;  %v5299_v58 = vadd.f32 %v1932_v4, %v1681_v30  ;;  %v1684_v18 = vadd.f32 %v4065_v17, %v5206_v15 }
 0x183   : > { %v1935_v1 = vpop.f32.mrf.mxu0  ;;  %v1629_v29 = vpop.f32.mrf.mxu1 }
 0x184   : > { %5593 = vst [vmem:[#allocation10_spill] sm:$0xff] %v5299_v58  ;;  %v5302_v37 = vadd.f32 %v4113_v55, %v1684_v18  ;;  %v1682_v6 = vadd.f32 %v1629_v29, %v5209_v47 }
 0x185   : > { %v4116_v23 = vpop.f32.mrf.mxu0  ;;  %v4068_v21 = vpop.f32.mrf.mxu1 }
 0x186   : > { %5594 = vst [vmem:[#allocation11_spill] sm:$0xff] %v5302_v37  ;;  %v5305_v13 = vadd.f32 %v1935_v1, %v1682_v6  ;;  %v1687_v10 = vadd.f32 %v4068_v21, %v5212_v34 }
 0x187   : > { %v1948_v33 = vpop.f32.mrf.mxu0  ;;  %v1642_v22 = vpop.f32.mrf.mxu1 }
 0x188   : > { %5595 = vst [vmem:[#allocation12_spill] sm:$0xff] %v5305_v13  ;;  %v5308_v41 = vadd.f32 %v4116_v23, %v1687_v10  ;;  %v1685_v11 = vadd.f32 %v1642_v22, %v5215_v56 }
 0x189   : > { %v4117_v7 = vpop.f32.mrf.mxu0  ;;  %v4069_v15 = vpop.f32.mrf.mxu1 }
 0x18a   : > { %5596 = vst [vmem:[#allocation13_spill] sm:$0xff] %v5308_v41  ;;  %v5311_v8 = vadd.f32 %v1948_v33, %v1685_v11  ;;  %v1688_v54 = vadd.f32 %v4069_v15, %v5218_v63 }
 0x18b   : > { %v1951_v50 = vpop.f32.mrf.mxu0  ;;  %v1645_v47 = vpop.f32.mrf.mxu1 }
 0x18c   : > { %5597 = vst [vmem:[#allocation14_spill] sm:$0xff] %v5311_v8  ;;  %v5314_v24 = vadd.f32 %v4117_v7, %v1688_v54  ;;  %v1686_v46 = vadd.f32 %v1645_v47, %v5221_v12 }
 0x18d   : > { %v5317_v20 = vpop.f32.mrf.mxu0  ;;  %v4136_v34 = vpop.f32.mrf.mxu1 }
 0x18e   : > { %5598 = vst [vmem:[#allocation15_spill] sm:$0xff] %v5314_v24  ;;  %v5319_v52 = vadd.f32 %v1951_v50, %v1686_v46 }
 0x18f   : > { %v5321_v16 = vpop.f32.mrf.mxu0  ;;  %v2142_v56 = vpop.f32.mrf.mxu1 }
 0x190   : > { %5599 = vst [vmem:[#allocation16_spill] sm:$0xff] %v5319_v52 }
 0x191   : > { %v5323_v59 = vpop.f32.mrf.mxu0  ;;  %v4137_v40 = vpop.f32.mrf.mxu1 }
 0x193   : > { %v5325_v51 = vpop.f32.mrf.mxu0  ;;  %v5327_v63 = vpop.f32.mrf.mxu1 }
 0x195   : > { %v5329_v48 = vpop.f32.mrf.mxu0  ;;  %v5331_v2 = vpop.f32.mrf.mxu1 }
 0x197   : > { %v5333_v12 = vpop.f32.mrf.mxu0  ;;  %v5335_v4 = vpop.f32.mrf.mxu1 }
 0x199   : > { %v5337_v38 = vpop.f32.mrf.mxu0  ;;  %v5339_v30 = vpop.f32.mrf.mxu1 }
 0x19b   : > { %v5341_v55 = vpop.f32.mrf.mxu0  ;;  %v5343_v17 = vpop.f32.mrf.mxu1 }
 0x19d   : > { %v5345_v18 = vpop.f32.mrf.mxu0  ;;  %v5347_v1 = vpop.f32.mrf.mxu1 }
 0x19f   : > { %v5349_v29 = vpop.f32.mrf.mxu0  ;;  %v5351_v6 = vpop.f32.mrf.mxu1 }
 0x1a1   : > { %v5353_v23 = vpop.f32.mrf.mxu0  ;;  %v5355_v21 = vpop.f32.mrf.mxu1 }
 0x1a3   : > { %v5357_v10 = vpop.f32.mrf.mxu0  ;;  %v5359_v33 = vpop.f32.mrf.mxu1 }
 0x1a5   : > { %v5361_v22 = vpop.f32.mrf.mxu0  ;;  %v5363_v11 = vpop.f32.mrf.mxu1 }
 0x1a7   : > { %v5365_v7 = vpop.f32.mrf.mxu0  ;;  %v5367_v15 = vpop.f32.mrf.mxu1 }
 0x1a9   : > { %v5369_v54 = vpop.f32.mrf.mxu0  ;;  %v5371_v50 = vpop.f32.mrf.mxu1 }
 0x1ab   : > { %v5373_v47 = vpop.f32.mrf.mxu0  ;;  %v5375_v46 = vpop.f32.mrf.mxu1 }
 0x1ad   : > { %v5377_v52 = vpop.f32.mrf.mxu0  ;;  %v5379_v24 = vpop.f32.mrf.mxu1 }
 0x1af   : > { %v5381_v8 = vpop.f32.mrf.mxu0  ;;  %v5383_v41 = vpop.f32.mrf.mxu1 }
 0x1b0   : > { %5600 = vst [vmem:[#allocation17_spill] sm:$0xff] %v5381_v8 }
 0x1b1   : > { %v5385_v13 = vpop.f32.mrf.mxu0  ;;  %v5387_v37 = vpop.f32.mrf.mxu1 }
 0x1b2   : > { %5601 = vst [vmem:[#allocation18_spill] sm:$0xff] %v5385_v13  ;;  %5602 = vst [vmem:[#allocation19_spill] sm:$0xff] %v5387_v37 }
 0x1b3   : > { %v5389_v58 = vpop.f32.mrf.mxu0  ;;  %v5391_v60 = vpop.f32.mrf.mxu1 }
 0x1b4   : > { %5603 = vst [vmem:[#allocation20_spill] sm:$0xff] %v5389_v58  ;;  %5604 = vst [vmem:[#allocation21_spill] sm:$0xff] %v5391_v60 }
 0x1b5   : > { %v5393_v42 = vpop.f32.mrf.mxu0  ;;  %v5395_v31 = vpop.f32.mrf.mxu1 }
 0x1b6   : > { %5605 = vst [vmem:[#allocation22_spill] sm:$0xff] %v5393_v42  ;;  %5606 = vst [vmem:[#allocation23_spill] sm:$0xff] %v5395_v31 }
 0x1b7   : > { %v5397_v5 = vpop.f32.mrf.mxu0  ;;  %v5399_v35 = vpop.f32.mrf.mxu1 }
 0x1b8   : > { %5607 = vst [vmem:[#allocation24_spill] sm:$0xff] %v5397_v5  ;;  %5608 = vst [vmem:[#allocation25_spill] sm:$0xff] %v5399_v35 }
 0x1b9   : > { %v5401_v3 = vpop.f32.mrf.mxu0  ;;  %v5403_v8 = vpop.f32.mrf.mxu1 }
 0x1ba   : > { %5609 = vst [vmem:[#allocation26_spill] sm:$0xff] %v5401_v3  ;;  %5610 = vst [vmem:[#allocation27_spill] sm:$0xff] %v5403_v8 }
 0x1bb   : > { %v5405_v39 = vpop.f32.mrf.mxu0  ;;  %v5407_v13 = vpop.f32.mrf.mxu1 }
 0x1bc   : > { %5611 = vst [vmem:[#allocation28_spill] sm:$0xff] %v5405_v39  ;;  %5612 = vst [vmem:[#allocation29_spill] sm:$0xff] %v5407_v13 }
 0x1bd   : > { %v5409_v37 = vpop.f32.mrf.mxu0  ;;  %v5411_v58 = vpop.f32.mrf.mxu1 }
 0x1be   : > { %5613 = vst [vmem:[#allocation30_spill] sm:$0xff] %v5409_v37  ;;  %5614 = vst [vmem:[#allocation31_spill] sm:$0xff] %v5411_v58 }
 0x1bf   : > { %v5413_v60 = vpop.f32.mrf.mxu0  ;;  %v5415_v42 = vpop.f32.mrf.mxu1 }
 0x1c0   : > { %5615 = vst [vmem:[#allocation32_spill] sm:$0xff] %v5413_v60  ;;  %5616 = vst [vmem:[#allocation33_spill] sm:$0xff] %v5415_v42  ;;  %v2271_v60 = vadd.f32 %v4136_v34, %v5224_v19  ;;  %v2270_v19 = vadd.f32 %v5327_v63, %v5233_v61 }
 0x1c1   : > { %v5417_v31 = vpop.f32.mrf.mxu0  ;;  %v5419_v5 = vpop.f32.mrf.mxu1 }
 0x1c2   : > { %5617 = vst [vmem:[#allocation34_spill] sm:$0xff] %v5417_v31  ;;  %5618 = vst [vmem:[#allocation35_spill] sm:$0xff] %v5419_v5  ;;  %v2269_v5 = vadd.f32 %v2142_v56, %v5227_v62 }
 0x1c3   : > { %v5421_v35 = vpop.f32.mrf.mxu0  ;;  %v5423_v3 = vpop.f32.mrf.mxu1 }
 0x1c4   : > { %5619 = vst [vmem:[#allocation36_spill] sm:$0xff] %v5421_v35  ;;  %5620 = vst [vmem:[#allocation37_spill] sm:$0xff] %v5423_v3 }
 0x1c5   : > { %v5425_v8 = vpop.f32.mrf.mxu0  ;;  %v5427_v39 = vpop.f32.mrf.mxu1 }
 0x1c6   : > { %5621 = vst [vmem:[#allocation38_spill] sm:$0xff] %v5425_v8  ;;  %5622 = vst [vmem:[#allocation39_spill] sm:$0xff] %v5427_v39  ;;  %v2578_v8 = vadd.f32 %v5317_v20, %v2271_v60  ;;  %v2272_v39 = vadd.f32 %v4137_v40, %v5230_v0  ;;  %v2275_v60 = vadd.f32 %v5331_v2, %v5236_v32 }
 0x1c7   : > { %v5429_v13 = vpop.f32.mrf.mxu0  ;;  %v5431_v37 = vpop.f32.mrf.mxu1 }
 0x1c8   : > { %5623 = vst [vmem:[#allocation40_spill] sm:$0xff] %v5429_v13  ;;  %5624 = vst [vmem:[#allocation41_spill] sm:$0xff] %v5431_v37  ;;  %v2576_v37 = vadd.f32 %v5321_v16, %v2269_v5  ;;  %v2579_v0 = vadd.f32 %v5323_v59, %v2272_v39  ;;  %v2582_v39 = vadd.f32 %v5329_v48, %v2275_v60 }
 0x1c9   : > { %v5434_v42 = vpop.f32.mrf.mxu0  ;;  %v5436_v31 = vpop.f32.mrf.mxu1  ;;  %v2276_v59 = vadd.f32 %v5339_v30, %v5242_v27  ;;  %v2279_v48 = vadd.f32 %v5347_v1, %v5248_v25 }
 0x1ca   : > { %5625 = vst [vmem:[#allocation42_spill] sm:$0xff] %v5434_v42 }
 0x1cb   : > { %v5439_v35 = vpop.f32.mrf.mxu0  ;;  %v5441_v3 = vpop.f32.mrf.mxu1  ;;  %v2586_v1 = vadd.f32 %v5345_v18, %v2279_v48 }
 0x1cc   : > { %5626 = vst [vmem:[#allocation43_spill] sm:$0xff] %v5439_v35 }
 0x1cd   : > { %v4280_v13 = vpop.f32.mrf.mxu0  ;;  %v4232_v58 = vpop.f32.mrf.mxu1 }
 0x1ce   : > { %v2884_v34 = vadd.f32 %v4232_v58, %v2578_v8  ;;  %v2577_v58 = vadd.f32 %v5325_v51, %v2270_v19  ;;  %v2273_v8 = vadd.f32 %v5335_v4, %v5239_v53  ;;  %v2274_v51 = vadd.f32 %v5343_v17, %v5245_v36 }
 0x1cf   : > { %v3061_v42 = vpop.f32.mrf.mxu0  ;;  %v2755_v62 = vpop.f32.mrf.mxu1  ;;  %v2583_v36 = vadd.f32 %v5337_v38, %v2276_v59 }
 0x1d0   : > { %v3190_v5 = vadd.f32 %v4280_v13, %v2884_v34  ;;  %v2882_v20 = vadd.f32 %v2755_v62, %v2576_v37  ;;  %v2580_v53 = vadd.f32 %v5333_v12, %v2273_v8  ;;  %v2581_v12 = vadd.f32 %v5341_v55, %v2274_v51 }
 0x1d1   : > { %v4281_v16 = vpop.f32.mrf.mxu0  ;;  %v4233_v61 = vpop.f32.mrf.mxu1  ;;  %v2277_v8 = vadd.f32 %v5351_v6, %v5251_v9 }
 0x1d2   : > { %3222 = vst [vmem:[%s5453_s27 + $0x10] sm:$0xff] %v3190_v5  ;;  %v3188_v56 = vadd.f32 %v3061_v42, %v2882_v20  ;;  %v2885_v40 = vadd.f32 %v4233_v61, %v2579_v0  ;;  %v3292_v20 = vmul.f32 %v3190_v5, %v3190_v5 }
 0x1d3   : > { %v3064_v63 = vpop.f32.mrf.mxu0  ;;  %v2758_v35 = vpop.f32.mrf.mxu1 }
 0x1d4   : > { %3220 = vst [vmem:[%s5453_s27] sm:$0xff] %v3188_v56  ;;  %v3191_v32 = vadd.f32 %v4281_v16, %v2885_v40  ;;  %v2883_v13 = vadd.f32 %v2758_v35, %v2577_v58  ;;  %v3290_v34 = vmul.f32 %v3188_v56, %v3188_v56 }
 0x1d5   : > { %v4284_v37 = vpop.f32.mrf.mxu0  ;;  %v4236_v2 = vpop.f32.mrf.mxu1 }
 0x1d6   : > { %3223 = vst [vmem:[%s5453_s27 + $0x18] sm:$0xff] %v3191_v32  ;;  %v3189_v42 = vadd.f32 %v3064_v63, %v2883_v13  ;;  %v2888_v4 = vadd.f32 %v4236_v2, %v2582_v39  ;;  %v3293_v63 = vmul.f32 %v3191_v32, %v3191_v32 }
 0x1d7   : > { %v3077_v19 = vpop.f32.mrf.mxu0  ;;  %v2771_v35 = vpop.f32.mrf.mxu1 }
 0x1d8   : > { %3221 = vst [vmem:[%s5453_s27 + $0x8] sm:$0xff] %v3189_v42  ;;  %v3252_v62 = vadd.f32 %v3189_v42, %v3188_v56  ;;  %v3291_v0 = vmul.f32 %v3189_v42, %v3189_v42  ;;  %v3194_v27 = vadd.f32 %v4284_v37, %v2888_v4  ;;  %v2886_v30 = vadd.f32 %v2771_v35, %v2580_v53 }
 0x1d9   : > { %v4285_v60 = vpop.f32.mrf.mxu0  ;;  %v4237_v17 = vpop.f32.mrf.mxu1  ;;  %v2280_v56 = vadd.f32 %v5355_v21, %v5254_v28  ;;  %v2278_v37 = vadd.f32 %v5359_v33, %v5257_v44  ;;  %v2584_v53 = vadd.f32 %v5349_v29, %v2277_v8  ;;  %v2283_v35 = vadd.f32 %v5363_v11, %v5260_v14 }
 0x1da   : > { %v3253_v16 = vadd.f32 %v3252_v62, %v3190_v5  ;;  %v3322_v61 = vadd.f32 %v3291_v0, %v3290_v34  ;;  %3226 = vst [vmem:[%s5453_s27 + $0x30] sm:$0xff] %v3194_v27  ;;  %v3192_v58 = vadd.f32 %v3077_v19, %v2886_v30  ;;  %v2889_v40 = vadd.f32 %v4237_v17, %v2583_v36 }
 0x1db   : > { %v3080_v25 = vpop.f32.mrf.mxu0  ;;  %v2774_v38 = vpop.f32.mrf.mxu1  ;;  %v2587_v42 = vadd.f32 %v5353_v23, %v2280_v56  ;;  %v2585_v34 = vadd.f32 %v5357_v10, %v2278_v37  ;;  %v2281_v62 = vadd.f32 %v5367_v15, %v5263_v26  ;;  %v3296_v23 = vmul.f32 %v3194_v27, %v3194_v27 }
 0x1dc   : > { %v3323_v39 = vadd.f32 %v3322_v61, %v3292_v20  ;;  %3224 = vst [vmem:[%s5453_s27 + $0x20] sm:$0xff] %v3192_v58  ;;  %v3254_v55 = vadd.f32 %v3253_v16, %v3191_v32  ;;  %v2887_v5 = vadd.f32 %v2774_v38, %v2581_v12  ;;  %v3294_v18 = vmul.f32 %v3192_v58, %v3192_v58 }
 0x1dd   : > { %v4288_v13 = vpop.f32.mrf.mxu0  ;;  %v3195_v59 = vadd.f32 %v4285_v60, %v2889_v40  ;;  %v4240_v51 = vpop.f32.mrf.mxu1  ;;  %v2284_v17 = vadd.f32 %v5371_v50, %v5266_v45  ;;  %v2282_v38 = vadd.f32 %v5375_v46, %v5269_v57 }
 0x1de   : > { %v3255_v9 = vadd.f32 %v3254_v55, %v3192_v58  ;;  %v3324_v6 = vadd.f32 %v3323_v39, %v3293_v63  ;;  %v3193_v2 = vadd.f32 %v3080_v25, %v2887_v5  ;;  %v2892_v28 = vadd.f32 %v4240_v51, %v2586_v1 }
 0x1df   : > { %v3093_v21 = vpop.f32.mrf.mxu0  ;;  %3227 = vst [vmem:[%s5453_s27 + $0x38] sm:$0xff] %v3195_v59  ;;  %v2787_v32 = vpop.f32.mrf.mxu1  ;;  %v3297_v10 = vmul.f32 %v3195_v59, %v3195_v59  ;;  %v2590_v58 = vadd.f32 %v5361_v22, %v2283_v35  ;;  %v2591_v40 = vadd.f32 %v5369_v54, %v2284_v17  ;;  %v2287_v63 = vadd.f32 %v5379_v24, %v5272_v43 }
 0x1e0   : > { %v3325_v4 = vadd.f32 %v3324_v6, %v3294_v18  ;;  %3225 = vst [vmem:[%s5453_s27 + $0x28] sm:$0xff] %v3193_v2  ;;  %v3256_v19 = vadd.f32 %v3255_v9, %v3193_v2  ;;  %v3295_v48 = vmul.f32 %v3193_v2, %v3193_v2  ;;  %v3198_v44 = vadd.f32 %v4288_v13, %v2892_v28  ;;  %v5627_v28 = vld [vmem:[#allocation3_spill] sm:$0xff] }
 0x1e1   : > { %v4289_v33 = vpop.f32.mrf.mxu0  ;;  %v2890_v29 = vadd.f32 %v2787_v32, %v2584_v53  ;;  %v4241_v0 = vpop.f32.mrf.mxu1  ;;  %v2285_v18 = vadd.f32 %v5383_v41, %v5275_v49  ;;  %v2589_v6 = vadd.f32 %v5373_v47, %v2282_v38  ;;  %v2594_v2 = vadd.f32 %v5377_v52, %v2287_v63  ;;  %v5638_v63 = vld [vmem:[#allocation7_spill] sm:$0xff] }
 0x1e2   : > { %v3257_v30 = vadd.f32 %v3256_v19, %v3194_v27  ;;  %v3326_v60 = vadd.f32 %v3325_v4, %v3295_v48  ;;  %3230 = vst [vmem:[%s5453_s27 + $0x50] sm:$0xff] %v3198_v44  ;;  %v2893_v36 = vadd.f32 %v4241_v0, %v2587_v42  ;;  %v2588_v27 = vadd.f32 %v5365_v7, %v2281_v62  ;;  %v5629_v48 = vld [vmem:[#allocation17_spill] sm:$0xff] }
 0x1e3   : > { %v3096_v12 = vpop.f32.mrf.mxu0  ;;  %v3196_v20 = vadd.f32 %v3093_v21, %v2890_v29  ;;  %v2790_v16 = vpop.f32.mrf.mxu1  ;;  %v3300_v54 = vmul.f32 %v3198_v44, %v3198_v44  ;;  %v5628_v21 = vld [vmem:[#allocation19_spill] sm:$0xff] }
 0x1e4   : > { %v3327_v14 = vadd.f32 %v3326_v60, %v3296_v23  ;;  %v3258_v11 = vadd.f32 %v3257_v30, %v3195_v59  ;;  %v3199_v61 = vadd.f32 %v4289_v33, %v2893_v36  ;;  %v2891_v26 = vadd.f32 %v2790_v16, %v2585_v34  ;;  %v5630_v33 = vld [vmem:[#allocation4_spill] sm:$0xff]  ;;  %v5631_v34 = vld [vmem:[#allocation21_spill] sm:$0xff]  ;;  %v5632_v60 = vld [vmem:[#allocation18_spill] sm:$0xff] }
 0x1e5   : > { %v4292_v15 = vpop.f32.mrf.mxu0  ;;  %3228 = vst [vmem:[%s5453_s27 + $0x40] sm:$0xff] %v3196_v20  ;;  %v4244_v25 = vpop.f32.mrf.mxu1  ;;  %v3298_v8 = vmul.f32 %v3196_v20, %v3196_v20  ;;  %v2288_v53 = vadd.f32 %v5628_v21, %v5627_v28  ;;  %v2286_v35 = vadd.f32 %v5631_v34, %v5630_v33  ;;  %v5642_v28 = vld [vmem:[#allocation8_spill] sm:$0xff]  ;;  %v5643_v21 = vld [vmem:[#allocation29_spill] sm:$0xff] }
 0x1e6   : > { %v3259_v1 = vadd.f32 %v3258_v11, %v3196_v20  ;;  %v3328_v56 = vadd.f32 %v3327_v14, %v3297_v10  ;;  %3231 = vst [vmem:[%s5453_s27 + $0x58] sm:$0xff] %v3199_v61  ;;  %v3197_v45 = vadd.f32 %v3096_v12, %v2891_v26  ;;  %v2896_v22 = vadd.f32 %v4244_v25, %v2590_v58  ;;  %v5633_v10 = vld [vmem:[#allocation5_spill] sm:$0xff]  ;;  %v5634_v20 = vld [vmem:[#allocation23_spill] sm:$0xff]  ;;  %v5635_v25 = vld [vmem:[#allocation20_spill] sm:$0xff] }
 0x1e7   : > { %v3109_v50 = vpop.f32.mrf.mxu0  ;;  %v2803_v39 = vpop.f32.mrf.mxu1  ;;  %v3301_v49 = vmul.f32 %v3199_v61, %v3199_v61  ;;  %v2595_v36 = vadd.f32 %v5632_v60, %v2288_v53  ;;  %v2291_v16 = vadd.f32 %v5634_v20, %v5633_v10  ;;  %v2290_v53 = vadd.f32 %v5643_v21, %v5642_v28  ;;  %v5645_v34 = vld [vmem:[#allocation9_spill] sm:$0xff]  ;;  %v5647_v60 = vld [vmem:[#allocation28_spill] sm:$0xff]  ;;  %v5658_v28 = vld [vmem:[#allocation39_spill] sm:$0xff] }
 0x1e8   : > { %v3329_v55 = vadd.f32 %v3328_v56, %v3298_v8  ;;  %3229 = vst [vmem:[%s5453_s27 + $0x48] sm:$0xff] %v3197_v45  ;;  %v3260_v7 = vadd.f32 %v3259_v1, %v3197_v45  ;;  %v3299_v5 = vmul.f32 %v3197_v45, %v3197_v45  ;;  %v2894_v13 = vadd.f32 %v2803_v39, %v2588_v27  ;;  %v5636_v8 = vld [vmem:[#allocation6_spill] sm:$0xff]  ;;  %v5637_v56 = vld [vmem:[#allocation25_spill] sm:$0xff] }
 0x1e9   : > { %v4293_v37 = vpop.f32.mrf.mxu0  ;;  %v3202_v59 = vadd.f32 %v4292_v15, %v2896_v22  ;;  %v4245_v51 = vpop.f32.mrf.mxu1  ;;  %v2593_v1 = vadd.f32 %v5635_v25, %v2286_v35  ;;  %v2289_v45 = vadd.f32 %v5637_v56, %v5636_v8  ;;  %v5639_v22 = vld [vmem:[#allocation27_spill] sm:$0xff]  ;;  %v5652_v8 = vld [vmem:[#allocation30_spill] sm:$0xff] }
 0x1ea   : > { %v3261_v57 = vadd.f32 %v3260_v7, %v3198_v44  ;;  %v3330_v46 = vadd.f32 %v3329_v55, %v3299_v5  ;;  %v3200_v9 = vadd.f32 %v3109_v50, %v2894_v13  ;;  %v2897_v43 = vadd.f32 %v4245_v51, %v2591_v40  ;;  %v5646_v35 = vld [vmem:[#allocation31_spill] sm:$0xff] }
 0x1eb   : > { %v3112_v24 = vpop.f32.mrf.mxu0  ;;  %3234 = vst [vmem:[%s5453_s27 + $0x70] sm:$0xff] %v3202_v59  ;;  %v2806_v42 = vpop.f32.mrf.mxu1  ;;  %v2592_v44 = vadd.f32 %v5629_v48, %v2285_v18  ;;  %v2292_v39 = vadd.f32 %v5639_v22, %v5638_v63  ;;  %v3304_v55 = vmul.f32 %v3202_v59, %v3202_v59 }
 0x1ec   : > { %v3331_v41 = vadd.f32 %v3330_v46, %v3300_v54  ;;  %3232 = vst [vmem:[%s5453_s27 + $0x60] sm:$0xff] %v3200_v9  ;;  %v3262_v32 = vadd.f32 %v3261_v57, %v3199_v61  ;;  %v3203_v4 = vadd.f32 %v4293_v37, %v2897_v43  ;;  %v2895_v47 = vadd.f32 %v2806_v42, %v2589_v6  ;;  %v5640_v37 = vld [vmem:[#allocation22_spill] sm:$0xff]  ;;  %v5641_v6 = vld [vmem:[#allocation24_spill] sm:$0xff] }
 0x1ed   : > { %v4296_v19 = vpop.f32.mrf.mxu0  ;;  %v4248_v52 = vpop.f32.mrf.mxu1  ;;  %v3302_v29 = vmul.f32 %v3200_v9, %v3200_v9  ;;  %v2598_v18 = vadd.f32 %v5640_v37, %v2291_v16 }
 0x1ee   : > { %v3263_v62 = vadd.f32 %v3262_v32, %v3200_v9  ;;  %v3332_v0 = vadd.f32 %v3331_v41, %v3301_v49  ;;  %3235 = vst [vmem:[%s5453_s27 + $0x78] sm:$0xff] %v3203_v4  ;;  %v2900_v23 = vadd.f32 %v4248_v52, %v2594_v2  ;;  %v3201_v12 = vadd.f32 %v3112_v24, %v2895_v47  ;;  %v5644_v41 = vld [vmem:[#allocation26_spill] sm:$0xff] }
 0x1ef   : > { %v3125_v30 = vpop.f32.mrf.mxu0  ;;  %v2819_v17 = vpop.f32.mrf.mxu1  ;;  %v3305_v46 = vmul.f32 %v3203_v4, %v3203_v4  ;;  %v2596_v2 = vadd.f32 %v5641_v6, %v2289_v45  ;;  %v2599_v32 = vadd.f32 %v5644_v41, %v2292_v39 }
 0x1f0   : > { %v3333_v14 = vadd.f32 %v3332_v0, %v3302_v29  ;;  %v3206_v11 = vadd.f32 %v4296_v19, %v2900_v23  ;;  %v2898_v61 = vadd.f32 %v2819_v17, %v2592_v44  ;;  %3233 = vst [vmem:[%s5453_s27 + $0x68] sm:$0xff] %v3201_v12  ;;  %v3264_v15 = vadd.f32 %v3263_v62, %v3201_v12  ;;  %v5649_v17 = vld [vmem:[#allocation33_spill] sm:$0xff] }
 0x1f1   : > { %v4297_v26 = vpop.f32.mrf.mxu0  ;;  %v3303_v58 = vmul.f32 %v3201_v12, %v3201_v12  ;;  %v4249_v27 = vpop.f32.mrf.mxu1  ;;  %v5648_v12 = vld [vmem:[#allocation10_spill] sm:$0xff] }
 0x1f2   : > { %3238 = vst [vmem:[%s5453_s27 + $0x90] sm:$0xff] %v3206_v11  ;;  %v3204_v50 = vadd.f32 %v3125_v30, %v2898_v61  ;;  %v2901_v40 = vadd.f32 %v4249_v27, %v2595_v36  ;;  %v3265_v7 = vadd.f32 %v3264_v15, %v3202_v59  ;;  %v2597_v36 = vadd.f32 %v5647_v60, %v2290_v53  ;;  %v5650_v61 = vld [vmem:[#allocation11_spill] sm:$0xff] }
 0x1f3   : > { %v3128_v38 = vpop.f32.mrf.mxu0  ;;  %v3334_v5 = vadd.f32 %v3333_v14, %v3303_v58  ;;  %v2822_v13 = vpop.f32.mrf.mxu1  ;;  %v2293_v10 = vadd.f32 %v5649_v17, %v5648_v12  ;;  %v3308_v58 = vmul.f32 %v3206_v11, %v3206_v11 }
 0x1f4   : > { %3236 = vst [vmem:[%s5453_s27 + $0x80] sm:$0xff] %v3204_v50  ;;  %v3207_v54 = vadd.f32 %v4297_v26, %v2901_v40  ;;  %v2899_v51 = vadd.f32 %v2822_v13, %v2593_v1  ;;  %v3266_v43 = vadd.f32 %v3265_v7, %v3203_v4  ;;  %v3306_v48 = vmul.f32 %v3204_v50, %v3204_v50  ;;  %v5651_v26 = vld [vmem:[#allocation35_spill] sm:$0xff]  ;;  %v5655_v13 = vld [vmem:[#allocation37_spill] sm:$0xff] }
 0x1f5   : > { %v4300_v57 = vpop.f32.mrf.mxu0  ;;  %v3335_v9 = vadd.f32 %v3334_v5, %v3304_v55  ;;  %v4252_v24 = vpop.f32.mrf.mxu1  ;;  %v2295_v4 = vadd.f32 %v5646_v35, %v5645_v34  ;;  %v2296_v15 = vadd.f32 %v5651_v26, %v5650_v61  ;;  %v5653_v55 = vld [vmem:[#allocation32_spill] sm:$0xff] }
 0x1f6   : > { %3239 = vst [vmem:[%s5453_s27 + $0x98] sm:$0xff] %v3207_v54  ;;  %v3205_v59 = vadd.f32 %v3128_v38, %v2899_v51  ;;  %v2904_v42 = vadd.f32 %v4252_v24, %v2598_v18  ;;  %v3267_v19 = vadd.f32 %v3266_v43, %v3204_v50  ;;  %v3309_v38 = vmul.f32 %v3207_v54, %v3207_v54  ;;  %v5654_v5 = vld [vmem:[#allocation12_spill] sm:$0xff] }
 0x1f7   : > { %v3141_v49 = vpop.f32.mrf.mxu0  ;;  %v3336_v44 = vadd.f32 %v3335_v9, %v3305_v46  ;;  %v2835_v33 = vpop.f32.mrf.mxu1  ;;  %v2602_v56 = vadd.f32 %v5652_v8, %v2295_v4  ;;  %v2600_v7 = vadd.f32 %v5653_v55, %v2293_v10  ;;  %v2294_v37 = vadd.f32 %v5655_v13, %v5654_v5  ;;  %v5667_v13 = vld [vmem:[#allocation43_spill] sm:$0xff] }
 0x1f8   : > { %3237 = vst [vmem:[%s5453_s27 + $0x88] sm:$0xff] %v3205_v59  ;;  %v3307_v47 = vmul.f32 %v3205_v59, %v3205_v59  ;;  %v3210_v52 = vadd.f32 %v4300_v57, %v2904_v42  ;;  %v2902_v62 = vadd.f32 %v2835_v33, %v2596_v2  ;;  %v3268_v23 = vadd.f32 %v3267_v19, %v3205_v59  ;;  %v5656_v57 = vld [vmem:[#allocation34_spill] sm:$0xff]  ;;  %v5657_v2 = vld [vmem:[#allocation13_spill] sm:$0xff]  ;;  %v5659_v19 = vld [vmem:[#allocation36_spill] sm:$0xff] }
 0x1f9   : > { %v4301_v29 = vpop.f32.mrf.mxu0  ;;  %v3337_v0 = vadd.f32 %v3336_v44, %v3306_v48  ;;  %v4253_v30 = vpop.f32.mrf.mxu1  ;;  %v2603_v46 = vadd.f32 %v5656_v57, %v2296_v15  ;;  %v2601_v48 = vadd.f32 %v5659_v19, %v2294_v37  ;;  %v5660_v44 = vld [vmem:[#allocation14_spill] sm:$0xff]  ;;  %v5661_v33 = vld [vmem:[#allocation41_spill] sm:$0xff]  ;;  %v5664_v15 = vld [vmem:[#allocation40_spill] sm:$0xff] }
 0x1fa   : > { %3242 = vst [vmem:[%s5453_s27 + $0xb0] sm:$0xff] %v3210_v52  ;;  %v3208_v20 = vadd.f32 %v3141_v49, %v2902_v62  ;;  %v2905_v16 = vadd.f32 %v4253_v30, %v2599_v32  ;;  %v3269_v27 = vadd.f32 %v3268_v23, %v3206_v11  ;;  %v2297_v34 = vadd.f32 %v5661_v33, %v5660_v44  ;;  %v5662_v30 = vld [vmem:[#allocation38_spill] sm:$0xff] }
 0x1fb   : > { %v3144_v14 = vpop.f32.mrf.mxu0  ;;  %v3338_v25 = vadd.f32 %v3337_v0, %v3307_v47  ;;  %v2838_v1 = vpop.f32.mrf.mxu1  ;;  %v3312_v62 = vmul.f32 %v3210_v52, %v3210_v52 }
 0x1fc   : > { %3240 = vst [vmem:[%s5453_s27 + $0xa0] sm:$0xff] %v3208_v20  ;;  %v3211_v45 = vadd.f32 %v4301_v29, %v2905_v16  ;;  %v2903_v50 = vadd.f32 %v2838_v1, %v2597_v36  ;;  %v3270_v22 = vadd.f32 %v3269_v27, %v3207_v54  ;;  %v3310_v43 = vmul.f32 %v3208_v20, %v3208_v20  ;;  %v5663_v36 = vld [vmem:[#allocation15_spill] sm:$0xff]  ;;  %v5665_v27 = vld [vmem:[#allocation16_spill] sm:$0xff] }
 0x1fd   : > { %v4304_v40 = vpop.f32.mrf.mxu0  ;;  %v3339_v63 = vadd.f32 %v3338_v25, %v3308_v58  ;;  %v4256_v39 = vpop.f32.mrf.mxu1  ;;  %v2299_v54 = vadd.f32 %v5658_v28, %v5657_v2  ;;  %v2300_v12 = vadd.f32 %v5436_v31, %v5663_v36  ;;  %v2604_v58 = vadd.f32 %v5664_v15, %v2297_v34 }
 0x1fe   : > { %3243 = vst [vmem:[%s5453_s27 + $0xb8] sm:$0xff] %v3211_v45  ;;  %v3209_v11 = vadd.f32 %v3144_v14, %v2903_v50  ;;  %v2908_v18 = vadd.f32 %v4256_v39, %v2602_v56  ;;  %v3271_v9 = vadd.f32 %v3270_v22, %v3208_v20  ;;  %v3313_v16 = vmul.f32 %v3211_v45, %v3211_v45 }
 0x1ff   : > { %v3157_v51 = vpop.f32.mrf.mxu0  ;;  %v3340_v24 = vadd.f32 %v3339_v63, %v3309_v38  ;;  %v2851_v6 = vpop.f32.mrf.mxu1  ;;  %v2606_v60 = vadd.f32 %v5662_v30, %v2299_v54  ;;  %v5666_v38 = vld [vmem:[#allocation42_spill] sm:$0xff] }
 0x200   : > { %3241 = vst [vmem:[%s5453_s27 + $0xa8] sm:$0xff] %v3209_v11  ;;  %v3311_v21 = vmul.f32 %v3209_v11, %v3209_v11  ;;  %v3214_v53 = vadd.f32 %v4304_v40, %v2908_v18  ;;  %v2906_v59 = vadd.f32 %v2851_v6, %v2600_v7  ;;  %v3272_v41 = vadd.f32 %v3271_v9, %v3209_v11 }
 0x201   : > { %v4305_v42 = vpop.f32.mrf.mxu0  ;;  %v3341_v49 = vadd.f32 %v3340_v24, %v3310_v43  ;;  %v4257_v32 = vpop.f32.mrf.mxu1  ;;  %v2607_v63 = vadd.f32 %v5666_v38, %v2300_v12 }
 0x202   : > { %3246 = vst [vmem:[%s5453_s27 + $0xd0] sm:$0xff] %v3214_v53  ;;  %v3212_v35 = vadd.f32 %v3157_v51, %v2906_v59  ;;  %v2909_v4 = vadd.f32 %v4257_v32, %v2603_v46  ;;  %v3273_v29 = vadd.f32 %v3272_v41, %v3210_v52  ;;  %v2298_v52 = vadd.f32 %v5441_v3, %v5665_v27 }
 0x203   : > { %v3160_v47 = vpop.f32.mrf.mxu0  ;;  %v3342_v0 = vadd.f32 %v3341_v49, %v3311_v21  ;;  %v2854_v23 = vpop.f32.mrf.mxu1  ;;  %v3316_v51 = vmul.f32 %v3214_v53, %v3214_v53 }
 0x204   : > { %3244 = vst [vmem:[%s5453_s27 + $0xc0] sm:$0xff] %v3212_v35  ;;  %v3215_v17 = vadd.f32 %v4305_v42, %v2909_v4  ;;  %v2907_v10 = vadd.f32 %v2854_v23, %v2601_v48  ;;  %v3274_v61 = vadd.f32 %v3273_v29, %v3211_v45  ;;  %v3314_v56 = vmul.f32 %v3212_v35, %v3212_v35 }
 0x205   : > { %v4308_v20 = vpop.f32.mrf.mxu0  ;;  %v3343_v14 = vadd.f32 %v3342_v0, %v3312_v62  ;;  %v4260_v26 = vpop.f32.mrf.mxu1  ;;  %v2605_v37 = vadd.f32 %v5667_v13, %v2298_v52 }
 0x206   : > { %3247 = vst [vmem:[%s5453_s27 + $0xd8] sm:$0xff] %v3215_v17  ;;  %v3213_v25 = vadd.f32 %v3160_v47, %v2907_v10  ;;  %v2912_v1 = vadd.f32 %v4260_v26, %v2606_v60  ;;  %v3275_v31 = vadd.f32 %v3274_v61, %v3212_v35  ;;  %v3317_v6 = vmul.f32 %v3215_v17, %v3215_v17 }
 0x207   : > { %v3173_v8 = vpop.f32.mrf.mxu0  ;;  %v3344_v50 = vadd.f32 %v3343_v14, %v3313_v16  ;;  %v2867_v40 = vpop.f32.mrf.mxu1 }
 0x208   : > { %3245 = vst [vmem:[%s5453_s27 + $0xc8] sm:$0xff] %v3213_v25  ;;  %v3315_v45 = vmul.f32 %v3213_v25, %v3213_v25  ;;  %v3218_v22 = vadd.f32 %v4308_v20, %v2912_v1  ;;  %v2910_v39 = vadd.f32 %v2867_v40, %v2604_v58  ;;  %v3276_v7 = vadd.f32 %v3275_v31, %v3213_v25 }
 0x209   : > { %v3345_v55 = vadd.f32 %v3344_v50, %v3314_v56  ;;  %v4261_v5 = vpop.f32.mrf.mxu1  ;;  %v4309_v3 = vpop.f32.mrf.mxu0 }
 0x20a   : > { %3250 = vst [vmem:[%s5453_s27 + $0xf0] sm:$0xff] %v3218_v22  ;;  %v3216_v11 = vadd.f32 %v3173_v8, %v2910_v39  ;;  %v2913_v18 = vadd.f32 %v4261_v5, %v2607_v63  ;;  %v3277_v57 = vadd.f32 %v3276_v7, %v3214_v53  ;;  %v3320_v53 = vmul.f32 %v3218_v22, %v3218_v22 }
 0x20b   : > { %v3346_v46 = vadd.f32 %v3345_v55, %v3315_v45  ;;  %v2870_v9 = vpop.f32.mrf.mxu1  ;;  %v3176_v54 = vpop.f32.mrf.mxu0 }
 0x20c   : > { %3248 = vst [vmem:[%s5453_s27 + $0xe0] sm:$0xff] %v3216_v11  ;;  %v3219_v43 = vadd.f32 %v4309_v3, %v2913_v18  ;;  %v2911_v24 = vadd.f32 %v2870_v9, %v2605_v37  ;;  %v3278_v28 = vadd.f32 %v3277_v57, %v3215_v17  ;;  %v3318_v42 = vmul.f32 %v3216_v11, %v3216_v11 }
 0x20d   : > { %v3347_v2 = vadd.f32 %v3346_v46, %v3316_v51 }
 0x20e   : > { %3251 = vst [vmem:[%s5453_s27 + $0xf8] sm:$0xff] %v3219_v43  ;;  %v3217_v21 = vadd.f32 %v3176_v54, %v2911_v24  ;;  %v3279_v59 = vadd.f32 %v3278_v28, %v3216_v11  ;;  %v3321_v33 = vmul.f32 %v3219_v43, %v3219_v43 }
 0x20f   : > { %v3348_v49 = vadd.f32 %v3347_v2, %v3317_v6 }
 0x210   : > { %3249 = vst [vmem:[%s5453_s27 + $0xe8] sm:$0xff] %v3217_v21  ;;  %v3319_v41 = vmul.f32 %v3217_v21, %v3217_v21  ;;  %v3280_v19 = vadd.f32 %v3279_v59, %v3217_v21 }
 0x211   : > { %v3349_v32 = vadd.f32 %v3348_v49, %v3318_v42 }
 0x212   : > { %v3281_v48 = vadd.f32 %v3280_v19, %v3218_v22 }
 0x213   : > { %v3350_v44 = vadd.f32 %v3349_v32, %v3319_v41 }
 0x214   : > { %v3282_v34 = vadd.f32 %v3281_v48, %v3219_v43 }
 0x215   : > { %v3351_v35 = vadd.f32 %v3350_v44, %v3320_v53 }
 0x216   : > { %v3283_v4 = vrot.slane %v3282_v34, 4 }
 0x217   : > { %v3352_v47 = vadd.f32 %v3351_v35, %v3321_v33 }
 0x218   : > { %v3284_v62 = vadd.f32 %v3283_v4, %v3282_v34 }
 0x219   : > { %v3353_v29 = vrot.slane %v3352_v47, 4 }
 0x21a   : > { %v3285_v0 = vrot.slane %v3284_v62, 2 }
 0x21b   : > { %v3354_v23 = vadd.f32 %v3353_v29, %v3352_v47 }
 0x21c   : > { %v3286_v30 = vadd.f32 %v3285_v0, %v3284_v62 }
 0x21d   : > { %v3355_v60 = vrot.slane %v3354_v23, 2 }
 0x21e   : > { %v3287_v36 = vrot.slane %v3286_v30, 1 }
 0x21f   : > { %v3356_v12 = vadd.f32 %v3355_v60, %v3354_v23 }
 0x220   : > { %v3288_v17 = vadd.f32 %v3287_v36, %v3286_v30 }
 0x221   : > { %v3357_v10 = vrot.slane %v3356_v12, 1 }
 0x222   : > { %3289 = vst [vmem:[%s235_s30] sm:$0x1] %v3288_v17 }
 0x223   : > { %v3358_v20 = vadd.f32 %v3357_v10, %v3356_v12 }
 0x225   : > { %3359 = vst [vmem:[%s235_s30 + $0x1] sm:$0x1] %v3358_v20 }
 0x226 PF: > { %s16_s18 = sadd.s32 1, %s4416_s18  }
 0x227   : > { %p13_p4 = scmp.ge.s32.totalorder %s16_s18, 4  }
 0x229   :  { %15 = sbr.rel (!%p13_p4) target bundleno = 1 (0x1), region = 88 }

</bundles_post_ra>
